<compile_context>
chip_gen: v7x
topology: tpu7x:2x2x1
jax: 0.10.0
libtpu: 0.0.40
codegen_flags: <defaults>
</compile_context>

<pallas_src>
import functools

import numpy as np

import jax
import jax.numpy as jnp
from jax.experimental import pallas as pl
from jax.experimental.pallas import tpu as pltpu


# ----------------------------------------------------------------------------
# Fused kernel: one batch tile per grid step.  All activation blocks live in
# VMEM; only the tensors the PyTorch module returns are written to HBM.
# ----------------------------------------------------------------------------
def _fused_kernel(x_ref, w1_ref, b1_ref, w2_ref, b2_ref, w3_ref, b3_ref,
                  w4_ref, b4_ref,
                  c1_ref, c2_ref, f1_ref, logit_ref, prob_ref,
                  c1p_ref):
    TB = x_ref.shape[0]
    f32 = jnp.float32
    zero_row = jnp.zeros((TB, 256), f32)

    # ---- conv1: 1->16, k=4, s=2, p=1 ; 28x28 -> 14x14 ----------------------
    # x_ref is the wrapper-padded input: 30 rows x 64 lanes (lanes 28..63 and
    # rows 0/29 are zero), so the slab for output row oh is the 128-aligned,
    # 256-lane window [oh*128, oh*128+256).
    w1 = w1_ref[...]                                       # (256, 256)
    b1 = jnp.broadcast_to(b1_ref[...], (TB, 256))          # hoisted broadcast

    # zero the height-pad rows (0 and 15) of the relu(conv1) scratch.  Done
    # every step (2 aligned 256-lane stores) -- safe under megacore "parallel"
    # grid partitioning, unlike a pid==0 one-time init.
    c1p_ref[:, 0:256] = zero_row
    c1p_ref[:, 15 * 256:16 * 256] = zero_row

    for oh in range(14):
        slab = x_ref[:, oh * 128: oh * 128 + 256]                    # (TB,256)
        row = jnp.dot(slab, w1, preferred_element_type=f32) + b1     # (TB,256)
        c1_ref[:, oh * 256:(oh + 1) * 256] = row                     # pre-act
        c1p_ref[:, (oh + 1) * 256:(oh + 2) * 256] = jnp.maximum(row, 0.0)

    # ---- conv2: 16->32, k=4, s=2, p=1 ; 14x14 -> 7x7, fused with fc1 -------
    w2 = w2_ref[...]                                       # (1024, 256)
    b2 = jnp.broadcast_to(b2_ref[...], (TB, 256))
    f1 = jnp.broadcast_to(b3_ref[...], (TB, 128))          # fc1 acc, start=bias
    for oh in range(7):
        slab = c1p_ref[:, oh * 512: oh * 512 + 1024]                 # (TB,1024)
        row = jnp.dot(slab, w2, preferred_element_type=f32) + b2     # (TB,256)
        c2_ref[:, oh * 256:(oh + 1) * 256] = row                     # pre-act
        rrow = jnp.maximum(row, 0.0)
        f1 = f1 + jnp.dot(rrow, w3_ref[oh * 256:(oh + 1) * 256, :],
                          preferred_element_type=f32)

    # ---- fc1 (1568 -> 100, padded to 128 lanes) ----------------------------
    f1_ref[...] = f1
    f1r = jnp.maximum(f1, 0.0)

    # ---- fc2 (100 -> 10, padded to 128 lanes; pad bias = -1e30) + softmax --
    z = jnp.dot(f1r, w4_ref[...], preferred_element_type=f32) + b4_ref[...]
    logit_ref[...] = z
    m = jnp.max(z, axis=-1, keepdims=True)       # full-vreg reduction; pad=-1e30
    e = jnp.exp(z - m)                           # padded lanes underflow to 0
    s = jnp.sum(e, axis=-1, keepdims=True)
    prob_ref[...] = e * (1.0 / s)                # exact division (parity)


def _const_spec(shape):
    return pl.BlockSpec(shape, lambda i: (0,) * len(shape))


# ----------------------------------------------------------------------------
# Wrapper
# ----------------------------------------------------------------------------
@functools.partial(jax.jit, static_argnames=("block_b",))
def forward(x, prep, block_b=128):
    """x: (B, 1, 28, 28) NCHW float32.  prep: output of prepare_params()."""
    B = x.shape[0]

    # Layout plumbing in the wrapper (lane-dense input slab): height-pad to 30
    # rows and width-pad each 28-pixel row to 64 lanes -> (B, 30*64) flat.
    xr = x.astype(jnp.float32).reshape(B, 28, 28)
    xr = jnp.pad(xr, ((0, 0), (1, 1), (0, 36)))          # (B, 30, 64)
    xf = xr.reshape(B, 30 * 64)

    # Batch tiling.  For moderate batches that fit one block we still split
    # into two tiles so both v7x TensorCores get work.
    if B > block_b:
        TB = block_b
    elif B > 16:
        TB = (((B + 1) // 2) + 7) // 8 * 8               # ~half batch, mult of 8
    else:
        TB = ((B + 7) // 8) * 8                          # tiny batch, one tile
    Bp = ((B + TB - 1) // TB) * TB
    if Bp != B:
        xf = jnp.pad(xf, ((0, Bp - B), (0, 0)))
    grid = (Bp // TB,)

    out_shape = (
        jax.ShapeDtypeStruct((Bp, 14 * 256), jnp.float32),   # conv1 pre (padded)
        jax.ShapeDtypeStruct((Bp, 7 * 256), jnp.float32),    # conv2 pre (padded)
        jax.ShapeDtypeStruct((Bp, 128), jnp.float32),        # fc1 pre (padded)
        jax.ShapeDtypeStruct((Bp, 128), jnp.float32),        # logits (padded)
        jax.ShapeDtypeStruct((Bp, 128), jnp.float32),        # probs (padded)
    )

    grid_spec = pltpu.PrefetchScalarGridSpec(
        num_scalar_prefetch=0,
        grid=grid,
        in_specs=[
            pl.BlockSpec((TB, 30 * 64), lambda i: (i, 0)),        # x tile
            _const_spec((256, 256)),  _const_spec((1, 256)),      # conv1
            _const_spec((1024, 256)), _const_spec((1, 256)),      # conv2
            _const_spec((7 * 256, 128)), _const_spec((1, 128)),   # fc1
            _const_spec((128, 128)),  _const_spec((1, 128)),      # fc2
        ],
        out_specs=(
            pl.BlockSpec((TB, 14 * 256), lambda i: (i, 0)),
            pl.BlockSpec((TB, 7 * 256), lambda i: (i, 0)),
            pl.BlockSpec((TB, 128), lambda i: (i, 0)),
            pl.BlockSpec((TB, 128), lambda i: (i, 0)),
            pl.BlockSpec((TB, 128), lambda i: (i, 0)),
        ),
        scratch_shapes=[
            pltpu.VMEM((TB, 16 * 256), jnp.float32),   # height-padded relu(conv1)
        ],
    )

    c1f, c2f, f1p, logp, probp = pl.pallas_call(
        _fused_kernel,
        out_shape=out_shape,
        grid_spec=grid_spec,
        compiler_params=pltpu.CompilerParams(
            dimension_semantics=("parallel",),          # v7x: 2 TCs split batch
            vmem_limit_bytes=48 * 1024 * 1024),         # clears v5e 16 MiB default
    )(xf, prep["w1"], prep["b1"], prep["w2"], prep["b2"],
      prep["w3"], prep["b3"], prep["w4"], prep["b4"])

    # Only the returned (PyTorch-interface) tensors are reformatted here.
    conv1 = (c1f[:B].reshape(B, 14, 256)[:, :, :224]
             .reshape(B, 14, 14, 16).transpose(0, 3, 1, 2))          # NCHW
    conv2 = (c2f[:B].reshape(B, 7, 256)[:, :, :224]
             .reshape(B, 7, 7, 32).transpose(0, 3, 1, 2))            # NCHW
    fc1 = f1p[:B, :100]
    logits = logp[:B, :10]
    probs = probp[:B, :10]
    return probs, logits, {"conv1": conv1, "conv2": conv2, "fc1": fc1}


# ----------------------------------------------------------------------------
# One-time (outside jit) weight folding / reordering into lane-dense layouts.
# ----------------------------------------------------------------------------
def prepare_params(params):
    w1 = np.asarray(params["conv1_w"], np.float32)   # (16, 1, 4, 4)
    b1 = np.asarray(params["conv1_b"], np.float32)
    w2 = np.asarray(params["conv2_w"], np.float32)   # (32, 16, 4, 4)
    b2 = np.asarray(params["conv2_b"], np.float32)
    fw1 = np.asarray(params["fc1_w"], np.float32)    # (100, 1568) NCHW-flat cols
    fb1 = np.asarray(params["fc1_b"], np.float32)
    fw2 = np.asarray(params["fc2_w"], np.float32)    # (10, 100)
    fb2 = np.asarray(params["fc2_b"], np.float32)

    # conv1: rows = (kh, 64-lane padded input col); cols = (ow*16+co), 224->256.
    W1 = np.zeros((4 * 64, 256), np.float32)
    for ow in range(14):
        for kh in range(4):
            for kw in range(4):
                wi = 2 * ow + kw - 1
                if 0 <= wi < 28:
                    W1[kh * 64 + wi, ow * 16:(ow + 1) * 16] = w1[:, 0, kh, kw]
    B1 = np.zeros((1, 256), np.float32)
    B1[0, :224] = np.tile(b1, 14)

    # conv2: rows = (kh, 256-lane padded conv1 row: wi*16+ci); cols = (ow*32+co).
    W2 = np.zeros((4 * 256, 256), np.float32)
    for ow in range(7):
        for kh in range(4):
            for kw in range(4):
                wi = 2 * ow + kw - 1
                if 0 <= wi < 14:
                    W2[kh * 256 + wi * 16: kh * 256 + wi * 16 + 16,
                       ow * 32:(ow + 1) * 32] = w2[:, :, kh, kw].T
    B2 = np.zeros((1, 256), np.float32)
    B2[0, :224] = np.tile(b2, 7)

    # fc1: reorder PyTorch NCHW-flat input cols to our per-oh (ow*32+co) blocks
    # (256-lane padded rows), pad N 100 -> 128.
    f1w = fw1.reshape(100, 32, 7, 7).transpose(2, 3, 1, 0)   # (oh, ow, ci, n)
    W3 = np.zeros((7, 256, 128), np.float32)
    W3[:, :224, :100] = f1w.reshape(7, 224, 100)
    W3 = W3.reshape(7 * 256, 128)
    B3 = np.zeros((1, 128), np.float32); B3[0, :100] = fb1

    # fc2: pad K 100 -> 128 (zero rows), N 10 -> 128 (zero cols; pad bias -1e30
    # so padded logits vanish under the full-lane softmax reductions).
    W4 = np.zeros((128, 128), np.float32); W4[:100, :10] = fw2.T
    B4 = np.full((1, 128), -1e30, np.float32); B4[0, :10] = fb2

    return {"w1": jnp.asarray(W1), "b1": jnp.asarray(B1),
            "w2": jnp.asarray(W2), "b2": jnp.asarray(B2),
            "w3": jnp.asarray(W3), "b3": jnp.asarray(B3),
            "w4": jnp.asarray(W4), "b4": jnp.asarray(B4)}


# ----------------------------------------------------------------------------
# Parameters (PyTorch-style uniform init) and pure-JAX reference.
# ----------------------------------------------------------------------------
def init_params(key):
    def uniform(k, shape, fan_in):
        bound = 1.0 / np.sqrt(np.float32(fan_in))
        return jax.random.uniform(k, shape, jnp.float32, -bound, bound)

    ks = jax.random.split(key, 8)
    return {
        "conv1_w": uniform(ks[0], (16, 1, 4, 4), 1 * 4 * 4),
        "conv1_b": uniform(ks[1], (16,), 1 * 4 * 4),
        "conv2_w": uniform(ks[2], (32, 16, 4, 4), 16 * 4 * 4),
        "conv2_b": uniform(ks[3], (32,), 16 * 4 * 4),
        "fc1_w": uniform(ks[4], (100, 32 * 7 * 7), 32 * 7 * 7),
        "fc1_b": uniform(ks[5], (100,), 32 * 7 * 7),
        "fc2_w": uniform(ks[6], (10, 100), 100),
        "fc2_b": uniform(ks[7], (10,), 100),
    }


def ref_forward(x, p):
    dn = ("NCHW", "OIHW", "NCHW")
    c1 = jax.lax.conv_general_dilated(
        x, p["conv1_w"], (2, 2), ((1, 1), (1, 1)), dimension_numbers=dn)
    c1 = c1 + p["conv1_b"][None, :, None, None]
    c2 = jax.lax.conv_general_dilated(
        jnp.maximum(c1, 0.0), p["conv2_w"], (2, 2), ((1, 1), (1, 1)),
        dimension_numbers=dn)
    c2 = c2 + p["conv2_b"][None, :, None, None]
    flat = jnp.maximum(c2, 0.0).reshape(x.shape[0], -1)
    f1 = flat @ p["fc1_w"].T + p["fc1_b"]
    logits = jnp.maximum(f1, 0.0) @ p["fc2_w"].T + p["fc2_b"]
    return jax.nn.softmax(logits, axis=-1), logits, {"conv1": c1,
                                                     "conv2": c2, "fc1": f1}


if __name__ == "__main__":
    key = jax.random.PRNGKey(0)
    k_x, k_p = jax.random.split(key)
    # MNIST-shaped input (required: fc1 expects 32*7*7 features), small batch.
    x = jax.random.normal(k_x, (2, 1, 28, 28), dtype=jnp.float32)
    params = init_params(k_p)
    prep = prepare_params(params)

    probs, logits, inter = forward(x, prep)
    jax.block_until_ready(probs)

    r_probs, r_logits, r_inter = ref_forward(x, params)
    assert jnp.allclose(inter["conv1"], r_inter["conv1"], atol=1e-4), "conv1"
    assert jnp.allclose(inter["conv2"], r_inter["conv2"], atol=1e-4), "conv2"
    assert jnp.allclose(inter["fc1"], r_inter["fc1"], atol=2e-4), "fc1"
    assert jnp.allclose(logits, r_logits, atol=2e-4), "logits"
    assert jnp.allclose(probs, r_probs, atol=2e-4), "softmax"

    # Two-tile path (B <= block_b split across both v7x TensorCores).
    xm = jax.random.normal(jax.random.PRNGKey(2), (40, 1, 28, 28), jnp.float32)
    pm, lm, _ = forward(xm, prep)
    jax.block_until_ready(pm)
    rpm, rlm, _ = ref_forward(xm, params)
    assert jnp.allclose(lm, rlm, atol=2e-4), "2-tile logits"
    assert jnp.allclose(pm, rpm, atol=2e-4), "2-tile softmax"

    # Multi-step (tiled + batch-padded) grid path: B=300, tile=128.
    xb = jax.random.normal(jax.random.PRNGKey(1), (300, 1, 28, 28), jnp.float32)
    pb, lb, _ = forward(xb, prep)
    jax.block_until_ready(pb)
    rpb, rlb, _ = ref_forward(xb, params)
    assert jnp.allclose(lb, rlb, atol=2e-4), "tiled logits"
    assert jnp.allclose(pb, rpb, atol=2e-4), "tiled softmax"

    print("KERNEL_OK")
</pallas_src>

<mosaic_0001>
module attributes {stable_mosaic.version = 11 : i64} {
  func.func @_fused_kernel(%arg0: i32, %arg1: memref<8x1920xf32, #tpu.memory_space<vmem>>, %arg2: memref<256x256xf32, #tpu.memory_space<vmem>>, %arg3: memref<1x256xf32, #tpu.memory_space<vmem>>, %arg4: memref<1024x256xf32, #tpu.memory_space<vmem>>, %arg5: memref<1x256xf32, #tpu.memory_space<vmem>>, %arg6: memref<1792x128xf32, #tpu.memory_space<vmem>>, %arg7: memref<1x128xf32, #tpu.memory_space<vmem>>, %arg8: memref<128x128xf32, #tpu.memory_space<vmem>>, %arg9: memref<1x128xf32, #tpu.memory_space<vmem>>, %arg10: memref<8x3584xf32, #tpu.memory_space<vmem>>, %arg11: memref<8x1792xf32, #tpu.memory_space<vmem>>, %arg12: memref<8x128xf32, #tpu.memory_space<vmem>>, %arg13: memref<8x128xf32, #tpu.memory_space<vmem>>, %arg14: memref<8x128xf32, #tpu.memory_space<vmem>>, %arg15: memref<8x4096xf32, #tpu.memory_space<vmem>>) attributes {dimension_semantics = [#tpu.dimension_semantics<parallel>], iteration_bounds = array<i64: 1>, scalar_prefetch = 0 : i64, scratch_operands = 1 : i64, tpu.core_type = #tpu.core_type<tc>, window_params = [{transform_indices = @transform_0, window_bounds = array<i64: 8, 1920>}, {pipeline_mode = #tpu.pipeline_mode<synchronous>, transform_indices = @transform_1, window_bounds = array<i64: 256, 256>}, {pipeline_mode = #tpu.pipeline_mode<synchronous>, transform_indices = @transform_2, window_bounds = array<i64: 1, 256>}, {pipeline_mode = #tpu.pipeline_mode<synchronous>, transform_indices = @transform_3, window_bounds = array<i64: 1024, 256>}, {pipeline_mode = #tpu.pipeline_mode<synchronous>, transform_indices = @transform_4, window_bounds = array<i64: 1, 256>}, {pipeline_mode = #tpu.pipeline_mode<synchronous>, transform_indices = @transform_5, window_bounds = array<i64: 1792, 128>}, {pipeline_mode = #tpu.pipeline_mode<synchronous>, transform_indices = @transform_6, window_bounds = array<i64: 1, 128>}, {pipeline_mode = #tpu.pipeline_mode<synchronous>, transform_indices = @transform_7, window_bounds = array<i64: 128, 128>}, {pipeline_mode = #tpu.pipeline_mode<synchronous>, transform_indices = @transform_8, window_bounds = array<i64: 1, 128>}, {transform_indices = @transform_9, window_bounds = array<i64: 8, 3584>}, {transform_indices = @transform_10, window_bounds = array<i64: 8, 1792>}, {transform_indices = @transform_11, window_bounds = array<i64: 8, 128>}, {transform_indices = @transform_12, window_bounds = array<i64: 8, 128>}, {transform_indices = @transform_13, window_bounds = array<i64: 8, 128>}]} {
    %cst = arith.constant 0.000000e+00 : f32
    %0 = vector.broadcast %cst : f32 to vector<8x256xf32>
    %c0 = arith.constant 0 : index
    %c0_0 = arith.constant 0 : index
    %1 = vector.load %arg2[%c0, %c0_0] : memref<256x256xf32, #tpu.memory_space<vmem>>, vector<256x256xf32>
    %c0_1 = arith.constant 0 : index
    %c0_2 = arith.constant 0 : index
    %2 = vector.load %arg3[%c0_1, %c0_2] : memref<1x256xf32, #tpu.memory_space<vmem>>, vector<1x256xf32>
    %3 = vector.shape_cast %2 : vector<1x256xf32> to vector<1x256xf32>
    %4 = vector.broadcast %3 : vector<1x256xf32> to vector<8x256xf32>
    %c0_3 = arith.constant 0 : index
    %c0_4 = arith.constant 0 : index
    %5 = vector.load %arg15[%c0_3, %c0_4] : memref<8x4096xf32, #tpu.memory_space<vmem>>, vector<8x256xf32>
    tpu.vector_store %arg15[%c0_3, %c0_4], %0 {strides = array<i32>} : memref<8x4096xf32, #tpu.memory_space<vmem>>, vector<8x256xf32>,
    %c0_5 = arith.constant 0 : index
    %c3840 = arith.constant 3840 : index
    %6 = vector.load %arg15[%c0_5, %c3840] : memref<8x4096xf32, #tpu.memory_space<vmem>>, vector<8x256xf32>
    tpu.vector_store %arg15[%c0_5, %c3840], %0 {strides = array<i32>} : memref<8x4096xf32, #tpu.memory_space<vmem>>, vector<8x256xf32>,
    %c0_6 = arith.constant 0 : index
    %c0_7 = arith.constant 0 : index
    %7 = vector.load %arg1[%c0_6, %c0_7] : memref<8x1920xf32, #tpu.memory_space<vmem>>, vector<8x256xf32>
    %cst_8 = arith.constant dense<0.000000e+00> : vector<8x256xf32>
    %8 = tpu.matmul %7, %1, %cst_8 {dimension_numbers = #tpu.dot_dimension_numbers<[1], [0], [0], [1], [0, 0, 1, 1], [], []>} : vector<8x256xf32>, vector<256x256xf32>, vector<8x256xf32> -> vector<8x256xf32>
    %9 = arith.addf %8, %4 : vector<8x256xf32>
    %c0_9 = arith.constant 0 : index
    %c0_10 = arith.constant 0 : index
    %10 = vector.load %arg10[%c0_9, %c0_10] : memref<8x3584xf32, #tpu.memory_space<vmem>>, vector<8x256xf32>
    tpu.vector_store %arg10[%c0_9, %c0_10], %9 {strides = array<i32>} : memref<8x3584xf32, #tpu.memory_space<vmem>>, vector<8x256xf32>,
    %cst_11 = arith.constant 0.000000e+00 : f32
    %11 = vector.broadcast %cst_11 : f32 to vector<8x256xf32>
    %12 = arith.maximumf %9, %11 : vector<8x256xf32>
    %c0_12 = arith.constant 0 : index
    %c256 = arith.constant 256 : index
    %13 = vector.load %arg15[%c0_12, %c256] : memref<8x4096xf32, #tpu.memory_space<vmem>>, vector<8x256xf32>
    tpu.vector_store %arg15[%c0_12, %c256], %12 {strides = array<i32>} : memref<8x4096xf32, #tpu.memory_space<vmem>>, vector<8x256xf32>,
    %c0_13 = arith.constant 0 : index
    %c128 = arith.constant 128 : index
    %14 = vector.load %arg1[%c0_13, %c128] : memref<8x1920xf32, #tpu.memory_space<vmem>>, vector<8x256xf32>
    %cst_14 = arith.constant dense<0.000000e+00> : vector<8x256xf32>
    %15 = tpu.matmul %14, %1, %cst_14 {dimension_numbers = #tpu.dot_dimension_numbers<[1], [0], [0], [1], [0, 0, 1, 1], [], []>} : vector<8x256xf32>, vector<256x256xf32>, vector<8x256xf32> -> vector<8x256xf32>
    %16 = arith.addf %15, %4 : vector<8x256xf32>
    %c0_15 = arith.constant 0 : index
    %c256_16 = arith.constant 256 : index
    %17 = vector.load %arg10[%c0_15, %c256_16] : memref<8x3584xf32, #tpu.memory_space<vmem>>, vector<8x256xf32>
    tpu.vector_store %arg10[%c0_15, %c256_16], %16 {strides = array<i32>} : memref<8x3584xf32, #tpu.memory_space<vmem>>, vector<8x256xf32>,
    %cst_17 = arith.constant 0.000000e+00 : f32
    %18 = vector.broadcast %cst_17 : f32 to vector<8x256xf32>
    %19 = arith.maximumf %16, %18 : vector<8x256xf32>
    %c0_18 = arith.constant 0 : index
    %c512 = arith.constant 512 : index
    %20 = vector.load %arg15[%c0_18, %c512] : memref<8x4096xf32, #tpu.memory_space<vmem>>, vector<8x256xf32>
    tpu.vector_store %arg15[%c0_18, %c512], %19 {strides = array<i32>} : memref<8x4096xf32, #tpu.memory_space<vmem>>, vector<8x256xf32>,
    %c0_19 = arith.constant 0 : index
    %c256_20 = arith.constant 256 : index
    %21 = vector.load %arg1[%c0_19, %c256_20] : memref<8x1920xf32, #tpu.memory_space<vmem>>, vector<8x256xf32>
    %cst_21 = arith.constant dense<0.000000e+00> : vector<8x256xf32>
    %22 = tpu.matmul %21, %1, %cst_21 {dimension_numbers = #tpu.dot_dimension_numbers<[1], [0], [0], [1], [0, 0, 1, 1], [], []>} : vector<8x256xf32>, vector<256x256xf32>, vector<8x256xf32> -> vector<8x256xf32>
    %23 = arith.addf %22, %4 : vector<8x256xf32>
    %c0_22 = arith.constant 0 : index
    %c512_23 = arith.constant 512 : index
    %24 = vector.load %arg10[%c0_22, %c512_23] : memref<8x3584xf32, #tpu.memory_space<vmem>>, vector<8x256xf32>
    tpu.vector_store %arg10[%c0_22, %c512_23], %23 {strides = array<i32>} : memref<8x3584xf32, #tpu.memory_space<vmem>>, vector<8x256xf32>,
    %cst_24 = arith.constant 0.000000e+00 : f32
    %25 = vector.broadcast %cst_24 : f32 to vector<8x256xf32>
    %26 = arith.maximumf %23, %25 : vector<8x256xf32>
    %c0_25 = arith.constant 0 : index
    %c768 = arith.constant 768 : index
    %27 = vector.load %arg15[%c0_25, %c768] : memref<8x4096xf32, #tpu.memory_space<vmem>>, vector<8x256xf32>
    tpu.vector_store %arg15[%c0_25, %c768], %26 {strides = array<i32>} : memref<8x4096xf32, #tpu.memory_space<vmem>>, vector<8x256xf32>,
    %c0_26 = arith.constant 0 : index
    %c384 = arith.constant 384 : index
    %28 = vector.load %arg1[%c0_26, %c384] : memref<8x1920xf32, #tpu.memory_space<vmem>>, vector<8x256xf32>
    %cst_27 = arith.constant dense<0.000000e+00> : vector<8x256xf32>
    %29 = tpu.matmul %28, %1, %cst_27 {dimension_numbers = #tpu.dot_dimension_numbers<[1], [0], [0], [1], [0, 0, 1, 1], [], []>} : vector<8x256xf32>, vector<256x256xf32>, vector<8x256xf32> -> vector<8x256xf32>
    %30 = arith.addf %29, %4 : vector<8x256xf32>
    %c0_28 = arith.constant 0 : index
    %c768_29 = arith.constant 768 : index
    %31 = vector.load %arg10[%c0_28, %c768_29] : memref<8x3584xf32, #tpu.memory_space<vmem>>, vector<8x256xf32>
    tpu.vector_store %arg10[%c0_28, %c768_29], %30 {strides = array<i32>} : memref<8x3584xf32, #tpu.memory_space<vmem>>, vector<8x256xf32>,
    %cst_30 = arith.constant 0.000000e+00 : f32
    %32 = vector.broadcast %cst_30 : f32 to vector<8x256xf32>
    %33 = arith.maximumf %30, %32 : vector<8x256xf32>
    %c0_31 = arith.constant 0 : index
    %c1024 = arith.constant 1024 : index
    %34 = vector.load %arg15[%c0_31, %c1024] : memref<8x4096xf32, #tpu.memory_space<vmem>>, vector<8x256xf32>
    tpu.vector_store %arg15[%c0_31, %c1024], %33 {strides = array<i32>} : memref<8x4096xf32, #tpu.memory_space<vmem>>, vector<8x256xf32>,
    %c0_32 = arith.constant 0 : index
    %c512_33 = arith.constant 512 : index
    %35 = vector.load %arg1[%c0_32, %c512_33] : memref<8x1920xf32, #tpu.memory_space<vmem>>, vector<8x256xf32>
    %cst_34 = arith.constant dense<0.000000e+00> : vector<8x256xf32>
    %36 = tpu.matmul %35, %1, %cst_34 {dimension_numbers = #tpu.dot_dimension_numbers<[1], [0], [0], [1], [0, 0, 1, 1], [], []>} : vector<8x256xf32>, vector<256x256xf32>, vector<8x256xf32> -> vector<8x256xf32>
    %37 = arith.addf %36, %4 : vector<8x256xf32>
    %c0_35 = arith.constant 0 : index
    %c1024_36 = arith.constant 1024 : index
    %38 = vector.load %arg10[%c0_35, %c1024_36] : memref<8x3584xf32, #tpu.memory_space<vmem>>, vector<8x256xf32>
    tpu.vector_store %arg10[%c0_35, %c1024_36], %37 {strides = array<i32>} : memref<8x3584xf32, #tpu.memory_space<vmem>>, vector<8x256xf32>,
    %cst_37 = arith.constant 0.000000e+00 : f32
    %39 = vector.broadcast %cst_37 : f32 to vector<8x256xf32>
    %40 = arith.maximumf %37, %39 : vector<8x256xf32>
    %c0_38 = arith.constant 0 : index
    %c1280 = arith.constant 1280 : index
    %41 = vector.load %arg15[%c0_38, %c1280] : memref<8x4096xf32, #tpu.memory_space<vmem>>, vector<8x256xf32>
    tpu.vector_store %arg15[%c0_38, %c1280], %40 {strides = array<i32>} : memref<8x4096xf32, #tpu.memory_space<vmem>>, vector<8x256xf32>,
    %c0_39 = arith.constant 0 : index
    %c640 = arith.constant 640 : index
    %42 = vector.load %arg1[%c0_39, %c640] : memref<8x1920xf32, #tpu.memory_space<vmem>>, vector<8x256xf32>
    %cst_40 = arith.constant dense<0.000000e+00> : vector<8x256xf32>
    %43 = tpu.matmul %42, %1, %cst_40 {dimension_numbers = #tpu.dot_dimension_numbers<[1], [0], [0], [1], [0, 0, 1, 1], [], []>} : vector<8x256xf32>, vector<256x256xf32>, vector<8x256xf32> -> vector<8x256xf32>
    %44 = arith.addf %43, %4 : vector<8x256xf32>
    %c0_41 = arith.constant 0 : index
    %c1280_42 = arith.constant 1280 : index
    %45 = vector.load %arg10[%c0_41, %c1280_42] : memref<8x3584xf32, #tpu.memory_space<vmem>>, vector<8x256xf32>
    tpu.vector_store %arg10[%c0_41, %c1280_42], %44 {strides = array<i32>} : memref<8x3584xf32, #tpu.memory_space<vmem>>, vector<8x256xf32>,
    %cst_43 = arith.constant 0.000000e+00 : f32
    %46 = vector.broadcast %cst_43 : f32 to vector<8x256xf32>
    %47 = arith.maximumf %44, %46 : vector<8x256xf32>
    %c0_44 = arith.constant 0 : index
    %c1536 = arith.constant 1536 : index
    %48 = vector.load %arg15[%c0_44, %c1536] : memref<8x4096xf32, #tpu.memory_space<vmem>>, vector<8x256xf32>
    tpu.vector_store %arg15[%c0_44, %c1536], %47 {strides = array<i32>} : memref<8x4096xf32, #tpu.memory_space<vmem>>, vector<8x256xf32>,
    %c0_45 = arith.constant 0 : index
    %c768_46 = arith.constant 768 : index
    %49 = vector.load %arg1[%c0_45, %c768_46] : memref<8x1920xf32, #tpu.memory_space<vmem>>, vector<8x256xf32>
    %cst_47 = arith.constant dense<0.000000e+00> : vector<8x256xf32>
    %50 = tpu.matmul %49, %1, %cst_47 {dimension_numbers = #tpu.dot_dimension_numbers<[1], [0], [0], [1], [0, 0, 1, 1], [], []>} : vector<8x256xf32>, vector<256x256xf32>, vector<8x256xf32> -> vector<8x256xf32>
    %51 = arith.addf %50, %4 : vector<8x256xf32>
    %c0_48 = arith.constant 0 : index
    %c1536_49 = arith.constant 1536 : index
    %52 = vector.load %arg10[%c0_48, %c1536_49] : memref<8x3584xf32, #tpu.memory_space<vmem>>, vector<8x256xf32>
    tpu.vector_store %arg10[%c0_48, %c1536_49], %51 {strides = array<i32>} : memref<8x3584xf32, #tpu.memory_space<vmem>>, vector<8x256xf32>,
    %cst_50 = arith.constant 0.000000e+00 : f32
    %53 = vector.broadcast %cst_50 : f32 to vector<8x256xf32>
    %54 = arith.maximumf %51, %53 : vector<8x256xf32>
    %c0_51 = arith.constant 0 : index
    %c1792 = arith.constant 1792 : index
    %55 = vector.load %arg15[%c0_51, %c1792] : memref<8x4096xf32, #tpu.memory_space<vmem>>, vector<8x256xf32>
    tpu.vector_store %arg15[%c0_51, %c1792], %54 {strides = array<i32>} : memref<8x4096xf32, #tpu.memory_space<vmem>>, vector<8x256xf32>,
    %c0_52 = arith.constant 0 : index
    %c896 = arith.constant 896 : index
    %56 = vector.load %arg1[%c0_52, %c896] : memref<8x1920xf32, #tpu.memory_space<vmem>>, vector<8x256xf32>
    %cst_53 = arith.constant dense<0.000000e+00> : vector<8x256xf32>
    %57 = tpu.matmul %56, %1, %cst_53 {dimension_numbers = #tpu.dot_dimension_numbers<[1], [0], [0], [1], [0, 0, 1, 1], [], []>} : vector<8x256xf32>, vector<256x256xf32>, vector<8x256xf32> -> vector<8x256xf32>
    %58 = arith.addf %57, %4 : vector<8x256xf32>
    %c0_54 = arith.constant 0 : index
    %c1792_55 = arith.constant 1792 : index
    %59 = vector.load %arg10[%c0_54, %c1792_55] : memref<8x3584xf32, #tpu.memory_space<vmem>>, vector<8x256xf32>
    tpu.vector_store %arg10[%c0_54, %c1792_55], %58 {strides = array<i32>} : memref<8x3584xf32, #tpu.memory_space<vmem>>, vector<8x256xf32>,
    %cst_56 = arith.constant 0.000000e+00 : f32
    %60 = vector.broadcast %cst_56 : f32 to vector<8x256xf32>
    %61 = arith.maximumf %58, %60 : vector<8x256xf32>
    %c0_57 = arith.constant 0 : index
    %c2048 = arith.constant 2048 : index
    %62 = vector.load %arg15[%c0_57, %c2048] : memref<8x4096xf32, #tpu.memory_space<vmem>>, vector<8x256xf32>
    tpu.vector_store %arg15[%c0_57, %c2048], %61 {strides = array<i32>} : memref<8x4096xf32, #tpu.memory_space<vmem>>, vector<8x256xf32>,
    %c0_58 = arith.constant 0 : index
    %c1024_59 = arith.constant 1024 : index
    %63 = vector.load %arg1[%c0_58, %c1024_59] : memref<8x1920xf32, #tpu.memory_space<vmem>>, vector<8x256xf32>
    %cst_60 = arith.constant dense<0.000000e+00> : vector<8x256xf32>
    %64 = tpu.matmul %63, %1, %cst_60 {dimension_numbers = #tpu.dot_dimension_numbers<[1], [0], [0], [1], [0, 0, 1, 1], [], []>} : vector<8x256xf32>, vector<256x256xf32>, vector<8x256xf32> -> vector<8x256xf32>
    %65 = arith.addf %64, %4 : vector<8x256xf32>
    %c0_61 = arith.constant 0 : index
    %c2048_62 = arith.constant 2048 : index
    %66 = vector.load %arg10[%c0_61, %c2048_62] : memref<8x3584xf32, #tpu.memory_space<vmem>>, vector<8x256xf32>
    tpu.vector_store %arg10[%c0_61, %c2048_62], %65 {strides = array<i32>} : memref<8x3584xf32, #tpu.memory_space<vmem>>, vector<8x256xf32>,
    %cst_63 = arith.constant 0.000000e+00 : f32
    %67 = vector.broadcast %cst_63 : f32 to vector<8x256xf32>
    %68 = arith.maximumf %65, %67 : vector<8x256xf32>
    %c0_64 = arith.constant 0 : index
    %c2304 = arith.constant 2304 : index
    %69 = vector.load %arg15[%c0_64, %c2304] : memref<8x4096xf32, #tpu.memory_space<vmem>>, vector<8x256xf32>
    tpu.vector_store %arg15[%c0_64, %c2304], %68 {strides = array<i32>} : memref<8x4096xf32, #tpu.memory_space<vmem>>, vector<8x256xf32>,
    %c0_65 = arith.constant 0 : index
    %c1152 = arith.constant 1152 : index
    %70 = vector.load %arg1[%c0_65, %c1152] : memref<8x1920xf32, #tpu.memory_space<vmem>>, vector<8x256xf32>
    %cst_66 = arith.constant dense<0.000000e+00> : vector<8x256xf32>
    %71 = tpu.matmul %70, %1, %cst_66 {dimension_numbers = #tpu.dot_dimension_numbers<[1], [0], [0], [1], [0, 0, 1, 1], [], []>} : vector<8x256xf32>, vector<256x256xf32>, vector<8x256xf32> -> vector<8x256xf32>
    %72 = arith.addf %71, %4 : vector<8x256xf32>
    %c0_67 = arith.constant 0 : index
    %c2304_68 = arith.constant 2304 : index
    %73 = vector.load %arg10[%c0_67, %c2304_68] : memref<8x3584xf32, #tpu.memory_space<vmem>>, vector<8x256xf32>
    tpu.vector_store %arg10[%c0_67, %c2304_68], %72 {strides = array<i32>} : memref<8x3584xf32, #tpu.memory_space<vmem>>, vector<8x256xf32>,
    %cst_69 = arith.constant 0.000000e+00 : f32
    %74 = vector.broadcast %cst_69 : f32 to vector<8x256xf32>
    %75 = arith.maximumf %72, %74 : vector<8x256xf32>
    %c0_70 = arith.constant 0 : index
    %c2560 = arith.constant 2560 : index
    %76 = vector.load %arg15[%c0_70, %c2560] : memref<8x4096xf32, #tpu.memory_space<vmem>>, vector<8x256xf32>
    tpu.vector_store %arg15[%c0_70, %c2560], %75 {strides = array<i32>} : memref<8x4096xf32, #tpu.memory_space<vmem>>, vector<8x256xf32>,
    %c0_71 = arith.constant 0 : index
    %c1280_72 = arith.constant 1280 : index
    %77 = vector.load %arg1[%c0_71, %c1280_72] : memref<8x1920xf32, #tpu.memory_space<vmem>>, vector<8x256xf32>
    %cst_73 = arith.constant dense<0.000000e+00> : vector<8x256xf32>
    %78 = tpu.matmul %77, %1, %cst_73 {dimension_numbers = #tpu.dot_dimension_numbers<[1], [0], [0], [1], [0, 0, 1, 1], [], []>} : vector<8x256xf32>, vector<256x256xf32>, vector<8x256xf32> -> vector<8x256xf32>
    %79 = arith.addf %78, %4 : vector<8x256xf32>
    %c0_74 = arith.constant 0 : index
    %c2560_75 = arith.constant 2560 : index
    %80 = vector.load %arg10[%c0_74, %c2560_75] : memref<8x3584xf32, #tpu.memory_space<vmem>>, vector<8x256xf32>
    tpu.vector_store %arg10[%c0_74, %c2560_75], %79 {strides = array<i32>} : memref<8x3584xf32, #tpu.memory_space<vmem>>, vector<8x256xf32>,
    %cst_76 = arith.constant 0.000000e+00 : f32
    %81 = vector.broadcast %cst_76 : f32 to vector<8x256xf32>
    %82 = arith.maximumf %79, %81 : vector<8x256xf32>
    %c0_77 = arith.constant 0 : index
    %c2816 = arith.constant 2816 : index
    %83 = vector.load %arg15[%c0_77, %c2816] : memref<8x4096xf32, #tpu.memory_space<vmem>>, vector<8x256xf32>
    tpu.vector_store %arg15[%c0_77, %c2816], %82 {strides = array<i32>} : memref<8x4096xf32, #tpu.memory_space<vmem>>, vector<8x256xf32>,
    %c0_78 = arith.constant 0 : index
    %c1408 = arith.constant 1408 : index
    %84 = vector.load %arg1[%c0_78, %c1408] : memref<8x1920xf32, #tpu.memory_space<vmem>>, vector<8x256xf32>
    %cst_79 = arith.constant dense<0.000000e+00> : vector<8x256xf32>
    %85 = tpu.matmul %84, %1, %cst_79 {dimension_numbers = #tpu.dot_dimension_numbers<[1], [0], [0], [1], [0, 0, 1, 1], [], []>} : vector<8x256xf32>, vector<256x256xf32>, vector<8x256xf32> -> vector<8x256xf32>
    %86 = arith.addf %85, %4 : vector<8x256xf32>
    %c0_80 = arith.constant 0 : index
    %c2816_81 = arith.constant 2816 : index
    %87 = vector.load %arg10[%c0_80, %c2816_81] : memref<8x3584xf32, #tpu.memory_space<vmem>>, vector<8x256xf32>
    tpu.vector_store %arg10[%c0_80, %c2816_81], %86 {strides = array<i32>} : memref<8x3584xf32, #tpu.memory_space<vmem>>, vector<8x256xf32>,
    %cst_82 = arith.constant 0.000000e+00 : f32
    %88 = vector.broadcast %cst_82 : f32 to vector<8x256xf32>
    %89 = arith.maximumf %86, %88 : vector<8x256xf32>
    %c0_83 = arith.constant 0 : index
    %c3072 = arith.constant 3072 : index
    %90 = vector.load %arg15[%c0_83, %c3072] : memref<8x4096xf32, #tpu.memory_space<vmem>>, vector<8x256xf32>
    tpu.vector_store %arg15[%c0_83, %c3072], %89 {strides = array<i32>} : memref<8x4096xf32, #tpu.memory_space<vmem>>, vector<8x256xf32>,
    %c0_84 = arith.constant 0 : index
    %c1536_85 = arith.constant 1536 : index
    %91 = vector.load %arg1[%c0_84, %c1536_85] : memref<8x1920xf32, #tpu.memory_space<vmem>>, vector<8x256xf32>
    %cst_86 = arith.constant dense<0.000000e+00> : vector<8x256xf32>
    %92 = tpu.matmul %91, %1, %cst_86 {dimension_numbers = #tpu.dot_dimension_numbers<[1], [0], [0], [1], [0, 0, 1, 1], [], []>} : vector<8x256xf32>, vector<256x256xf32>, vector<8x256xf32> -> vector<8x256xf32>
    %93 = arith.addf %92, %4 : vector<8x256xf32>
    %c0_87 = arith.constant 0 : index
    %c3072_88 = arith.constant 3072 : index
    %94 = vector.load %arg10[%c0_87, %c3072_88] : memref<8x3584xf32, #tpu.memory_space<vmem>>, vector<8x256xf32>
    tpu.vector_store %arg10[%c0_87, %c3072_88], %93 {strides = array<i32>} : memref<8x3584xf32, #tpu.memory_space<vmem>>, vector<8x256xf32>,
    %cst_89 = arith.constant 0.000000e+00 : f32
    %95 = vector.broadcast %cst_89 : f32 to vector<8x256xf32>
    %96 = arith.maximumf %93, %95 : vector<8x256xf32>
    %c0_90 = arith.constant 0 : index
    %c3328 = arith.constant 3328 : index
    %97 = vector.load %arg15[%c0_90, %c3328] : memref<8x4096xf32, #tpu.memory_space<vmem>>, vector<8x256xf32>
    tpu.vector_store %arg15[%c0_90, %c3328], %96 {strides = array<i32>} : memref<8x4096xf32, #tpu.memory_space<vmem>>, vector<8x256xf32>,
    %c0_91 = arith.constant 0 : index
    %c1664 = arith.constant 1664 : index
    %98 = vector.load %arg1[%c0_91, %c1664] : memref<8x1920xf32, #tpu.memory_space<vmem>>, vector<8x256xf32>
    %cst_92 = arith.constant dense<0.000000e+00> : vector<8x256xf32>
    %99 = tpu.matmul %98, %1, %cst_92 {dimension_numbers = #tpu.dot_dimension_numbers<[1], [0], [0], [1], [0, 0, 1, 1], [], []>} : vector<8x256xf32>, vector<256x256xf32>, vector<8x256xf32> -> vector<8x256xf32>
    %100 = arith.addf %99, %4 : vector<8x256xf32>
    %c0_93 = arith.constant 0 : index
    %c3328_94 = arith.constant 3328 : index
    %101 = vector.load %arg10[%c0_93, %c3328_94] : memref<8x3584xf32, #tpu.memory_space<vmem>>, vector<8x256xf32>
    tpu.vector_store %arg10[%c0_93, %c3328_94], %100 {strides = array<i32>} : memref<8x3584xf32, #tpu.memory_space<vmem>>, vector<8x256xf32>,
    %cst_95 = arith.constant 0.000000e+00 : f32
    %102 = vector.broadcast %cst_95 : f32 to vector<8x256xf32>
    %103 = arith.maximumf %100, %102 : vector<8x256xf32>
    %c0_96 = arith.constant 0 : index
    %c3584 = arith.constant 3584 : index
    %104 = vector.load %arg15[%c0_96, %c3584] : memref<8x4096xf32, #tpu.memory_space<vmem>>, vector<8x256xf32>
    tpu.vector_store %arg15[%c0_96, %c3584], %103 {strides = array<i32>} : memref<8x4096xf32, #tpu.memory_space<vmem>>, vector<8x256xf32>,
    %c0_97 = arith.constant 0 : index
    %c0_98 = arith.constant 0 : index
    %105 = vector.load %arg4[%c0_97, %c0_98] : memref<1024x256xf32, #tpu.memory_space<vmem>>, vector<1024x256xf32>
    %c0_99 = arith.constant 0 : index
    %c0_100 = arith.constant 0 : index
    %106 = vector.load %arg5[%c0_99, %c0_100] : memref<1x256xf32, #tpu.memory_space<vmem>>, vector<1x256xf32>
    %107 = vector.shape_cast %106 : vector<1x256xf32> to vector<1x256xf32>
    %108 = vector.broadcast %107 : vector<1x256xf32> to vector<8x256xf32>
    %c0_101 = arith.constant 0 : index
    %c0_102 = arith.constant 0 : index
    %109 = vector.load %arg7[%c0_101, %c0_102] : memref<1x128xf32, #tpu.memory_space<vmem>>, vector<1x128xf32>
    %110 = vector.shape_cast %109 : vector<1x128xf32> to vector<1x128xf32>
    %111 = vector.broadcast %110 : vector<1x128xf32> to vector<8x128xf32>
    %c0_103 = arith.constant 0 : index
    %c0_104 = arith.constant 0 : index
    %112 = vector.load %arg15[%c0_103, %c0_104] : memref<8x4096xf32, #tpu.memory_space<vmem>>, vector<8x1024xf32>
    %cst_105 = arith.constant dense<0.000000e+00> : vector<8x256xf32>
    %113 = tpu.matmul %112, %105, %cst_105 {dimension_numbers = #tpu.dot_dimension_numbers<[1], [0], [0], [1], [0, 0, 1, 1], [], []>} : vector<8x1024xf32>, vector<1024x256xf32>, vector<8x256xf32> -> vector<8x256xf32>
    %114 = arith.addf %113, %108 : vector<8x256xf32>
    %c0_106 = arith.constant 0 : index
    %c0_107 = arith.constant 0 : index
    %115 = vector.load %arg11[%c0_106, %c0_107] : memref<8x1792xf32, #tpu.memory_space<vmem>>, vector<8x256xf32>
    tpu.vector_store %arg11[%c0_106, %c0_107], %114 {strides = array<i32>} : memref<8x1792xf32, #tpu.memory_space<vmem>>, vector<8x256xf32>,
    %cst_108 = arith.constant 0.000000e+00 : f32
    %116 = vector.broadcast %cst_108 : f32 to vector<8x256xf32>
    %117 = arith.maximumf %114, %116 : vector<8x256xf32>
    %c0_109 = arith.constant 0 : index
    %c0_110 = arith.constant 0 : index
    %118 = vector.load %arg6[%c0_109, %c0_110] : memref<1792x128xf32, #tpu.memory_space<vmem>>, vector<256x128xf32>
    %cst_111 = arith.constant dense<0.000000e+00> : vector<8x128xf32>
    %119 = tpu.matmul %117, %118, %cst_111 {dimension_numbers = #tpu.dot_dimension_numbers<[1], [0], [0], [1], [0, 0, 1, 1], [], []>} : vector<8x256xf32>, vector<256x128xf32>, vector<8x128xf32> -> vector<8x128xf32>
    %120 = arith.addf %111, %119 : vector<8x128xf32>
    %c0_112 = arith.constant 0 : index
    %c512_113 = arith.constant 512 : index
    %121 = vector.load %arg15[%c0_112, %c512_113] : memref<8x4096xf32, #tpu.memory_space<vmem>>, vector<8x1024xf32>
    %cst_114 = arith.constant dense<0.000000e+00> : vector<8x256xf32>
    %122 = tpu.matmul %121, %105, %cst_114 {dimension_numbers = #tpu.dot_dimension_numbers<[1], [0], [0], [1], [0, 0, 1, 1], [], []>} : vector<8x1024xf32>, vector<1024x256xf32>, vector<8x256xf32> -> vector<8x256xf32>
    %123 = arith.addf %122, %108 : vector<8x256xf32>
    %c0_115 = arith.constant 0 : index
    %c256_116 = arith.constant 256 : index
    %124 = vector.load %arg11[%c0_115, %c256_116] : memref<8x1792xf32, #tpu.memory_space<vmem>>, vector<8x256xf32>
    tpu.vector_store %arg11[%c0_115, %c256_116], %123 {strides = array<i32>} : memref<8x1792xf32, #tpu.memory_space<vmem>>, vector<8x256xf32>,
    %cst_117 = arith.constant 0.000000e+00 : f32
    %125 = vector.broadcast %cst_117 : f32 to vector<8x256xf32>
    %126 = arith.maximumf %123, %125 : vector<8x256xf32>
    %c256_118 = arith.constant 256 : index
    %c0_119 = arith.constant 0 : index
    %127 = vector.load %arg6[%c256_118, %c0_119] : memref<1792x128xf32, #tpu.memory_space<vmem>>, vector<256x128xf32>
    %cst_120 = arith.constant dense<0.000000e+00> : vector<8x128xf32>
    %128 = tpu.matmul %126, %127, %cst_120 {dimension_numbers = #tpu.dot_dimension_numbers<[1], [0], [0], [1], [0, 0, 1, 1], [], []>} : vector<8x256xf32>, vector<256x128xf32>, vector<8x128xf32> -> vector<8x128xf32>
    %129 = arith.addf %120, %128 : vector<8x128xf32>
    %c0_121 = arith.constant 0 : index
    %c1024_122 = arith.constant 1024 : index
    %130 = vector.load %arg15[%c0_121, %c1024_122] : memref<8x4096xf32, #tpu.memory_space<vmem>>, vector<8x1024xf32>
    %cst_123 = arith.constant dense<0.000000e+00> : vector<8x256xf32>
    %131 = tpu.matmul %130, %105, %cst_123 {dimension_numbers = #tpu.dot_dimension_numbers<[1], [0], [0], [1], [0, 0, 1, 1], [], []>} : vector<8x1024xf32>, vector<1024x256xf32>, vector<8x256xf32> -> vector<8x256xf32>
    %132 = arith.addf %131, %108 : vector<8x256xf32>
    %c0_124 = arith.constant 0 : index
    %c512_125 = arith.constant 512 : index
    %133 = vector.load %arg11[%c0_124, %c512_125] : memref<8x1792xf32, #tpu.memory_space<vmem>>, vector<8x256xf32>
    tpu.vector_store %arg11[%c0_124, %c512_125], %132 {strides = array<i32>} : memref<8x1792xf32, #tpu.memory_space<vmem>>, vector<8x256xf32>,
    %cst_126 = arith.constant 0.000000e+00 : f32
    %134 = vector.broadcast %cst_126 : f32 to vector<8x256xf32>
    %135 = arith.maximumf %132, %134 : vector<8x256xf32>
    %c512_127 = arith.constant 512 : index
    %c0_128 = arith.constant 0 : index
    %136 = vector.load %arg6[%c512_127, %c0_128] : memref<1792x128xf32, #tpu.memory_space<vmem>>, vector<256x128xf32>
    %cst_129 = arith.constant dense<0.000000e+00> : vector<8x128xf32>
    %137 = tpu.matmul %135, %136, %cst_129 {dimension_numbers = #tpu.dot_dimension_numbers<[1], [0], [0], [1], [0, 0, 1, 1], [], []>} : vector<8x256xf32>, vector<256x128xf32>, vector<8x128xf32> -> vector<8x128xf32>
    %138 = arith.addf %129, %137 : vector<8x128xf32>
    %c0_130 = arith.constant 0 : index
    %c1536_131 = arith.constant 1536 : index
    %139 = vector.load %arg15[%c0_130, %c1536_131] : memref<8x4096xf32, #tpu.memory_space<vmem>>, vector<8x1024xf32>
    %cst_132 = arith.constant dense<0.000000e+00> : vector<8x256xf32>
    %140 = tpu.matmul %139, %105, %cst_132 {dimension_numbers = #tpu.dot_dimension_numbers<[1], [0], [0], [1], [0, 0, 1, 1], [], []>} : vector<8x1024xf32>, vector<1024x256xf32>, vector<8x256xf32> -> vector<8x256xf32>
    %141 = arith.addf %140, %108 : vector<8x256xf32>
    %c0_133 = arith.constant 0 : index
    %c768_134 = arith.constant 768 : index
    %142 = vector.load %arg11[%c0_133, %c768_134] : memref<8x1792xf32, #tpu.memory_space<vmem>>, vector<8x256xf32>
    tpu.vector_store %arg11[%c0_133, %c768_134], %141 {strides = array<i32>} : memref<8x1792xf32, #tpu.memory_space<vmem>>, vector<8x256xf32>,
    %cst_135 = arith.constant 0.000000e+00 : f32
    %143 = vector.broadcast %cst_135 : f32 to vector<8x256xf32>
    %144 = arith.maximumf %141, %143 : vector<8x256xf32>
    %c768_136 = arith.constant 768 : index
    %c0_137 = arith.constant 0 : index
    %145 = vector.load %arg6[%c768_136, %c0_137] : memref<1792x128xf32, #tpu.memory_space<vmem>>, vector<256x128xf32>
    %cst_138 = arith.constant dense<0.000000e+00> : vector<8x128xf32>
    %146 = tpu.matmul %144, %145, %cst_138 {dimension_numbers = #tpu.dot_dimension_numbers<[1], [0], [0], [1], [0, 0, 1, 1], [], []>} : vector<8x256xf32>, vector<256x128xf32>, vector<8x128xf32> -> vector<8x128xf32>
    %147 = arith.addf %138, %146 : vector<8x128xf32>
    %c0_139 = arith.constant 0 : index
    %c2048_140 = arith.constant 2048 : index
    %148 = vector.load %arg15[%c0_139, %c2048_140] : memref<8x4096xf32, #tpu.memory_space<vmem>>, vector<8x1024xf32>
    %cst_141 = arith.constant dense<0.000000e+00> : vector<8x256xf32>
    %149 = tpu.matmul %148, %105, %cst_141 {dimension_numbers = #tpu.dot_dimension_numbers<[1], [0], [0], [1], [0, 0, 1, 1], [], []>} : vector<8x1024xf32>, vector<1024x256xf32>, vector<8x256xf32> -> vector<8x256xf32>
    %150 = arith.addf %149, %108 : vector<8x256xf32>
    %c0_142 = arith.constant 0 : index
    %c1024_143 = arith.constant 1024 : index
    %151 = vector.load %arg11[%c0_142, %c1024_143] : memref<8x1792xf32, #tpu.memory_space<vmem>>, vector<8x256xf32>
    tpu.vector_store %arg11[%c0_142, %c1024_143], %150 {strides = array<i32>} : memref<8x1792xf32, #tpu.memory_space<vmem>>, vector<8x256xf32>,
    %cst_144 = arith.constant 0.000000e+00 : f32
    %152 = vector.broadcast %cst_144 : f32 to vector<8x256xf32>
    %153 = arith.maximumf %150, %152 : vector<8x256xf32>
    %c1024_145 = arith.constant 1024 : index
    %c0_146 = arith.constant 0 : index
    %154 = vector.load %arg6[%c1024_145, %c0_146] : memref<1792x128xf32, #tpu.memory_space<vmem>>, vector<256x128xf32>
    %cst_147 = arith.constant dense<0.000000e+00> : vector<8x128xf32>
    %155 = tpu.matmul %153, %154, %cst_147 {dimension_numbers = #tpu.dot_dimension_numbers<[1], [0], [0], [1], [0, 0, 1, 1], [], []>} : vector<8x256xf32>, vector<256x128xf32>, vector<8x128xf32> -> vector<8x128xf32>
    %156 = arith.addf %147, %155 : vector<8x128xf32>
    %c0_148 = arith.constant 0 : index
    %c2560_149 = arith.constant 2560 : index
    %157 = vector.load %arg15[%c0_148, %c2560_149] : memref<8x4096xf32, #tpu.memory_space<vmem>>, vector<8x1024xf32>
    %cst_150 = arith.constant dense<0.000000e+00> : vector<8x256xf32>
    %158 = tpu.matmul %157, %105, %cst_150 {dimension_numbers = #tpu.dot_dimension_numbers<[1], [0], [0], [1], [0, 0, 1, 1], [], []>} : vector<8x1024xf32>, vector<1024x256xf32>, vector<8x256xf32> -> vector<8x256xf32>
    %159 = arith.addf %158, %108 : vector<8x256xf32>
    %c0_151 = arith.constant 0 : index
    %c1280_152 = arith.constant 1280 : index
    %160 = vector.load %arg11[%c0_151, %c1280_152] : memref<8x1792xf32, #tpu.memory_space<vmem>>, vector<8x256xf32>
    tpu.vector_store %arg11[%c0_151, %c1280_152], %159 {strides = array<i32>} : memref<8x1792xf32, #tpu.memory_space<vmem>>, vector<8x256xf32>,
    %cst_153 = arith.constant 0.000000e+00 : f32
    %161 = vector.broadcast %cst_153 : f32 to vector<8x256xf32>
    %162 = arith.maximumf %159, %161 : vector<8x256xf32>
    %c1280_154 = arith.constant 1280 : index
    %c0_155 = arith.constant 0 : index
    %163 = vector.load %arg6[%c1280_154, %c0_155] : memref<1792x128xf32, #tpu.memory_space<vmem>>, vector<256x128xf32>
    %cst_156 = arith.constant dense<0.000000e+00> : vector<8x128xf32>
    %164 = tpu.matmul %162, %163, %cst_156 {dimension_numbers = #tpu.dot_dimension_numbers<[1], [0], [0], [1], [0, 0, 1, 1], [], []>} : vector<8x256xf32>, vector<256x128xf32>, vector<8x128xf32> -> vector<8x128xf32>
    %165 = arith.addf %156, %164 : vector<8x128xf32>
    %c0_157 = arith.constant 0 : index
    %c3072_158 = arith.constant 3072 : index
    %166 = vector.load %arg15[%c0_157, %c3072_158] : memref<8x4096xf32, #tpu.memory_space<vmem>>, vector<8x1024xf32>
    %cst_159 = arith.constant dense<0.000000e+00> : vector<8x256xf32>
    %167 = tpu.matmul %166, %105, %cst_159 {dimension_numbers = #tpu.dot_dimension_numbers<[1], [0], [0], [1], [0, 0, 1, 1], [], []>} : vector<8x1024xf32>, vector<1024x256xf32>, vector<8x256xf32> -> vector<8x256xf32>
    %168 = arith.addf %167, %108 : vector<8x256xf32>
    %c0_160 = arith.constant 0 : index
    %c1536_161 = arith.constant 1536 : index
    %169 = vector.load %arg11[%c0_160, %c1536_161] : memref<8x1792xf32, #tpu.memory_space<vmem>>, vector<8x256xf32>
    tpu.vector_store %arg11[%c0_160, %c1536_161], %168 {strides = array<i32>} : memref<8x1792xf32, #tpu.memory_space<vmem>>, vector<8x256xf32>,
    %cst_162 = arith.constant 0.000000e+00 : f32
    %170 = vector.broadcast %cst_162 : f32 to vector<8x256xf32>
    %171 = arith.maximumf %168, %170 : vector<8x256xf32>
    %c1536_163 = arith.constant 1536 : index
    %c0_164 = arith.constant 0 : index
    %172 = vector.load %arg6[%c1536_163, %c0_164] : memref<1792x128xf32, #tpu.memory_space<vmem>>, vector<256x128xf32>
    %cst_165 = arith.constant dense<0.000000e+00> : vector<8x128xf32>
    %173 = tpu.matmul %171, %172, %cst_165 {dimension_numbers = #tpu.dot_dimension_numbers<[1], [0], [0], [1], [0, 0, 1, 1], [], []>} : vector<8x256xf32>, vector<256x128xf32>, vector<8x128xf32> -> vector<8x128xf32>
    %174 = arith.addf %165, %173 : vector<8x128xf32>
    %c0_166 = arith.constant 0 : index
    %c0_167 = arith.constant 0 : index
    %175 = vector.load %arg12[%c0_166, %c0_167] : memref<8x128xf32, #tpu.memory_space<vmem>>, vector<8x128xf32>
    tpu.vector_store %arg12[%c0_166, %c0_167], %174 {strides = array<i32>} : memref<8x128xf32, #tpu.memory_space<vmem>>, vector<8x128xf32>,
    %cst_168 = arith.constant 0.000000e+00 : f32
    %176 = vector.broadcast %cst_168 : f32 to vector<8x128xf32>
    %177 = arith.maximumf %174, %176 : vector<8x128xf32>
    %c0_169 = arith.constant 0 : index
    %c0_170 = arith.constant 0 : index
    %178 = vector.load %arg8[%c0_169, %c0_170] : memref<128x128xf32, #tpu.memory_space<vmem>>, vector<128x128xf32>
    %cst_171 = arith.constant dense<0.000000e+00> : vector<8x128xf32>
    %179 = tpu.matmul %177, %178, %cst_171 {dimension_numbers = #tpu.dot_dimension_numbers<[1], [0], [0], [1], [0, 0, 1, 1], [], []>} : vector<8x128xf32>, vector<128x128xf32>, vector<8x128xf32> -> vector<8x128xf32>
    %c0_172 = arith.constant 0 : index
    %c0_173 = arith.constant 0 : index
    %180 = vector.load %arg9[%c0_172, %c0_173] : memref<1x128xf32, #tpu.memory_space<vmem>>, vector<1x128xf32>
    %181 = vector.broadcast %180 : vector<1x128xf32> to vector<8x128xf32>
    %182 = arith.addf %179, %181 : vector<8x128xf32>
    %c0_174 = arith.constant 0 : index
    %c0_175 = arith.constant 0 : index
    %183 = vector.load %arg13[%c0_174, %c0_175] : memref<8x128xf32, #tpu.memory_space<vmem>>, vector<8x128xf32>
    tpu.vector_store %arg13[%c0_174, %c0_175], %182 {strides = array<i32>} : memref<8x128xf32, #tpu.memory_space<vmem>>, vector<8x128xf32>,
    %cst_176 = arith.constant dense<0xFF800000> : vector<8xf32>
    %184 = vector.multi_reduction <maximumf>, %182, %cst_176 [1] : vector<8x128xf32> to vector<8xf32>
    %185 = vector.shape_cast %184 : vector<8xf32> to vector<8x1xf32>
    %186 = vector.broadcast %185 : vector<8x1xf32> to vector<8x128xf32>
    %187 = arith.subf %182, %186 : vector<8x128xf32>
    %188 = math.exp %187 : vector<8x128xf32>
    %cst_177 = arith.constant dense<0.000000e+00> : vector<8xf32>
    %189 = vector.multi_reduction <add>, %188, %cst_177 [1] : vector<8x128xf32> to vector<8xf32>
    %190 = vector.shape_cast %189 : vector<8xf32> to vector<8x1xf32>
    %cst_178 = arith.constant 1.000000e+00 : f32
    %191 = vector.broadcast %cst_178 : f32 to vector<8x1xf32>
    %192 = arith.divf %191, %190 : vector<8x1xf32>
    %193 = vector.broadcast %192 : vector<8x1xf32> to vector<8x128xf32>
    %194 = arith.mulf %188, %193 : vector<8x128xf32>
    %c0_179 = arith.constant 0 : index
    %c0_180 = arith.constant 0 : index
    %195 = vector.load %arg14[%c0_179, %c0_180] : memref<8x128xf32, #tpu.memory_space<vmem>>, vector<8x128xf32>
    tpu.vector_store %arg14[%c0_179, %c0_180], %194 {strides = array<i32>} : memref<8x128xf32, #tpu.memory_space<vmem>>, vector<8x128xf32>,
    return
  }
  func.func @transform_0(%arg0: i32) -> (i32, i32) {
    %c0_i32 = arith.constant 0 : i32
    %c0_i32_0 = arith.constant 0 : i32
    return %arg0, %c0_i32 : i32, i32
  }
  func.func @transform_1(%arg0: i32) -> (i32, i32) {
    %c0_i32 = arith.constant 0 : i32
    %c0_i32_0 = arith.constant 0 : i32
    %c0_i32_1 = arith.constant 0 : i32
    return %c0_i32, %c0_i32_0 : i32, i32
  }
  func.func @transform_2(%arg0: i32) -> (i32, i32) {
    %c0_i32 = arith.constant 0 : i32
    %c0_i32_0 = arith.constant 0 : i32
    %c0_i32_1 = arith.constant 0 : i32
    return %c0_i32, %c0_i32_0 : i32, i32
  }
  func.func @transform_3(%arg0: i32) -> (i32, i32) {
    %c0_i32 = arith.constant 0 : i32
    %c0_i32_0 = arith.constant 0 : i32
    %c0_i32_1 = arith.constant 0 : i32
    return %c0_i32, %c0_i32_0 : i32, i32
  }
  func.func @transform_4(%arg0: i32) -> (i32, i32) {
    %c0_i32 = arith.constant 0 : i32
    %c0_i32_0 = arith.constant 0 : i32
    %c0_i32_1 = arith.constant 0 : i32
    return %c0_i32, %c0_i32_0 : i32, i32
  }
  func.func @transform_5(%arg0: i32) -> (i32, i32) {
    %c0_i32 = arith.constant 0 : i32
    %c0_i32_0 = arith.constant 0 : i32
    %c0_i32_1 = arith.constant 0 : i32
    return %c0_i32, %c0_i32_0 : i32, i32
  }
  func.func @transform_6(%arg0: i32) -> (i32, i32) {
    %c0_i32 = arith.constant 0 : i32
    %c0_i32_0 = arith.constant 0 : i32
    %c0_i32_1 = arith.constant 0 : i32
    return %c0_i32, %c0_i32_0 : i32, i32
  }
  func.func @transform_7(%arg0: i32) -> (i32, i32) {
    %c0_i32 = arith.constant 0 : i32
    %c0_i32_0 = arith.constant 0 : i32
    %c0_i32_1 = arith.constant 0 : i32
    return %c0_i32, %c0_i32_0 : i32, i32
  }
  func.func @transform_8(%arg0: i32) -> (i32, i32) {
    %c0_i32 = arith.constant 0 : i32
    %c0_i32_0 = arith.constant 0 : i32
    %c0_i32_1 = arith.constant 0 : i32
    return %c0_i32, %c0_i32_0 : i32, i32
  }
  func.func @transform_9(%arg0: i32) -> (i32, i32) {
    %c0_i32 = arith.constant 0 : i32
    %c0_i32_0 = arith.constant 0 : i32
    return %arg0, %c0_i32 : i32, i32
  }
  func.func @transform_10(%arg0: i32) -> (i32, i32) {
    %c0_i32 = arith.constant 0 : i32
    %c0_i32_0 = arith.constant 0 : i32
    return %arg0, %c0_i32 : i32, i32
  }
  func.func @transform_11(%arg0: i32) -> (i32, i32) {
    %c0_i32 = arith.constant 0 : i32
    %c0_i32_0 = arith.constant 0 : i32
    return %arg0, %c0_i32 : i32, i32
  }
  func.func @transform_12(%arg0: i32) -> (i32, i32) {
    %c0_i32 = arith.constant 0 : i32
    %c0_i32_0 = arith.constant 0 : i32
    return %arg0, %c0_i32 : i32, i32
  }
  func.func @transform_13(%arg0: i32) -> (i32, i32) {
    %c0_i32 = arith.constant 0 : i32
    %c0_i32_0 = arith.constant 0 : i32
    return %arg0, %c0_i32 : i32, i32
  }
}

</mosaic_0001>

<bundles_post_ra>
// kernel: forward.1
= control target key start
LH: loop header
LB: loop body
LE: loop exit
PB: predicated region body
PF: predicated region fallthrough
CT: control target
= control target key end

     0   :  { %19 = vsyncpa [#allocation4], 0  ;;  %s10397_s0 = inlined_call_operand.vmem [shape: f32[8,1920], index: 0, kind: input, shape index: {}]   ;;  %s10398_s1 = inlined_call_operand.vmem [shape: f32[256,256], index: 1, kind: input, shape index: {}]   ;;  %s10399_s2 = inlined_call_operand.vmem [shape: f32[1,256], index: 2, kind: input, shape index: {}]   ;;  %s10400_s3 = inlined_call_operand.hbm [shape: f32[1024,256], index: 3, kind: input, shape index: {}]   ;;  %s10401_s4 = inlined_call_operand.vmem [shape: f32[1,256], index: 4, kind: input, shape index: {}]   ;;  %s10402_s5 = inlined_call_operand.hbm [shape: f32[1792,128], index: 5, kind: input, shape index: {}]   ;;  %s10403_s6 = inlined_call_operand.vmem [shape: f32[1,128], index: 6, kind: input, shape index: {}]   ;;  %s10404_s7 = inlined_call_operand.hbm [shape: f32[128,128], index: 7, kind: input, shape index: {}]   ;;  %s10405_s8 = inlined_call_operand.vmem [shape: f32[1,128], index: 8, kind: input, shape index: {}]   ;;  %s10406_s9 = inlined_call_operand.vmem [shape: f32[8,3584], index: 9, kind: output, shape index: {0}]   ;;  %s10407_s10 = inlined_call_operand.vmem [shape: f32[8,1792], index: 10, kind: output, shape index: {1}]   ;;  %s10408_s11 = inlined_call_operand.vmem [shape: f32[8,128], index: 11, kind: output, shape index: {2}]   ;;  %s10409_s12 = inlined_call_operand.vmem [shape: f32[8,128], index: 12, kind: output, shape index: {3}]   ;;  %s10410_s13 = inlined_call_operand.vmem [shape: f32[8,128], index: 13, kind: output, shape index: {4}]  }
   0x1   :  { %20 = vsyncpa [#allocation6], 0  ;;  %s7855_s25 = smov [#allocation5]   ;;  %s7785_s29 = scalar_lea.hbm %s10402_s5, 28672 }
   0x2   :  { %s46_s26 = sshll.u32 %s7855_s25, 4  ;;  %p7786_p0 = scmp.ne.s32.totalorder %s10402_s5, %s7785_s29  ;;  %s47_s26 = int_to_ptr.vmem [resolvable:$true] %s46_s26 }
   0x3   :  { %p7789_p1 = scmp.lt.u32.totalorder %s7785_s29, %s10402_s5 }
   0x5   :  { %p7791_p2 = pnand %p7789_p1, %p7786_p0 }
   0x7   :  { %7794 = shalt.err (!%p7791_p2)
}
   0x8   :  { %s7795_s17 = scalar_lea.vmem %s47_s26, 28672  ;;  %p7800_p4 = scmp.lt.s32.totalorder %s47_s26, %s47_s26 }
   0x9   :  { %p7796_p3 = scmp.ne.s32.totalorder %s47_s26, %s7795_s17  ;;  %p7801_p5 = scmp.lt.s32.totalorder %s7795_s17, %s7795_s17 }
   0xb   :  { %p7802_p6 = por %p7801_p5, %p7800_p4 }
   0xd   :  { %p7803_p7 = pnand %p7802_p6, %p7796_p3 }
   0xf   :  { %7806 = shalt.err (!%p7803_p7)
}
  0x10   :  { %s7856_s18 = smov 128   ;;  %s7857_s19 = smov 8  }
  0x11   :  { %52 = dma.hbm_to_vmem [thread:$0]  %s10402_s5, 28672, %s47_s26, [#allocation6], %s7856_s18, %s7856_s18, %s7857_s19  }
  0x12   :  { %s7858_s22 = smov [#allocation3]   ;;  %s7807_s27 = scalar_lea.hbm %s10400_s3, 32768 }
  0x13   :  { %s32_s23 = sshll.u32 %s7858_s22, 4  ;;  %p7808_p8 = scmp.ne.s32.totalorder %s10400_s3, %s7807_s27  ;;  %s33_s23 = int_to_ptr.vmem [resolvable:$true] %s32_s23 }
  0x14   :  { %p7811_p9 = scmp.lt.u32.totalorder %s7807_s27, %s10400_s3 }
  0x16   :  { %p7813_p10 = pnand %p7811_p9, %p7808_p8 }
  0x18   :  { %7816 = shalt.err (!%p7813_p10)
}
  0x19   :  { %s7817_s15 = scalar_lea.vmem %s33_s23, 32768  ;;  %p7822_p12 = scmp.lt.s32.totalorder %s33_s23, %s33_s23 }
  0x1a   :  { %p7818_p11 = scmp.ne.s32.totalorder %s33_s23, %s7817_s15  ;;  %p7823_p13 = scmp.lt.s32.totalorder %s7817_s15, %s7817_s15 }
  0x1c   :  { %p7824_p0 = por %p7823_p13, %p7822_p12 }
  0x1e   :  { %p7825_p1 = pnand %p7824_p0, %p7818_p11 }
  0x20   :  { %7828 = shalt.err (!%p7825_p1)
}
  0x21   :  { %s7859_s5 = smov 256   ;;  %s7860_s26 = smov 16  }
  0x22   :  { %38 = dma.hbm_to_vmem [thread:$0]  %s10400_s3, 32768, %s33_s23, [#allocation4], %s7859_s5, %s7859_s5, %s7860_s26  }
  0x23   :  { %s7861_s20 = smov [#allocation7]   ;;  %s7829_s25 = scalar_lea.hbm %s10404_s7, 2048 }
  0x24   :  { %s60_s21 = sshll.u32 %s7861_s20, 4  ;;  %p7830_p2 = scmp.ne.s32.totalorder %s10404_s7, %s7829_s25  ;;  %s61_s21 = int_to_ptr.vmem [resolvable:$true] %s60_s21 }
  0x25   :  { %p7833_p3 = scmp.lt.u32.totalorder %s7829_s25, %s10404_s7 }
  0x27   :  { %p7835_p4 = pnand %p7833_p3, %p7830_p2 }
  0x29   :  { %7838 = shalt.err (!%p7835_p4)
}
  0x2a   :  { %s7839_s14 = scalar_lea.vmem %s61_s21, 2048  ;;  %p7844_p6 = scmp.lt.s32.totalorder %s61_s21, %s61_s21 }
  0x2b   :  { %p7840_p5 = scmp.ne.s32.totalorder %s61_s21, %s7839_s14  ;;  %p7845_p7 = scmp.lt.s32.totalorder %s7839_s14, %s7839_s14 }
  0x2d   :  { %p7846_p8 = por %p7845_p7, %p7844_p6 }
  0x2f   :  { %p7847_p9 = pnand %p7846_p8, %p7840_p5 }
  0x31   :  { %7850 = shalt.err (!%p7847_p9)
}
  0x32   :  { %66 = dma.hbm_to_vmem [thread:$0]  %s10404_s7, 2048, %s61_s21, [#allocation6], %s7856_s18, %s7856_s18, %s7857_s19  }
  0x33   :  { %7851 = dma.done.wait [#allocation4], 32768  }
  0x34   :  { %7852 = vsyncadd [#allocation4], 4294934528 }
  0x35   :  { %7853 = dma.done.wait [#allocation6], 30720  }
  0x36   :  { %7854 = vsyncadd [#allocation6], 4294936576  ;;  %v79_v0 = vld [vmem:[%s10398_s1 + $0x8] sm:$0xff]  ;;  %v81_v1 = vld [vmem:[%s10398_s1 + $0x18] sm:$0xff]  ;;  %vm7864_vm0 = vmmov 0  }
  0x37   :  { %v78_v2 = vld [vmem:[%s10398_s1] sm:$0xff]  ;;  %v7986_v3 = vpack.c.bf16 %v81_v1, %v79_v0  ;;  %v80_v4 = vld [vmem:[%s10398_s1 + $0x10] sm:$0xff]  ;;  %v83_v5 = vld [vmem:[%s10398_s1 + $0x28] sm:$0xff] }
  0x38   :  { %v85_v6 = vld [vmem:[%s10398_s1 + $0x38] sm:$0xff]  ;;  %v7997_v7 = vpack.c.bf16 %v80_v4, %v78_v2  ;;  %v82_v9 = vld [vmem:[%s10398_s1 + $0x20] sm:$0xff]  ;;  %v84_v10 = vld [vmem:[%s10398_s1 + $0x30] sm:$0xff] }
  0x39   :  { %v7999_v8 = vpack.c.bf16 %v85_v6, %v83_v5  ;;  %v87_v11 = vld [vmem:[%s10398_s1 + $0x48] sm:$0xff]  ;;  %4889 = vmatprep.subr.bf16.mxu0 %v7986_v3  ;;  %v89_v12 = vld [vmem:[%s10398_s1 + $0x58] sm:$0xff]  ;;  %4761 = vmatprep.subr.bf16.mxu1 %v7986_v3  ;;  %v8016_v13 = vpack.c.bf16 %v84_v10, %v82_v9  ;;  %v86_v15 = vld [vmem:[%s10398_s1 + $0x40] sm:$0xff] }
  0x3a   :  { %4891 = vmatpush1.bf16.msra.mxu0 %v7997_v7  ;;  %4763 = vmatpush1.bf16.msra.mxu1 %v7997_v7  ;;  %v8020_v14 = vpack.c.bf16 %v89_v12, %v87_v11  ;;  %v88_v16 = vld [vmem:[%s10398_s1 + $0x50] sm:$0xff]  ;;  %v91_v17 = vld [vmem:[%s10398_s1 + $0x68] sm:$0xff]  ;;  %v93_v18 = vld [vmem:[%s10398_s1 + $0x78] sm:$0xff] }
  0x3b   :  { %4893 = vmatprep.subr.bf16.mxu0 %v7999_v8  ;;  %4765 = vmatprep.subr.bf16.mxu1 %v7999_v8  ;;  %v8036_v19 = vpack.c.bf16 %v88_v16, %v86_v15  ;;  %v8040_v20 = vpack.c.bf16 %v93_v18, %v91_v17  ;;  %v90_v21 = vld [vmem:[%s10398_s1 + $0x60] sm:$0xff]  ;;  %v92_v22 = vld [vmem:[%s10398_s1 + $0x70] sm:$0xff]  ;;  %v95_v23 = vld [vmem:[%s10398_s1 + $0x88] sm:$0xff] }
  0x3c   :  { %v97_v24 = vld [vmem:[%s10398_s1 + $0x98] sm:$0xff]  ;;  %v8056_v25 = vpack.c.bf16 %v92_v22, %v90_v21  ;;  %v94_v27 = vld [vmem:[%s10398_s1 + $0x80] sm:$0xff]  ;;  %v96_v28 = vld [vmem:[%s10398_s1 + $0x90] sm:$0xff] }
  0x3d   :  { %v8060_v26 = vpack.c.bf16 %v97_v24, %v95_v23  ;;  %v99_v29 = vld [vmem:[%s10398_s1 + $0xa8] sm:$0xff]  ;;  %v101_v30 = vld [vmem:[%s10398_s1 + $0xb8] sm:$0xff]  ;;  %v8076_v31 = vpack.c.bf16 %v96_v28, %v94_v27  ;;  %v98_v33 = vld [vmem:[%s10398_s1 + $0xa0] sm:$0xff] }
  0x3e   :  { %4895 = vmatpush1.bf16.msra.mxu0 %v8016_v13  ;;  %4767 = vmatpush1.bf16.msra.mxu1 %v8016_v13  ;;  %v8080_v32 = vpack.c.bf16 %v101_v30, %v99_v29  ;;  %v100_v34 = vld [vmem:[%s10398_s1 + $0xb0] sm:$0xff]  ;;  %v103_v35 = vld [vmem:[%s10398_s1 + $0xc8] sm:$0xff]  ;;  %v105_v36 = vld [vmem:[%s10398_s1 + $0xd8] sm:$0xff] }
  0x3f   :  { %4897 = vmatprep.subr.bf16.mxu0 %v8020_v14  ;;  %4769 = vmatprep.subr.bf16.mxu1 %v8020_v14  ;;  %v8096_v37 = vpack.c.bf16 %v100_v34, %v98_v33  ;;  %v8100_v38 = vpack.c.bf16 %v105_v36, %v103_v35  ;;  %v102_v39 = vld [vmem:[%s10398_s1 + $0xc0] sm:$0xff]  ;;  %v104_v40 = vld [vmem:[%s10398_s1 + $0xd0] sm:$0xff]  ;;  %v317_v41 = vld [vmem:[%s10397_s0 + $0x18] sm:$0xff] }
  0x40   :  { %v107_v42 = vld [vmem:[%s10398_s1 + $0xe8] sm:$0xff]  ;;  %v109_v43 = vld [vmem:[%s10398_s1 + $0xf8] sm:$0xff]  ;;  %382 = vmatprep.mubr.f32.mxu0 %v317_v41  ;;  %v8119_v44 = vpack.c.bf16 %v104_v40, %v102_v39  ;;  %v106_v46 = vld [vmem:[%s10398_s1 + $0xe0] sm:$0xff] }
  0x41   :  { %v8123_v45 = vpack.c.bf16 %v109_v43, %v107_v42  ;;  %v108_v47 = vld [vmem:[%s10398_s1 + $0xf0] sm:$0xff]  ;;  %v111_v48 = vld [vmem:[%s10398_s1 + $0x108] sm:$0xff]  ;;  %v113_v49 = vld [vmem:[%s10398_s1 + $0x118] sm:$0xff] }
  0x42   :  { %4899 = vmatpush1.bf16.msra.mxu0 %v8036_v19  ;;  %4771 = vmatpush1.bf16.msra.mxu1 %v8036_v19  ;;  %v8139_v50 = vpack.c.bf16 %v108_v47, %v106_v46  ;;  %v8143_v51 = vpack.c.bf16 %v113_v49, %v111_v48  ;;  %v110_v52 = vld [vmem:[%s10398_s1 + $0x100] sm:$0xff]  ;;  %v112_v53 = vld [vmem:[%s10398_s1 + $0x110] sm:$0xff]  ;;  %v115_v54 = vld [vmem:[%s10398_s1 + $0x128] sm:$0xff] }
  0x43   :  { %4901 = vmatprep.subr.bf16.mxu0 %v8040_v20  ;;  %4773 = vmatprep.subr.bf16.mxu1 %v8040_v20  ;;  %v117_v55 = vld [vmem:[%s10398_s1 + $0x138] sm:$0xff]  ;;  %v8159_v56 = vpack.c.bf16 %v112_v53, %v110_v52  ;;  %v114_v58 = vld [vmem:[%s10398_s1 + $0x120] sm:$0xff]  ;;  %v116_v59 = vld [vmem:[%s10398_s1 + $0x130] sm:$0xff] }
  0x44   :  { %v8163_v57 = vpack.c.bf16 %v117_v55, %v115_v54  ;;  %v119_v60 = vld [vmem:[%s10398_s1 + $0x148] sm:$0xff]  ;;  %v121_v61 = vld [vmem:[%s10398_s1 + $0x158] sm:$0xff]  ;;  %v8179_v62 = vpack.c.bf16 %v116_v59, %v114_v58  ;;  %v118_v0 = vld [vmem:[%s10398_s1 + $0x140] sm:$0xff] }
  0x45   :  { %v8183_v63 = vpack.c.bf16 %v121_v61, %v119_v60  ;;  %v120_v1 = vld [vmem:[%s10398_s1 + $0x150] sm:$0xff]  ;;  %v123_v2 = vld [vmem:[%s10398_s1 + $0x168] sm:$0xff]  ;;  %v125_v4 = vld [vmem:[%s10398_s1 + $0x178] sm:$0xff] }
  0x46   :  { %4903 = vmatpush1.bf16.msra.mxu0 %v8056_v25  ;;  %4775 = vmatpush1.bf16.msra.mxu1 %v8056_v25  ;;  %v8199_v5 = vpack.c.bf16 %v120_v1, %v118_v0  ;;  %v8203_v6 = vpack.c.bf16 %v125_v4, %v123_v2  ;;  %v122_v9 = vld [vmem:[%s10398_s1 + $0x160] sm:$0xff]  ;;  %v124_v10 = vld [vmem:[%s10398_s1 + $0x170] sm:$0xff]  ;;  %v127_v11 = vld [vmem:[%s10398_s1 + $0x188] sm:$0xff]  ;;  %v144_v0 = vlaneseq }
  0x47   :  { %4905 = vmatprep.subr.bf16.mxu0 %v8060_v26  ;;  %4777 = vmatprep.subr.bf16.mxu1 %v8060_v26  ;;  %v129_v12 = vld [vmem:[%s10398_s1 + $0x198] sm:$0xff]  ;;  %v8219_v15 = vpack.c.bf16 %v124_v10, %v122_v9  ;;  %v126_v17 = vld [vmem:[%s10398_s1 + $0x180] sm:$0xff]  ;;  %v128_v18 = vld [vmem:[%s10398_s1 + $0x190] sm:$0xff] }
  0x48   :  { %v8223_v16 = vpack.c.bf16 %v129_v12, %v127_v11  ;;  %v131_v21 = vld [vmem:[%s10398_s1 + $0x1a8] sm:$0xff]  ;;  %v133_v22 = vld [vmem:[%s10398_s1 + $0x1b8] sm:$0xff]  ;;  %v8239_v23 = vpack.c.bf16 %v128_v18, %v126_v17  ;;  %v130_v27 = vld [vmem:[%s10398_s1 + $0x1a0] sm:$0xff]  ;;  %v8493_v1 = vshrl.u32 %v144_v0, 7 }
  0x49   :  { %v8243_v24 = vpack.c.bf16 %v133_v22, %v131_v21  ;;  %v132_v28 = vld [vmem:[%s10398_s1 + $0x1b0] sm:$0xff]  ;;  %v135_v29 = vld [vmem:[%s10398_s1 + $0x1c8] sm:$0xff]  ;;  %v137_v30 = vld [vmem:[%s10398_s1 + $0x1d8] sm:$0xff] }
  0x4a   :  { %4907 = vmatpush1.bf16.msra.mxu0 %v8076_v31  ;;  %4779 = vmatpush1.bf16.msra.mxu1 %v8076_v31  ;;  %v8259_v33 = vpack.c.bf16 %v132_v28, %v130_v27  ;;  %v8263_v34 = vpack.c.bf16 %v137_v30, %v135_v29  ;;  %v134_v35 = vld [vmem:[%s10398_s1 + $0x1c0] sm:$0xff]  ;;  %v136_v36 = vld [vmem:[%s10398_s1 + $0x1d0] sm:$0xff]  ;;  %v139_v39 = vld [vmem:[%s10398_s1 + $0x1e8] sm:$0xff]  ;;  %10758 = vst [vmem:[#allocation10_spill] sm:$0xff] %v8493_v1  ;;  %v10412_v2 = vsub.s32 0, %v8493_v1  ;;  %v10411_v9 = vsub.s32 1, %v8493_v1 }
  0x4b   :  { %4909 = vmatprep.subr.bf16.mxu0 %v8080_v32  ;;  %4781 = vmatprep.subr.bf16.mxu1 %v8080_v32  ;;  %v141_v40 = vld [vmem:[%s10398_s1 + $0x1f8] sm:$0xff]  ;;  %v8279_v41 = vpack.c.bf16 %v136_v36, %v134_v35  ;;  %v138_v43 = vld [vmem:[%s10398_s1 + $0x1e0] sm:$0xff]  ;;  %v140_v46 = vld [vmem:[%s10398_s1 + $0x1f0] sm:$0xff] }
  0x4c   :  { %v8283_v42 = vpack.c.bf16 %v141_v40, %v139_v39  ;;  %v8293_v47 = vpack.c.bf16 %v140_v46, %v138_v43  ;;  %v8302_v48 = vld [vmem:[%s10397_s0 + $0x10] sm:$0xff]  ;;  %v475_v49 = vld [vmem:[%s10397_s0 + $0x28] sm:$0xff]  ;;  %v8345_v52 = vld [vmem:[%s10397_s0 + $0x20] sm:$0xff] }
  0x4d   :  { %v633_v53 = vld [vmem:[%s10397_s0 + $0x38] sm:$0xff]  ;;  %v8373_v54 = vld [vmem:[%s10397_s0 + $0x8] sm:$0xff]  ;;  %v158_v55 = vld [vmem:[%s10397_s0] sm:$0xff] }
  0x4e   :  { %4911 = vmatpush1.bf16.msra.mxu0 %v8096_v37  ;;  %4783 = vmatpush1.bf16.msra.mxu1 %v8096_v37  ;;  %v632_v58 = vld [vmem:[%s10397_s0 + $0x30] sm:$0xff]  ;;  %v791_v59 = vld [vmem:[%s10397_s0 + $0x48] sm:$0xff]  ;;  %v790_v60 = vld [vmem:[%s10397_s0 + $0x40] sm:$0xff] }
  0x4f   :  { %4913 = vmatprep.subr.bf16.mxu0 %v8100_v38  ;;  %4785 = vmatprep.subr.bf16.mxu1 %v8100_v38  ;;  %v949_v61 = vld [vmem:[%s10397_s0 + $0x58] sm:$0xff]  ;;  %v142_v4 = vld [vmem:[%s10399_s2] sm:$0x3]  ;;  %v948_v22 = vld [vmem:[%s10397_s0 + $0x50] sm:$0xff] }
  0x50   :  { %224 = vmatprep.mubr.f32.mxu1 %v8373_v54  ;;  %v8510_v10 = vrot.slane %v142_v4, %v10412_v2  ;;  %v8516_v11 = vrot.slane %v142_v4, %v10411_v9  ;;  %v1107_v27 = vld [vmem:[%s10397_s0 + $0x68] sm:$0xff]  ;;  %v395_v36 = vld [vmem:[%s10397_s0 + $0x18] sm:$0xff]  ;;  %v1268_v0 = vld [vmem:[#allocation3 + $0x20] sm:$0xff] }
  0x51   :  { %v1265_v39 = vld [vmem:[#allocation3 + $0x8] sm:$0xff]  ;;  %v1267_v40 = vld [vmem:[#allocation3 + $0x18] sm:$0xff]  ;;  %v1270_v4 = vld [vmem:[#allocation3 + $0x30] sm:$0xff] }
  0x52   :  { %4915 = vmatpush1.bf16.msra.mxu0 %v8119_v44  ;;  %4787 = vmatpush1.bf16.msra.mxu1 %v8119_v44  ;;  %v8616_v46 = vpack.c.bf16 %v1267_v40, %v1265_v39  ;;  %v1276_v39 = vld [vmem:[#allocation3 + $0x60] sm:$0xff]  ;;  %v1278_v40 = vld [vmem:[#allocation3 + $0x70] sm:$0xff]  ;;  %v1303_v2 = vld [vmem:[#allocation3 + $0x138] sm:$0xff] }
  0x53   :  { %4917 = vmatprep.subr.bf16.mxu0 %v8123_v45  ;;  %4789 = vmatprep.subr.bf16.mxu1 %v8123_v45 }
  0x54   :  { %10759 = vst [vmem:[#allocation11_spill] sm:$0xff] %v8616_v46 }
  0x56   :  { %4919 = vmatpush1.bf16.msra.mxu0 %v8139_v50  ;;  %4791 = vmatpush1.bf16.msra.mxu1 %v8139_v50 }
  0x57   :  { %4921 = vmatprep.subr.bf16.mxu0 %v8143_v51  ;;  %4793 = vmatprep.subr.bf16.mxu1 %v8143_v51 }
  0x5a   :  { %4923 = vmatpush1.bf16.msra.mxu0 %v8159_v56  ;;  %4795 = vmatpush1.bf16.msra.mxu1 %v8159_v56 }
  0x5b   :  { %4925 = vmatprep.subr.bf16.mxu0 %v8163_v57  ;;  %4797 = vmatprep.subr.bf16.mxu1 %v8163_v57 }
  0x5e   :  { %4927 = vmatpush1.bf16.msra.mxu0 %v8179_v62  ;;  %4799 = vmatpush1.bf16.msra.mxu1 %v8179_v62 }
  0x5f   :  { %4929 = vmatprep.subr.bf16.mxu0 %v8183_v63  ;;  %4801 = vmatprep.subr.bf16.mxu1 %v8183_v63 }
  0x62   :  { %4931 = vmatpush1.bf16.msra.mxu0 %v8199_v5  ;;  %4803 = vmatpush1.bf16.msra.mxu1 %v8199_v5 }
  0x63   :  { %4933 = vmatprep.subr.bf16.mxu0 %v8203_v6  ;;  %4805 = vmatprep.subr.bf16.mxu1 %v8203_v6 }
  0x66   :  { %4935 = vmatpush1.bf16.msra.mxu0 %v8219_v15  ;;  %4807 = vmatpush1.bf16.msra.mxu1 %v8219_v15 }
  0x67   :  { %4937 = vmatprep.subr.bf16.mxu0 %v8223_v16  ;;  %4809 = vmatprep.subr.bf16.mxu1 %v8223_v16 }
  0x6a   :  { %4939 = vmatpush1.bf16.msra.mxu0 %v8239_v23  ;;  %4811 = vmatpush1.bf16.msra.mxu1 %v8239_v23 }
  0x6b   :  { %4941 = vmatprep.subr.bf16.mxu0 %v8243_v24  ;;  %4813 = vmatprep.subr.bf16.mxu1 %v8243_v24 }
  0x6e   :  { %4943 = vmatpush1.bf16.msra.mxu0 %v8259_v33  ;;  %4815 = vmatpush1.bf16.msra.mxu1 %v8259_v33 }
  0x6f   :  { %4945 = vmatprep.subr.bf16.mxu0 %v8263_v34  ;;  %4817 = vmatprep.subr.bf16.mxu1 %v8263_v34 }
  0x72   :  { %4947 = vmatpush1.bf16.msra.mxu0 %v8279_v41  ;;  %4819 = vmatpush1.bf16.msra.mxu1 %v8279_v41 }
  0x73   :  { %4949 = vmatprep.subr.bf16.mxu0 %v8283_v42  ;;  %4821 = vmatprep.subr.bf16.mxu1 %v8283_v42 }
  0x76   :  { %4951 = vmatpush1.bf16.msra.mxu0 %v8293_v47  ;;  %4823 = vmatpush1.bf16.msra.mxu1 %v8293_v47 }
  0x77   :  { %5017 = vmatprep.subr.bf16.mxu0 %v7986_v3  ;;  %4825 = vmatprep.subr.bf16.mxu1 %v7986_v3 }
  0x79   :  { %383 = vmatmul.mubr.f32.vlgmr.msra.gmra.mrb[0].mxu0 %v8302_v48  ;;  %225 = vmatmul.mubr.f32.vlgmr.msra.gmra.mrb[0].mxu1 %v158_v55  ;;  %v1271_v55 = vld [vmem:[#allocation3 + $0x38] sm:$0xff] }
  0x7a   :  { %5019 = vmatpush1.bf16.msra.mxu0 %v7997_v7  ;;  %540 = vmatprep.mubr.f32.mxu0 %v475_v49  ;;  %v1266_v49 = vld [vmem:[#allocation3 + $0x10] sm:$0xff] }
  0x7b   :  { %5021 = vmatprep.subr.bf16.mxu0 %v7999_v8  ;;  %4827 = vmatpush1.bf16.msra.mxu1 %v7997_v7 }
  0x7c   :  { %303 = vmatprep.mubr.f32.mxu1 %v8302_v48  ;;  %4829 = vmatprep.subr.bf16.mxu1 %v7999_v8  ;;  %v1264_v48 = vld [vmem:[#allocation3] sm:$0xff] }
  0x7e   :  { %5023 = vmatpush1.bf16.msra.mxu0 %v8016_v13 }
  0x7f   :  { %5025 = vmatprep.subr.bf16.mxu0 %v8020_v14  ;;  %4831 = vmatpush1.bf16.msra.mxu1 %v8016_v13 }
  0x80   :  { %4833 = vmatprep.subr.bf16.mxu1 %v8020_v14 }
  0x82   :  { %5027 = vmatpush1.bf16.msra.mxu0 %v8036_v19 }
  0x83   :  { %5029 = vmatprep.subr.bf16.mxu0 %v8040_v20  ;;  %4835 = vmatpush1.bf16.msra.mxu1 %v8036_v19 }
  0x84   :  { %4837 = vmatprep.subr.bf16.mxu1 %v8040_v20 }
  0x86   :  { %5031 = vmatpush1.bf16.msra.mxu0 %v8056_v25 }
  0x87   :  { %5033 = vmatprep.subr.bf16.mxu0 %v8060_v26  ;;  %4839 = vmatpush1.bf16.msra.mxu1 %v8056_v25 }
  0x88   :  { %4841 = vmatprep.subr.bf16.mxu1 %v8060_v26 }
  0x8a   :  { %5035 = vmatpush1.bf16.msra.mxu0 %v8076_v31 }
  0x8b   :  { %5037 = vmatprep.subr.bf16.mxu0 %v8080_v32  ;;  %4843 = vmatpush1.bf16.msra.mxu1 %v8076_v31 }
  0x8c   :  { %4845 = vmatprep.subr.bf16.mxu1 %v8080_v32 }
  0x8e   :  { %5039 = vmatpush1.bf16.msra.mxu0 %v8096_v37 }
  0x8f   :  { %5041 = vmatprep.subr.bf16.mxu0 %v8100_v38  ;;  %4847 = vmatpush1.bf16.msra.mxu1 %v8096_v37 }
  0x90   :  { %4849 = vmatprep.subr.bf16.mxu1 %v8100_v38 }
  0x92   :  { %5043 = vmatpush1.bf16.msra.mxu0 %v8119_v44 }
  0x93   :  { %5045 = vmatprep.subr.bf16.mxu0 %v8123_v45  ;;  %4851 = vmatpush1.bf16.msra.mxu1 %v8119_v44 }
  0x94   :  { %4853 = vmatprep.subr.bf16.mxu1 %v8123_v45 }
  0x96   :  { %5047 = vmatpush1.bf16.msra.mxu0 %v8139_v50 }
  0x97   :  { %5049 = vmatprep.subr.bf16.mxu0 %v8143_v51  ;;  %4855 = vmatpush1.bf16.msra.mxu1 %v8139_v50 }
  0x98   :  { %4857 = vmatprep.subr.bf16.mxu1 %v8143_v51 }
  0x9a   :  { %5051 = vmatpush1.bf16.msra.mxu0 %v8159_v56 }
  0x9b   :  { %5053 = vmatprep.subr.bf16.mxu0 %v8163_v57  ;;  %4859 = vmatpush1.bf16.msra.mxu1 %v8159_v56 }
  0x9c   :  { %4861 = vmatprep.subr.bf16.mxu1 %v8163_v57 }
  0x9e   :  { %5055 = vmatpush1.bf16.msra.mxu0 %v8179_v62 }
  0x9f   :  { %5057 = vmatprep.subr.bf16.mxu0 %v8183_v63  ;;  %4863 = vmatpush1.bf16.msra.mxu1 %v8179_v62 }
  0xa0   :  { %4865 = vmatprep.subr.bf16.mxu1 %v8183_v63 }
  0xa2   :  { %5059 = vmatpush1.bf16.msra.mxu0 %v8199_v5 }
  0xa3   :  { %5061 = vmatprep.subr.bf16.mxu0 %v8203_v6  ;;  %4867 = vmatpush1.bf16.msra.mxu1 %v8199_v5 }
  0xa4   :  { %4869 = vmatprep.subr.bf16.mxu1 %v8203_v6 }
  0xa6   :  { %5063 = vmatpush1.bf16.msra.mxu0 %v8219_v15 }
  0xa7   :  { %5065 = vmatprep.subr.bf16.mxu0 %v8223_v16  ;;  %4871 = vmatpush1.bf16.msra.mxu1 %v8219_v15 }
  0xa8   :  { %4873 = vmatprep.subr.bf16.mxu1 %v8223_v16 }
  0xaa   :  { %5067 = vmatpush1.bf16.msra.mxu0 %v8239_v23 }
  0xab   :  { %5069 = vmatprep.subr.bf16.mxu0 %v8243_v24  ;;  %4875 = vmatpush1.bf16.msra.mxu1 %v8239_v23 }
  0xac   :  { %4877 = vmatprep.subr.bf16.mxu1 %v8243_v24 }
  0xae   :  { %5071 = vmatpush1.bf16.msra.mxu0 %v8259_v33 }
  0xaf   :  { %5073 = vmatprep.subr.bf16.mxu0 %v8263_v34  ;;  %4879 = vmatpush1.bf16.msra.mxu1 %v8259_v33 }
  0xb0   :  { %4881 = vmatprep.subr.bf16.mxu1 %v8263_v34 }
  0xb2   :  { %5075 = vmatpush1.bf16.msra.mxu0 %v8279_v41 }
  0xb3   :  { %5077 = vmatprep.subr.bf16.mxu0 %v8283_v42  ;;  %4883 = vmatpush1.bf16.msra.mxu1 %v8279_v41 }
  0xb4   :  { %4885 = vmatprep.subr.bf16.mxu1 %v8283_v42 }
  0xb6   :  { %5079 = vmatpush1.bf16.msra.mxu0 %v8293_v47 }
  0xb7   :  { %5145 = vmatprep.subr.bf16.mxu0 %v7986_v3  ;;  %4887 = vmatpush1.bf16.msra.mxu1 %v8293_v47 }
  0xb8   :  { %4953 = vmatprep.subr.bf16.mxu1 %v7986_v3 }
  0xb9   :  { %541 = vmatmul.mubr.f32.vlgmr.msra.gmra.mrb[2].mxu0 %v8345_v52 }
  0xba   :  { %5147 = vmatpush1.bf16.msra.mxu0 %v7997_v7  ;;  %698 = vmatprep.mubr.f32.mxu0 %v633_v53 }
  0xbb   :  { %5149 = vmatprep.subr.bf16.mxu0 %v7999_v8  ;;  %304 = vmatmul.mubr.f32.vlgmr.msra.gmra.mrb[2].mxu1 %v8373_v54  ;;  %v1269_v54 = vld [vmem:[#allocation3 + $0x28] sm:$0xff] }
  0xbc   :  { %4955 = vmatpush1.bf16.msra.mxu1 %v7997_v7  ;;  %461 = vmatprep.mubr.f32.mxu1 %v8345_v52 }
  0xbd   :  { %4957 = vmatprep.subr.bf16.mxu1 %v7999_v8 }
  0xbe   :  { %5151 = vmatpush1.bf16.msra.mxu0 %v8016_v13 }
  0xbf   :  { %5153 = vmatprep.subr.bf16.mxu0 %v8020_v14 }
  0xc0   :  { %4959 = vmatpush1.bf16.msra.mxu1 %v8016_v13 }
  0xc1   :  { %4961 = vmatprep.subr.bf16.mxu1 %v8020_v14 }
  0xc2   :  { %5155 = vmatpush1.bf16.msra.mxu0 %v8036_v19 }
  0xc3   :  { %5157 = vmatprep.subr.bf16.mxu0 %v8040_v20 }
  0xc4   :  { %4963 = vmatpush1.bf16.msra.mxu1 %v8036_v19 }
  0xc5   :  { %4965 = vmatprep.subr.bf16.mxu1 %v8040_v20 }
  0xc6   :  { %5159 = vmatpush1.bf16.msra.mxu0 %v8056_v25 }
  0xc7   :  { %5161 = vmatprep.subr.bf16.mxu0 %v8060_v26 }
  0xc8   :  { %4967 = vmatpush1.bf16.msra.mxu1 %v8056_v25 }
  0xc9   :  { %4969 = vmatprep.subr.bf16.mxu1 %v8060_v26 }
  0xca   :  { %5163 = vmatpush1.bf16.msra.mxu0 %v8076_v31 }
  0xcb   :  { %5165 = vmatprep.subr.bf16.mxu0 %v8080_v32 }
  0xcc   :  { %4971 = vmatpush1.bf16.msra.mxu1 %v8076_v31 }
  0xcd   :  { %4973 = vmatprep.subr.bf16.mxu1 %v8080_v32 }
  0xce   :  { %5167 = vmatpush1.bf16.msra.mxu0 %v8096_v37 }
  0xcf   :  { %5169 = vmatprep.subr.bf16.mxu0 %v8100_v38 }
  0xd0   :  { %4975 = vmatpush1.bf16.msra.mxu1 %v8096_v37 }
  0xd1   :  { %4977 = vmatprep.subr.bf16.mxu1 %v8100_v38 }
  0xd2   :  { %5171 = vmatpush1.bf16.msra.mxu0 %v8119_v44 }
  0xd3   :  { %5173 = vmatprep.subr.bf16.mxu0 %v8123_v45 }
  0xd4   :  { %4979 = vmatpush1.bf16.msra.mxu1 %v8119_v44 }
  0xd5   :  { %4981 = vmatprep.subr.bf16.mxu1 %v8123_v45 }
  0xd6   :  { %5175 = vmatpush1.bf16.msra.mxu0 %v8139_v50 }
  0xd7   :  { %5177 = vmatprep.subr.bf16.mxu0 %v8143_v51 }
  0xd8   :  { %4983 = vmatpush1.bf16.msra.mxu1 %v8139_v50 }
  0xd9   :  { %4985 = vmatprep.subr.bf16.mxu1 %v8143_v51 }
  0xda   :  { %5179 = vmatpush1.bf16.msra.mxu0 %v8159_v56 }
  0xdb   :  { %5181 = vmatprep.subr.bf16.mxu0 %v8163_v57 }
  0xdc   :  { %4987 = vmatpush1.bf16.msra.mxu1 %v8159_v56 }
  0xdd   :  { %4989 = vmatprep.subr.bf16.mxu1 %v8163_v57 }
  0xde   :  { %5183 = vmatpush1.bf16.msra.mxu0 %v8179_v62 }
  0xdf   :  { %5185 = vmatprep.subr.bf16.mxu0 %v8183_v63 }
  0xe0   :  { %4991 = vmatpush1.bf16.msra.mxu1 %v8179_v62 }
  0xe1   :  { %4993 = vmatprep.subr.bf16.mxu1 %v8183_v63 }
  0xe2   :  { %5187 = vmatpush1.bf16.msra.mxu0 %v8199_v5 }
  0xe3   :  { %5189 = vmatprep.subr.bf16.mxu0 %v8203_v6 }
  0xe4   :  { %4995 = vmatpush1.bf16.msra.mxu1 %v8199_v5 }
  0xe5   :  { %4997 = vmatprep.subr.bf16.mxu1 %v8203_v6 }
  0xe6   :  { %5191 = vmatpush1.bf16.msra.mxu0 %v8219_v15 }
  0xe7   :  { %5193 = vmatprep.subr.bf16.mxu0 %v8223_v16 }
  0xe8   :  { %4999 = vmatpush1.bf16.msra.mxu1 %v8219_v15 }
  0xe9   :  { %5001 = vmatprep.subr.bf16.mxu1 %v8223_v16 }
  0xea   :  { %5195 = vmatpush1.bf16.msra.mxu0 %v8239_v23 }
  0xeb   :  { %5197 = vmatprep.subr.bf16.mxu0 %v8243_v24 }
  0xec   :  { %5003 = vmatpush1.bf16.msra.mxu1 %v8239_v23 }
  0xed   :  { %5005 = vmatprep.subr.bf16.mxu1 %v8243_v24 }
  0xee   :  { %5199 = vmatpush1.bf16.msra.mxu0 %v8259_v33 }
  0xef   :  { %5201 = vmatprep.subr.bf16.mxu0 %v8263_v34 }
  0xf0   :  { %5007 = vmatpush1.bf16.msra.mxu1 %v8259_v33 }
  0xf1   :  { %5009 = vmatprep.subr.bf16.mxu1 %v8263_v34 }
  0xf2   :  { %5203 = vmatpush1.bf16.msra.mxu0 %v8279_v41 }
  0xf3   :  { %5205 = vmatprep.subr.bf16.mxu0 %v8283_v42 }
  0xf4   :  { %5011 = vmatpush1.bf16.msra.mxu1 %v8279_v41 }
  0xf5   :  { %5013 = vmatprep.subr.bf16.mxu1 %v8283_v42 }
  0xf6   :  { %5207 = vmatpush1.bf16.msra.mxu0 %v8293_v47 }
  0xf7   :  { %5273 = vmatprep.subr.bf16.mxu0 %v7986_v3 }
  0xf8   :  { %5015 = vmatpush1.bf16.msra.mxu1 %v8293_v47 }
  0xf9   :  { %699 = vmatmul.mubr.f32.vlgmr.msra.gmra.mrb[4].mxu0 %v632_v58  ;;  %5081 = vmatprep.subr.bf16.mxu1 %v7986_v3 }
  0xfa   :  { %5275 = vmatpush1.bf16.msra.mxu0 %v7997_v7  ;;  %856 = vmatprep.mubr.f32.mxu0 %v791_v59  ;;  %v1106_v59 = vld [vmem:[%s10397_s0 + $0x60] sm:$0xff] }
  0xfb   :  { %5277 = vmatprep.subr.bf16.mxu0 %v7999_v8  ;;  %462 = vmatmul.mubr.f32.vlgmr.msra.gmra.mrb[4].mxu1 %v395_v36 }
  0xfc   :  { %5083 = vmatpush1.bf16.msra.mxu1 %v7997_v7 }
  0xfd   :  { %5085 = vmatprep.subr.bf16.mxu1 %v7999_v8 }
  0xfe   :  { %5279 = vmatpush1.bf16.msra.mxu0 %v8016_v13 }
  0xff   :  { %5281 = vmatprep.subr.bf16.mxu0 %v8020_v14 }
 0x100   :  { %5087 = vmatpush1.bf16.msra.mxu1 %v8016_v13 }
 0x101   :  { %5089 = vmatprep.subr.bf16.mxu1 %v8020_v14 }
 0x102   :  { %5283 = vmatpush1.bf16.msra.mxu0 %v8036_v19 }
 0x103   :  { %5285 = vmatprep.subr.bf16.mxu0 %v8040_v20 }
 0x104   :  { %5091 = vmatpush1.bf16.msra.mxu1 %v8036_v19 }
 0x105   :  { %5093 = vmatprep.subr.bf16.mxu1 %v8040_v20 }
 0x106   :  { %5287 = vmatpush1.bf16.msra.mxu0 %v8056_v25 }
 0x107   :  { %5289 = vmatprep.subr.bf16.mxu0 %v8060_v26 }
 0x108   :  { %5095 = vmatpush1.bf16.msra.mxu1 %v8056_v25 }
 0x109   :  { %5097 = vmatprep.subr.bf16.mxu1 %v8060_v26 }
 0x10a   :  { %5291 = vmatpush1.bf16.msra.mxu0 %v8076_v31 }
 0x10b   :  { %5293 = vmatprep.subr.bf16.mxu0 %v8080_v32 }
 0x10c   :  { %5099 = vmatpush1.bf16.msra.mxu1 %v8076_v31 }
 0x10d   :  { %5101 = vmatprep.subr.bf16.mxu1 %v8080_v32 }
 0x10e   :  { %5295 = vmatpush1.bf16.msra.mxu0 %v8096_v37 }
 0x10f   :  { %5297 = vmatprep.subr.bf16.mxu0 %v8100_v38 }
 0x110   :  { %5103 = vmatpush1.bf16.msra.mxu1 %v8096_v37 }
 0x111   :  { %5105 = vmatprep.subr.bf16.mxu1 %v8100_v38 }
 0x112   :  { %5299 = vmatpush1.bf16.msra.mxu0 %v8119_v44 }
 0x113   :  { %5301 = vmatprep.subr.bf16.mxu0 %v8123_v45 }
 0x114   :  { %5107 = vmatpush1.bf16.msra.mxu1 %v8119_v44 }
 0x115   :  { %5109 = vmatprep.subr.bf16.mxu1 %v8123_v45 }
 0x116   :  { %5303 = vmatpush1.bf16.msra.mxu0 %v8139_v50 }
 0x117   :  { %5305 = vmatprep.subr.bf16.mxu0 %v8143_v51 }
 0x118   :  { %5111 = vmatpush1.bf16.msra.mxu1 %v8139_v50 }
 0x119   :  { %5113 = vmatprep.subr.bf16.mxu1 %v8143_v51 }
 0x11a   :  { %5307 = vmatpush1.bf16.msra.mxu0 %v8159_v56 }
 0x11b   :  { %5309 = vmatprep.subr.bf16.mxu0 %v8163_v57 }
 0x11c   :  { %5115 = vmatpush1.bf16.msra.mxu1 %v8159_v56 }
 0x11d   :  { %5117 = vmatprep.subr.bf16.mxu1 %v8163_v57 }
 0x11e   :  { %5311 = vmatpush1.bf16.msra.mxu0 %v8179_v62 }
 0x11f   :  { %5313 = vmatprep.subr.bf16.mxu0 %v8183_v63 }
 0x120   :  { %5119 = vmatpush1.bf16.msra.mxu1 %v8179_v62 }
 0x121   :  { %5121 = vmatprep.subr.bf16.mxu1 %v8183_v63 }
 0x122   :  { %5315 = vmatpush1.bf16.msra.mxu0 %v8199_v5 }
 0x123   :  { %5317 = vmatprep.subr.bf16.mxu0 %v8203_v6 }
 0x124   :  { %5123 = vmatpush1.bf16.msra.mxu1 %v8199_v5 }
 0x125   :  { %5125 = vmatprep.subr.bf16.mxu1 %v8203_v6 }
 0x126   :  { %5319 = vmatpush1.bf16.msra.mxu0 %v8219_v15 }
 0x127   :  { %5321 = vmatprep.subr.bf16.mxu0 %v8223_v16 }
 0x128   :  { %5127 = vmatpush1.bf16.msra.mxu1 %v8219_v15 }
 0x129   :  { %5129 = vmatprep.subr.bf16.mxu1 %v8223_v16 }
 0x12a   :  { %5323 = vmatpush1.bf16.msra.mxu0 %v8239_v23 }
 0x12b   :  { %5325 = vmatprep.subr.bf16.mxu0 %v8243_v24 }
 0x12c   :  { %5131 = vmatpush1.bf16.msra.mxu1 %v8239_v23 }
 0x12d   :  { %5133 = vmatprep.subr.bf16.mxu1 %v8243_v24 }
 0x12e   :  { %5327 = vmatpush1.bf16.msra.mxu0 %v8259_v33 }
 0x12f   :  { %5329 = vmatprep.subr.bf16.mxu0 %v8263_v34 }
 0x130   :  { %5135 = vmatpush1.bf16.msra.mxu1 %v8259_v33 }
 0x131   :  { %5137 = vmatprep.subr.bf16.mxu1 %v8263_v34 }
 0x132   :  { %5331 = vmatpush1.bf16.msra.mxu0 %v8279_v41 }
 0x133   :  { %5333 = vmatprep.subr.bf16.mxu0 %v8283_v42 }
 0x134   :  { %5139 = vmatpush1.bf16.msra.mxu1 %v8279_v41 }
 0x135   :  { %5141 = vmatprep.subr.bf16.mxu1 %v8283_v42 }
 0x136   :  { %5335 = vmatpush1.bf16.msra.mxu0 %v8293_v47 }
 0x137   :  { %5401 = vmatprep.subr.bf16.mxu0 %v7986_v3 }
 0x138   :  { %5143 = vmatpush1.bf16.msra.mxu1 %v8293_v47 }
 0x139   :  { %857 = vmatmul.mubr.f32.vlgmr.msra.gmra.mrb[6].mxu0 %v790_v60  ;;  %v8634_v60 = vpack.c.bf16 %v1266_v49, %v1264_v48  ;;  %v1283_v48 = vld [vmem:[#allocation3 + $0x98] sm:$0xff]  ;;  %v8663_v49 = vpack.c.bf16 %v1278_v40, %v1276_v39  ;;  %v1288_v40 = vld [vmem:[#allocation3 + $0xc0] sm:$0xff]  ;;  %5209 = vmatprep.subr.bf16.mxu1 %v7986_v3 }
 0x13a   :  { %5403 = vmatpush1.bf16.msra.mxu0 %v7997_v7  ;;  %1014 = vmatprep.mubr.f32.mxu0 %v949_v61  ;;  %v8641_v61 = vpack.c.bf16 %v1271_v55, %v1269_v54  ;;  %v1280_v54 = vld [vmem:[#allocation3 + $0x80] sm:$0xff]  ;;  %v1282_v55 = vld [vmem:[#allocation3 + $0x90] sm:$0xff] }
 0x13b   :  { %5405 = vmatprep.subr.bf16.mxu0 %v7999_v8  ;;  %10762 = vst [vmem:[#allocation14_spill] sm:$0xff] %v8663_v49 }
 0x13e   :  { %5407 = vmatpush1.bf16.msra.mxu0 %v8016_v13 }
 0x13f   :  { %5409 = vmatprep.subr.bf16.mxu0 %v8020_v14 }
 0x142   :  { %5411 = vmatpush1.bf16.msra.mxu0 %v8036_v19 }
 0x143   :  { %5413 = vmatprep.subr.bf16.mxu0 %v8040_v20 }
 0x146   :  { %5415 = vmatpush1.bf16.msra.mxu0 %v8056_v25 }
 0x147   :  { %5417 = vmatprep.subr.bf16.mxu0 %v8060_v26 }
 0x14a   :  { %5419 = vmatpush1.bf16.msra.mxu0 %v8076_v31 }
 0x14b   :  { %5421 = vmatprep.subr.bf16.mxu0 %v8080_v32 }
 0x14c   :  { %v384_v12 = vpop.f32.mrb[0].mxu0  ;;  %v226_v43 = vpop.f32.mrb[0].mxu1 }
 0x14d   :  { %v385_v17 = vadd.f32 %v384_v12, %v8510_v10  ;;  %v386_v18 = vpop.f32.mrb[1].mxu0  ;;  %v8619_v52 = vadd.f32 %v226_v43, %v8510_v10  ;;  %v228_v53 = vpop.f32.mrb[1].mxu1  ;;  %v1273_v12 = vld [vmem:[#allocation3 + $0x48] sm:$0xff] }
 0x14e   :  { %v387_v21 = vadd.f32 %v386_v18, %v8516_v11  ;;  %5423 = vmatpush1.bf16.msra.mxu0 %v8096_v37  ;;  %v8622_v58 = vadd.f32 %v228_v53, %v8516_v11  ;;  %v8646_v18 = vpack.c.bf16 %v1270_v4, %v1268_v0  ;;  %v1281_v43 = vld [vmem:[#allocation3 + $0x88] sm:$0xff]  ;;  %v1287_v0 = vld [vmem:[#allocation3 + $0xb8] sm:$0xff]  ;;  %v8671_v4 = vpack.c.bf16 %v1282_v55, %v1280_v54 }
 0x14f   :  { %389 = vst [vmem:[%s10406_s9 + $0x20] sm:$0xff] %v385_v17  ;;  %5425 = vmatprep.subr.bf16.mxu0 %v8100_v38  ;;  %231 = vst [vmem:[%s10406_s9] sm:$0xff] %v8619_v52  ;;  %v1275_v17 = vld [vmem:[#allocation3 + $0x58] sm:$0xff]  ;;  %v8666_v53 = vpack.c.bf16 %v1283_v48, %v1281_v43  ;;  %v1290_v43 = vld [vmem:[#allocation3 + $0xd0] sm:$0xff] }
 0x150   :  { %390 = vst [vmem:[%s10406_s9 + $0x28] sm:$0xff] %v387_v21  ;;  %232 = vst [vmem:[%s10406_s9 + $0x8] sm:$0xff] %v8622_v58  ;;  %v10413_v21 = vmov 0.0   ;;  %v1293_v54 = vld [vmem:[#allocation3 + $0xe8] sm:$0xff]  ;;  %v1295_v55 = vld [vmem:[#allocation3 + $0xf8] sm:$0xff] }
 0x152   :  { %5427 = vmatpush1.bf16.msra.mxu0 %v8119_v44 }
 0x153   :  { %5429 = vmatprep.subr.bf16.mxu0 %v8123_v45 }
 0x156   :  { %5431 = vmatpush1.bf16.msra.mxu0 %v8139_v50 }
 0x157   :  { %5433 = vmatprep.subr.bf16.mxu0 %v8143_v51 }
 0x15a   :  { %5435 = vmatpush1.bf16.msra.mxu0 %v8159_v56 }
 0x15b   :  { %5437 = vmatprep.subr.bf16.mxu0 %v8163_v57 }
 0x15e   :  { %5439 = vmatpush1.bf16.msra.mxu0 %v8179_v62 }
 0x15f   :  { %5441 = vmatprep.subr.bf16.mxu0 %v8183_v63 }
 0x162   :  { %5443 = vmatpush1.bf16.msra.mxu0 %v8199_v5 }
 0x163   :  { %5445 = vmatprep.subr.bf16.mxu0 %v8203_v6 }
 0x166   :  { %5447 = vmatpush1.bf16.msra.mxu0 %v8219_v15 }
 0x167   :  { %5449 = vmatprep.subr.bf16.mxu0 %v8223_v16 }
 0x16a   :  { %5451 = vmatpush1.bf16.msra.mxu0 %v8239_v23 }
 0x16b   :  { %5453 = vmatprep.subr.bf16.mxu0 %v8243_v24 }
 0x16e   :  { %5455 = vmatpush1.bf16.msra.mxu0 %v8259_v33 }
 0x16f   :  { %5457 = vmatprep.subr.bf16.mxu0 %v8263_v34 }
 0x172   :  { %5459 = vmatpush1.bf16.msra.mxu0 %v8279_v41 }
 0x173   :  { %5461 = vmatprep.subr.bf16.mxu0 %v8283_v42 }
 0x176   :  { %5463 = vmatpush1.bf16.msra.mxu0 %v8293_v47 }
 0x177   :  { %5529 = vmatprep.subr.bf16.mxu0 %v7986_v3 }
 0x179   :  { %1015 = vmatmul.mubr.f32.vlgmr.msra.gmra.mrb[8].mxu0 %v948_v22  ;;  %v8650_v22 = vpack.c.bf16 %v1275_v17, %v1273_v12  ;;  %v1284_v17 = vld [vmem:[#allocation3 + $0xa0] sm:$0xff] }
 0x17a   :  { %5531 = vmatpush1.bf16.msra.mxu0 %v7997_v7  ;;  %1172 = vmatprep.mubr.f32.mxu0 %v1107_v27  ;;  %v1272_v27 = vld [vmem:[#allocation3 + $0x40] sm:$0xff] }
 0x17b   :  { %5533 = vmatprep.subr.bf16.mxu0 %v7999_v8  ;;  %10760 = vst [vmem:[#allocation12_spill] sm:$0xff] %v8650_v22 }
 0x17e   :  { %5535 = vmatpush1.bf16.msra.mxu0 %v8016_v13 }
 0x17f   :  { %5537 = vmatprep.subr.bf16.mxu0 %v8020_v14 }
 0x182   :  { %5539 = vmatpush1.bf16.msra.mxu0 %v8036_v19 }
 0x183   :  { %5541 = vmatprep.subr.bf16.mxu0 %v8040_v20 }
 0x186   :  { %5543 = vmatpush1.bf16.msra.mxu0 %v8056_v25 }
 0x187   :  { %5545 = vmatprep.subr.bf16.mxu0 %v8060_v26 }
 0x18a   :  { %5547 = vmatpush1.bf16.msra.mxu0 %v8076_v31 }
 0x18b   :  { %5549 = vmatprep.subr.bf16.mxu0 %v8080_v32 }
 0x18c   :  { %v542_v28 = vpop.f32.mrb[2].mxu0 }
 0x18d   :  { %v543_v29 = vadd.f32 %v542_v28, %v8510_v10  ;;  %v544_v30 = vpop.f32.mrb[3].mxu0  ;;  %v1274_v28 = vld [vmem:[#allocation3 + $0x50] sm:$0xff] }
 0x18e   :  { %v545_v35 = vadd.f32 %v544_v30, %v8516_v11  ;;  %5551 = vmatpush1.bf16.msra.mxu0 %v8096_v37  ;;  %v1279_v30 = vld [vmem:[#allocation3 + $0x78] sm:$0xff] }
 0x18f   :  { %547 = vst [vmem:[%s10406_s9 + $0x40] sm:$0xff] %v543_v29  ;;  %5553 = vmatprep.subr.bf16.mxu0 %v8100_v38  ;;  %v1277_v29 = vld [vmem:[#allocation3 + $0x68] sm:$0xff] }
 0x190   :  { %548 = vst [vmem:[%s10406_s9 + $0x48] sm:$0xff] %v545_v35  ;;  %v8655_v35 = vpack.c.bf16 %v1274_v28, %v1272_v27  ;;  %v8658_v36 = vpack.c.bf16 %v1279_v30, %v1277_v29  ;;  %v1286_v27 = vld [vmem:[#allocation3 + $0xb0] sm:$0xff]  ;;  %v1289_v28 = vld [vmem:[#allocation3 + $0xc8] sm:$0xff]  ;;  %v1291_v29 = vld [vmem:[#allocation3 + $0xd8] sm:$0xff] }
 0x191   :  { %v8679_v30 = vpack.c.bf16 %v1286_v27, %v1284_v17  ;;  %v8682_v39 = vpack.c.bf16 %v1291_v29, %v1289_v28  ;;  %v8689_v17 = vpack.c.bf16 %v1290_v43, %v1288_v40  ;;  %v8695_v27 = vpack.c.bf16 %v1295_v55, %v1293_v54  ;;  %v1292_v28 = vld [vmem:[#allocation3 + $0xe0] sm:$0xff]  ;;  %v1294_v29 = vld [vmem:[#allocation3 + $0xf0] sm:$0xff] }
 0x192   :  { %5555 = vmatpush1.bf16.msra.mxu0 %v8119_v44  ;;  %10761 = vst [vmem:[#allocation13_spill] sm:$0xff] %v8655_v35  ;;  %v8703_v40 = vpack.c.bf16 %v1294_v29, %v1292_v28  ;;  %v1296_v54 = vld [vmem:[#allocation3 + $0x100] sm:$0xff]  ;;  %v1298_v55 = vld [vmem:[#allocation3 + $0x110] sm:$0xff] }
 0x193   :  { %5557 = vmatprep.subr.bf16.mxu0 %v8123_v45  ;;  %10763 = vst [vmem:[#allocation15_spill] sm:$0xff] %v8682_v39  ;;  %10764 = vst [vmem:[#allocation16_spill] sm:$0xff] %v8689_v17  ;;  %v1300_v29 = vld [vmem:[#allocation3 + $0x120] sm:$0xff] }
 0x194   :  { %10765 = vst [vmem:[#allocation17_spill] sm:$0xff] %v8695_v27  ;;  %10766 = vst [vmem:[#allocation18_spill] sm:$0xff] %v8703_v40 }
 0x196   :  { %5559 = vmatpush1.bf16.msra.mxu0 %v8139_v50 }
 0x197   :  { %5561 = vmatprep.subr.bf16.mxu0 %v8143_v51 }
 0x19a   :  { %5563 = vmatpush1.bf16.msra.mxu0 %v8159_v56 }
 0x19b   :  { %5565 = vmatprep.subr.bf16.mxu0 %v8163_v57 }
 0x19e   :  { %5567 = vmatpush1.bf16.msra.mxu0 %v8179_v62 }
 0x19f   :  { %5569 = vmatprep.subr.bf16.mxu0 %v8183_v63 }
 0x1a2   :  { %5571 = vmatpush1.bf16.msra.mxu0 %v8199_v5 }
 0x1a3   :  { %5573 = vmatprep.subr.bf16.mxu0 %v8203_v6 }
 0x1a6   :  { %5575 = vmatpush1.bf16.msra.mxu0 %v8219_v15 }
 0x1a7   :  { %5577 = vmatprep.subr.bf16.mxu0 %v8223_v16 }
 0x1aa   :  { %5579 = vmatpush1.bf16.msra.mxu0 %v8239_v23 }
 0x1ab   :  { %5581 = vmatprep.subr.bf16.mxu0 %v8243_v24 }
 0x1ae   :  { %5583 = vmatpush1.bf16.msra.mxu0 %v8259_v33 }
 0x1af   :  { %5585 = vmatprep.subr.bf16.mxu0 %v8263_v34 }
 0x1b2   :  { %5587 = vmatpush1.bf16.msra.mxu0 %v8279_v41 }
 0x1b3   :  { %5589 = vmatprep.subr.bf16.mxu0 %v8283_v42 }
 0x1b6   :  { %5591 = vmatpush1.bf16.msra.mxu0 %v8293_v47 }
 0x1b7   :  { %5657 = vmatprep.subr.bf16.mxu0 %v8616_v46 }
 0x1b9   :  { %1173 = vmatmul.mubr.f32.vlgmr.msra.gmra.mrb[10].mxu0 %v1106_v59  ;;  %v1285_v59 = vld [vmem:[#allocation3 + $0xa8] sm:$0xff] }
 0x1ba   :  { %5659 = vmatpush1.bf16.msra.mxu0 %v8634_v60  ;;  %1611 = vmatprep.mubr.f32.mxu0 %v10413_v21  ;;  %v8674_v12 = vpack.c.bf16 %v1287_v0, %v1285_v59  ;;  %v1302_v21 = vld [vmem:[#allocation3 + $0x130] sm:$0xff] }
 0x1bb   :  { %5661 = vmatprep.subr.bf16.mxu0 %v8641_v61  ;;  %v8719_v1 = vpack.c.bf16 %v1302_v21, %v1300_v29  ;;  %v1308_v29 = vld [vmem:[#allocation3 + $0x160] sm:$0xff] }
 0x1bd   :  { %10770 = vst [vmem:[#allocation22_spill] sm:$0xff] %v8719_v1 }
 0x1be   :  { %5663 = vmatpush1.bf16.msra.mxu0 %v8646_v18 }
 0x1bf   :  { %5665 = vmatprep.subr.bf16.mxu0 %v8650_v22 }
 0x1c2   :  { %5667 = vmatpush1.bf16.msra.mxu0 %v8655_v35 }
 0x1c3   :  { %5669 = vmatprep.subr.bf16.mxu0 %v8658_v36 }
 0x1c6   :  { %5671 = vmatpush1.bf16.msra.mxu0 %v8663_v49 }
 0x1c7   :  { %5673 = vmatprep.subr.bf16.mxu0 %v8666_v53 }
 0x1ca   :  { %5675 = vmatpush1.bf16.msra.mxu0 %v8671_v4 }
 0x1cb   :  { %5677 = vmatprep.subr.bf16.mxu0 %v8674_v12 }
 0x1cc   :  { %v700_v48 = vpop.f32.mrb[4].mxu0 }
 0x1cd   :  { %v701_v59 = vadd.f32 %v700_v48, %v8510_v10  ;;  %v702_v0 = vpop.f32.mrb[5].mxu0  ;;  %v1297_v48 = vld [vmem:[#allocation3 + $0x108] sm:$0xff] }
 0x1ce   :  { %v703_v9 = vadd.f32 %v702_v0, %v8516_v11  ;;  %5679 = vmatpush1.bf16.msra.mxu0 %v8679_v30  ;;  %v1299_v0 = vld [vmem:[#allocation3 + $0x118] sm:$0xff] }
 0x1cf   :  { %705 = vst [vmem:[%s10406_s9 + $0x60] sm:$0xff] %v701_v59  ;;  %5681 = vmatprep.subr.bf16.mxu0 %v8682_v39  ;;  %v8706_v43 = vpack.c.bf16 %v1299_v0, %v1297_v48  ;;  %v1301_v59 = vld [vmem:[#allocation3 + $0x128] sm:$0xff]  ;;  %v1307_v0 = vld [vmem:[#allocation3 + $0x158] sm:$0xff] }
 0x1d0   :  { %706 = vst [vmem:[%s10406_s9 + $0x68] sm:$0xff] %v703_v9  ;;  %v8711_v9 = vpack.c.bf16 %v1298_v55, %v1296_v54  ;;  %v8714_v28 = vpack.c.bf16 %v1303_v2, %v1301_v59  ;;  %v1305_v48 = vld [vmem:[#allocation3 + $0x148] sm:$0xff]  ;;  %v1304_v55 = vld [vmem:[#allocation3 + $0x140] sm:$0xff]  ;;  %v1311_v59 = vld [vmem:[#allocation3 + $0x178] sm:$0xff] }
 0x1d1   :  { %10767 = vst [vmem:[#allocation19_spill] sm:$0xff] %v8706_v43  ;;  %v8722_v54 = vpack.c.bf16 %v1307_v0, %v1305_v48  ;;  %v1309_v2 = vld [vmem:[#allocation3 + $0x168] sm:$0xff]  ;;  %v1315_v0 = vld [vmem:[#allocation3 + $0x198] sm:$0xff] }
 0x1d2   :  { %5683 = vmatpush1.bf16.msra.mxu0 %v8689_v17  ;;  %10768 = vst [vmem:[#allocation20_spill] sm:$0xff] %v8711_v9  ;;  %10769 = vst [vmem:[#allocation21_spill] sm:$0xff] %v8714_v28  ;;  %v8730_v21 = vpack.c.bf16 %v1311_v59, %v1309_v2  ;;  %v1313_v48 = vld [vmem:[#allocation3 + $0x188] sm:$0xff]  ;;  %v1312_v17 = vld [vmem:[#allocation3 + $0x180] sm:$0xff] }
 0x1d3   :  { %5685 = vmatprep.subr.bf16.mxu0 %v8695_v27  ;;  %10771 = vst [vmem:[#allocation23_spill] sm:$0xff] %v8722_v54  ;;  %v8736_v27 = vpack.c.bf16 %v1315_v0, %v1313_v48 }
 0x1d4   :  { %10773 = vst [vmem:[#allocation25_spill] sm:$0xff] %v8730_v21 }
 0x1d5   :  { %10775 = vst [vmem:[#allocation27_spill] sm:$0xff] %v8736_v27 }
 0x1d6   :  { %5687 = vmatpush1.bf16.msra.mxu0 %v8703_v40 }
 0x1d7   :  { %5689 = vmatprep.subr.bf16.mxu0 %v8706_v43  ;;  %v1306_v43 = vld [vmem:[#allocation3 + $0x150] sm:$0xff] }
 0x1d8   :  { %v8727_v40 = vpack.c.bf16 %v1306_v43, %v1304_v55  ;;  %v1317_v43 = vld [vmem:[#allocation3 + $0x1a8] sm:$0xff]  ;;  %v1319_v55 = vld [vmem:[#allocation3 + $0x1b8] sm:$0xff] }
 0x1d9   :  { %v8742_v59 = vpack.c.bf16 %v1319_v55, %v1317_v43  ;;  %v554_v55 = vld [vmem:[%s10397_s0 + $0x30] sm:$0xff] }
 0x1da   :  { %5691 = vmatpush1.bf16.msra.mxu0 %v8711_v9  ;;  %10772 = vst [vmem:[#allocation24_spill] sm:$0xff] %v8727_v40  ;;  %619 = vmatprep.mubr.f32.mxu1 %v554_v55  ;;  %v1330_v55 = vld [vmem:[#allocation3 + $0x210] sm:$0xff] }
 0x1db   :  { %5693 = vmatprep.subr.bf16.mxu0 %v8714_v28  ;;  %v1310_v28 = vld [vmem:[#allocation3 + $0x170] sm:$0xff]  ;;  %10777 = vst [vmem:[#allocation29_spill] sm:$0xff] %v8742_v59 }
 0x1dc   :  { %v8733_v9 = vpack.c.bf16 %v1310_v28, %v1308_v29  ;;  %v1321_v28 = vld [vmem:[#allocation3 + $0x1c8] sm:$0xff]  ;;  %v1323_v29 = vld [vmem:[#allocation3 + $0x1d8] sm:$0xff] }
 0x1dd   :  { %v8748_v0 = vpack.c.bf16 %v1323_v29, %v1321_v28  ;;  %v553_v28 = vld [vmem:[%s10397_s0 + $0x28] sm:$0xff] }
 0x1de   :  { %5695 = vmatpush1.bf16.msra.mxu0 %v8719_v1  ;;  %10774 = vst [vmem:[#allocation26_spill] sm:$0xff] %v8733_v9  ;;  %v1314_v1 = vld [vmem:[#allocation3 + $0x190] sm:$0xff]  ;;  %v1329_v29 = vld [vmem:[#allocation3 + $0x208] sm:$0xff]  ;;  %620 = vmatmul.mubr.f32.vlgmr.msra.gmra.mrb[6].mxu1 %v553_v28 }
 0x1df   :  { %5697 = vmatprep.subr.bf16.mxu0 %v8722_v54  ;;  %v8739_v2 = vpack.c.bf16 %v1314_v1, %v1312_v17  ;;  %v1316_v54 = vld [vmem:[#allocation3 + $0x1a0] sm:$0xff]  ;;  %10779 = vst [vmem:[#allocation31_spill] sm:$0xff] %v8748_v0  ;;  %v1325_v1 = vld [vmem:[#allocation3 + $0x1e8] sm:$0xff]  ;;  %v1327_v17 = vld [vmem:[#allocation3 + $0x1f8] sm:$0xff]  ;;  %5211 = vmatpush1.bf16.msra.mxu1 %v7997_v7 }
 0x1e0   :  { %5213 = vmatprep.subr.bf16.mxu1 %v7999_v8  ;;  %v1333_v28 = vld [vmem:[#allocation3 + $0x228] sm:$0xff] }
 0x1e1   :  { %10776 = vst [vmem:[#allocation28_spill] sm:$0xff] %v8739_v2 }
 0x1e2   :  { %5699 = vmatpush1.bf16.msra.mxu0 %v8727_v40  ;;  %v1318_v40 = vld [vmem:[#allocation3 + $0x1b0] sm:$0xff] }
 0x1e3   :  { %5701 = vmatprep.subr.bf16.mxu0 %v8730_v21  ;;  %v8745_v48 = vpack.c.bf16 %v1318_v40, %v1316_v54  ;;  %v1320_v21 = vld [vmem:[#allocation3 + $0x1c0] sm:$0xff]  ;;  %v8757_v40 = vpack.c.bf16 %v1327_v17, %v1325_v1  ;;  %5215 = vmatpush1.bf16.msra.mxu1 %v8016_v13 }
 0x1e4   :  { %v1324_v54 = vld [vmem:[#allocation3 + $0x1e0] sm:$0xff]  ;;  %5217 = vmatprep.subr.bf16.mxu1 %v8020_v14 }
 0x1e5   :  { %10778 = vst [vmem:[#allocation30_spill] sm:$0xff] %v8745_v48  ;;  %10781 = vst [vmem:[#allocation33_spill] sm:$0xff] %v8757_v40  ;;  %v1328_v17 = vld [vmem:[#allocation3 + $0x200] sm:$0xff] }
 0x1e6   :  { %5703 = vmatpush1.bf16.msra.mxu0 %v8733_v9  ;;  %v1322_v9 = vld [vmem:[#allocation3 + $0x1d0] sm:$0xff] }
 0x1e7   :  { %5705 = vmatprep.subr.bf16.mxu0 %v8736_v27  ;;  %v8751_v43 = vpack.c.bf16 %v1322_v9, %v1320_v21  ;;  %v305_v21 = vpop.f32.mrb[2].mxu1  ;;  %v1335_v27 = vld [vmem:[#allocation3 + $0x238] sm:$0xff]  ;;  %5219 = vmatpush1.bf16.msra.mxu1 %v8036_v19 }
 0x1e8   :  { %5221 = vmatprep.subr.bf16.mxu1 %v8040_v20 }
 0x1e9   :  { %10780 = vst [vmem:[#allocation32_spill] sm:$0xff] %v8751_v43 }
 0x1ea   :  { %5707 = vmatpush1.bf16.msra.mxu0 %v8739_v2  ;;  %v1331_v2 = vld [vmem:[#allocation3 + $0x218] sm:$0xff] }
 0x1eb   :  { %5709 = vmatprep.subr.bf16.mxu0 %v8742_v59  ;;  %v1326_v59 = vld [vmem:[#allocation3 + $0x1f0] sm:$0xff]  ;;  %v8768_v1 = vpack.c.bf16 %v1331_v2, %v1329_v29  ;;  %v8782_v2 = vpack.c.bf16 %v1330_v55, %v1328_v17  ;;  %v1336_v55 = vld [vmem:[#allocation3 + $0x240] sm:$0xff]  ;;  %5223 = vmatpush1.bf16.msra.mxu1 %v8056_v25 }
 0x1ec   :  { %v8764_v9 = vpack.c.bf16 %v1326_v59, %v1324_v54  ;;  %v234_v59 = vmax.f32 %v8622_v58, 0.0  ;;  %v1332_v54 = vld [vmem:[#allocation3 + $0x220] sm:$0xff]  ;;  %v1334_v29 = vld [vmem:[#allocation3 + $0x230] sm:$0xff]  ;;  %5225 = vmatprep.subr.bf16.mxu1 %v8060_v26 }
 0x1ed   :  { %10783 = vst [vmem:[#allocation35_spill] sm:$0xff] %v8768_v1  ;;  %10786 = vst [vmem:[#allocation38_spill] sm:$0xff] %v8782_v2  ;;  %v8796_v58 = vpack.c.bf16 %v1334_v29, %v1332_v54  ;;  %v1342_v54 = vld [vmem:[#allocation3 + $0x270] sm:$0xff]  ;;  %v1345_v29 = vld [vmem:[#allocation3 + $0x288] sm:$0xff] }
 0x1ee   :  { %5711 = vmatpush1.bf16.msra.mxu0 %v8745_v48  ;;  %10782 = vst [vmem:[#allocation34_spill] sm:$0xff] %v8764_v9  ;;  %v307_v48 = vpop.f32.mrb[3].mxu1 }
 0x1ef   :  { %5713 = vmatprep.subr.bf16.mxu0 %v8748_v0  ;;  %v8771_v0 = vadd.f32 %v305_v21, %v8510_v10  ;;  %v8774_v39 = vadd.f32 %v307_v48, %v8516_v11  ;;  %v8791_v48 = vpack.c.bf16 %v1335_v27, %v1333_v28  ;;  %v1337_v21 = vld [vmem:[#allocation3 + $0x248] sm:$0xff]  ;;  %10789 = vst [vmem:[#allocation40_spill] sm:$0xff] %v8796_v58  ;;  %v1338_v27 = vld [vmem:[#allocation3 + $0x250] sm:$0xff] }
 0x1f0   :  { %v1341_v28 = vld [vmem:[#allocation3 + $0x268] sm:$0xff]  ;;  %5227 = vmatpush1.bf16.msra.mxu1 %v8076_v31 }
 0x1f1   :  { %10784 = vst [vmem:[#allocation36_spill] sm:$0xff] %v8771_v0  ;;  %10785 = vst [vmem:[#allocation37_spill] sm:$0xff] %v8774_v39  ;;  %5229 = vmatprep.subr.bf16.mxu1 %v8080_v32 }
 0x1f2   :  { %5715 = vmatpush1.bf16.msra.mxu0 %v8751_v43  ;;  %310 = vst [vmem:[%s10406_s9 + $0x10] sm:$0xff] %v8771_v0  ;;  %311 = vst [vmem:[%s10406_s9 + $0x18] sm:$0xff] %v8774_v39 }
 0x1f3   :  { %5717 = vmatprep.subr.bf16.mxu0 %v8757_v40  ;;  %10787 = vst [vmem:[#allocation39_spill] sm:$0xff] %v8791_v48  ;;  %v1339_v40 = vld [vmem:[#allocation3 + $0x258] sm:$0xff] }
 0x1f4   :  { %v8799_v17 = vpack.c.bf16 %v1339_v40, %v1337_v21  ;;  %v1340_v40 = vld [vmem:[#allocation3 + $0x260] sm:$0xff]  ;;  %v1347_v21 = vld [vmem:[#allocation3 + $0x298] sm:$0xff]  ;;  %5231 = vmatpush1.bf16.msra.mxu1 %v8096_v37 }
 0x1f5   :  { %5233 = vmatprep.subr.bf16.mxu1 %v8100_v38 }
 0x1f6   :  { %5719 = vmatpush1.bf16.msra.mxu0 %v8764_v9  ;;  %v10788_v9 = vmov 0.0   ;;  %10790 = vst [vmem:[#allocation41_spill] sm:$0xff] %v8799_v17 }
 0x1f7   :  { %5721 = vmatprep.subr.bf16.mxu0 %v8768_v1  ;;  %v1343_v1 = vld [vmem:[#allocation3 + $0x278] sm:$0xff] }
 0x1f8   :  { %5235 = vmatpush1.bf16.msra.mxu1 %v8119_v44 }
 0x1f9   :  { %1612 = vmatmul.mubr.f32.vlgmr.msra.gmra.mrb[12].mxu0 %v10788_v9  ;;  %v8804_v9 = vpack.c.bf16 %v1338_v27, %v1336_v55  ;;  %v8816_v55 = vpack.c.bf16 %v1347_v21, %v1345_v29  ;;  %v1344_v27 = vld [vmem:[#allocation3 + $0x280] sm:$0xff]  ;;  %v1353_v29 = vld [vmem:[#allocation3 + $0x2c8] sm:$0xff]  ;;  %v1355_v21 = vld [vmem:[#allocation3 + $0x2d8] sm:$0xff]  ;;  %5237 = vmatprep.subr.bf16.mxu1 %v8123_v45 }
 0x1fa   :  { %5723 = vmatpush1.bf16.msra.mxu0 %v8782_v2  ;;  %1682 = vmatprep.mubr.f32.mxu0 %v234_v59  ;;  %v8808_v59 = vpack.c.bf16 %v1343_v1, %v1341_v28  ;;  %v1349_v1 = vld [vmem:[#allocation3 + $0x2a8] sm:$0xff]  ;;  %v1351_v28 = vld [vmem:[#allocation3 + $0x2b8] sm:$0xff] }
 0x1fb   :  { %5725 = vmatprep.subr.bf16.mxu0 %v8791_v48  ;;  %10791 = vst [vmem:[#allocation42_spill] sm:$0xff] %v8804_v9  ;;  %v8812_v48 = vpack.c.bf16 %v1342_v54, %v1340_v40  ;;  %10794 = vst [vmem:[#allocation45_spill] sm:$0xff] %v8816_v55  ;;  %v8824_v40 = vpack.c.bf16 %v1351_v28, %v1349_v1  ;;  %v1348_v54 = vld [vmem:[#allocation3 + $0x2a0] sm:$0xff]  ;;  %v1357_v28 = vld [vmem:[#allocation3 + $0x2e8] sm:$0xff] }
 0x1fc   :  { %10792 = vst [vmem:[#allocation43_spill] sm:$0xff] %v8808_v59  ;;  %5239 = vmatpush1.bf16.msra.mxu1 %v8139_v50 }
 0x1fd   :  { %10793 = vst [vmem:[#allocation44_spill] sm:$0xff] %v8812_v48  ;;  %10796 = vst [vmem:[#allocation47_spill] sm:$0xff] %v8824_v40  ;;  %5241 = vmatprep.subr.bf16.mxu1 %v8143_v51 }
 0x1fe   :  { %5727 = vmatpush1.bf16.msra.mxu0 %v8796_v58 }
 0x1ff   :  { %5729 = vmatprep.subr.bf16.mxu0 %v8799_v17  ;;  %v1346_v17 = vld [vmem:[#allocation3 + $0x290] sm:$0xff] }
 0x200   :  { %v8820_v58 = vpack.c.bf16 %v1346_v17, %v1344_v27  ;;  %v8832_v17 = vpack.c.bf16 %v1355_v21, %v1353_v29  ;;  %v1352_v27 = vld [vmem:[#allocation3 + $0x2c0] sm:$0xff]  ;;  %v1358_v21 = vld [vmem:[#allocation3 + $0x2f0] sm:$0xff]  ;;  %5243 = vmatpush1.bf16.msra.mxu1 %v8159_v56 }
 0x201   :  { %v1356_v29 = vld [vmem:[#allocation3 + $0x2e0] sm:$0xff]  ;;  %5245 = vmatprep.subr.bf16.mxu1 %v8163_v57 }
 0x202   :  { %5731 = vmatpush1.bf16.msra.mxu0 %v8804_v9  ;;  %10795 = vst [vmem:[#allocation46_spill] sm:$0xff] %v8820_v58  ;;  %10798 = vst [vmem:[#allocation49_spill] sm:$0xff] %v8832_v17 }
 0x203   :  { %5733 = vmatprep.subr.bf16.mxu0 %v8808_v59  ;;  %v1350_v59 = vld [vmem:[#allocation3 + $0x2b0] sm:$0xff] }
 0x204   :  { %v8828_v9 = vpack.c.bf16 %v1350_v59, %v1348_v54  ;;  %5247 = vmatpush1.bf16.msra.mxu1 %v8179_v62 }
 0x205   :  { %5249 = vmatprep.subr.bf16.mxu1 %v8183_v63 }
 0x206   :  { %5735 = vmatpush1.bf16.msra.mxu0 %v8812_v48  ;;  %10797 = vst [vmem:[#allocation48_spill] sm:$0xff] %v8828_v9  ;;  %v1359_v48 = vld [vmem:[#allocation3 + $0x2f8] sm:$0xff] }
 0x207   :  { %5737 = vmatprep.subr.bf16.mxu0 %v8816_v55  ;;  %v1354_v55 = vld [vmem:[#allocation3 + $0x2d0] sm:$0xff]  ;;  %v8845_v54 = vpack.c.bf16 %v1359_v48, %v1357_v28  ;;  %v1360_v48 = vld [vmem:[#allocation3 + $0x300] sm:$0xff]  ;;  %v1365_v28 = vld [vmem:[#allocation3 + $0x328] sm:$0xff] }
 0x208   :  { %v8838_v59 = vpack.c.bf16 %v1354_v55, %v1352_v27  ;;  %v8852_v55 = vpack.c.bf16 %v1358_v21, %v1356_v29  ;;  %v1362_v27 = vld [vmem:[#allocation3 + $0x310] sm:$0xff]  ;;  %v1364_v21 = vld [vmem:[#allocation3 + $0x320] sm:$0xff]  ;;  %5251 = vmatpush1.bf16.msra.mxu1 %v8199_v5 }
 0x209   :  { %10800 = vst [vmem:[#allocation51_spill] sm:$0xff] %v8845_v54  ;;  %5253 = vmatprep.subr.bf16.mxu1 %v8203_v6 }
 0x20a   :  { %5739 = vmatpush1.bf16.msra.mxu0 %v8820_v58  ;;  %10799 = vst [vmem:[#allocation50_spill] sm:$0xff] %v8838_v59  ;;  %10801 = vst [vmem:[#allocation52_spill] sm:$0xff] %v8852_v55 }
 0x20b   :  { %5741 = vmatprep.subr.bf16.mxu0 %v8824_v40 }
 0x20c   :  { %v858_v1 = vpop.f32.mrb[6].mxu0  ;;  %5255 = vmatpush1.bf16.msra.mxu1 %v8219_v15 }
 0x20d   :  { %v859_v2 = vadd.f32 %v858_v1, %v8510_v10  ;;  %v860_v43 = vpop.f32.mrb[7].mxu0  ;;  %v1363_v1 = vld [vmem:[#allocation3 + $0x318] sm:$0xff]  ;;  %5257 = vmatprep.subr.bf16.mxu1 %v8223_v16 }
 0x20e   :  { %v861_v58 = vadd.f32 %v860_v43, %v8516_v11  ;;  %5743 = vmatpush1.bf16.msra.mxu0 %v8828_v9  ;;  %v1361_v43 = vld [vmem:[#allocation3 + $0x308] sm:$0xff]  ;;  %v233_v9 = vmax.f32 %v8619_v52, 0.0 }
 0x20f   :  { %863 = vst [vmem:[%s10406_s9 + $0x80] sm:$0xff] %v859_v2  ;;  %5745 = vmatprep.subr.bf16.mxu0 %v8832_v17  ;;  %v8856_v2 = vpack.c.bf16 %v1363_v1, %v1361_v43  ;;  %v1367_v17 = vld [vmem:[#allocation3 + $0x338] sm:$0xff]  ;;  %v1369_v43 = vld [vmem:[#allocation3 + $0x348] sm:$0xff] }
 0x210   :  { %864 = vst [vmem:[%s10406_s9 + $0x88] sm:$0xff] %v861_v58  ;;  %v8860_v58 = vpack.c.bf16 %v1362_v27, %v1360_v48  ;;  %v8864_v29 = vpack.c.bf16 %v1367_v17, %v1365_v28  ;;  %v1371_v1 = vld [vmem:[#allocation3 + $0x358] sm:$0xff]  ;;  %v1368_v27 = vld [vmem:[#allocation3 + $0x340] sm:$0xff]  ;;  %v1373_v17 = vld [vmem:[#allocation3 + $0x368] sm:$0xff]  ;;  %5259 = vmatpush1.bf16.msra.mxu1 %v8239_v23 }
 0x211   :  { %10802 = vst [vmem:[#allocation53_spill] sm:$0xff] %v8856_v2  ;;  %v8872_v48 = vpack.c.bf16 %v1371_v1, %v1369_v43  ;;  %v1375_v28 = vld [vmem:[#allocation3 + $0x378] sm:$0xff]  ;;  %v1377_v43 = vld [vmem:[#allocation3 + $0x388] sm:$0xff]  ;;  %5261 = vmatprep.subr.bf16.mxu1 %v8243_v24 }
 0x212   :  { %5747 = vmatpush1.bf16.msra.mxu0 %v8838_v59  ;;  %10803 = vst [vmem:[#allocation54_spill] sm:$0xff] %v8860_v58  ;;  %10804 = vst [vmem:[#allocation55_spill] sm:$0xff] %v8864_v29  ;;  %v1379_v1 = vld [vmem:[#allocation3 + $0x398] sm:$0xff] }
 0x213   :  { %5749 = vmatprep.subr.bf16.mxu0 %v8845_v54  ;;  %v1366_v54 = vld [vmem:[#allocation3 + $0x330] sm:$0xff]  ;;  %10806 = vst [vmem:[#allocation57_spill] sm:$0xff] %v8872_v48 }
 0x214   :  { %v8868_v59 = vpack.c.bf16 %v1366_v54, %v1364_v21  ;;  %v8880_v54 = vpack.c.bf16 %v1375_v28, %v1373_v17  ;;  %v1372_v21 = vld [vmem:[#allocation3 + $0x360] sm:$0xff]  ;;  %v1381_v17 = vld [vmem:[#allocation3 + $0x3a8] sm:$0xff]  ;;  %v1383_v28 = vld [vmem:[#allocation3 + $0x3b8] sm:$0xff]  ;;  %5263 = vmatpush1.bf16.msra.mxu1 %v8259_v33 }
 0x215   :  { %5265 = vmatprep.subr.bf16.mxu1 %v8263_v34 }
 0x216   :  { %5751 = vmatpush1.bf16.msra.mxu0 %v8852_v55  ;;  %10805 = vst [vmem:[#allocation56_spill] sm:$0xff] %v8868_v59  ;;  %10808 = vst [vmem:[#allocation59_spill] sm:$0xff] %v8880_v54 }
 0x217   :  { %5753 = vmatprep.subr.bf16.mxu0 %v8856_v2  ;;  %v1370_v2 = vld [vmem:[#allocation3 + $0x350] sm:$0xff] }
 0x218   :  { %v8876_v55 = vpack.c.bf16 %v1370_v2, %v1368_v27  ;;  %v8888_v2 = vpack.c.bf16 %v1379_v1, %v1377_v43  ;;  %v1376_v27 = vld [vmem:[#allocation3 + $0x380] sm:$0xff]  ;;  %v1385_v43 = vld [vmem:[#allocation3 + $0x3c8] sm:$0xff]  ;;  %v1387_v1 = vld [vmem:[#allocation3 + $0x3d8] sm:$0xff]  ;;  %5267 = vmatpush1.bf16.msra.mxu1 %v8279_v41 }
 0x219   :  { %5269 = vmatprep.subr.bf16.mxu1 %v8283_v42 }
 0x21a   :  { %5755 = vmatpush1.bf16.msra.mxu0 %v8860_v58  ;;  %10807 = vst [vmem:[#allocation58_spill] sm:$0xff] %v8876_v55  ;;  %10810 = vst [vmem:[#allocation61_spill] sm:$0xff] %v8888_v2 }
 0x21b   :  { %5757 = vmatprep.subr.bf16.mxu0 %v8864_v29  ;;  %v1374_v29 = vld [vmem:[#allocation3 + $0x370] sm:$0xff] }
 0x21c   :  { %v8884_v58 = vpack.c.bf16 %v1374_v29, %v1372_v21  ;;  %v8896_v29 = vpack.c.bf16 %v1383_v28, %v1381_v17  ;;  %v1380_v21 = vld [vmem:[#allocation3 + $0x3a0] sm:$0xff]  ;;  %v1389_v17 = vld [vmem:[#allocation3 + $0x3e8] sm:$0xff]  ;;  %v1391_v28 = vld [vmem:[#allocation3 + $0x3f8] sm:$0xff]  ;;  %5271 = vmatpush1.bf16.msra.mxu1 %v8293_v47 }
 0x21d   :  { %5337 = vmatprep.subr.bf16.mxu1 %v7986_v3 }
 0x21e   :  { %5759 = vmatpush1.bf16.msra.mxu0 %v8868_v59  ;;  %10809 = vst [vmem:[#allocation60_spill] sm:$0xff] %v8884_v58  ;;  %10812 = vst [vmem:[#allocation63_spill] sm:$0xff] %v8896_v29 }
 0x21f   :  { %5761 = vmatprep.subr.bf16.mxu0 %v8872_v48  ;;  %v1378_v48 = vld [vmem:[#allocation3 + $0x390] sm:$0xff] }
 0x220   :  { %v8892_v59 = vpack.c.bf16 %v1378_v48, %v1376_v27  ;;  %v8904_v48 = vpack.c.bf16 %v1387_v1, %v1385_v43  ;;  %v1384_v27 = vld [vmem:[#allocation3 + $0x3c0] sm:$0xff]  ;;  %v1390_v1 = vld [vmem:[#allocation3 + $0x3f0] sm:$0xff] }
 0x221   :  { %v1388_v43 = vld [vmem:[#allocation3 + $0x3e0] sm:$0xff] }
 0x222   :  { %5763 = vmatpush1.bf16.msra.mxu0 %v8876_v55  ;;  %10811 = vst [vmem:[#allocation62_spill] sm:$0xff] %v8892_v59  ;;  %10814 = vst [vmem:[#allocation65_spill] sm:$0xff] %v8904_v48 }
 0x223   :  { %5765 = vmatprep.subr.bf16.mxu0 %v8880_v54  ;;  %v1382_v54 = vld [vmem:[#allocation3 + $0x3b0] sm:$0xff] }
 0x224   :  { %v8900_v55 = vpack.c.bf16 %v1382_v54, %v1380_v21  ;;  %v712_v54 = vld [vmem:[%s10397_s0 + $0x40] sm:$0xff]  ;;  %v8915_v21 = vpack.c.bf16 %v1391_v28, %v1389_v17 }
 0x225   :  { %777 = vmatprep.mubr.f32.mxu1 %v712_v54  ;;  %v1392_v28 = vld [vmem:[#allocation3 + $0x400] sm:$0xff]  ;;  %v1394_v54 = vld [vmem:[#allocation3 + $0x410] sm:$0xff] }
 0x226   :  { %5767 = vmatpush1.bf16.msra.mxu0 %v8884_v58  ;;  %10813 = vst [vmem:[#allocation64_spill] sm:$0xff] %v8900_v55  ;;  %10816 = vst [vmem:[#allocation67_spill] sm:$0xff] %v8915_v21 }
 0x227   :  { %5769 = vmatprep.subr.bf16.mxu0 %v8888_v2  ;;  %v1386_v2 = vld [vmem:[#allocation3 + $0x3d0] sm:$0xff] }
 0x228   :  { %v8908_v58 = vpack.c.bf16 %v1386_v2, %v1384_v27  ;;  %v1395_v2 = vld [vmem:[#allocation3 + $0x418] sm:$0xff]  ;;  %v8922_v27 = vpack.c.bf16 %v1390_v1, %v1388_v43  ;;  %v10519_v43 = vmax.f32 %v8774_v39, 0.0  ;;  %v1396_v1 = vld [vmem:[#allocation3 + $0x420] sm:$0xff] }
 0x22a   :  { %5771 = vmatpush1.bf16.msra.mxu0 %v8892_v59  ;;  %10815 = vst [vmem:[#allocation66_spill] sm:$0xff] %v8908_v58  ;;  %10817 = vst [vmem:[#allocation68_spill] sm:$0xff] %v8922_v27  ;;  %v1399_v59 = vld [vmem:[#allocation3 + $0x438] sm:$0xff] }
 0x22b   :  { %5773 = vmatprep.subr.bf16.mxu0 %v8896_v29  ;;  %v711_v29 = vld [vmem:[%s10397_s0 + $0x38] sm:$0xff] }
 0x22c   :  { %778 = vmatmul.mubr.f32.vlgmr.msra.gmra.mrb[8].mxu1 %v711_v29  ;;  %v8931_v29 = vpack.c.bf16 %v1394_v54, %v1392_v28  ;;  %v1405_v54 = vld [vmem:[#allocation3 + $0x468] sm:$0xff] }
 0x22d   :  { %5339 = vmatpush1.bf16.msra.mxu1 %v7997_v7 }
 0x22e   :  { %5775 = vmatpush1.bf16.msra.mxu0 %v8900_v55  ;;  %v1393_v55 = vld [vmem:[#allocation3 + $0x408] sm:$0xff]  ;;  %5341 = vmatprep.subr.bf16.mxu1 %v7999_v8  ;;  %10819 = vst [vmem:[#allocation70_spill] sm:$0xff] %v8931_v29 }
 0x22f   :  { %5777 = vmatprep.subr.bf16.mxu0 %v8904_v48  ;;  %v8926_v17 = vpack.c.bf16 %v1395_v2, %v1393_v55  ;;  %v1397_v48 = vld [vmem:[#allocation3 + $0x428] sm:$0xff]  ;;  %v1398_v2 = vld [vmem:[#allocation3 + $0x430] sm:$0xff] }
 0x230   :  { %v8936_v55 = vpack.c.bf16 %v1399_v59, %v1397_v48  ;;  %v8940_v52 = vpack.c.bf16 %v1398_v2, %v1396_v1  ;;  %v1400_v59 = vld [vmem:[#allocation3 + $0x440] sm:$0xff]  ;;  %v1402_v48 = vld [vmem:[#allocation3 + $0x450] sm:$0xff]  ;;  %v1409_v2 = vld [vmem:[#allocation3 + $0x488] sm:$0xff] }
 0x231   :  { %10818 = vst [vmem:[#allocation69_spill] sm:$0xff] %v8926_v17  ;;  %5343 = vmatpush1.bf16.msra.mxu1 %v8016_v13 }
 0x232   :  { %5779 = vmatpush1.bf16.msra.mxu0 %v8908_v58  ;;  %5345 = vmatprep.subr.bf16.mxu1 %v8020_v14  ;;  %10820 = vst [vmem:[#allocation71_spill] sm:$0xff] %v8936_v55  ;;  %v1403_v58 = vld [vmem:[#allocation3 + $0x458] sm:$0xff]  ;;  %10821 = vst [vmem:[#allocation72_spill] sm:$0xff] %v8940_v52 }
 0x233   :  { %5781 = vmatprep.subr.bf16.mxu0 %v8915_v21  ;;  %v1401_v21 = vld [vmem:[#allocation3 + $0x448] sm:$0xff] }
 0x234   :  { %v8945_v28 = vpack.c.bf16 %v1403_v58, %v1401_v21  ;;  %v1404_v58 = vld [vmem:[#allocation3 + $0x460] sm:$0xff]  ;;  %v1406_v21 = vld [vmem:[#allocation3 + $0x470] sm:$0xff] }
 0x235   :  { %5347 = vmatpush1.bf16.msra.mxu1 %v8036_v19  ;;  %v8958_v39 = vpack.c.bf16 %v1406_v21, %v1404_v58  ;;  %v1412_v21 = vld [vmem:[#allocation3 + $0x4a0] sm:$0xff] }
 0x236   :  { %5783 = vmatpush1.bf16.msra.mxu0 %v8922_v27  ;;  %10822 = vst [vmem:[#allocation73_spill] sm:$0xff] %v8945_v28  ;;  %5349 = vmatprep.subr.bf16.mxu1 %v8040_v20 }
 0x237   :  { %5785 = vmatprep.subr.bf16.mxu0 %v8926_v17  ;;  %v1407_v17 = vld [vmem:[#allocation3 + $0x478] sm:$0xff]  ;;  %10825 = vst [vmem:[#allocation76_spill] sm:$0xff] %v8958_v39 }
 0x238   :  { %v8954_v1 = vpack.c.bf16 %v1407_v17, %v1405_v54  ;;  %v1413_v17 = vld [vmem:[#allocation3 + $0x4a8] sm:$0xff]  ;;  %v1415_v54 = vld [vmem:[#allocation3 + $0x4b8] sm:$0xff] }
 0x239   :  { %1683 = vmatmul.mubr.f32.vlgmr.msra.gmra.mrb[12].mxu0 %v233_v9  ;;  %5351 = vmatpush1.bf16.msra.mxu1 %v8056_v25  ;;  %v8950_v9 = vpack.c.bf16 %v1402_v48, %v1400_v59  ;;  %v1408_v48 = vld [vmem:[#allocation3 + $0x480] sm:$0xff]  ;;  %v8970_v58 = vpack.c.bf16 %v1415_v54, %v1413_v17  ;;  %v1421_v54 = vld [vmem:[#allocation3 + $0x4e8] sm:$0xff] }
 0x23a   :  { %5787 = vmatpush1.bf16.msra.mxu0 %v8931_v29  ;;  %1753 = vmatprep.mubr.f32.mxu0 %v10519_v43  ;;  %10824 = vst [vmem:[#allocation75_spill] sm:$0xff] %v8954_v1  ;;  %v1411_v43 = vld [vmem:[#allocation3 + $0x498] sm:$0xff] }
 0x23b   :  { %5789 = vmatprep.subr.bf16.mxu0 %v8936_v55  ;;  %10823 = vst [vmem:[#allocation74_spill] sm:$0xff] %v8950_v9  ;;  %5353 = vmatprep.subr.bf16.mxu1 %v8060_v26  ;;  %v8962_v59 = vpack.c.bf16 %v1411_v43, %v1409_v2  ;;  %10828 = vst [vmem:[#allocation79_spill] sm:$0xff] %v8970_v58  ;;  %v1417_v43 = vld [vmem:[#allocation3 + $0x4c8] sm:$0xff]  ;;  %v1419_v2 = vld [vmem:[#allocation3 + $0x4d8] sm:$0xff] }
 0x23d   :  { %5355 = vmatpush1.bf16.msra.mxu1 %v8076_v31  ;;  %10826 = vst [vmem:[#allocation77_spill] sm:$0xff] %v8962_v59 }
 0x23e   :  { %5791 = vmatpush1.bf16.msra.mxu0 %v8940_v52  ;;  %5357 = vmatprep.subr.bf16.mxu1 %v8080_v32 }
 0x23f   :  { %5793 = vmatprep.subr.bf16.mxu0 %v8945_v28  ;;  %v1410_v28 = vld [vmem:[#allocation3 + $0x490] sm:$0xff] }
 0x240   :  { %v8966_v52 = vpack.c.bf16 %v1410_v28, %v1408_v48  ;;  %v8978_v28 = vpack.c.bf16 %v1419_v2, %v1417_v43  ;;  %v1416_v48 = vld [vmem:[#allocation3 + $0x4c0] sm:$0xff]  ;;  %v1422_v2 = vld [vmem:[#allocation3 + $0x4f0] sm:$0xff] }
 0x241   :  { %5359 = vmatpush1.bf16.msra.mxu1 %v8096_v37  ;;  %v1420_v43 = vld [vmem:[#allocation3 + $0x4e0] sm:$0xff] }
 0x242   :  { %5795 = vmatpush1.bf16.msra.mxu0 %v8950_v9  ;;  %10827 = vst [vmem:[#allocation78_spill] sm:$0xff] %v8966_v52  ;;  %5361 = vmatprep.subr.bf16.mxu1 %v8100_v38  ;;  %10830 = vst [vmem:[#allocation81_spill] sm:$0xff] %v8978_v28 }
 0x243   :  { %5797 = vmatprep.subr.bf16.mxu0 %v8954_v1  ;;  %v1414_v1 = vld [vmem:[#allocation3 + $0x4b0] sm:$0xff] }
 0x244   :  { %v8974_v9 = vpack.c.bf16 %v1414_v1, %v1412_v21 }
 0x245   :  { %5363 = vmatpush1.bf16.msra.mxu1 %v8119_v44 }
 0x246   :  { %5799 = vmatpush1.bf16.msra.mxu0 %v8958_v39  ;;  %10829 = vst [vmem:[#allocation80_spill] sm:$0xff] %v8974_v9  ;;  %5365 = vmatprep.subr.bf16.mxu1 %v8123_v45  ;;  %v1423_v39 = vld [vmem:[#allocation3 + $0x4f8] sm:$0xff] }
 0x247   :  { %5801 = vmatprep.subr.bf16.mxu0 %v8962_v59  ;;  %v1418_v59 = vld [vmem:[#allocation3 + $0x4d0] sm:$0xff]  ;;  %v8991_v21 = vpack.c.bf16 %v1423_v39, %v1421_v54  ;;  %v1429_v54 = vld [vmem:[#allocation3 + $0x528] sm:$0xff] }
 0x248   :  { %v8984_v1 = vpack.c.bf16 %v1418_v59, %v1416_v48  ;;  %v8998_v59 = vpack.c.bf16 %v1422_v2, %v1420_v43  ;;  %v1426_v48 = vld [vmem:[#allocation3 + $0x510] sm:$0xff]  ;;  %v1428_v2 = vld [vmem:[#allocation3 + $0x520] sm:$0xff] }
 0x249   :  { %5367 = vmatpush1.bf16.msra.mxu1 %v8139_v50  ;;  %10832 = vst [vmem:[#allocation83_spill] sm:$0xff] %v8991_v21 }
 0x24a   :  { %5803 = vmatpush1.bf16.msra.mxu0 %v8966_v52  ;;  %10831 = vst [vmem:[#allocation82_spill] sm:$0xff] %v8984_v1  ;;  %5369 = vmatprep.subr.bf16.mxu1 %v8143_v51  ;;  %10833 = vst [vmem:[#allocation84_spill] sm:$0xff] %v8998_v59 }
 0x24b   :  { %5805 = vmatprep.subr.bf16.mxu0 %v8970_v58  ;;  %v1463_v58 = vld [vmem:[#allocation3 + $0x638] sm:$0xff] }
 0x24c   :  { %v1016_v17 = vpop.f32.mrb[8].mxu0 }
 0x24d   :  { %v1017_v55 = vadd.f32 %v1016_v17, %v8510_v10  ;;  %v1018_v29 = vpop.f32.mrb[9].mxu0  ;;  %v1427_v17 = vld [vmem:[#allocation3 + $0x518] sm:$0xff]  ;;  %5371 = vmatpush1.bf16.msra.mxu1 %v8159_v56 }
 0x24e   :  { %v1019_v52 = vadd.f32 %v1018_v29, %v8516_v11  ;;  %5807 = vmatpush1.bf16.msra.mxu0 %v8974_v9  ;;  %v1425_v29 = vld [vmem:[#allocation3 + $0x508] sm:$0xff]  ;;  %5373 = vmatprep.subr.bf16.mxu1 %v8163_v57 }
 0x24f   :  { %1021 = vst [vmem:[%s10406_s9 + $0xa0] sm:$0xff] %v1017_v55  ;;  %5809 = vmatprep.subr.bf16.mxu0 %v8978_v28  ;;  %v9002_v39 = vpack.c.bf16 %v1427_v17, %v1425_v29  ;;  %v1424_v55 = vld [vmem:[#allocation3 + $0x500] sm:$0xff]  ;;  %v1431_v28 = vld [vmem:[#allocation3 + $0x538] sm:$0xff]  ;;  %v1433_v29 = vld [vmem:[#allocation3 + $0x548] sm:$0xff] }
 0x250   :  { %1022 = vst [vmem:[%s10406_s9 + $0xa8] sm:$0xff] %v1019_v52  ;;  %v9006_v52 = vpack.c.bf16 %v1426_v48, %v1424_v55  ;;  %v9010_v43 = vpack.c.bf16 %v1431_v28, %v1429_v54  ;;  %v1435_v17 = vld [vmem:[#allocation3 + $0x558] sm:$0xff]  ;;  %v1432_v48 = vld [vmem:[#allocation3 + $0x540] sm:$0xff]  ;;  %v1437_v28 = vld [vmem:[#allocation3 + $0x568] sm:$0xff] }
 0x251   :  { %10834 = vst [vmem:[#allocation85_spill] sm:$0xff] %v9002_v39  ;;  %5375 = vmatpush1.bf16.msra.mxu1 %v8179_v62  ;;  %v9018_v55 = vpack.c.bf16 %v1435_v17, %v1433_v29  ;;  %v1439_v54 = vld [vmem:[#allocation3 + $0x578] sm:$0xff]  ;;  %v1441_v29 = vld [vmem:[#allocation3 + $0x588] sm:$0xff] }
 0x252   :  { %5811 = vmatpush1.bf16.msra.mxu0 %v8984_v1  ;;  %10835 = vst [vmem:[#allocation86_spill] sm:$0xff] %v9006_v52  ;;  %5377 = vmatprep.subr.bf16.mxu1 %v8183_v63  ;;  %10836 = vst [vmem:[#allocation87_spill] sm:$0xff] %v9010_v43  ;;  %v1443_v17 = vld [vmem:[#allocation3 + $0x598] sm:$0xff] }
 0x253   :  { %5813 = vmatprep.subr.bf16.mxu0 %v8991_v21  ;;  %v1430_v21 = vld [vmem:[#allocation3 + $0x530] sm:$0xff]  ;;  %10838 = vst [vmem:[#allocation89_spill] sm:$0xff] %v9018_v55 }
 0x254   :  { %v9014_v1 = vpack.c.bf16 %v1430_v21, %v1428_v2  ;;  %v9026_v21 = vpack.c.bf16 %v1439_v54, %v1437_v28  ;;  %v1436_v2 = vld [vmem:[#allocation3 + $0x560] sm:$0xff]  ;;  %v1445_v28 = vld [vmem:[#allocation3 + $0x5a8] sm:$0xff]  ;;  %v1447_v54 = vld [vmem:[#allocation3 + $0x5b8] sm:$0xff] }
 0x255   :  { %5379 = vmatpush1.bf16.msra.mxu1 %v8199_v5 }
 0x256   :  { %5815 = vmatpush1.bf16.msra.mxu0 %v8998_v59  ;;  %10837 = vst [vmem:[#allocation88_spill] sm:$0xff] %v9014_v1  ;;  %5381 = vmatprep.subr.bf16.mxu1 %v8203_v6  ;;  %10840 = vst [vmem:[#allocation91_spill] sm:$0xff] %v9026_v21 }
 0x257   :  { %5817 = vmatprep.subr.bf16.mxu0 %v9002_v39  ;;  %v1434_v39 = vld [vmem:[#allocation3 + $0x550] sm:$0xff] }
 0x258   :  { %v9022_v59 = vpack.c.bf16 %v1434_v39, %v1432_v48  ;;  %v9034_v39 = vpack.c.bf16 %v1443_v17, %v1441_v29  ;;  %v1440_v48 = vld [vmem:[#allocation3 + $0x580] sm:$0xff]  ;;  %v1449_v29 = vld [vmem:[#allocation3 + $0x5c8] sm:$0xff]  ;;  %v1451_v17 = vld [vmem:[#allocation3 + $0x5d8] sm:$0xff] }
 0x259   :  { %5383 = vmatpush1.bf16.msra.mxu1 %v8219_v15 }
 0x25a   :  { %5819 = vmatpush1.bf16.msra.mxu0 %v9006_v52  ;;  %10839 = vst [vmem:[#allocation90_spill] sm:$0xff] %v9022_v59  ;;  %5385 = vmatprep.subr.bf16.mxu1 %v8223_v16  ;;  %10842 = vst [vmem:[#allocation93_spill] sm:$0xff] %v9034_v39 }
 0x25b   :  { %5821 = vmatprep.subr.bf16.mxu0 %v9010_v43  ;;  %v1438_v43 = vld [vmem:[#allocation3 + $0x570] sm:$0xff] }
 0x25c   :  { %v9030_v52 = vpack.c.bf16 %v1438_v43, %v1436_v2  ;;  %v9042_v43 = vpack.c.bf16 %v1447_v54, %v1445_v28  ;;  %v1444_v2 = vld [vmem:[#allocation3 + $0x5a0] sm:$0xff]  ;;  %v1453_v28 = vld [vmem:[#allocation3 + $0x5e8] sm:$0xff]  ;;  %v1455_v54 = vld [vmem:[#allocation3 + $0x5f8] sm:$0xff] }
 0x25d   :  { %5387 = vmatpush1.bf16.msra.mxu1 %v8239_v23 }
 0x25e   :  { %5823 = vmatpush1.bf16.msra.mxu0 %v9014_v1  ;;  %10841 = vst [vmem:[#allocation92_spill] sm:$0xff] %v9030_v52  ;;  %5389 = vmatprep.subr.bf16.mxu1 %v8243_v24  ;;  %10844 = vst [vmem:[#allocation95_spill] sm:$0xff] %v9042_v43 }
 0x25f   :  { %5825 = vmatprep.subr.bf16.mxu0 %v9018_v55  ;;  %v1442_v55 = vld [vmem:[#allocation3 + $0x590] sm:$0xff] }
 0x260   :  { %v9038_v1 = vpack.c.bf16 %v1442_v55, %v1440_v48  ;;  %v9050_v55 = vpack.c.bf16 %v1451_v17, %v1449_v29  ;;  %v1448_v48 = vld [vmem:[#allocation3 + $0x5c0] sm:$0xff]  ;;  %v1454_v17 = vld [vmem:[#allocation3 + $0x5f0] sm:$0xff] }
 0x261   :  { %5391 = vmatpush1.bf16.msra.mxu1 %v8259_v33  ;;  %v1452_v29 = vld [vmem:[#allocation3 + $0x5e0] sm:$0xff] }
 0x262   :  { %5827 = vmatpush1.bf16.msra.mxu0 %v9022_v59  ;;  %10843 = vst [vmem:[#allocation94_spill] sm:$0xff] %v9038_v1  ;;  %5393 = vmatprep.subr.bf16.mxu1 %v8263_v34  ;;  %10846 = vst [vmem:[#allocation97_spill] sm:$0xff] %v9050_v55 }
 0x263   :  { %5829 = vmatprep.subr.bf16.mxu0 %v9026_v21  ;;  %v1446_v21 = vld [vmem:[#allocation3 + $0x5b0] sm:$0xff] }
 0x264   :  { %v9046_v59 = vpack.c.bf16 %v1446_v21, %v1444_v2  ;;  %v870_v21 = vld [vmem:[%s10397_s0 + $0x50] sm:$0xff]  ;;  %v9061_v2 = vpack.c.bf16 %v1455_v54, %v1453_v28  ;;  %v1456_v54 = vld [vmem:[#allocation3 + $0x600] sm:$0xff] }
 0x265   :  { %5395 = vmatpush1.bf16.msra.mxu1 %v8279_v41  ;;  %935 = vmatprep.mubr.f32.mxu1 %v870_v21  ;;  %v1458_v21 = vld [vmem:[#allocation3 + $0x610] sm:$0xff] }
 0x266   :  { %5831 = vmatpush1.bf16.msra.mxu0 %v9030_v52  ;;  %10845 = vst [vmem:[#allocation96_spill] sm:$0xff] %v9046_v59  ;;  %5397 = vmatprep.subr.bf16.mxu1 %v8283_v42  ;;  %10848 = vst [vmem:[#allocation99_spill] sm:$0xff] %v9061_v2 }
 0x267   :  { %5833 = vmatprep.subr.bf16.mxu0 %v9034_v39  ;;  %v1450_v39 = vld [vmem:[#allocation3 + $0x5d0] sm:$0xff] }
 0x268   :  { %v9054_v52 = vpack.c.bf16 %v1450_v39, %v1448_v48  ;;  %v1459_v39 = vld [vmem:[#allocation3 + $0x618] sm:$0xff]  ;;  %v9068_v48 = vpack.c.bf16 %v1454_v17, %v1452_v29  ;;  %v1462_v17 = vld [vmem:[#allocation3 + $0x630] sm:$0xff] }
 0x269   :  { %5399 = vmatpush1.bf16.msra.mxu1 %v8293_v47  ;;  %v1467_v29 = vld [vmem:[#allocation3 + $0x658] sm:$0xff] }
 0x26a   :  { %5835 = vmatpush1.bf16.msra.mxu0 %v9038_v1  ;;  %10847 = vst [vmem:[#allocation98_spill] sm:$0xff] %v9054_v52  ;;  %5465 = vmatprep.subr.bf16.mxu1 %v7986_v3  ;;  %10849 = vst [vmem:[#allocation100_spill] sm:$0xff] %v9068_v48  ;;  %v463_v1 = vpop.f32.mrb[4].mxu1 }
 0x26b   :  { %5837 = vmatprep.subr.bf16.mxu0 %v9042_v43  ;;  %v869_v43 = vld [vmem:[%s10397_s0 + $0x48] sm:$0xff]  ;;  %v465_v9 = vpop.f32.mrb[5].mxu1 }
 0x26c   :  { %936 = vmatmul.mubr.f32.vlgmr.msra.gmra.mrb[10].mxu1 %v869_v43  ;;  %v1461_v43 = vld [vmem:[#allocation3 + $0x628] sm:$0xff]  ;;  %v9078_v27 = vadd.f32 %v465_v9, %v8516_v11 }
 0x26d   :  { %5467 = vmatpush1.bf16.msra.mxu1 %v7997_v7  ;;  %v9095_v9 = vpack.c.bf16 %v1463_v58, %v1461_v43 }
 0x26e   :  { %5839 = vmatpush1.bf16.msra.mxu0 %v9046_v59  ;;  %v1457_v59 = vld [vmem:[#allocation3 + $0x608] sm:$0xff]  ;;  %5469 = vmatprep.subr.bf16.mxu1 %v7999_v8  ;;  %10852 = vst [vmem:[#allocation103_spill] sm:$0xff] %v9078_v27  ;;  %469 = vst [vmem:[%s10406_s9 + $0x38] sm:$0xff] %v9078_v27 }
 0x26f   :  { %5841 = vmatprep.subr.bf16.mxu0 %v9050_v55  ;;  %v9072_v28 = vpack.c.bf16 %v1459_v39, %v1457_v59  ;;  %v9075_v55 = vadd.f32 %v463_v1, %v8510_v10  ;;  %v9087_v59 = vpack.c.bf16 %v1458_v21, %v1456_v54  ;;  %10854 = vst [vmem:[#allocation105_spill] sm:$0xff] %v9095_v9  ;;  %v1460_v1 = vld [vmem:[#allocation3 + $0x620] sm:$0xff]  ;;  %v9100_v39 = vld [vmem:[%s10406_s9 + $0x28] sm:$0xff] }
 0x270   :  { %10855 = vst [vmem:[#allocation106_spill] sm:$0xff] %v9100_v39  ;;  %v10588_v54 = vmax.f32 %v9100_v39, 0.0  ;;  %v1465_v21 = vld [vmem:[#allocation3 + $0x648] sm:$0xff]  ;;  %v9109_v58 = vpack.c.bf16 %v1462_v17, %v1460_v1  ;;  %v1470_v17 = vld [vmem:[#allocation3 + $0x670] sm:$0xff] }
 0x271   :  { %10850 = vst [vmem:[#allocation101_spill] sm:$0xff] %v9072_v28  ;;  %10851 = vst [vmem:[#allocation102_spill] sm:$0xff] %v9075_v55  ;;  %5471 = vmatpush1.bf16.msra.mxu1 %v8016_v13  ;;  %v9112_v43 = vpack.c.bf16 %v1467_v29, %v1465_v21  ;;  %v1468_v29 = vld [vmem:[#allocation3 + $0x660] sm:$0xff]  ;;  %v1473_v21 = vld [vmem:[#allocation3 + $0x688] sm:$0xff] }
 0x272   :  { %5843 = vmatpush1.bf16.msra.mxu0 %v9054_v52  ;;  %468 = vst [vmem:[%s10406_s9 + $0x30] sm:$0xff] %v9075_v55  ;;  %10853 = vst [vmem:[#allocation104_spill] sm:$0xff] %v9087_v59  ;;  %5473 = vmatprep.subr.bf16.mxu1 %v8020_v14  ;;  %v1469_v52 = vld [vmem:[#allocation3 + $0x668] sm:$0xff]  ;;  %v9125_v39 = vpack.c.bf16 %v1470_v17, %v1468_v29  ;;  %v1476_v17 = vld [vmem:[#allocation3 + $0x6a0] sm:$0xff] }
 0x273   :  { %5845 = vmatprep.subr.bf16.mxu0 %v9061_v2  ;;  %10857 = vst [vmem:[#allocation107_spill] sm:$0xff] %v9109_v58  ;;  %10858 = vst [vmem:[#allocation108_spill] sm:$0xff] %v9112_v43  ;;  %v1466_v2 = vld [vmem:[#allocation3 + $0x650] sm:$0xff] }
 0x274   :  { %10861 = vst [vmem:[#allocation111_spill] sm:$0xff] %v9125_v39 }
 0x275   :  { %5475 = vmatpush1.bf16.msra.mxu1 %v8036_v19 }
 0x276   :  { %5847 = vmatpush1.bf16.msra.mxu0 %v9068_v48  ;;  %v10856_v48 = vmax.f32 %v8771_v0, 0.0  ;;  %5477 = vmatprep.subr.bf16.mxu1 %v8040_v20  ;;  %v1471_v0 = vld [vmem:[#allocation3 + $0x678] sm:$0xff] }
 0x277   :  { %5849 = vmatprep.subr.bf16.mxu0 %v9072_v28  ;;  %v1464_v28 = vld [vmem:[#allocation3 + $0x640] sm:$0xff]  ;;  %v9121_v1 = vpack.c.bf16 %v1471_v0, %v1469_v52  ;;  %v1477_v0 = vld [vmem:[#allocation3 + $0x6a8] sm:$0xff]  ;;  %v1479_v52 = vld [vmem:[#allocation3 + $0x6b8] sm:$0xff] }
 0x278   :  { %v9137_v29 = vpack.c.bf16 %v1479_v52, %v1477_v0  ;;  %v1485_v52 = vld [vmem:[#allocation3 + $0x6e8] sm:$0xff] }
 0x279   :  { %1754 = vmatmul.mubr.f32.vlgmr.msra.gmra.mrb[12].mxu0 %v10856_v48  ;;  %5479 = vmatpush1.bf16.msra.mxu1 %v8056_v25  ;;  %v9117_v48 = vpack.c.bf16 %v1466_v2, %v1464_v28  ;;  %10860 = vst [vmem:[#allocation110_spill] sm:$0xff] %v9121_v1  ;;  %v1472_v28 = vld [vmem:[#allocation3 + $0x680] sm:$0xff] }
 0x27a   :  { %5851 = vmatpush1.bf16.msra.mxu0 %v9087_v59  ;;  %1824 = vmatprep.mubr.f32.mxu0 %v10588_v54  ;;  %v1475_v54 = vld [vmem:[#allocation3 + $0x698] sm:$0xff]  ;;  %10864 = vst [vmem:[#allocation114_spill] sm:$0xff] %v9137_v29 }
 0x27b   :  { %5853 = vmatprep.subr.bf16.mxu0 %v9095_v9  ;;  %10859 = vst [vmem:[#allocation109_spill] sm:$0xff] %v9117_v48  ;;  %5481 = vmatprep.subr.bf16.mxu1 %v8060_v26  ;;  %v9129_v2 = vpack.c.bf16 %v1475_v54, %v1473_v21  ;;  %v1481_v54 = vld [vmem:[#allocation3 + $0x6c8] sm:$0xff]  ;;  %v1483_v21 = vld [vmem:[#allocation3 + $0x6d8] sm:$0xff] }
 0x27d   :  { %5483 = vmatpush1.bf16.msra.mxu1 %v8076_v31  ;;  %10862 = vst [vmem:[#allocation112_spill] sm:$0xff] %v9129_v2 }
 0x27e   :  { %5855 = vmatpush1.bf16.msra.mxu0 %v9109_v58  ;;  %5485 = vmatprep.subr.bf16.mxu1 %v8080_v32 }
 0x27f   :  { %5857 = vmatprep.subr.bf16.mxu0 %v9112_v43  ;;  %v1474_v43 = vld [vmem:[#allocation3 + $0x690] sm:$0xff] }
 0x280   :  { %v9133_v58 = vpack.c.bf16 %v1474_v43, %v1472_v28  ;;  %v9145_v43 = vpack.c.bf16 %v1483_v21, %v1481_v54  ;;  %v1480_v28 = vld [vmem:[#allocation3 + $0x6c0] sm:$0xff]  ;;  %v1486_v21 = vld [vmem:[#allocation3 + $0x6f0] sm:$0xff] }
 0x281   :  { %5487 = vmatpush1.bf16.msra.mxu1 %v8096_v37  ;;  %v1484_v54 = vld [vmem:[#allocation3 + $0x6e0] sm:$0xff] }
 0x282   :  { %5859 = vmatpush1.bf16.msra.mxu0 %v9117_v48  ;;  %10863 = vst [vmem:[#allocation113_spill] sm:$0xff] %v9133_v58  ;;  %5489 = vmatprep.subr.bf16.mxu1 %v8100_v38  ;;  %10866 = vst [vmem:[#allocation116_spill] sm:$0xff] %v9145_v43 }
 0x283   :  { %5861 = vmatprep.subr.bf16.mxu0 %v9121_v1  ;;  %v1478_v1 = vld [vmem:[#allocation3 + $0x6b0] sm:$0xff] }
 0x284   :  { %v9141_v48 = vpack.c.bf16 %v1478_v1, %v1476_v17 }
 0x285   :  { %5491 = vmatpush1.bf16.msra.mxu1 %v8119_v44 }
 0x286   :  { %5863 = vmatpush1.bf16.msra.mxu0 %v9125_v39  ;;  %10865 = vst [vmem:[#allocation115_spill] sm:$0xff] %v9141_v48  ;;  %5493 = vmatprep.subr.bf16.mxu1 %v8123_v45  ;;  %v1487_v39 = vld [vmem:[#allocation3 + $0x6f8] sm:$0xff] }
 0x287   :  { %5865 = vmatprep.subr.bf16.mxu0 %v9129_v2  ;;  %v1482_v2 = vld [vmem:[#allocation3 + $0x6d0] sm:$0xff]  ;;  %v9158_v17 = vpack.c.bf16 %v1487_v39, %v1485_v52  ;;  %v1488_v39 = vld [vmem:[#allocation3 + $0x700] sm:$0xff]  ;;  %v1493_v52 = vld [vmem:[#allocation3 + $0x728] sm:$0xff] }
 0x288   :  { %v9151_v1 = vpack.c.bf16 %v1482_v2, %v1480_v28  ;;  %v9165_v2 = vpack.c.bf16 %v1486_v21, %v1484_v54  ;;  %v1490_v28 = vld [vmem:[#allocation3 + $0x710] sm:$0xff]  ;;  %v1492_v21 = vld [vmem:[#allocation3 + $0x720] sm:$0xff] }
 0x289   :  { %5495 = vmatpush1.bf16.msra.mxu1 %v8139_v50  ;;  %10868 = vst [vmem:[#allocation118_spill] sm:$0xff] %v9158_v17 }
 0x28a   :  { %5867 = vmatpush1.bf16.msra.mxu0 %v9133_v58  ;;  %10867 = vst [vmem:[#allocation117_spill] sm:$0xff] %v9151_v1  ;;  %5497 = vmatprep.subr.bf16.mxu1 %v8143_v51  ;;  %10869 = vst [vmem:[#allocation119_spill] sm:$0xff] %v9165_v2 }
 0x28b   :  { %5869 = vmatprep.subr.bf16.mxu0 %v9137_v29 }
 0x28c   :  { %v1174_v0 = vpop.f32.mrb[10].mxu0 }
 0x28d   :  { %v1175_v9 = vadd.f32 %v1174_v0, %v8510_v10  ;;  %v1176_v59 = vpop.f32.mrb[11].mxu0  ;;  %v1491_v0 = vld [vmem:[#allocation3 + $0x718] sm:$0xff]  ;;  %5499 = vmatpush1.bf16.msra.mxu1 %v8159_v56 }
 0x28e   :  { %v1177_v58 = vadd.f32 %v1176_v59, %v8516_v11  ;;  %5871 = vmatpush1.bf16.msra.mxu0 %v9141_v48  ;;  %v1489_v59 = vld [vmem:[#allocation3 + $0x708] sm:$0xff]  ;;  %5501 = vmatprep.subr.bf16.mxu1 %v8163_v57 }
 0x28f   :  { %1179 = vst [vmem:[%s10406_s9 + $0xc0] sm:$0xff] %v1175_v9  ;;  %5873 = vmatprep.subr.bf16.mxu0 %v9145_v43  ;;  %v9169_v9 = vpack.c.bf16 %v1491_v0, %v1489_v59  ;;  %v1495_v43 = vld [vmem:[#allocation3 + $0x738] sm:$0xff]  ;;  %v1497_v59 = vld [vmem:[#allocation3 + $0x748] sm:$0xff] }
 0x290   :  { %1180 = vst [vmem:[%s10406_s9 + $0xc8] sm:$0xff] %v1177_v58  ;;  %v9173_v58 = vpack.c.bf16 %v1490_v28, %v1488_v39  ;;  %v9177_v54 = vpack.c.bf16 %v1495_v43, %v1493_v52  ;;  %v1499_v0 = vld [vmem:[#allocation3 + $0x758] sm:$0xff]  ;;  %v1496_v28 = vld [vmem:[#allocation3 + $0x740] sm:$0xff]  ;;  %v1501_v43 = vld [vmem:[#allocation3 + $0x768] sm:$0xff] }
 0x291   :  { %10870 = vst [vmem:[#allocation120_spill] sm:$0xff] %v9169_v9  ;;  %5503 = vmatpush1.bf16.msra.mxu1 %v8179_v62  ;;  %v9185_v39 = vpack.c.bf16 %v1499_v0, %v1497_v59  ;;  %v1503_v52 = vld [vmem:[#allocation3 + $0x778] sm:$0xff]  ;;  %v1505_v59 = vld [vmem:[#allocation3 + $0x788] sm:$0xff] }
 0x292   :  { %5875 = vmatpush1.bf16.msra.mxu0 %v9151_v1  ;;  %10871 = vst [vmem:[#allocation121_spill] sm:$0xff] %v9173_v58  ;;  %5505 = vmatprep.subr.bf16.mxu1 %v8183_v63  ;;  %10872 = vst [vmem:[#allocation122_spill] sm:$0xff] %v9177_v54  ;;  %v1507_v0 = vld [vmem:[#allocation3 + $0x798] sm:$0xff] }
 0x293   :  { %5877 = vmatprep.subr.bf16.mxu0 %v9158_v17  ;;  %v1494_v17 = vld [vmem:[#allocation3 + $0x730] sm:$0xff]  ;;  %10874 = vst [vmem:[#allocation124_spill] sm:$0xff] %v9185_v39 }
 0x294   :  { %v9181_v1 = vpack.c.bf16 %v1494_v17, %v1492_v21  ;;  %v9193_v17 = vpack.c.bf16 %v1503_v52, %v1501_v43  ;;  %v1500_v21 = vld [vmem:[#allocation3 + $0x760] sm:$0xff]  ;;  %v1509_v43 = vld [vmem:[#allocation3 + $0x7a8] sm:$0xff]  ;;  %v1511_v52 = vld [vmem:[#allocation3 + $0x7b8] sm:$0xff] }
 0x295   :  { %5507 = vmatpush1.bf16.msra.mxu1 %v8199_v5 }
 0x296   :  { %5879 = vmatpush1.bf16.msra.mxu0 %v9165_v2  ;;  %10873 = vst [vmem:[#allocation123_spill] sm:$0xff] %v9181_v1  ;;  %5509 = vmatprep.subr.bf16.mxu1 %v8203_v6  ;;  %10876 = vst [vmem:[#allocation126_spill] sm:$0xff] %v9193_v17 }
 0x297   :  { %5881 = vmatprep.subr.bf16.mxu0 %v9169_v9  ;;  %v1498_v9 = vld [vmem:[#allocation3 + $0x750] sm:$0xff] }
 0x298   :  { %v9189_v2 = vpack.c.bf16 %v1498_v9, %v1496_v28  ;;  %v9201_v9 = vpack.c.bf16 %v1507_v0, %v1505_v59  ;;  %v1504_v28 = vld [vmem:[#allocation3 + $0x780] sm:$0xff]  ;;  %v1513_v59 = vld [vmem:[#allocation3 + $0x7c8] sm:$0xff]  ;;  %v1515_v0 = vld [vmem:[#allocation3 + $0x7d8] sm:$0xff] }
 0x299   :  { %5511 = vmatpush1.bf16.msra.mxu1 %v8219_v15 }
 0x29a   :  { %5883 = vmatpush1.bf16.msra.mxu0 %v9173_v58  ;;  %10875 = vst [vmem:[#allocation125_spill] sm:$0xff] %v9189_v2  ;;  %5513 = vmatprep.subr.bf16.mxu1 %v8223_v16  ;;  %10878 = vst [vmem:[#allocation128_spill] sm:$0xff] %v9201_v9 }
 0x29b   :  { %5885 = vmatprep.subr.bf16.mxu0 %v9177_v54  ;;  %v1502_v54 = vld [vmem:[#allocation3 + $0x770] sm:$0xff] }
 0x29c   :  { %v9197_v58 = vpack.c.bf16 %v1502_v54, %v1500_v21  ;;  %v9209_v54 = vpack.c.bf16 %v1511_v52, %v1509_v43  ;;  %v1508_v21 = vld [vmem:[#allocation3 + $0x7a0] sm:$0xff]  ;;  %v1517_v43 = vld [vmem:[#allocation3 + $0x7e8] sm:$0xff]  ;;  %v1519_v52 = vld [vmem:[#allocation3 + $0x7f8] sm:$0xff] }
 0x29d   :  { %5515 = vmatpush1.bf16.msra.mxu1 %v8239_v23 }
 0x29e   :  { %5887 = vmatpush1.bf16.msra.mxu0 %v9181_v1  ;;  %10877 = vst [vmem:[#allocation127_spill] sm:$0xff] %v9197_v58  ;;  %5517 = vmatprep.subr.bf16.mxu1 %v8243_v24  ;;  %10880 = vst [vmem:[#allocation130_spill] sm:$0xff] %v9209_v54 }
 0x29f   :  { %5889 = vmatprep.subr.bf16.mxu0 %v9185_v39  ;;  %v1506_v39 = vld [vmem:[#allocation3 + $0x790] sm:$0xff] }
 0x2a0   :  { %v9205_v1 = vpack.c.bf16 %v1506_v39, %v1504_v28  ;;  %v9217_v39 = vpack.c.bf16 %v1515_v0, %v1513_v59  ;;  %v1512_v28 = vld [vmem:[#allocation3 + $0x7c0] sm:$0xff]  ;;  %v1518_v0 = vld [vmem:[#allocation3 + $0x7f0] sm:$0xff] }
 0x2a1   :  { %5519 = vmatpush1.bf16.msra.mxu1 %v8259_v33  ;;  %v1516_v59 = vld [vmem:[#allocation3 + $0x7e0] sm:$0xff] }
 0x2a2   :  { %5891 = vmatpush1.bf16.msra.mxu0 %v9189_v2  ;;  %10879 = vst [vmem:[#allocation129_spill] sm:$0xff] %v9205_v1  ;;  %5521 = vmatprep.subr.bf16.mxu1 %v8263_v34  ;;  %10882 = vst [vmem:[#allocation132_spill] sm:$0xff] %v9217_v39 }
 0x2a3   :  { %5893 = vmatprep.subr.bf16.mxu0 %v9193_v17  ;;  %v1510_v17 = vld [vmem:[#allocation3 + $0x7b0] sm:$0xff] }
 0x2a4   :  { %v9213_v2 = vpack.c.bf16 %v1510_v17, %v1508_v21  ;;  %v1028_v17 = vld [vmem:[%s10397_s0 + $0x60] sm:$0xff]  ;;  %v9228_v21 = vpack.c.bf16 %v1519_v52, %v1517_v43  ;;  %v1853_v43 = vld [vmem:[#allocation5 + $0x90] sm:$0xff]  ;;  %v1854_v52 = vld [vmem:[#allocation5 + $0x98] sm:$0xff] }
 0x2a5   :  { %5523 = vmatpush1.bf16.msra.mxu1 %v8279_v41  ;;  %1093 = vmatprep.mubr.f32.mxu1 %v1028_v17  ;;  %v5916_v17 = vpack.c.bf16 %v1854_v52, %v1853_v43  ;;  %v1840_v43 = vld [vmem:[#allocation5 + $0x28] sm:$0xff] }
 0x2a6   :  { %5895 = vmatpush1.bf16.msra.mxu0 %v9197_v58  ;;  %10881 = vst [vmem:[#allocation131_spill] sm:$0xff] %v9213_v2  ;;  %5525 = vmatprep.subr.bf16.mxu1 %v8283_v42  ;;  %10884 = vst [vmem:[#allocation134_spill] sm:$0xff] %v9228_v21 }
 0x2a7   :  { %5897 = vmatprep.subr.bf16.mxu0 %v9201_v9  ;;  %v1514_v9 = vld [vmem:[#allocation3 + $0x7d0] sm:$0xff] }
 0x2a8   :  { %v9221_v58 = vpack.c.bf16 %v1514_v9, %v1512_v28  ;;  %v9235_v9 = vpack.c.bf16 %v1518_v0, %v1516_v59  ;;  %v10907_v28 = vld [vmem:[#allocation33_spill] sm:$0xff]  ;;  %v1837_v59 = vld [vmem:[#allocation5 + $0x10] sm:$0xff] }
 0x2a9   :  { %5527 = vmatpush1.bf16.msra.mxu1 %v8293_v47  ;;  %v1838_v0 = vld [vmem:[#allocation5 + $0x18] sm:$0xff] }
 0x2aa   :  { %5899 = vmatpush1.bf16.msra.mxu0 %v9205_v1  ;;  %10883 = vst [vmem:[#allocation133_spill] sm:$0xff] %v9221_v58  ;;  %5593 = vmatprep.subr.bf16.mxu1 %v7986_v3  ;;  %10885 = vst [vmem:[#allocation135_spill] sm:$0xff] %v9235_v9  ;;  %v10636_v3 = vmax.f32 %v9078_v27, 0.0  ;;  %v10913_v27 = vld [vmem:[#allocation40_spill] sm:$0xff] }
 0x2ab   :  { %5901 = vmatprep.subr.bf16.mxu0 %v9209_v54  ;;  %v1027_v54 = vld [vmem:[%s10397_s0 + $0x58] sm:$0xff] }
 0x2ac   :  { %1094 = vmatmul.mubr.f32.vlgmr.msra.gmra.mrb[12].mxu1 %v1027_v54 }
 0x2ad   :  { %5595 = vmatpush1.bf16.msra.mxu1 %v7997_v7  ;;  %v9246_v7 = vld [vmem:[%s10406_s9 + $0x20] sm:$0xff] }
 0x2ae   :  { %5903 = vmatpush1.bf16.msra.mxu0 %v9213_v2  ;;  %5597 = vmatprep.subr.bf16.mxu1 %v7999_v8  ;;  %10886 = vst [vmem:[#allocation136_spill] sm:$0xff] %v9246_v7  ;;  %v10637_v54 = vmax.f32 %v9246_v7, 0.0 }
 0x2af   :  { %5905 = vmatprep.subr.bf16.mxu0 %v9217_v39 }
 0x2b1   :  { %5599 = vmatpush1.bf16.msra.mxu1 %v8016_v13  ;;  %v621_v8 = vpop.f32.mrb[6].mxu1 }
 0x2b2   :  { %5907 = vmatpush1.bf16.msra.mxu0 %v9221_v58  ;;  %5601 = vmatprep.subr.bf16.mxu1 %v8020_v14  ;;  %v9267_v13 = vadd.f32 %v621_v8, %v8510_v10  ;;  %v623_v14 = vpop.f32.mrb[7].mxu1  ;;  %v10639_v8 = vmax.f32 %v9075_v55, 0.0  ;;  %v1844_v55 = vld [vmem:[#allocation5 + $0x48] sm:$0xff] }
 0x2b3   :  { %5909 = vmatprep.subr.bf16.mxu0 %v9228_v21 }
 0x2b4   :  { %10887 = vst [vmem:[#allocation137_spill] sm:$0xff] %v9267_v13  ;;  %626 = vst [vmem:[%s10406_s9 + $0x50] sm:$0xff] %v9267_v13 }
 0x2b5   :  { %5603 = vmatpush1.bf16.msra.mxu1 %v8036_v19  ;;  %v9270_v19 = vadd.f32 %v623_v14, %v8516_v11  ;;  %v5918_v14 = vpack.c.bf16 %v1838_v0, %v1837_v59  ;;  %v10912_v59 = vld [vmem:[#allocation39_spill] sm:$0xff]  ;;  %v1857_v0 = vld [vmem:[#allocation5 + $0xb0] sm:$0xff] }
 0x2b6   :  { %5911 = vmatpush1.bf16.msra.mxu0 %v9235_v9  ;;  %5605 = vmatprep.subr.bf16.mxu1 %v8040_v20  ;;  %v10889_v20 = vld [vmem:[#allocation15_spill] sm:$0xff] }
 0x2b7   :  { %6233 = vmatprep.subr.bf16.mxu0 %v8616_v46  ;;  %10888 = vst [vmem:[#allocation138_spill] sm:$0xff] %v9270_v19  ;;  %627 = vst [vmem:[%s10406_s9 + $0x58] sm:$0xff] %v9270_v19 }
 0x2b9   :  { %1825 = vmatmul.mubr.f32.vlgmr.msra.gmra.mrb[12].mxu0 %v10637_v54  ;;  %5607 = vmatpush1.bf16.msra.mxu1 %v8056_v25  ;;  %v10890_v25 = vld [vmem:[#allocation16_spill] sm:$0xff] }
 0x2ba   :  { %6235 = vmatpush1.bf16.msra.mxu0 %v8634_v60  ;;  %2409 = vmatprep.mubr.f32.mxu0 %v10636_v3  ;;  %v1841_v54 = vld [vmem:[#allocation5 + $0x30] sm:$0xff] }
 0x2bb   :  { %6237 = vmatprep.subr.bf16.mxu0 %v8641_v61  ;;  %5609 = vmatprep.subr.bf16.mxu1 %v8060_v26  ;;  %v10891_v26 = vld [vmem:[#allocation17_spill] sm:$0xff] }
 0x2bd   :  { %5611 = vmatpush1.bf16.msra.mxu1 %v8076_v31  ;;  %v10892_v31 = vld [vmem:[#allocation18_spill] sm:$0xff] }
 0x2be   :  { %6239 = vmatpush1.bf16.msra.mxu0 %v8646_v18  ;;  %5613 = vmatprep.subr.bf16.mxu1 %v8080_v32  ;;  %v10893_v32 = vld [vmem:[#allocation19_spill] sm:$0xff] }
 0x2bf   :  { %6241 = vmatprep.subr.bf16.mxu0 %v8650_v22 }
 0x2c1   :  { %5615 = vmatpush1.bf16.msra.mxu1 %v8096_v37  ;;  %v10894_v37 = vld [vmem:[#allocation20_spill] sm:$0xff] }
 0x2c2   :  { %6243 = vmatpush1.bf16.msra.mxu0 %v8655_v35  ;;  %5617 = vmatprep.subr.bf16.mxu1 %v8100_v38  ;;  %v10895_v38 = vld [vmem:[#allocation21_spill] sm:$0xff] }
 0x2c3   :  { %6245 = vmatprep.subr.bf16.mxu0 %v8658_v36 }
 0x2c5   :  { %5619 = vmatpush1.bf16.msra.mxu1 %v8119_v44  ;;  %v10896_v44 = vld [vmem:[#allocation22_spill] sm:$0xff] }
 0x2c6   :  { %6247 = vmatpush1.bf16.msra.mxu0 %v8663_v49  ;;  %5621 = vmatprep.subr.bf16.mxu1 %v8123_v45  ;;  %v10897_v45 = vld [vmem:[#allocation23_spill] sm:$0xff] }
 0x2c7   :  { %6249 = vmatprep.subr.bf16.mxu0 %v8666_v53 }
 0x2c9   :  { %5623 = vmatpush1.bf16.msra.mxu1 %v8139_v50  ;;  %v10898_v50 = vld [vmem:[#allocation24_spill] sm:$0xff] }
 0x2ca   :  { %6251 = vmatpush1.bf16.msra.mxu0 %v8671_v4  ;;  %5625 = vmatprep.subr.bf16.mxu1 %v8143_v51  ;;  %v10899_v51 = vld [vmem:[#allocation25_spill] sm:$0xff] }
 0x2cb   :  { %6253 = vmatprep.subr.bf16.mxu0 %v8674_v12 }
 0x2cd   :  { %5627 = vmatpush1.bf16.msra.mxu1 %v8159_v56  ;;  %v10900_v56 = vld [vmem:[#allocation26_spill] sm:$0xff] }
 0x2ce   :  { %6255 = vmatpush1.bf16.msra.mxu0 %v8679_v30  ;;  %5629 = vmatprep.subr.bf16.mxu1 %v8163_v57  ;;  %v10901_v57 = vld [vmem:[#allocation27_spill] sm:$0xff] }
 0x2cf   :  { %6257 = vmatprep.subr.bf16.mxu0 %v10889_v20 }
 0x2d1   :  { %5631 = vmatpush1.bf16.msra.mxu1 %v8179_v62  ;;  %v10902_v62 = vld [vmem:[#allocation28_spill] sm:$0xff] }
 0x2d2   :  { %6259 = vmatpush1.bf16.msra.mxu0 %v10890_v25  ;;  %5633 = vmatprep.subr.bf16.mxu1 %v8183_v63  ;;  %v10903_v63 = vld [vmem:[#allocation29_spill] sm:$0xff] }
 0x2d3   :  { %6261 = vmatprep.subr.bf16.mxu0 %v10891_v26 }
 0x2d5   :  { %5635 = vmatpush1.bf16.msra.mxu1 %v8199_v5  ;;  %v10904_v5 = vld [vmem:[#allocation30_spill] sm:$0xff] }
 0x2d6   :  { %6263 = vmatpush1.bf16.msra.mxu0 %v10892_v31  ;;  %5637 = vmatprep.subr.bf16.mxu1 %v8203_v6  ;;  %v1186_v6 = vld [vmem:[%s10397_s0 + $0x70] sm:$0xff] }
 0x2d7   :  { %6265 = vmatprep.subr.bf16.mxu0 %v10893_v32  ;;  %1251 = vmatprep.mubr.f32.mxu1 %v1186_v6  ;;  %v10908_v6 = vld [vmem:[#allocation34_spill] sm:$0xff] }
 0x2d9   :  { %5639 = vmatpush1.bf16.msra.mxu1 %v8219_v15  ;;  %v10905_v15 = vld [vmem:[#allocation31_spill] sm:$0xff] }
 0x2da   :  { %6267 = vmatpush1.bf16.msra.mxu0 %v10894_v37  ;;  %5641 = vmatprep.subr.bf16.mxu1 %v8223_v16  ;;  %v1185_v16 = vld [vmem:[%s10397_s0 + $0x68] sm:$0xff] }
 0x2db   :  { %6269 = vmatprep.subr.bf16.mxu0 %v10895_v38 }
 0x2dd   :  { %5643 = vmatpush1.bf16.msra.mxu1 %v8239_v23  ;;  %v1851_v23 = vld [vmem:[#allocation5 + $0x80] sm:$0xff] }
 0x2de   :  { %6271 = vmatpush1.bf16.msra.mxu0 %v10896_v44  ;;  %5645 = vmatprep.subr.bf16.mxu1 %v8243_v24  ;;  %v1852_v24 = vld [vmem:[#allocation5 + $0x88] sm:$0xff] }
 0x2df   :  { %6273 = vmatprep.subr.bf16.mxu0 %v10897_v45 }
 0x2e1   :  { %5647 = vmatpush1.bf16.msra.mxu1 %v8259_v33  ;;  %v5912_v33 = vpack.c.bf16 %v1852_v24, %v1851_v23  ;;  %v1855_v23 = vld [vmem:[#allocation5 + $0xa0] sm:$0xff]  ;;  %v1856_v24 = vld [vmem:[#allocation5 + $0xa8] sm:$0xff] }
 0x2e2   :  { %6275 = vmatpush1.bf16.msra.mxu0 %v10898_v50  ;;  %5649 = vmatprep.subr.bf16.mxu1 %v8263_v34  ;;  %v1835_v34 = vld [vmem:[#allocation5] sm:$0xff] }
 0x2e3   :  { %6277 = vmatprep.subr.bf16.mxu0 %v10899_v51 }
 0x2e5   :  { %5651 = vmatpush1.bf16.msra.mxu1 %v8279_v41  ;;  %v1836_v41 = vld [vmem:[#allocation5 + $0x8] sm:$0xff] }
 0x2e6   :  { %6279 = vmatpush1.bf16.msra.mxu0 %v10900_v56  ;;  %5653 = vmatprep.subr.bf16.mxu1 %v8283_v42  ;;  %v5914_v42 = vpack.c.bf16 %v1836_v41, %v1835_v34  ;;  %v5920_v41 = vpack.c.bf16 %v1856_v24, %v1855_v23  ;;  %v1842_v23 = vld [vmem:[#allocation5 + $0x38] sm:$0xff] }
 0x2e7   :  { %6281 = vmatprep.subr.bf16.mxu0 %v10901_v57  ;;  %v5926_v24 = vpack.c.bf16 %v1842_v23, %v1841_v54  ;;  %v1862_v54 = vld [vmem:[#allocation5 + $0xd8] sm:$0xff] }
 0x2e9   :  { %5655 = vmatpush1.bf16.msra.mxu1 %v8293_v47  ;;  %v10906_v47 = vld [vmem:[#allocation32_spill] sm:$0xff] }
 0x2ea   :  { %6283 = vmatpush1.bf16.msra.mxu0 %v10902_v62  ;;  %5913 = vmatprep.subr.bf16.mxu1 %v5912_v33  ;;  %v9337_v33 = vld [vmem:[%s10406_s9 + $0x48] sm:$0xff] }
 0x2eb   :  { %6285 = vmatprep.subr.bf16.mxu0 %v10903_v63  ;;  %10910 = vst [vmem:[#allocation15_spill] sm:$0xff] %v9337_v33  ;;  %v10641_v34 = vmax.f32 %v9337_v33, 0.0 }
 0x2ec   :  { %1252 = vmatmul.mubr.f32.vlgmr.msra.gmra.mrb[14].mxu1 %v1185_v16  ;;  %v10909_v16 = vld [vmem:[#allocation35_spill] sm:$0xff] }
 0x2ed   :  { %5915 = vmatpush3.bf16.msra.mxu1 %v5914_v42  ;;  %v1839_v42 = vld [vmem:[#allocation5 + $0x20] sm:$0xff] }
 0x2ee   :  { %6287 = vmatpush1.bf16.msra.mxu0 %v10904_v5  ;;  %5917 = vmatprep.subr.bf16.mxu1 %v5916_v17  ;;  %v5922_v52 = vpack.c.bf16 %v1840_v43, %v1839_v42  ;;  %v10911_v17 = vld [vmem:[#allocation38_spill] sm:$0xff]  ;;  %v1860_v43 = vld [vmem:[#allocation5 + $0xc8] sm:$0xff] }
 0x2ef   :  { %6289 = vmatprep.subr.bf16.mxu0 %v10905_v15  ;;  %v1859_v42 = vld [vmem:[#allocation5 + $0xc0] sm:$0xff] }
 0x2f0   :  { %v5928_v33 = vpack.c.bf16 %v1860_v43, %v1859_v42 }
 0x2f1   :  { %5919 = vmatpush3.bf16.msra.mxu1 %v5918_v14  ;;  %v1858_v14 = vld [vmem:[#allocation5 + $0xb8] sm:$0xff] }
 0x2f2   :  { %6291 = vmatpush1.bf16.msra.mxu0 %v10906_v47  ;;  %5921 = vmatprep.subr.bf16.mxu1 %v5920_v41  ;;  %v5924_v3 = vpack.c.bf16 %v1858_v14, %v1857_v0  ;;  %v10915_v41 = vld [vmem:[#allocation42_spill] sm:$0xff]  ;;  %v1861_v14 = vld [vmem:[#allocation5 + $0xd0] sm:$0xff] }
 0x2f3   :  { %6293 = vmatprep.subr.bf16.mxu0 %v10907_v28 }
 0x2f5   :  { %5923 = vmatpush3.bf16.msra.mxu1 %v5922_v52  ;;  %v10916_v52 = vld [vmem:[#allocation43_spill] sm:$0xff] }
 0x2f6   :  { %6295 = vmatpush1.bf16.msra.mxu0 %v10908_v6  ;;  %5925 = vmatprep.subr.bf16.mxu1 %v5924_v3 }
 0x2f7   :  { %6297 = vmatprep.subr.bf16.mxu0 %v10909_v16 }
 0x2f9   :  { %2410 = vmatmul.mubr.f32.vlgmr.msra.gmra.mrb[14].mxu0 %v10639_v8  ;;  %v10914_v8 = vld [vmem:[#allocation41_spill] sm:$0xff]  ;;  %5927 = vmatpush3.bf16.msra.mxu1 %v5926_v24 }
 0x2fa   :  { %6299 = vmatpush1.bf16.msra.mxu0 %v10911_v17  ;;  %2480 = vmatprep.mubr.f32.mxu0 %v10641_v34  ;;  %v1843_v34 = vld [vmem:[#allocation5 + $0x40] sm:$0xff] }
 0x2fb   :  { %6301 = vmatprep.subr.bf16.mxu0 %v10912_v59  ;;  %v5930_v7 = vpack.c.bf16 %v1844_v55, %v1843_v34  ;;  %5929 = vmatprep.subr.bf16.mxu1 %v5928_v33  ;;  %v1846_v59 = vld [vmem:[#allocation5 + $0x58] sm:$0xff]  ;;  %v10918_v55 = vld [vmem:[#allocation44_spill] sm:$0xff]  ;;  %v1864_v34 = vld [vmem:[#allocation5 + $0xe8] sm:$0xff] }
 0x2fc   :  { %v10919_v33 = vld [vmem:[#allocation45_spill] sm:$0xff] }
 0x2fd   :  { %5931 = vmatpush3.bf16.msra.mxu1 %v5930_v7  ;;  %v1863_v7 = vld [vmem:[#allocation5 + $0xe0] sm:$0xff] }
 0x2fe   :  { %6303 = vmatpush1.bf16.msra.mxu0 %v10913_v27  ;;  %v1845_v27 = vld [vmem:[#allocation5 + $0x50] sm:$0xff]  ;;  %v5936_v43 = vpack.c.bf16 %v1864_v34, %v1863_v7  ;;  %v10923_v7 = vld [vmem:[#allocation50_spill] sm:$0xff]  ;;  %v10924_v34 = vld [vmem:[#allocation51_spill] sm:$0xff] }
 0x2ff   :  { %6305 = vmatprep.subr.bf16.mxu0 %v10914_v8  ;;  %v779_v0 = vpop.f32.mrb[8].mxu1  ;;  %v5932_v8 = vpack.c.bf16 %v1862_v54, %v1861_v14  ;;  %v5934_v42 = vpack.c.bf16 %v1846_v59, %v1845_v27  ;;  %v1848_v27 = vld [vmem:[#allocation5 + $0x68] sm:$0xff]  ;;  %v10920_v14 = vld [vmem:[#allocation46_spill] sm:$0xff]  ;;  %v1866_v54 = vld [vmem:[#allocation5 + $0xf8] sm:$0xff] }
 0x300   :  { %v780_v3 = vadd.f32 %v779_v0, %v8510_v10  ;;  %v781_v23 = vpop.f32.mrb[9].mxu1  ;;  %v1847_v0 = vld [vmem:[#allocation5 + $0x60] sm:$0xff] }
 0x301   :  { %v9352_v24 = vadd.f32 %v781_v23, %v8516_v11  ;;  %5933 = vmatprep.subr.bf16.mxu1 %v5932_v8  ;;  %v5938_v59 = vpack.c.bf16 %v1848_v27, %v1847_v0  ;;  %v1865_v8 = vld [vmem:[#allocation5 + $0xf0] sm:$0xff]  ;;  %v10926_v0 = vld [vmem:[#allocation53_spill] sm:$0xff]  ;;  %v10927_v27 = vld [vmem:[#allocation54_spill] sm:$0xff] }
 0x302   :  { %6307 = vmatpush1.bf16.msra.mxu0 %v10915_v41  ;;  %784 = vst [vmem:[%s10406_s9 + $0x70] sm:$0xff] %v780_v3  ;;  %5935 = vmatpush3.bf16.msra.mxu1 %v5934_v42  ;;  %v5940_v3 = vpack.c.bf16 %v1866_v54, %v1865_v8  ;;  %v1849_v23 = vld [vmem:[#allocation5 + $0x70] sm:$0xff]  ;;  %v10922_v42 = vld [vmem:[#allocation49_spill] sm:$0xff]  ;;  %v10931_v54 = vld [vmem:[#allocation58_spill] sm:$0xff] }
 0x303   :  { %6309 = vmatprep.subr.bf16.mxu0 %v10916_v52  ;;  %10917 = vst [vmem:[#allocation18_spill] sm:$0xff] %v9352_v24  ;;  %785 = vst [vmem:[%s10406_s9 + $0x78] sm:$0xff] %v9352_v24  ;;  %5937 = vmatprep.subr.bf16.mxu1 %v5936_v43  ;;  %v10921_v24 = vld [vmem:[#allocation48_spill] sm:$0xff]  ;;  %v10930_v8 = vld [vmem:[#allocation57_spill] sm:$0xff] }
 0x304   :  { %v10925_v43 = vld [vmem:[#allocation52_spill] sm:$0xff] }
 0x306   :  { %6311 = vmatpush1.bf16.msra.mxu0 %v10918_v55  ;;  %5939 = vmatpush3.bf16.msra.mxu1 %v5938_v59  ;;  %v10928_v59 = vld [vmem:[#allocation55_spill] sm:$0xff] }
 0x307   :  { %6313 = vmatprep.subr.bf16.mxu0 %v10919_v33  ;;  %v1850_v33 = vld [vmem:[#allocation5 + $0x78] sm:$0xff]  ;;  %5941 = vmatprep.subr.bf16.mxu1 %v5940_v3  ;;  %v10933_v3 = vld [vmem:[#allocation60_spill] sm:$0xff] }
 0x308   :  { %v5942_v55 = vpack.c.bf16 %v1850_v33, %v1849_v23  ;;  %v10929_v33 = vld [vmem:[#allocation56_spill] sm:$0xff]  ;;  %v10934_v23 = vld [vmem:[#allocation61_spill] sm:$0xff] }
 0x30a   :  { %6315 = vmatpush1.bf16.msra.mxu0 %v10920_v14  ;;  %5943 = vmatpush3.bf16.msra.mxu1 %v5942_v55  ;;  %v10932_v55 = vld [vmem:[#allocation59_spill] sm:$0xff] }
 0x30b   :  { %6317 = vmatprep.subr.bf16.mxu0 %v8824_v40  ;;  %5945 = vmatprep.subr.bf16.mxu1 %v8616_v46  ;;  %v10935_v46 = vld [vmem:[#allocation62_spill] sm:$0xff] }
 0x30e   :  { %6319 = vmatpush1.bf16.msra.mxu0 %v10921_v24 }
 0x30f   :  { %6321 = vmatprep.subr.bf16.mxu0 %v10922_v42 }
 0x312   :  { %6323 = vmatpush1.bf16.msra.mxu0 %v10923_v7 }
 0x313   :  { %6325 = vmatprep.subr.bf16.mxu0 %v10924_v34 }
 0x316   :  { %6327 = vmatpush1.bf16.msra.mxu0 %v10925_v43  ;;  %v10936_v43 = vld [vmem:[#allocation63_spill] sm:$0xff] }
 0x317   :  { %6329 = vmatprep.subr.bf16.mxu0 %v10926_v0  ;;  %v10937_v0 = vld [vmem:[#allocation64_spill] sm:$0xff] }
 0x31a   :  { %6331 = vmatpush1.bf16.msra.mxu0 %v10927_v27  ;;  %v10938_v27 = vld [vmem:[#allocation65_spill] sm:$0xff] }
 0x31b   :  { %6333 = vmatprep.subr.bf16.mxu0 %v10928_v59  ;;  %v10939_v59 = vld [vmem:[#allocation66_spill] sm:$0xff] }
 0x31e   :  { %6335 = vmatpush1.bf16.msra.mxu0 %v10929_v33  ;;  %v10940_v33 = vld [vmem:[#allocation67_spill] sm:$0xff] }
 0x31f   :  { %6337 = vmatprep.subr.bf16.mxu0 %v10930_v8  ;;  %v10941_v8 = vld [vmem:[#allocation68_spill] sm:$0xff] }
 0x322   :  { %6339 = vmatpush1.bf16.msra.mxu0 %v10931_v54 }
 0x323   :  { %6341 = vmatprep.subr.bf16.mxu0 %v10932_v55  ;;  %v10651_v55 = vmax.f32 %v9270_v19, 0.0  ;;  %v10951_v19 = vld [vmem:[#allocation77_spill] sm:$0xff] }
 0x326   :  { %6343 = vmatpush1.bf16.msra.mxu0 %v10933_v3  ;;  %v10949_v3 = vld [vmem:[#allocation75_spill] sm:$0xff] }
 0x327   :  { %6345 = vmatprep.subr.bf16.mxu0 %v10934_v23  ;;  %v9391_v23 = vld [vmem:[%s10406_s9 + $0x40] sm:$0xff] }
 0x328   :  { %10942 = vst [vmem:[#allocation19_spill] sm:$0xff] %v9391_v23 }
 0x32a   :  { %6347 = vmatpush1.bf16.msra.mxu0 %v10935_v46  ;;  %v10649_v46 = vmax.f32 %v9391_v23, 0.0 }
 0x32b   :  { %6349 = vmatprep.subr.bf16.mxu0 %v10936_v43  ;;  %v10943_v43 = vld [vmem:[#allocation69_spill] sm:$0xff] }
 0x32e   :  { %6351 = vmatpush1.bf16.msra.mxu0 %v10937_v0  ;;  %v10948_v0 = vld [vmem:[#allocation74_spill] sm:$0xff] }
 0x32f   :  { %6353 = vmatprep.subr.bf16.mxu0 %v10938_v27  ;;  %v10944_v27 = vld [vmem:[#allocation70_spill] sm:$0xff] }
 0x332   :  { %6355 = vmatpush1.bf16.msra.mxu0 %v10939_v59  ;;  %v10947_v59 = vld [vmem:[#allocation73_spill] sm:$0xff] }
 0x333   :  { %6357 = vmatprep.subr.bf16.mxu0 %v10940_v33  ;;  %v10946_v33 = vld [vmem:[#allocation72_spill] sm:$0xff] }
 0x336   :  { %6359 = vmatpush1.bf16.msra.mxu0 %v10941_v8  ;;  %v10945_v8 = vld [vmem:[#allocation71_spill] sm:$0xff] }
 0x337   :  { %6361 = vmatprep.subr.bf16.mxu0 %v10943_v43 }
 0x339   :  { %2481 = vmatmul.mubr.f32.vlgmr.msra.gmra.mrb[14].mxu0 %v10649_v46  ;;  %v10950_v46 = vld [vmem:[#allocation76_spill] sm:$0xff] }
 0x33a   :  { %6363 = vmatpush1.bf16.msra.mxu0 %v10944_v27  ;;  %2551 = vmatprep.mubr.f32.mxu0 %v10651_v55  ;;  %v10952_v55 = vld [vmem:[#allocation78_spill] sm:$0xff] }
 0x33b   :  { %6365 = vmatprep.subr.bf16.mxu0 %v10945_v8 }
 0x33e   :  { %6367 = vmatpush1.bf16.msra.mxu0 %v10946_v33  ;;  %v10961_v33 = vld [vmem:[#allocation87_spill] sm:$0xff] }
 0x33f   :  { %6369 = vmatprep.subr.bf16.mxu0 %v10947_v59  ;;  %v937_v54 = vpop.f32.mrb[10].mxu1  ;;  %v10959_v59 = vld [vmem:[#allocation85_spill] sm:$0xff] }
 0x340   :  { %v938_v43 = vadd.f32 %v937_v54, %v8510_v10  ;;  %v939_v23 = vpop.f32.mrb[11].mxu1  ;;  %v10954_v54 = vld [vmem:[#allocation80_spill] sm:$0xff] }
 0x341   :  { %v940_v27 = vadd.f32 %v939_v23, %v8516_v11  ;;  %v10957_v23 = vld [vmem:[#allocation83_spill] sm:$0xff] }
 0x342   :  { %6371 = vmatpush1.bf16.msra.mxu0 %v10948_v0  ;;  %942 = vst [vmem:[%s10406_s9 + $0x90] sm:$0xff] %v938_v43  ;;  %v10955_v0 = vld [vmem:[#allocation81_spill] sm:$0xff]  ;;  %v10960_v43 = vld [vmem:[#allocation86_spill] sm:$0xff] }
 0x343   :  { %6373 = vmatprep.subr.bf16.mxu0 %v10949_v3  ;;  %943 = vst [vmem:[%s10406_s9 + $0x98] sm:$0xff] %v940_v27  ;;  %v10953_v3 = vld [vmem:[#allocation79_spill] sm:$0xff]  ;;  %v10962_v27 = vld [vmem:[#allocation88_spill] sm:$0xff] }
 0x346   :  { %6375 = vmatpush1.bf16.msra.mxu0 %v10950_v46  ;;  %v10956_v46 = vld [vmem:[#allocation82_spill] sm:$0xff] }
 0x347   :  { %6377 = vmatprep.subr.bf16.mxu0 %v10951_v19  ;;  %v10958_v19 = vld [vmem:[#allocation84_spill] sm:$0xff] }
 0x34a   :  { %6379 = vmatpush1.bf16.msra.mxu0 %v10952_v55  ;;  %v10963_v55 = vld [vmem:[#allocation89_spill] sm:$0xff] }
 0x34b   :  { %6381 = vmatprep.subr.bf16.mxu0 %v10953_v3  ;;  %v10964_v3 = vld [vmem:[#allocation90_spill] sm:$0xff] }
 0x34e   :  { %6383 = vmatpush1.bf16.msra.mxu0 %v10954_v54  ;;  %v10965_v54 = vld [vmem:[#allocation91_spill] sm:$0xff] }
 0x34f   :  { %6385 = vmatprep.subr.bf16.mxu0 %v10955_v0  ;;  %v10966_v0 = vld [vmem:[#allocation92_spill] sm:$0xff] }
 0x352   :  { %6387 = vmatpush1.bf16.msra.mxu0 %v10956_v46  ;;  %v10967_v46 = vld [vmem:[#allocation93_spill] sm:$0xff] }
 0x353   :  { %6389 = vmatprep.subr.bf16.mxu0 %v10957_v23  ;;  %v10968_v23 = vld [vmem:[#allocation94_spill] sm:$0xff] }
 0x356   :  { %6391 = vmatpush1.bf16.msra.mxu0 %v10958_v19  ;;  %v10969_v19 = vld [vmem:[#allocation95_spill] sm:$0xff] }
 0x357   :  { %6393 = vmatprep.subr.bf16.mxu0 %v10959_v59  ;;  %v10970_v59 = vld [vmem:[#allocation96_spill] sm:$0xff] }
 0x35a   :  { %6395 = vmatpush1.bf16.msra.mxu0 %v10960_v43  ;;  %v10971_v43 = vld [vmem:[#allocation97_spill] sm:$0xff] }
 0x35b   :  { %6397 = vmatprep.subr.bf16.mxu0 %v10961_v33  ;;  %v10972_v33 = vld [vmem:[#allocation98_spill] sm:$0xff] }
 0x35e   :  { %6399 = vmatpush1.bf16.msra.mxu0 %v10962_v27  ;;  %v10973_v27 = vld [vmem:[#allocation99_spill] sm:$0xff] }
 0x35f   :  { %6401 = vmatprep.subr.bf16.mxu0 %v10963_v55  ;;  %v10974_v55 = vld [vmem:[#allocation100_spill] sm:$0xff] }
 0x362   :  { %6403 = vmatpush1.bf16.msra.mxu0 %v10964_v3  ;;  %v10975_v3 = vld [vmem:[#allocation101_spill] sm:$0xff] }
 0x363   :  { %6405 = vmatprep.subr.bf16.mxu0 %v10965_v54  ;;  %v10653_v54 = vmax.f32 %v9267_v13, 0.0 }
 0x366   :  { %6407 = vmatpush1.bf16.msra.mxu0 %v10966_v0 }
 0x367   :  { %6409 = vmatprep.subr.bf16.mxu0 %v10967_v46 }
 0x36a   :  { %6411 = vmatpush1.bf16.msra.mxu0 %v10968_v23  ;;  %v9443_v23 = vld [vmem:[%s10406_s9 + $0x68] sm:$0xff] }
 0x36b   :  { %6413 = vmatprep.subr.bf16.mxu0 %v10969_v19  ;;  %10976 = vst [vmem:[#allocation23_spill] sm:$0xff] %v9443_v23  ;;  %v10654_v19 = vmax.f32 %v9443_v23, 0.0 }
 0x36e   :  { %6415 = vmatpush1.bf16.msra.mxu0 %v10970_v59  ;;  %v10982_v59 = vld [vmem:[#allocation110_spill] sm:$0xff] }
 0x36f   :  { %6417 = vmatprep.subr.bf16.mxu0 %v10971_v43  ;;  %v10977_v43 = vld [vmem:[#allocation104_spill] sm:$0xff] }
 0x372   :  { %6419 = vmatpush1.bf16.msra.mxu0 %v10972_v33  ;;  %v10981_v33 = vld [vmem:[#allocation109_spill] sm:$0xff] }
 0x373   :  { %6421 = vmatprep.subr.bf16.mxu0 %v10973_v27  ;;  %v10979_v27 = vld [vmem:[#allocation107_spill] sm:$0xff] }
 0x376   :  { %6423 = vmatpush1.bf16.msra.mxu0 %v10974_v55  ;;  %v10978_v55 = vld [vmem:[#allocation105_spill] sm:$0xff] }
 0x377   :  { %6425 = vmatprep.subr.bf16.mxu0 %v10975_v3  ;;  %v10980_v3 = vld [vmem:[#allocation108_spill] sm:$0xff] }
 0x379   :  { %2552 = vmatmul.mubr.f32.vlgmr.msra.gmra.mrb[14].mxu0 %v10653_v54  ;;  %v10983_v54 = vld [vmem:[#allocation111_spill] sm:$0xff] }
 0x37a   :  { %6427 = vmatpush1.bf16.msra.mxu0 %v10977_v43  ;;  %2622 = vmatprep.mubr.f32.mxu0 %v10654_v19  ;;  %v1520_v19 = vld [vmem:[%s10401_s4] sm:$0x3] }
 0x37b   :  { %6429 = vmatprep.subr.bf16.mxu0 %v10978_v55  ;;  %v10984_v55 = vld [vmem:[#allocation112_spill] sm:$0xff] }
 0x37e   :  { %6431 = vmatpush1.bf16.msra.mxu0 %v10979_v27 }
 0x37f   :  { %6433 = vmatprep.subr.bf16.mxu0 %v10980_v3  ;;  %v1095_v46 = vpop.f32.mrb[12].mxu1 }
 0x380   :  { %v1096_v0 = vadd.f32 %v1095_v46, %v8510_v10  ;;  %v1097_v13 = vpop.f32.mrb[13].mxu1  ;;  %v10985_v46 = vld [vmem:[#allocation10_spill] sm:$0xff] }
 0x381   :  { %v1098_v23 = vadd.f32 %v1097_v13, %v8516_v11  ;;  %v10989_v3 = vsub.s32 1, %v10985_v46 }
 0x382   :  { %6435 = vmatpush1.bf16.msra.mxu0 %v10981_v33  ;;  %1100 = vst [vmem:[%s10406_s9 + $0xb0] sm:$0xff] %v1096_v0 }
 0x383   :  { %6437 = vmatprep.subr.bf16.mxu0 %v10982_v59  ;;  %1101 = vst [vmem:[%s10406_s9 + $0xb8] sm:$0xff] %v1098_v23  ;;  %v10986_v59 = vsub.s32 0, %v10985_v46  ;;  %v9476_v27 = vrot.slane %v1520_v19, %v10989_v3  ;;  %v10992_v23 = vld [vmem:[#allocation117_spill] sm:$0xff]  ;;  %v10993_v46 = vld [vmem:[#allocation118_spill] sm:$0xff] }
 0x385   :  { %v9471_v33 = vrot.slane %v1520_v19, %v10986_v59  ;;  %10990 = vst [vmem:[#allocation139_spill] sm:$0xff] %v9476_v27  ;;  %v10991_v59 = vld [vmem:[#allocation116_spill] sm:$0xff] }
 0x386   :  { %6439 = vmatpush1.bf16.msra.mxu0 %v10983_v54  ;;  %v10988_v54 = vld [vmem:[#allocation113_spill] sm:$0xff] }
 0x387   :  { %6441 = vmatprep.subr.bf16.mxu0 %v10984_v55  ;;  %10987 = vst [vmem:[#allocation10_spill] sm:$0xff] %v9471_v33 }
 0x38a   :  { %6443 = vmatpush1.bf16.msra.mxu0 %v10988_v54 }
 0x38b   :  { %6445 = vmatprep.subr.bf16.mxu0 %v9137_v29 }
 0x38c   :  { %v1826_v13 = vpop.f32.mrb[12].mxu0 }
 0x38d   :  { %v7696_v55 = vadd.f32 %v1826_v13, %v9471_v33  ;;  %v1828_v0 = vpop.f32.mrb[13].mxu0  ;;  %v10994_v13 = vld [vmem:[#allocation37_spill] sm:$0xff]  ;;  %v10997_v33 = vld [vmem:[#allocation120_spill] sm:$0xff] }
 0x38e   :  { %v7697_v43 = vadd.f32 %v1828_v0, %v9476_v27  ;;  %6447 = vmatpush1.bf16.msra.mxu0 %v9141_v48  ;;  %v10995_v0 = vmax.f32 %v10994_v13, 0.0  ;;  %v10996_v27 = vld [vmem:[#allocation119_spill] sm:$0xff]  ;;  %v11002_v13 = vld [vmem:[#allocation125_spill] sm:$0xff] }
 0x38f   :  { %1831 = vst [vmem:[%s10407_s10] sm:$0xff] %v7696_v55  ;;  %6449 = vmatprep.subr.bf16.mxu0 %v10991_v59  ;;  %v1833_v3 = vmax.f32 %v7696_v55, 0.0  ;;  %v10998_v55 = vld [vmem:[#allocation121_spill] sm:$0xff] }
 0x390   :  { %1832 = vst [vmem:[%s10407_s10 + $0x8] sm:$0xff] %v7697_v43  ;;  %v1834_v19 = vmax.f32 %v7697_v43, 0.0  ;;  %v10999_v43 = vld [vmem:[#allocation122_spill] sm:$0xff] }
 0x392   :  { %1931 = vmatprep.mubr.f32.mxu1 %v1834_v19  ;;  %6451 = vmatpush1.bf16.msra.mxu0 %v10992_v23  ;;  %v11000_v19 = vld [vmem:[#allocation123_spill] sm:$0xff] }
 0x393   :  { %1932 = vmatmul.mubr.f32.vlgmr.msra.gmra.mrb[16].mxu1 %v1833_v3  ;;  %6453 = vmatprep.subr.bf16.mxu0 %v10993_v46  ;;  %v11001_v3 = vld [vmem:[#allocation124_spill] sm:$0xff] }
 0x394   :  { %5947 = vmatpush1.bf16.msra.mxu1 %v8634_v60  ;;  %2010 = vmatprep.mubr.f32.mxu1 %v10995_v0  ;;  %v11003_v0 = vld [vmem:[#allocation126_spill] sm:$0xff] }
 0x395   :  { %5949 = vmatprep.subr.bf16.mxu1 %v8641_v61 }
 0x396   :  { %6455 = vmatpush1.bf16.msra.mxu0 %v10996_v27 }
 0x397   :  { %6457 = vmatprep.subr.bf16.mxu0 %v10997_v33 }
 0x398   :  { %5951 = vmatpush1.bf16.msra.mxu1 %v8646_v18 }
 0x399   :  { %5953 = vmatprep.subr.bf16.mxu1 %v8650_v22  ;;  %v11004_v22 = vld [vmem:[#allocation127_spill] sm:$0xff] }
 0x39a   :  { %6459 = vmatpush1.bf16.msra.mxu0 %v10998_v55 }
 0x39b   :  { %6461 = vmatprep.subr.bf16.mxu0 %v10999_v43 }
 0x39c   :  { %5955 = vmatpush1.bf16.msra.mxu1 %v8655_v35  ;;  %v11005_v35 = vld [vmem:[#allocation128_spill] sm:$0xff] }
 0x39d   :  { %5957 = vmatprep.subr.bf16.mxu1 %v8658_v36 }
 0x39e   :  { %6463 = vmatpush1.bf16.msra.mxu0 %v11000_v19 }
 0x39f   :  { %6465 = vmatprep.subr.bf16.mxu0 %v11001_v3 }
 0x3a0   :  { %5959 = vmatpush1.bf16.msra.mxu1 %v8663_v49  ;;  %v11006_v49 = vld [vmem:[#allocation130_spill] sm:$0xff] }
 0x3a1   :  { %5961 = vmatprep.subr.bf16.mxu1 %v8666_v53 }
 0x3a2   :  { %6467 = vmatpush1.bf16.msra.mxu0 %v11002_v13 }
 0x3a3   :  { %6469 = vmatprep.subr.bf16.mxu0 %v11003_v0 }
 0x3a4   :  { %5963 = vmatpush1.bf16.msra.mxu1 %v8671_v4 }
 0x3a5   :  { %5965 = vmatprep.subr.bf16.mxu1 %v8674_v12 }
 0x3a6   :  { %6471 = vmatpush1.bf16.msra.mxu0 %v11004_v22 }
 0x3a7   :  { %6473 = vmatprep.subr.bf16.mxu0 %v11005_v35 }
 0x3a8   :  { %5967 = vmatpush1.bf16.msra.mxu1 %v8679_v30 }
 0x3a9   :  { %5969 = vmatprep.subr.bf16.mxu1 %v10889_v20 }
 0x3aa   :  { %6475 = vmatpush1.bf16.msra.mxu0 %v9205_v1 }
 0x3ab   :  { %6477 = vmatprep.subr.bf16.mxu0 %v11006_v49 }
 0x3ac   :  { %5971 = vmatpush1.bf16.msra.mxu1 %v10890_v25 }
 0x3ad   :  { %5973 = vmatprep.subr.bf16.mxu1 %v10891_v26  ;;  %v9531_v26 = vld [vmem:[%s10406_s9 + $0x60] sm:$0xff] }
 0x3ae   :  { %6479 = vmatpush1.bf16.msra.mxu0 %v9213_v2  ;;  %11007 = vst [vmem:[#allocation37_spill] sm:$0xff] %v9531_v26  ;;  %v10671_v25 = vmax.f32 %v9531_v26, 0.0  ;;  %v11014_v26 = vld [vmem:[#allocation41_spill] sm:$0xff] }
 0x3af   :  { %6481 = vmatprep.subr.bf16.mxu0 %v9217_v39 }
 0x3b0   :  { %5975 = vmatpush1.bf16.msra.mxu1 %v10892_v31 }
 0x3b1   :  { %5977 = vmatprep.subr.bf16.mxu1 %v10893_v32 }
 0x3b2   :  { %6483 = vmatpush1.bf16.msra.mxu0 %v9221_v58 }
 0x3b3   :  { %6485 = vmatprep.subr.bf16.mxu0 %v9228_v21 }
 0x3b4   :  { %5979 = vmatpush1.bf16.msra.mxu1 %v10894_v37 }
 0x3b5   :  { %5981 = vmatprep.subr.bf16.mxu1 %v10895_v38 }
 0x3b6   :  { %6487 = vmatpush1.bf16.msra.mxu0 %v9235_v9 }
 0x3b8   :  { %5983 = vmatpush1.bf16.msra.mxu1 %v10896_v44 }
 0x3b9   :  { %2623 = vmatmul.mubr.f32.vlgmr.msra.gmra.mrb[14].mxu0 %v10671_v25  ;;  %5985 = vmatprep.subr.bf16.mxu1 %v10897_v45 }
 0x3bc   :  { %5987 = vmatpush1.bf16.msra.mxu1 %v10898_v50 }
 0x3bd   :  { %5989 = vmatprep.subr.bf16.mxu1 %v10899_v51 }
 0x3bf   :  { %v1253_v38 = vpop.f32.mrb[14].mxu1 }
 0x3c0   :  { %5991 = vmatpush1.bf16.msra.mxu1 %v10900_v56  ;;  %v1254_v44 = vadd.f32 %v1253_v38, %v8510_v10  ;;  %v1255_v37 = vpop.f32.mrb[15].mxu1  ;;  %v11008_v10 = vld [vmem:[#allocation36_spill] sm:$0xff] }
 0x3c1   :  { %5993 = vmatprep.subr.bf16.mxu1 %v10901_v57  ;;  %v1256_v25 = vadd.f32 %v1255_v37, %v8516_v11  ;;  %v11009_v11 = vmax.f32 %v11008_v10, 0.0  ;;  %v11010_v37 = vld [vmem:[#allocation106_spill] sm:$0xff]  ;;  %v11017_v10 = vld [vmem:[#allocation52_spill] sm:$0xff] }
 0x3c2   :  { %1258 = vst [vmem:[%s10406_s9 + $0xd0] sm:$0xff] %v1254_v44  ;;  %v11011_v38 = vmax.f32 %v11010_v37, 0.0  ;;  %v11012_v44 = vld [vmem:[#allocation39_spill] sm:$0xff]  ;;  %v11019_v37 = vld [vmem:[#allocation54_spill] sm:$0xff] }
 0x3c3   :  { %1259 = vst [vmem:[%s10406_s9 + $0xd8] sm:$0xff] %v1256_v25  ;;  %v11013_v25 = vld [vmem:[#allocation40_spill] sm:$0xff] }
 0x3c4   :  { %5995 = vmatpush1.bf16.msra.mxu1 %v10902_v62 }
 0x3c5   :  { %5997 = vmatprep.subr.bf16.mxu1 %v10903_v63 }
 0x3c8   :  { %5999 = vmatpush1.bf16.msra.mxu1 %v10904_v5 }
 0x3c9   :  { %6001 = vmatprep.subr.bf16.mxu1 %v10905_v15 }
 0x3cc   :  { %6003 = vmatpush1.bf16.msra.mxu1 %v10906_v47 }
 0x3cd   :  { %6005 = vmatprep.subr.bf16.mxu1 %v10907_v28 }
 0x3d0   :  { %6007 = vmatpush1.bf16.msra.mxu1 %v10908_v6  ;;  %v11015_v6 = vld [vmem:[#allocation44_spill] sm:$0xff] }
 0x3d1   :  { %6009 = vmatprep.subr.bf16.mxu1 %v10909_v16  ;;  %v11016_v16 = vld [vmem:[#allocation45_spill] sm:$0xff] }
 0x3d3   :  { %2011 = vmatmul.mubr.f32.vlgmr.msra.gmra.mrb[18].mxu1 %v11009_v11  ;;  %v11018_v11 = vld [vmem:[#allocation53_spill] sm:$0xff] }
 0x3d4   :  { %6011 = vmatpush1.bf16.msra.mxu1 %v10911_v17  ;;  %2081 = vmatprep.mubr.f32.mxu1 %v11011_v38  ;;  %v11020_v38 = vld [vmem:[#allocation55_spill] sm:$0xff] }
 0x3d5   :  { %6013 = vmatprep.subr.bf16.mxu1 %v11012_v44 }
 0x3d8   :  { %6015 = vmatpush1.bf16.msra.mxu1 %v11013_v25 }
 0x3d9   :  { %6017 = vmatprep.subr.bf16.mxu1 %v11014_v26 }
 0x3dc   :  { %6019 = vmatpush1.bf16.msra.mxu1 %v10915_v41 }
 0x3dd   :  { %6021 = vmatprep.subr.bf16.mxu1 %v10916_v52 }
 0x3e0   :  { %6023 = vmatpush1.bf16.msra.mxu1 %v11015_v6 }
 0x3e1   :  { %6025 = vmatprep.subr.bf16.mxu1 %v11016_v16  ;;  %v11021_v16 = vld [vmem:[#allocation56_spill] sm:$0xff] }
 0x3e4   :  { %6027 = vmatpush1.bf16.msra.mxu1 %v10920_v14  ;;  %v11022_v14 = vld [vmem:[#allocation57_spill] sm:$0xff] }
 0x3e5   :  { %6029 = vmatprep.subr.bf16.mxu1 %v8824_v40  ;;  %v11023_v40 = vld [vmem:[#allocation58_spill] sm:$0xff] }
 0x3e8   :  { %6031 = vmatpush1.bf16.msra.mxu1 %v10921_v24  ;;  %v11024_v24 = vld [vmem:[#allocation59_spill] sm:$0xff] }
 0x3e9   :  { %6033 = vmatprep.subr.bf16.mxu1 %v10922_v42  ;;  %v11025_v42 = vld [vmem:[#allocation60_spill] sm:$0xff] }
 0x3ec   :  { %6035 = vmatpush1.bf16.msra.mxu1 %v10923_v7  ;;  %v11026_v7 = vld [vmem:[#allocation61_spill] sm:$0xff] }
 0x3ed   :  { %6037 = vmatprep.subr.bf16.mxu1 %v10924_v34  ;;  %v11027_v34 = vld [vmem:[#allocation62_spill] sm:$0xff] }
 0x3f0   :  { %6039 = vmatpush1.bf16.msra.mxu1 %v11017_v10  ;;  %v11028_v10 = vld [vmem:[#allocation63_spill] sm:$0xff] }
 0x3f1   :  { %6041 = vmatprep.subr.bf16.mxu1 %v11018_v11  ;;  %v11029_v11 = vld [vmem:[#allocation64_spill] sm:$0xff] }
 0x3f4   :  { %6043 = vmatpush1.bf16.msra.mxu1 %v11019_v37  ;;  %v11030_v37 = vld [vmem:[#allocation65_spill] sm:$0xff] }
 0x3f5   :  { %6045 = vmatprep.subr.bf16.mxu1 %v11020_v38  ;;  %v11031_v38 = vld [vmem:[#allocation66_spill] sm:$0xff] }
 0x3f8   :  { %6047 = vmatpush1.bf16.msra.mxu1 %v11021_v16  ;;  %v11032_v16 = vld [vmem:[#allocation67_spill] sm:$0xff] }
 0x3f9   :  { %6049 = vmatprep.subr.bf16.mxu1 %v11022_v14  ;;  %v11033_v14 = vld [vmem:[#allocation68_spill] sm:$0xff] }
 0x3fc   :  { %6051 = vmatpush1.bf16.msra.mxu1 %v11023_v40  ;;  %v11034_v40 = vld [vmem:[#allocation69_spill] sm:$0xff] }
 0x3fd   :  { %6053 = vmatprep.subr.bf16.mxu1 %v11024_v24  ;;  %v11035_v24 = vld [vmem:[#allocation136_spill] sm:$0xff] }
 0x400   :  { %6055 = vmatpush1.bf16.msra.mxu1 %v11025_v42  ;;  %v11036_v42 = vmax.f32 %v11035_v24, 0.0  ;;  %v11046_v24 = vld [vmem:[#allocation78_spill] sm:$0xff] }
 0x401   :  { %6057 = vmatprep.subr.bf16.mxu1 %v11026_v7  ;;  %v11037_v7 = vld [vmem:[#allocation70_spill] sm:$0xff] }
 0x404   :  { %6059 = vmatpush1.bf16.msra.mxu1 %v11027_v34  ;;  %v11038_v34 = vld [vmem:[#allocation103_spill] sm:$0xff] }
 0x405   :  { %6061 = vmatprep.subr.bf16.mxu1 %v11028_v10  ;;  %v11039_v6 = vmax.f32 %v11038_v34, 0.0  ;;  %v11048_v34 = vld [vmem:[#allocation80_spill] sm:$0xff] }
 0x408   :  { %6063 = vmatpush1.bf16.msra.mxu1 %v11029_v11  ;;  %v11040_v11 = vld [vmem:[#allocation72_spill] sm:$0xff] }
 0x409   :  { %6065 = vmatprep.subr.bf16.mxu1 %v11030_v37  ;;  %v11041_v37 = vld [vmem:[#allocation73_spill] sm:$0xff] }
 0x40c   :  { %6067 = vmatpush1.bf16.msra.mxu1 %v11031_v38  ;;  %v11042_v38 = vld [vmem:[#allocation74_spill] sm:$0xff] }
 0x40d   :  { %6069 = vmatprep.subr.bf16.mxu1 %v11032_v16  ;;  %v11043_v16 = vld [vmem:[#allocation75_spill] sm:$0xff] }
 0x410   :  { %6071 = vmatpush1.bf16.msra.mxu1 %v11033_v14  ;;  %v11044_v14 = vld [vmem:[#allocation76_spill] sm:$0xff] }
 0x411   :  { %6073 = vmatprep.subr.bf16.mxu1 %v11034_v40  ;;  %v11045_v40 = vld [vmem:[#allocation77_spill] sm:$0xff] }
 0x413   :  { %2082 = vmatmul.mubr.f32.vlgmr.msra.gmra.mrb[18].mxu1 %v11036_v42  ;;  %v11047_v42 = vld [vmem:[#allocation79_spill] sm:$0xff] }
 0x414   :  { %6075 = vmatpush1.bf16.msra.mxu1 %v11037_v7  ;;  %2152 = vmatprep.mubr.f32.mxu1 %v11039_v6  ;;  %v11049_v6 = vld [vmem:[#allocation81_spill] sm:$0xff] }
 0x415   :  { %6077 = vmatprep.subr.bf16.mxu1 %v10945_v8  ;;  %v11050_v8 = vld [vmem:[#allocation82_spill] sm:$0xff] }
 0x418   :  { %6079 = vmatpush1.bf16.msra.mxu1 %v11040_v11  ;;  %v11051_v11 = vld [vmem:[#allocation83_spill] sm:$0xff] }
 0x419   :  { %6081 = vmatprep.subr.bf16.mxu1 %v11041_v37  ;;  %v11052_v37 = vld [vmem:[#allocation84_spill] sm:$0xff] }
 0x41c   :  { %6083 = vmatpush1.bf16.msra.mxu1 %v11042_v38  ;;  %v11053_v38 = vld [vmem:[#allocation85_spill] sm:$0xff] }
 0x41d   :  { %6085 = vmatprep.subr.bf16.mxu1 %v11043_v16  ;;  %v11054_v16 = vld [vmem:[#allocation86_spill] sm:$0xff] }
 0x420   :  { %6087 = vmatpush1.bf16.msra.mxu1 %v11044_v14  ;;  %v11055_v14 = vld [vmem:[#allocation87_spill] sm:$0xff] }
 0x421   :  { %6089 = vmatprep.subr.bf16.mxu1 %v11045_v40  ;;  %v11056_v40 = vld [vmem:[#allocation88_spill] sm:$0xff] }
 0x424   :  { %6091 = vmatpush1.bf16.msra.mxu1 %v11046_v24  ;;  %v11057_v24 = vld [vmem:[#allocation89_spill] sm:$0xff] }
 0x425   :  { %6093 = vmatprep.subr.bf16.mxu1 %v11047_v42  ;;  %v11058_v42 = vld [vmem:[#allocation90_spill] sm:$0xff] }
 0x428   :  { %6095 = vmatpush1.bf16.msra.mxu1 %v11048_v34  ;;  %v11059_v34 = vld [vmem:[#allocation91_spill] sm:$0xff] }
 0x429   :  { %6097 = vmatprep.subr.bf16.mxu1 %v11049_v6  ;;  %v11060_v6 = vld [vmem:[#allocation92_spill] sm:$0xff] }
 0x42c   :  { %6099 = vmatpush1.bf16.msra.mxu1 %v11050_v8  ;;  %v11061_v8 = vld [vmem:[#allocation93_spill] sm:$0xff] }
 0x42d   :  { %6101 = vmatprep.subr.bf16.mxu1 %v11051_v11  ;;  %v11062_v11 = vld [vmem:[#allocation94_spill] sm:$0xff] }
 0x430   :  { %6103 = vmatpush1.bf16.msra.mxu1 %v11052_v37  ;;  %v11063_v37 = vld [vmem:[#allocation95_spill] sm:$0xff] }
 0x431   :  { %6105 = vmatprep.subr.bf16.mxu1 %v11053_v38  ;;  %v11064_v38 = vld [vmem:[#allocation96_spill] sm:$0xff] }
 0x434   :  { %6107 = vmatpush1.bf16.msra.mxu1 %v11054_v16  ;;  %v11065_v16 = vld [vmem:[#allocation97_spill] sm:$0xff] }
 0x435   :  { %6109 = vmatprep.subr.bf16.mxu1 %v11055_v14  ;;  %v11066_v14 = vld [vmem:[#allocation98_spill] sm:$0xff] }
 0x438   :  { %6111 = vmatpush1.bf16.msra.mxu1 %v11056_v40  ;;  %v11067_v40 = vld [vmem:[#allocation99_spill] sm:$0xff] }
 0x439   :  { %6113 = vmatprep.subr.bf16.mxu1 %v11057_v24  ;;  %v11068_v24 = vld [vmem:[#allocation100_spill] sm:$0xff] }
 0x43c   :  { %6115 = vmatpush1.bf16.msra.mxu1 %v11058_v42  ;;  %v11069_v42 = vld [vmem:[#allocation101_spill] sm:$0xff] }
 0x43d   :  { %6117 = vmatprep.subr.bf16.mxu1 %v11059_v34  ;;  %v11070_v34 = vld [vmem:[#allocation102_spill] sm:$0xff] }
 0x440   :  { %6119 = vmatpush1.bf16.msra.mxu1 %v11060_v6  ;;  %v11071_v6 = vmax.f32 %v11070_v34, 0.0 }
 0x441   :  { %6121 = vmatprep.subr.bf16.mxu1 %v11061_v8  ;;  %v11072_v8 = vld [vmem:[#allocation104_spill] sm:$0xff] }
 0x444   :  { %6123 = vmatpush1.bf16.msra.mxu1 %v11062_v11  ;;  %v11073_v11 = vld [vmem:[#allocation15_spill] sm:$0xff] }
 0x445   :  { %6125 = vmatprep.subr.bf16.mxu1 %v11063_v37  ;;  %v11074_v7 = vmax.f32 %v11073_v11, 0.0  ;;  %v11075_v37 = vld [vmem:[#allocation105_spill] sm:$0xff] }
 0x448   :  { %6127 = vmatpush1.bf16.msra.mxu1 %v11064_v38  ;;  %v11076_v38 = vld [vmem:[#allocation107_spill] sm:$0xff] }
 0x449   :  { %6129 = vmatprep.subr.bf16.mxu1 %v11065_v16  ;;  %v11077_v16 = vld [vmem:[#allocation108_spill] sm:$0xff] }
 0x44c   :  { %6131 = vmatpush1.bf16.msra.mxu1 %v11066_v14  ;;  %v11078_v14 = vld [vmem:[#allocation109_spill] sm:$0xff] }
 0x44d   :  { %6133 = vmatprep.subr.bf16.mxu1 %v11067_v40  ;;  %v11079_v40 = vld [vmem:[#allocation110_spill] sm:$0xff] }
 0x450   :  { %6135 = vmatpush1.bf16.msra.mxu1 %v11068_v24  ;;  %v11080_v24 = vld [vmem:[#allocation111_spill] sm:$0xff] }
 0x451   :  { %6137 = vmatprep.subr.bf16.mxu1 %v11069_v42  ;;  %v11081_v42 = vld [vmem:[#allocation112_spill] sm:$0xff] }
 0x453   :  { %2153 = vmatmul.mubr.f32.vlgmr.msra.gmra.mrb[18].mxu1 %v11071_v6  ;;  %v2250_v6 = vld [vmem:[#allocation5 + $0x180] sm:$0xff] }
 0x454   :  { %6139 = vmatpush1.bf16.msra.mxu1 %v11072_v8  ;;  %2223 = vmatprep.mubr.f32.mxu1 %v11074_v7 }
 0x455   :  { %6141 = vmatprep.subr.bf16.mxu1 %v11075_v37 }
 0x458   :  { %6143 = vmatpush1.bf16.msra.mxu1 %v11076_v38 }
 0x459   :  { %6145 = vmatprep.subr.bf16.mxu1 %v11077_v16 }
 0x45c   :  { %6147 = vmatpush1.bf16.msra.mxu1 %v11078_v14 }
 0x45d   :  { %6149 = vmatprep.subr.bf16.mxu1 %v11079_v40 }
 0x460   :  { %6151 = vmatpush1.bf16.msra.mxu1 %v11080_v24 }
 0x461   :  { %6153 = vmatprep.subr.bf16.mxu1 %v11081_v42 }
 0x464   :  { %6155 = vmatpush1.bf16.msra.mxu1 %v10988_v54 }
 0x465   :  { %6157 = vmatprep.subr.bf16.mxu1 %v9137_v29 }
 0x466   :  { %v4495_v11 = vpop.f32.mrb[16].mxu1 }
 0x467   :  { %v4496_v7 = vpop.f32.mrb[17].mxu1 }
 0x468   :  { %v9644_v34 = vadd.f32 %v4496_v7, %v4495_v11  ;;  %6159 = vmatpush1.bf16.msra.mxu1 %v9141_v48  ;;  %v2251_v11 = vld [vmem:[#allocation5 + $0x188] sm:$0xff]  ;;  %v2257_v48 = vld [vmem:[#allocation5 + $0x1b8] sm:$0xff] }
 0x469   :  { %6161 = vmatprep.subr.bf16.mxu1 %v10991_v59  ;;  %v2256_v59 = vld [vmem:[#allocation5 + $0x1b0] sm:$0xff] }
 0x46c   :  { %6163 = vmatpush1.bf16.msra.mxu1 %v10992_v23  ;;  %v2239_v23 = vld [vmem:[#allocation5 + $0x128] sm:$0xff] }
 0x46d   :  { %6165 = vmatprep.subr.bf16.mxu1 %v10993_v46  ;;  %v2238_v46 = vld [vmem:[#allocation5 + $0x120] sm:$0xff] }
 0x470   :  { %6167 = vmatpush1.bf16.msra.mxu1 %v10996_v27 }
 0x471   :  { %6169 = vmatprep.subr.bf16.mxu1 %v10997_v33 }
 0x474   :  { %6171 = vmatpush1.bf16.msra.mxu1 %v10998_v55 }
 0x475   :  { %6173 = vmatprep.subr.bf16.mxu1 %v10999_v43  ;;  %v2253_v43 = vld [vmem:[#allocation5 + $0x198] sm:$0xff] }
 0x478   :  { %6175 = vmatpush1.bf16.msra.mxu1 %v11000_v19  ;;  %v11083_v19 = vld [vmem:[#allocation139_spill] sm:$0xff] }
 0x479   :  { %6177 = vmatprep.subr.bf16.mxu1 %v11001_v3 }
 0x47c   :  { %6179 = vmatpush1.bf16.msra.mxu1 %v11002_v13  ;;  %v11082_v13 = vld [vmem:[#allocation10_spill] sm:$0xff] }
 0x47d   :  { %6181 = vmatprep.subr.bf16.mxu1 %v11003_v0 }
 0x480   :  { %6183 = vmatpush1.bf16.msra.mxu1 %v11004_v22  ;;  %v2234_v22 = vld [vmem:[#allocation5 + $0x100] sm:$0xff] }
 0x481   :  { %6185 = vmatprep.subr.bf16.mxu1 %v11005_v35  ;;  %v6200_v35 = vpack.c.bf16 %v2251_v11, %v2250_v6 }
 0x484   :  { %6187 = vmatpush1.bf16.msra.mxu1 %v9205_v1  ;;  %v2235_v1 = vld [vmem:[#allocation5 + $0x108] sm:$0xff] }
 0x485   :  { %6189 = vmatprep.subr.bf16.mxu1 %v11006_v49  ;;  %v6202_v6 = vpack.c.bf16 %v2235_v1, %v2234_v22  ;;  %v6212_v22 = vpack.c.bf16 %v2257_v48, %v2256_v59  ;;  %v2241_v1 = vld [vmem:[#allocation5 + $0x138] sm:$0xff]  ;;  %v2263_v48 = vld [vmem:[#allocation5 + $0x1e8] sm:$0xff] }
 0x488   :  { %6191 = vmatpush1.bf16.msra.mxu1 %v9213_v2  ;;  %v2252_v2 = vld [vmem:[#allocation5 + $0x190] sm:$0xff] }
 0x489   :  { %6193 = vmatprep.subr.bf16.mxu1 %v9217_v39  ;;  %v6204_v11 = vpack.c.bf16 %v2253_v43, %v2252_v2  ;;  %v11084_v39 = vld [vmem:[#allocation19_spill] sm:$0xff]  ;;  %v2258_v2 = vld [vmem:[#allocation5 + $0x1c0] sm:$0xff] }
 0x48a   :  { %v11085_v55 = vmax.f32 %v11084_v39, 0.0  ;;  %v2259_v43 = vld [vmem:[#allocation5 + $0x1c8] sm:$0xff] }
 0x48b   :  { %v6216_v39 = vpack.c.bf16 %v2259_v43, %v2258_v2  ;;  %v2248_v2 = vld [vmem:[#allocation5 + $0x170] sm:$0xff]  ;;  %v2249_v43 = vld [vmem:[#allocation5 + $0x178] sm:$0xff] }
 0x48c   :  { %6195 = vmatpush1.bf16.msra.mxu1 %v9221_v58  ;;  %v2624_v7 = vpop.f32.mrb[14].mxu0  ;;  %v2255_v58 = vld [vmem:[#allocation5 + $0x1a8] sm:$0xff] }
 0x48d   :  { %v9666_v3 = vadd.f32 %v2624_v7, %v11082_v13  ;;  %v2626_v0 = vpop.f32.mrb[15].mxu0  ;;  %6197 = vmatprep.subr.bf16.mxu1 %v9228_v21  ;;  %v2236_v7 = vld [vmem:[#allocation5 + $0x110] sm:$0xff]  ;;  %v2254_v21 = vld [vmem:[#allocation5 + $0x1a0] sm:$0xff] }
 0x48e   :  { %v9670_v49 = vadd.f32 %v2626_v0, %v11083_v19  ;;  %v2237_v0 = vld [vmem:[#allocation5 + $0x118] sm:$0xff]  ;;  %v6208_v27 = vpack.c.bf16 %v2255_v58, %v2254_v21 }
 0x48f   :  { %2629 = vst [vmem:[%s10407_s10 + $0x20] sm:$0xff] %v9666_v3  ;;  %v6206_v33 = vpack.c.bf16 %v2237_v0, %v2236_v7  ;;  %v2261_v58 = vld [vmem:[#allocation5 + $0x1d8] sm:$0xff]  ;;  %v2247_v0 = vld [vmem:[#allocation5 + $0x168] sm:$0xff] }
 0x490   :  { %2630 = vst [vmem:[%s10407_s10 + $0x28] sm:$0xff] %v9670_v49  ;;  %6199 = vmatpush1.bf16.msra.mxu1 %v9235_v9  ;;  %v6210_v9 = vpack.c.bf16 %v2239_v23, %v2238_v46  ;;  %v2245_v23 = vld [vmem:[#allocation5 + $0x158] sm:$0xff] }
 0x491   :  { %6201 = vmatprep.subr.bf16.mxu1 %v6200_v35  ;;  %v2240_v35 = vld [vmem:[#allocation5 + $0x130] sm:$0xff] }
 0x492   :  { %v6214_v29 = vpack.c.bf16 %v2241_v1, %v2240_v35  ;;  %v2264_v35 = vld [vmem:[#allocation5 + $0x1f0] sm:$0xff]  ;;  %v2265_v1 = vld [vmem:[#allocation5 + $0x1f8] sm:$0xff] }
 0x493   :  { %2224 = vmatmul.mubr.f32.vlgmr.msra.gmra.mrb[18].mxu1 %v11085_v55  ;;  %v2242_v55 = vld [vmem:[#allocation5 + $0x140] sm:$0xff] }
 0x494   :  { %6203 = vmatpush3.bf16.msra.mxu1 %v6202_v6  ;;  %v2243_v6 = vld [vmem:[#allocation5 + $0x148] sm:$0xff] }
 0x495   :  { %6205 = vmatprep.subr.bf16.mxu1 %v6204_v11  ;;  %v2260_v11 = vld [vmem:[#allocation5 + $0x1d0] sm:$0xff]  ;;  %v6218_v21 = vpack.c.bf16 %v2243_v6, %v2242_v55  ;;  %v2649_v55 = vld [vmem:[#allocation5 + $0x280] sm:$0xff]  ;;  %v2650_v6 = vld [vmem:[#allocation5 + $0x288] sm:$0xff] }
 0x496   :  { %v6220_v7 = vpack.c.bf16 %v2261_v58, %v2260_v11  ;;  %v6488_v11 = vpack.c.bf16 %v2650_v6, %v2649_v55  ;;  %v2637_v6 = vld [vmem:[#allocation5 + $0x220] sm:$0xff] }
 0x498   :  { %6207 = vmatpush3.bf16.msra.mxu1 %v6206_v33  ;;  %v2244_v33 = vld [vmem:[#allocation5 + $0x150] sm:$0xff] }
 0x499   :  { %6209 = vmatprep.subr.bf16.mxu1 %v6208_v27  ;;  %v2262_v27 = vld [vmem:[#allocation5 + $0x1e0] sm:$0xff]  ;;  %v6222_v59 = vpack.c.bf16 %v2245_v23, %v2244_v33  ;;  %v2634_v23 = vld [vmem:[#allocation5 + $0x208] sm:$0xff] }
 0x49a   :  { %v6224_v46 = vpack.c.bf16 %v2263_v48, %v2262_v27  ;;  %v2633_v33 = vld [vmem:[#allocation5 + $0x200] sm:$0xff]  ;;  %v2651_v48 = vld [vmem:[#allocation5 + $0x290] sm:$0xff] }
 0x49c   :  { %6211 = vmatpush3.bf16.msra.mxu1 %v6210_v9  ;;  %v2246_v9 = vld [vmem:[#allocation5 + $0x160] sm:$0xff] }
 0x49d   :  { %6213 = vmatprep.subr.bf16.mxu1 %v6212_v22  ;;  %v6226_v22 = vpack.c.bf16 %v2247_v0, %v2246_v9  ;;  %v6490_v9 = vpack.c.bf16 %v2634_v23, %v2633_v33  ;;  %v2639_v23 = vld [vmem:[#allocation5 + $0x230] sm:$0xff] }
 0x4a0   :  { %6215 = vmatpush3.bf16.msra.mxu1 %v6214_v29  ;;  %v6228_v29 = vpack.c.bf16 %v2265_v1, %v2264_v35  ;;  %v2635_v35 = vld [vmem:[#allocation5 + $0x210] sm:$0xff]  ;;  %v2636_v1 = vld [vmem:[#allocation5 + $0x218] sm:$0xff] }
 0x4a1   :  { %6217 = vmatprep.subr.bf16.mxu1 %v6216_v39  ;;  %v6230_v39 = vpack.c.bf16 %v2249_v43, %v2248_v2  ;;  %v2653_v2 = vld [vmem:[#allocation5 + $0x2a0] sm:$0xff]  ;;  %v2654_v43 = vld [vmem:[#allocation5 + $0x2a8] sm:$0xff] }
 0x4a2   :  { %v6496_v55 = vpack.c.bf16 %v2654_v43, %v2653_v2  ;;  %v2643_v2 = vld [vmem:[#allocation5 + $0x250] sm:$0xff]  ;;  %v2644_v43 = vld [vmem:[#allocation5 + $0x258] sm:$0xff] }
 0x4a4   :  { %6219 = vmatpush3.bf16.msra.mxu1 %v6218_v21 }
 0x4a5   :  { %6221 = vmatprep.subr.bf16.mxu1 %v6220_v7 }
 0x4a8   :  { %6223 = vmatpush3.bf16.msra.mxu1 %v6222_v59  ;;  %v2652_v59 = vld [vmem:[#allocation5 + $0x298] sm:$0xff] }
 0x4a9   :  { %6225 = vmatprep.subr.bf16.mxu1 %v6224_v46 }
 0x4ac   :  { %6227 = vmatpush3.bf16.msra.mxu1 %v6226_v22  ;;  %v6492_v22 = vpack.c.bf16 %v2652_v59, %v2651_v48  ;;  %v2658_v48 = vld [vmem:[#allocation5 + $0x2c8] sm:$0xff] }
 0x4ad   :  { %6229 = vmatprep.subr.bf16.mxu1 %v6228_v29  ;;  %v2632_v29 = vmax.f32 %v9670_v49, 0.0  ;;  %v2657_v49 = vld [vmem:[#allocation5 + $0x2c0] sm:$0xff] }
 0x4b0   :  { %6231 = vmatpush3.bf16.msra.mxu1 %v6230_v39  ;;  %v6494_v39 = vpack.c.bf16 %v2636_v1, %v2635_v35  ;;  %v2660_v35 = vld [vmem:[#allocation5 + $0x2d8] sm:$0xff] }
 0x4b1   :  { %6489 = vmatprep.subr.bf16.mxu1 %v6488_v11  ;;  %v2638_v11 = vld [vmem:[#allocation5 + $0x228] sm:$0xff] }
 0x566   :  { %v2225_v58 = vpop.f32.mrb[18].mxu1 }
 0x567   :  { %v7698_v21 = vadd.f32 %v2225_v58, %v11082_v13  ;;  %v2227_v7 = vpop.f32.mrb[19].mxu1  ;;  %v2655_v58 = vld [vmem:[#allocation5 + $0x2b0] sm:$0xff] }
 0x568   :  { %v7699_v27 = vadd.f32 %v2227_v7, %v11083_v19  ;;  %v2656_v7 = vld [vmem:[#allocation5 + $0x2b8] sm:$0xff] }
 0x569   :  { %2230 = vst [vmem:[%s10407_s10 + $0x10] sm:$0xff] %v7698_v21  ;;  %v2232_v0 = vmax.f32 %v7698_v21, 0.0  ;;  %v6498_v21 = vpack.c.bf16 %v2638_v11, %v2637_v6  ;;  %v6500_v33 = vpack.c.bf16 %v2656_v7, %v2655_v58  ;;  %v6510_v6 = vpack.c.bf16 %v2644_v43, %v2643_v2  ;;  %v2645_v58 = vld [vmem:[#allocation5 + $0x260] sm:$0xff]  ;;  %v2646_v7 = vld [vmem:[#allocation5 + $0x268] sm:$0xff]  ;;  %v11093_v2 = vld [vmem:[#allocation17_spill] sm:$0xff] }
 0x56a   :  { %2231 = vst [vmem:[%s10407_s10 + $0x18] sm:$0xff] %v7699_v27  ;;  %v2233_v46 = vmax.f32 %v7699_v27, 0.0  ;;  %v2640_v27 = vld [vmem:[#allocation5 + $0x238] sm:$0xff]  ;;  %v11094_v43 = vld [vmem:[#allocation20_spill] sm:$0xff] }
 0x56b   :  { %v6502_v59 = vpack.c.bf16 %v2640_v27, %v2639_v23  ;;  %v6514_v23 = vpack.c.bf16 %v2646_v7, %v2645_v58  ;;  %v11099_v58 = vld [vmem:[#allocation137_spill] sm:$0xff] }
 0x56c   :  { %2330 = vmatprep.mubr.f32.mxu1 %v2233_v46  ;;  %v6504_v46 = vpack.c.bf16 %v2658_v48, %v2657_v49  ;;  %v2647_v49 = vld [vmem:[#allocation5 + $0x270] sm:$0xff]  ;;  %v2648_v48 = vld [vmem:[#allocation5 + $0x278] sm:$0xff]  ;;  %v11100_v7 = vmax.f32 %v11099_v58, 0.0 }
 0x56d   :  { %2331 = vmatmul.mubr.f32.vlgmr.msra.gmra.mrb[20].mxu1 %v2232_v0  ;;  %v2642_v0 = vld [vmem:[#allocation5 + $0x248] sm:$0xff]  ;;  %v11111_v58 = vld [vmem:[#allocation52_spill] sm:$0xff] }
 0x56e   :  { %6491 = vmatpush3.bf16.msra.mxu1 %v6490_v9  ;;  %2729 = vmatprep.mubr.f32.mxu1 %v2632_v29  ;;  %v2641_v9 = vld [vmem:[#allocation5 + $0x240] sm:$0xff] }
 0x56f   :  { %6493 = vmatprep.subr.bf16.mxu1 %v6492_v22  ;;  %v2659_v22 = vld [vmem:[#allocation5 + $0x2d0] sm:$0xff]  ;;  %v6506_v1 = vpack.c.bf16 %v2642_v0, %v2641_v9  ;;  %v11086_v9 = vld [vmem:[#allocation11_spill] sm:$0xff]  ;;  %v11087_v0 = vld [vmem:[#allocation138_spill] sm:$0xff] }
 0x570   :  { %v6508_v29 = vpack.c.bf16 %v2660_v35, %v2659_v22  ;;  %v11088_v22 = vmax.f32 %v11087_v0, 0.0  ;;  %v11089_v35 = vld [vmem:[#allocation12_spill] sm:$0xff]  ;;  %v11109_v0 = vld [vmem:[#allocation50_spill] sm:$0xff] }
 0x572   :  { %6495 = vmatpush3.bf16.msra.mxu1 %v6494_v39  ;;  %v2661_v39 = vld [vmem:[#allocation5 + $0x2e0] sm:$0xff] }
 0x573   :  { %6497 = vmatprep.subr.bf16.mxu1 %v6496_v55  ;;  %v2662_v55 = vld [vmem:[#allocation5 + $0x2e8] sm:$0xff] }
 0x574   :  { %v6512_v11 = vpack.c.bf16 %v2662_v55, %v2661_v39  ;;  %v11095_v39 = vld [vmem:[#allocation21_spill] sm:$0xff]  ;;  %v11096_v55 = vld [vmem:[#allocation22_spill] sm:$0xff] }
 0x576   :  { %6499 = vmatpush3.bf16.msra.mxu1 %v6498_v21  ;;  %v2663_v21 = vld [vmem:[#allocation5 + $0x2f0] sm:$0xff] }
 0x577   :  { %6501 = vmatprep.subr.bf16.mxu1 %v6500_v33  ;;  %v2664_v33 = vld [vmem:[#allocation5 + $0x2f8] sm:$0xff] }
 0x578   :  { %v6516_v27 = vpack.c.bf16 %v2664_v33, %v2663_v21  ;;  %v11101_v21 = vld [vmem:[#allocation23_spill] sm:$0xff] }
 0x579   :  { %v11102_v33 = vmax.f32 %v11101_v21, 0.0  ;;  %v11113_v21 = vld [vmem:[#allocation54_spill] sm:$0xff] }
 0x57a   :  { %6503 = vmatpush3.bf16.msra.mxu1 %v6502_v59  ;;  %v6518_v59 = vpack.c.bf16 %v2648_v48, %v2647_v49  ;;  %v11105_v49 = vld [vmem:[#allocation46_spill] sm:$0xff]  ;;  %v11106_v48 = vld [vmem:[#allocation47_spill] sm:$0xff] }
 0x57b   :  { %6505 = vmatprep.subr.bf16.mxu1 %v6504_v46  ;;  %v2631_v46 = vmax.f32 %v9666_v3, 0.0  ;;  %v11092_v3 = vld [vmem:[#allocation16_spill] sm:$0xff] }
 0x57e   :  { %6507 = vmatpush3.bf16.msra.mxu1 %v6506_v1  ;;  %v11090_v1 = vld [vmem:[#allocation13_spill] sm:$0xff] }
 0x57f   :  { %6509 = vmatprep.subr.bf16.mxu1 %v6508_v29  ;;  %v11091_v29 = vld [vmem:[#allocation14_spill] sm:$0xff] }
 0x582   :  { %6511 = vmatpush3.bf16.msra.mxu1 %v6510_v6  ;;  %v11097_v6 = vld [vmem:[#allocation34_spill] sm:$0xff] }
 0x583   :  { %6513 = vmatprep.subr.bf16.mxu1 %v6512_v11  ;;  %v11098_v11 = vld [vmem:[#allocation35_spill] sm:$0xff] }
 0x586   :  { %6515 = vmatpush3.bf16.msra.mxu1 %v6514_v23  ;;  %v11103_v23 = vld [vmem:[#allocation44_spill] sm:$0xff] }
 0x587   :  { %6517 = vmatprep.subr.bf16.mxu1 %v6516_v27  ;;  %v11104_v27 = vld [vmem:[#allocation45_spill] sm:$0xff] }
 0x58a   :  { %6519 = vmatpush3.bf16.msra.mxu1 %v6518_v59  ;;  %v11107_v59 = vld [vmem:[#allocation48_spill] sm:$0xff] }
 0x58b   :  { %6521 = vmatprep.subr.bf16.mxu1 %v11086_v9 }
 0x58d   :  { %2730 = vmatmul.mubr.f32.vlgmr.msra.gmra.mrb[22].mxu1 %v2631_v46  ;;  %v11108_v46 = vld [vmem:[#allocation49_spill] sm:$0xff] }
 0x58e   :  { %6523 = vmatpush1.bf16.msra.mxu1 %v8634_v60  ;;  %2808 = vmatprep.mubr.f32.mxu1 %v11088_v22  ;;  %v11110_v22 = vld [vmem:[#allocation51_spill] sm:$0xff] }
 0x58f   :  { %6525 = vmatprep.subr.bf16.mxu1 %v8641_v61 }
 0x592   :  { %6527 = vmatpush1.bf16.msra.mxu1 %v8646_v18 }
 0x593   :  { %6529 = vmatprep.subr.bf16.mxu1 %v11089_v35 }
 0x596   :  { %6531 = vmatpush1.bf16.msra.mxu1 %v11090_v1 }
 0x597   :  { %6533 = vmatprep.subr.bf16.mxu1 %v8658_v36 }
 0x59a   :  { %6535 = vmatpush1.bf16.msra.mxu1 %v11091_v29 }
 0x59b   :  { %6537 = vmatprep.subr.bf16.mxu1 %v8666_v53 }
 0x59e   :  { %6539 = vmatpush1.bf16.msra.mxu1 %v8671_v4 }
 0x59f   :  { %6541 = vmatprep.subr.bf16.mxu1 %v8674_v12 }
 0x5a2   :  { %6543 = vmatpush1.bf16.msra.mxu1 %v8679_v30 }
 0x5a3   :  { %6545 = vmatprep.subr.bf16.mxu1 %v10889_v20 }
 0x5a6   :  { %6547 = vmatpush1.bf16.msra.mxu1 %v11092_v3 }
 0x5a7   :  { %6549 = vmatprep.subr.bf16.mxu1 %v11093_v2 }
 0x5aa   :  { %6551 = vmatpush1.bf16.msra.mxu1 %v10892_v31 }
 0x5ab   :  { %6553 = vmatprep.subr.bf16.mxu1 %v10893_v32 }
 0x5ae   :  { %6555 = vmatpush1.bf16.msra.mxu1 %v11094_v43 }
 0x5af   :  { %6557 = vmatprep.subr.bf16.mxu1 %v11095_v39 }
 0x5b2   :  { %6559 = vmatpush1.bf16.msra.mxu1 %v11096_v55 }
 0x5b3   :  { %6561 = vmatprep.subr.bf16.mxu1 %v10897_v45 }
 0x5b6   :  { %6563 = vmatpush1.bf16.msra.mxu1 %v10898_v50 }
 0x5b7   :  { %6565 = vmatprep.subr.bf16.mxu1 %v10899_v51 }
 0x5ba   :  { %6567 = vmatpush1.bf16.msra.mxu1 %v10900_v56 }
 0x5bb   :  { %6569 = vmatprep.subr.bf16.mxu1 %v10901_v57 }
 0x5be   :  { %6571 = vmatpush1.bf16.msra.mxu1 %v10902_v62 }
 0x5bf   :  { %6573 = vmatprep.subr.bf16.mxu1 %v10903_v63 }
 0x5c2   :  { %6575 = vmatpush1.bf16.msra.mxu1 %v10904_v5 }
 0x5c3   :  { %6577 = vmatprep.subr.bf16.mxu1 %v10905_v15 }
 0x5c6   :  { %6579 = vmatpush1.bf16.msra.mxu1 %v10906_v47 }
 0x5c7   :  { %6581 = vmatprep.subr.bf16.mxu1 %v10907_v28 }
 0x5ca   :  { %6583 = vmatpush1.bf16.msra.mxu1 %v11097_v6  ;;  %v3055_v6 = vld [vmem:[#allocation5 + $0x3b8] sm:$0xff] }
 0x5cb   :  { %6585 = vmatprep.subr.bf16.mxu1 %v11098_v11  ;;  %v3054_v11 = vld [vmem:[#allocation5 + $0x3b0] sm:$0xff] }
 0x5cd   :  { %2809 = vmatmul.mubr.f32.vlgmr.msra.gmra.mrb[24].mxu1 %v11100_v7  ;;  %v11112_v7 = vld [vmem:[#allocation53_spill] sm:$0xff] }
 0x5ce   :  { %6587 = vmatpush1.bf16.msra.mxu1 %v10911_v17  ;;  %2879 = vmatprep.mubr.f32.mxu1 %v11102_v33  ;;  %v11114_v33 = vld [vmem:[#allocation55_spill] sm:$0xff]  ;;  %v11133_v17 = vld [vmem:[#allocation72_spill] sm:$0xff] }
 0x5cf   :  { %6589 = vmatprep.subr.bf16.mxu1 %v11012_v44 }
 0x5d2   :  { %6591 = vmatpush1.bf16.msra.mxu1 %v11013_v25  ;;  %v3035_v25 = vld [vmem:[#allocation5 + $0x318] sm:$0xff] }
 0x5d3   :  { %6593 = vmatprep.subr.bf16.mxu1 %v11014_v26  ;;  %v3034_v26 = vld [vmem:[#allocation5 + $0x310] sm:$0xff] }
 0x5d4   :  { %v6782_v44 = vpack.c.bf16 %v3035_v25, %v3034_v26  ;;  %v3056_v26 = vld [vmem:[#allocation5 + $0x3c0] sm:$0xff]  ;;  %v3057_v25 = vld [vmem:[#allocation5 + $0x3c8] sm:$0xff] }
 0x5d6   :  { %6595 = vmatpush1.bf16.msra.mxu1 %v10915_v41 }
 0x5d7   :  { %6597 = vmatprep.subr.bf16.mxu1 %v10916_v52  ;;  %v11131_v52 = vld [vmem:[#allocation70_spill] sm:$0xff] }
 0x5da   :  { %6599 = vmatpush1.bf16.msra.mxu1 %v11103_v23  ;;  %v3049_v23 = vld [vmem:[#allocation5 + $0x388] sm:$0xff] }
 0x5db   :  { %6601 = vmatprep.subr.bf16.mxu1 %v11104_v27  ;;  %v11115_v27 = vld [vmem:[#allocation56_spill] sm:$0xff] }
 0x5de   :  { %6603 = vmatpush1.bf16.msra.mxu1 %v11105_v49  ;;  %v11116_v49 = vld [vmem:[#allocation57_spill] sm:$0xff] }
 0x5df   :  { %6605 = vmatprep.subr.bf16.mxu1 %v11106_v48  ;;  %v11117_v48 = vld [vmem:[#allocation58_spill] sm:$0xff] }
 0x5e2   :  { %6607 = vmatpush1.bf16.msra.mxu1 %v11107_v59  ;;  %v11118_v59 = vld [vmem:[#allocation59_spill] sm:$0xff] }
 0x5e3   :  { %6609 = vmatprep.subr.bf16.mxu1 %v11108_v46  ;;  %v11119_v46 = vld [vmem:[#allocation60_spill] sm:$0xff] }
 0x5e6   :  { %6611 = vmatpush1.bf16.msra.mxu1 %v11109_v0  ;;  %v11120_v0 = vld [vmem:[#allocation61_spill] sm:$0xff] }
 0x5e7   :  { %6613 = vmatprep.subr.bf16.mxu1 %v11110_v22  ;;  %v11121_v22 = vld [vmem:[#allocation62_spill] sm:$0xff] }
 0x5ea   :  { %6615 = vmatpush1.bf16.msra.mxu1 %v11111_v58  ;;  %v11129_v58 = vld [vmem:[#allocation37_spill] sm:$0xff] }
 0x5eb   :  { %6617 = vmatprep.subr.bf16.mxu1 %v11112_v7  ;;  %v11122_v7 = vld [vmem:[#allocation64_spill] sm:$0xff] }
 0x5ee   :  { %6619 = vmatpush1.bf16.msra.mxu1 %v11113_v21  ;;  %v11123_v21 = vld [vmem:[#allocation65_spill] sm:$0xff] }
 0x5ef   :  { %6621 = vmatprep.subr.bf16.mxu1 %v11114_v33  ;;  %v11124_v33 = vld [vmem:[#allocation66_spill] sm:$0xff] }
 0x5f2   :  { %6623 = vmatpush1.bf16.msra.mxu1 %v11115_v27  ;;  %v11125_v27 = vld [vmem:[#allocation67_spill] sm:$0xff] }
 0x5f3   :  { %6625 = vmatprep.subr.bf16.mxu1 %v11116_v49  ;;  %v11126_v49 = vld [vmem:[#allocation68_spill] sm:$0xff] }
 0x5f6   :  { %6627 = vmatpush1.bf16.msra.mxu1 %v11117_v48  ;;  %v11127_v48 = vld [vmem:[#allocation69_spill] sm:$0xff] }
 0x5f7   :  { %6629 = vmatprep.subr.bf16.mxu1 %v11118_v59  ;;  %v11128_v59 = vld [vmem:[#allocation18_spill] sm:$0xff] }
 0x5fa   :  { %6631 = vmatpush1.bf16.msra.mxu1 %v11119_v46  ;;  %v10720_v46 = vmax.f32 %v11128_v59, 0.0 }
 0x5fb   :  { %6633 = vmatprep.subr.bf16.mxu1 %v11120_v0  ;;  %v11130_v0 = vmax.f32 %v11129_v58, 0.0  ;;  %v3052_v58 = vld [vmem:[#allocation5 + $0x3a0] sm:$0xff] }
 0x5fe   :  { %6635 = vmatpush1.bf16.msra.mxu1 %v11121_v22  ;;  %v3048_v22 = vld [vmem:[#allocation5 + $0x380] sm:$0xff] }
 0x5ff   :  { %6637 = vmatprep.subr.bf16.mxu1 %v11028_v10  ;;  %v3032_v10 = vld [vmem:[#allocation5 + $0x300] sm:$0xff] }
 0x602   :  { %6639 = vmatpush1.bf16.msra.mxu1 %v11122_v7  ;;  %v3051_v7 = vld [vmem:[#allocation5 + $0x398] sm:$0xff] }
 0x603   :  { %6641 = vmatprep.subr.bf16.mxu1 %v11123_v21  ;;  %v3033_v21 = vld [vmem:[#allocation5 + $0x308] sm:$0xff] }
 0x606   :  { %6643 = vmatpush1.bf16.msra.mxu1 %v11124_v33  ;;  %v6776_v33 = vpack.c.bf16 %v3049_v23, %v3048_v22  ;;  %v3037_v23 = vld [vmem:[#allocation5 + $0x328] sm:$0xff]  ;;  %v11134_v22 = vld [vmem:[#allocation73_spill] sm:$0xff] }
 0x607   :  { %6645 = vmatprep.subr.bf16.mxu1 %v11125_v27  ;;  %v3050_v27 = vld [vmem:[#allocation5 + $0x390] sm:$0xff] }
 0x608   :  { %v6780_v41 = vpack.c.bf16 %v3051_v7, %v3050_v27  ;;  %6777 = vmatprep.subr.bf16.mxu0 %v6776_v33  ;;  %v11135_v27 = vld [vmem:[#allocation74_spill] sm:$0xff]  ;;  %v6788_v7 = vpack.c.bf16 %v3055_v6, %v3054_v11  ;;  %v3039_v33 = vld [vmem:[#allocation5 + $0x338] sm:$0xff] }
 0x609   :  { %v11139_v6 = vld [vmem:[#allocation78_spill] sm:$0xff] }
 0x60a   :  { %6647 = vmatpush1.bf16.msra.mxu1 %v11126_v49  ;;  %v11132_v49 = vld [vmem:[#allocation71_spill] sm:$0xff] }
 0x60b   :  { %6649 = vmatprep.subr.bf16.mxu1 %v11127_v48  ;;  %v6778_v48 = vpack.c.bf16 %v3033_v21, %v3032_v10  ;;  %v3038_v21 = vld [vmem:[#allocation5 + $0x330] sm:$0xff] }
 0x60d   :  { %2880 = vmatmul.mubr.f32.vlgmr.msra.gmra.mrb[24].mxu1 %v11130_v0  ;;  %v3053_v0 = vld [vmem:[#allocation5 + $0x3a8] sm:$0xff]  ;;  %6779 = vmatpush3.bf16.msra.mxu0 %v6778_v48 }
 0x60e   :  { %6651 = vmatpush1.bf16.msra.mxu1 %v11131_v52  ;;  %2950 = vmatprep.mubr.f32.mxu1 %v10720_v46  ;;  %v6784_v52 = vpack.c.bf16 %v3053_v0, %v3052_v58  ;;  %v3036_v46 = vld [vmem:[#allocation5 + $0x320] sm:$0xff]  ;;  %v11136_v48 = vld [vmem:[#allocation75_spill] sm:$0xff]  ;;  %v11137_v58 = vld [vmem:[#allocation76_spill] sm:$0xff]  ;;  %v6792_v0 = vpack.c.bf16 %v3057_v25, %v3056_v26 }
 0x60f   :  { %6653 = vmatprep.subr.bf16.mxu1 %v11132_v49  ;;  %6781 = vmatprep.subr.bf16.mxu0 %v6780_v41  ;;  %v6786_v10 = vpack.c.bf16 %v3037_v23, %v3036_v46  ;;  %v6790_v41 = vpack.c.bf16 %v3039_v33, %v3038_v21  ;;  %v3058_v46 = vld [vmem:[#allocation5 + $0x3d0] sm:$0xff]  ;;  %v3059_v23 = vld [vmem:[#allocation5 + $0x3d8] sm:$0xff]  ;;  %v3060_v21 = vld [vmem:[#allocation5 + $0x3e0] sm:$0xff] }
 0x610   :  { %v6796_v11 = vpack.c.bf16 %v3059_v23, %v3058_v46  ;;  %v3061_v33 = vld [vmem:[#allocation5 + $0x3e8] sm:$0xff]  ;;  %v11141_v26 = vld [vmem:[#allocation80_spill] sm:$0xff]  ;;  %v11146_v23 = vld [vmem:[#allocation85_spill] sm:$0xff] }
 0x611   :  { %6783 = vmatpush3.bf16.msra.mxu0 %v6782_v44  ;;  %v11138_v44 = vld [vmem:[#allocation77_spill] sm:$0xff]  ;;  %v6800_v25 = vpack.c.bf16 %v3061_v33, %v3060_v21  ;;  %v11145_v46 = vld [vmem:[#allocation84_spill] sm:$0xff]  ;;  %v11151_v21 = vld [vmem:[#allocation90_spill] sm:$0xff] }
 0x612   :  { %6655 = vmatpush1.bf16.msra.mxu1 %v11133_v17  ;;  %6785 = vmatprep.subr.bf16.mxu0 %v6784_v52  ;;  %v3041_v17 = vld [vmem:[#allocation5 + $0x348] sm:$0xff]  ;;  %v11154_v33 = vld [vmem:[#allocation93_spill] sm:$0xff] }
 0x613   :  { %6657 = vmatprep.subr.bf16.mxu1 %v11134_v22  ;;  %v3040_v22 = vld [vmem:[#allocation5 + $0x340] sm:$0xff] }
 0x614   :  { %v6794_v52 = vpack.c.bf16 %v3041_v17, %v3040_v22  ;;  %v11143_v22 = vld [vmem:[#allocation82_spill] sm:$0xff] }
 0x615   :  { %6787 = vmatpush3.bf16.msra.mxu0 %v6786_v10  ;;  %v11140_v10 = vld [vmem:[#allocation79_spill] sm:$0xff] }
 0x616   :  { %6659 = vmatpush1.bf16.msra.mxu1 %v11135_v27  ;;  %6789 = vmatprep.subr.bf16.mxu0 %v6788_v7  ;;  %v3043_v27 = vld [vmem:[#allocation5 + $0x358] sm:$0xff] }
 0x617   :  { %6661 = vmatprep.subr.bf16.mxu1 %v11136_v48  ;;  %v3042_v48 = vld [vmem:[#allocation5 + $0x350] sm:$0xff] }
 0x618   :  { %v6798_v7 = vpack.c.bf16 %v3043_v27, %v3042_v48  ;;  %v11147_v27 = vld [vmem:[#allocation86_spill] sm:$0xff]  ;;  %v11148_v48 = vld [vmem:[#allocation87_spill] sm:$0xff] }
 0x619   :  { %6791 = vmatpush3.bf16.msra.mxu0 %v6790_v41  ;;  %v11142_v41 = vld [vmem:[#allocation81_spill] sm:$0xff] }
 0x61a   :  { %6663 = vmatpush1.bf16.msra.mxu1 %v11137_v58  ;;  %6793 = vmatprep.subr.bf16.mxu0 %v6792_v0  ;;  %v3045_v58 = vld [vmem:[#allocation5 + $0x368] sm:$0xff] }
 0x61b   :  { %6665 = vmatprep.subr.bf16.mxu1 %v11138_v44  ;;  %v3044_v44 = vld [vmem:[#allocation5 + $0x360] sm:$0xff]  ;;  %v11144_v0 = vld [vmem:[#allocation83_spill] sm:$0xff] }
 0x61c   :  { %v6802_v17 = vpack.c.bf16 %v3045_v58, %v3044_v44  ;;  %v11152_v58 = vld [vmem:[#allocation91_spill] sm:$0xff]  ;;  %v11153_v44 = vld [vmem:[#allocation92_spill] sm:$0xff] }
 0x61d   :  { %6795 = vmatpush3.bf16.msra.mxu0 %v6794_v52  ;;  %v11149_v52 = vld [vmem:[#allocation88_spill] sm:$0xff] }
 0x61e   :  { %6667 = vmatpush1.bf16.msra.mxu1 %v11139_v6  ;;  %6797 = vmatprep.subr.bf16.mxu0 %v6796_v11  ;;  %v11150_v11 = vld [vmem:[#allocation89_spill] sm:$0xff] }
 0x61f   :  { %6669 = vmatprep.subr.bf16.mxu1 %v11140_v10 }
 0x621   :  { %6799 = vmatpush3.bf16.msra.mxu0 %v6798_v7  ;;  %v11155_v7 = vld [vmem:[#allocation94_spill] sm:$0xff] }
 0x622   :  { %6671 = vmatpush1.bf16.msra.mxu1 %v11141_v26  ;;  %6801 = vmatprep.subr.bf16.mxu0 %v6800_v25  ;;  %v4461_v25 = vld [vmem:[%s10403_s6] ss:$0 sm:$0xff] }
 0x623   :  { %6673 = vmatprep.subr.bf16.mxu1 %v11142_v41 }
 0x625   :  { %6803 = vmatpush3.bf16.msra.mxu0 %v6802_v17  ;;  %v11156_v17 = vld [vmem:[#allocation95_spill] sm:$0xff] }
 0x626   :  { %6675 = vmatpush1.bf16.msra.mxu1 %v11143_v22 }
 0x627   :  { %6677 = vmatprep.subr.bf16.mxu1 %v11144_v0 }
 0x62a   :  { %6679 = vmatpush1.bf16.msra.mxu1 %v11145_v46 }
 0x62b   :  { %6681 = vmatprep.subr.bf16.mxu1 %v11146_v23  ;;  %v11159_v23 = vld [vmem:[#allocation98_spill] sm:$0xff] }
 0x62e   :  { %6683 = vmatpush1.bf16.msra.mxu1 %v11147_v27 }
 0x62f   :  { %6685 = vmatprep.subr.bf16.mxu1 %v11148_v48 }
 0x632   :  { %6687 = vmatpush1.bf16.msra.mxu1 %v11149_v52 }
 0x633   :  { %6689 = vmatprep.subr.bf16.mxu1 %v11150_v11  ;;  %v1937_v11 = vadd.f32 %v9644_v34, %v4461_v25  ;;  %v11162_v34 = vld [vmem:[#allocation101_spill] sm:$0xff] }
 0x636   :  { %6691 = vmatpush1.bf16.msra.mxu1 %v11151_v21  ;;  %v11157_v21 = vld [vmem:[#allocation96_spill] sm:$0xff] }
 0x637   :  { %6693 = vmatprep.subr.bf16.mxu1 %v11152_v58  ;;  %v11158_v58 = vld [vmem:[#allocation97_spill] sm:$0xff] }
 0x63a   :  { %6695 = vmatpush1.bf16.msra.mxu1 %v11153_v44 }
 0x63b   :  { %6697 = vmatprep.subr.bf16.mxu1 %v11154_v33  ;;  %v11160_v33 = vld [vmem:[#allocation99_spill] sm:$0xff] }
 0x63e   :  { %6699 = vmatpush1.bf16.msra.mxu1 %v11155_v7  ;;  %v11161_v7 = vld [vmem:[#allocation100_spill] sm:$0xff] }
 0x63f   :  { %6701 = vmatprep.subr.bf16.mxu1 %v11156_v17  ;;  %v9807_v17 = vld [vmem:[%s10406_s9 + $0x70] sm:$0xff] }
 0x640   :  { %v4530_v48 = vpop.f32.mrb[20].mxu1  ;;  %v10722_v46 = vmax.f32 %v9807_v17, 0.0 }
 0x641   :  { %v4531_v52 = vpop.f32.mrb[21].mxu1 }
 0x642   :  { %v4532_v27 = vadd.f32 %v4531_v52, %v4530_v48  ;;  %6703 = vmatpush1.bf16.msra.mxu1 %v11157_v21  ;;  %v9814_v48 = vld [vmem:[%s10406_s9 + $0x88] sm:$0xff]  ;;  %v11163_v52 = vld [vmem:[#allocation114_spill] sm:$0xff] }
 0x643   :  { %6705 = vmatprep.subr.bf16.mxu1 %v11158_v58 }
 0x644   :  { %v2336_v44 = vadd.f32 %v4532_v27, %v1937_v11  ;;  %v10721_v27 = vmax.f32 %v9814_v48, 0.0 }
 0x646   :  { %6707 = vmatpush1.bf16.msra.mxu1 %v11159_v23 }
 0x647   :  { %6709 = vmatprep.subr.bf16.mxu1 %v11160_v33 }
 0x64a   :  { %6711 = vmatpush1.bf16.msra.mxu1 %v11161_v7 }
 0x64b   :  { %6713 = vmatprep.subr.bf16.mxu1 %v11162_v34 }
 0x64d   :  { %2951 = vmatmul.mubr.f32.vlgmr.msra.gmra.mrb[24].mxu1 %v10722_v46  ;;  %v11164_v46 = vld [vmem:[#allocation115_spill] sm:$0xff] }
 0x64e   :  { %6715 = vmatpush1.bf16.msra.mxu1 %v11072_v8  ;;  %3021 = vmatprep.mubr.f32.mxu1 %v10721_v27 }
 0x64f   :  { %6717 = vmatprep.subr.bf16.mxu1 %v11075_v37  ;;  %v11173_v37 = vld [vmem:[#allocation123_spill] sm:$0xff] }
 0x652   :  { %6719 = vmatpush1.bf16.msra.mxu1 %v11076_v38  ;;  %v11165_v38 = vld [vmem:[#allocation116_spill] sm:$0xff] }
 0x653   :  { %6721 = vmatprep.subr.bf16.mxu1 %v11077_v16 }
 0x656   :  { %6723 = vmatpush1.bf16.msra.mxu1 %v11078_v14  ;;  %v11167_v14 = vld [vmem:[#allocation117_spill] sm:$0xff] }
 0x657   :  { %6725 = vmatprep.subr.bf16.mxu1 %v11079_v40  ;;  %v11168_v40 = vld [vmem:[#allocation118_spill] sm:$0xff] }
 0x65a   :  { %6727 = vmatpush1.bf16.msra.mxu1 %v11080_v24  ;;  %v11169_v24 = vld [vmem:[#allocation119_spill] sm:$0xff] }
 0x65b   :  { %6729 = vmatprep.subr.bf16.mxu1 %v11081_v42  ;;  %v11170_v42 = vld [vmem:[#allocation120_spill] sm:$0xff] }
 0x65e   :  { %6731 = vmatpush1.bf16.msra.mxu1 %v10988_v54  ;;  %v11171_v54 = vld [vmem:[#allocation121_spill] sm:$0xff] }
 0x65f   :  { %6733 = vmatprep.subr.bf16.mxu1 %v11163_v52  ;;  %v11172_v52 = vld [vmem:[#allocation122_spill] sm:$0xff] }
 0x660   :  { %v4565_v11 = vpop.f32.mrb[22].mxu1 }
 0x661   :  { %v4566_v25 = vpop.f32.mrb[23].mxu1 }
 0x662   :  { %v4567_v27 = vadd.f32 %v4566_v25, %v4565_v11  ;;  %6735 = vmatpush1.bf16.msra.mxu1 %v11164_v46  ;;  %v11174_v11 = vld [vmem:[#allocation124_spill] sm:$0xff]  ;;  %v11175_v25 = vld [vmem:[#allocation125_spill] sm:$0xff] }
 0x663   :  { %6737 = vmatprep.subr.bf16.mxu1 %v11165_v38 }
 0x664   :  { %v9833_v16 = vadd.f32 %v4567_v27, %v2336_v44  ;;  %v11176_v44 = vld [vmem:[#allocation126_spill] sm:$0xff]  ;;  %v11177_v27 = vld [vmem:[#allocation127_spill] sm:$0xff] }
 0x666   :  { %11166 = vst [vmem:[#allocation36_spill] sm:$0xff] %v9833_v16  ;;  %6739 = vmatpush1.bf16.msra.mxu1 %v11167_v14  ;;  %v11178_v14 = vld [vmem:[#allocation128_spill] sm:$0xff] }
 0x667   :  { %6741 = vmatprep.subr.bf16.mxu1 %v11168_v40  ;;  %v11179_v40 = vld [vmem:[#allocation129_spill] sm:$0xff] }
 0x66a   :  { %6743 = vmatpush1.bf16.msra.mxu1 %v11169_v24  ;;  %v11180_v24 = vld [vmem:[#allocation130_spill] sm:$0xff] }
 0x66b   :  { %6745 = vmatprep.subr.bf16.mxu1 %v11170_v42  ;;  %v11181_v42 = vld [vmem:[#allocation131_spill] sm:$0xff] }
 0x66e   :  { %6747 = vmatpush1.bf16.msra.mxu1 %v11171_v54  ;;  %v11182_v54 = vld [vmem:[#allocation132_spill] sm:$0xff] }
 0x66f   :  { %6749 = vmatprep.subr.bf16.mxu1 %v11172_v52  ;;  %v11183_v52 = vld [vmem:[#allocation133_spill] sm:$0xff] }
 0x672   :  { %6751 = vmatpush1.bf16.msra.mxu1 %v11173_v37  ;;  %v11184_v37 = vld [vmem:[#allocation134_spill] sm:$0xff] }
 0x673   :  { %6753 = vmatprep.subr.bf16.mxu1 %v11174_v11  ;;  %v11185_v11 = vld [vmem:[#allocation135_spill] sm:$0xff] }
 0x676   :  { %6755 = vmatpush1.bf16.msra.mxu1 %v11175_v25 }
 0x677   :  { %6757 = vmatprep.subr.bf16.mxu1 %v11176_v44  ;;  %v3047_v44 = vld [vmem:[#allocation5 + $0x378] sm:$0xff] }
 0x67a   :  { %6759 = vmatpush1.bf16.msra.mxu1 %v11177_v27  ;;  %v9857_v27 = vld [vmem:[%s10406_s9 + $0x80] sm:$0xff] }
 0x67b   :  { %6761 = vmatprep.subr.bf16.mxu1 %v11178_v14  ;;  %v10731_v14 = vmax.f32 %v9857_v27, 0.0 }
 0x67e   :  { %6763 = vmatpush1.bf16.msra.mxu1 %v11179_v40 }
 0x67f   :  { %6765 = vmatprep.subr.bf16.mxu1 %v11180_v24  ;;  %v3062_v24 = vld [vmem:[#allocation5 + $0x3f0] sm:$0xff] }
 0x682   :  { %6767 = vmatpush1.bf16.msra.mxu1 %v11181_v42  ;;  %v3063_v42 = vld [vmem:[#allocation5 + $0x3f8] sm:$0xff] }
 0x683   :  { %6769 = vmatprep.subr.bf16.mxu1 %v11182_v54  ;;  %v6804_v40 = vpack.c.bf16 %v3063_v42, %v3062_v24  ;;  %v3046_v54 = vld [vmem:[#allocation5 + $0x370] sm:$0xff]  ;;  %v11189_v42 = vmax.f32 %v9807_v17, 0.0  ;;  %v11199_v17 = vld [vmem:[#allocation46_spill] sm:$0xff] }
 0x685   :  { %6805 = vmatprep.subr.bf16.mxu0 %v6804_v40  ;;  %v11186_v40 = vmax.f32 %v11128_v59, 0.0  ;;  %v11190_v59 = vld [vmem:[#allocation38_spill] sm:$0xff] }
 0x686   :  { %6771 = vmatpush1.bf16.msra.mxu1 %v11183_v52  ;;  %v6806_v52 = vpack.c.bf16 %v3047_v44, %v3046_v54  ;;  %v11194_v44 = vld [vmem:[#allocation41_spill] sm:$0xff] }
 0x687   :  { %6773 = vmatprep.subr.bf16.mxu1 %v11184_v37 }
 0x688   :  { %6807 = vmatpush3.bf16.msra.mxu0 %v6806_v52  ;;  %v11191_v52 = vmax.f32 %v9814_v48, 0.0  ;;  %v11201_v48 = vld [vmem:[#allocation48_spill] sm:$0xff] }
 0x689   :  { %6809 = vmatprep.subr.bf16.mxu0 %v11086_v9 }
 0x68a   :  { %6775 = vmatpush1.bf16.msra.mxu1 %v11185_v11 }
 0x68d   :  { %3022 = vmatmul.mubr.f32.vlgmr.msra.gmra.mrb[24].mxu1 %v10731_v14  ;;  %v11198_v14 = vld [vmem:[#allocation45_spill] sm:$0xff] }
 0x760   :  { %v3023_v11 = vpop.f32.mrb[24].mxu1 }
 0x761   :  { %v7702_v37 = vadd.f32 %v3023_v11, %v11082_v13  ;;  %v3025_v25 = vpop.f32.mrb[25].mxu1  ;;  %v11192_v11 = vld [vmem:[#allocation39_spill] sm:$0xff] }
 0x762   :  { %v7703_v16 = vadd.f32 %v3025_v25, %v11083_v19  ;;  %v11193_v25 = vld [vmem:[#allocation40_spill] sm:$0xff] }
 0x763   :  { %3028 = vst [vmem:[%s10407_s10 + $0x30] sm:$0xff] %v7702_v37  ;;  %v3030_v54 = vmax.f32 %v7702_v37, 0.0  ;;  %v11188_v37 = vld [vmem:[#allocation35_spill] sm:$0xff] }
 0x764   :  { %3029 = vst [vmem:[%s10407_s10 + $0x38] sm:$0xff] %v7703_v16  ;;  %v3031_v24 = vmax.f32 %v7703_v16, 0.0  ;;  %v11187_v16 = vld [vmem:[#allocation34_spill] sm:$0xff] }
 0x766   :  { %3128 = vmatprep.mubr.f32.mxu0 %v3031_v24  ;;  %v11195_v24 = vld [vmem:[#allocation42_spill] sm:$0xff] }
 0x767   :  { %3129 = vmatmul.mubr.f32.vlgmr.msra.gmra.mrb[16].mxu0 %v3030_v54  ;;  %v11196_v54 = vld [vmem:[#allocation43_spill] sm:$0xff] }
 0x768   :  { %6811 = vmatpush1.bf16.msra.mxu0 %v8634_v60  ;;  %3207 = vmatprep.mubr.f32.mxu0 %v11186_v40  ;;  %v11197_v40 = vld [vmem:[#allocation44_spill] sm:$0xff] }
 0x769   :  { %6813 = vmatprep.subr.bf16.mxu0 %v8641_v61 }
 0x76c   :  { %6815 = vmatpush1.bf16.msra.mxu0 %v8646_v18 }
 0x76d   :  { %6817 = vmatprep.subr.bf16.mxu0 %v11089_v35 }
 0x770   :  { %6819 = vmatpush1.bf16.msra.mxu0 %v11090_v1 }
 0x771   :  { %6821 = vmatprep.subr.bf16.mxu0 %v8658_v36 }
 0x774   :  { %6823 = vmatpush1.bf16.msra.mxu0 %v11091_v29 }
 0x775   :  { %6825 = vmatprep.subr.bf16.mxu0 %v8666_v53 }
 0x778   :  { %6827 = vmatpush1.bf16.msra.mxu0 %v8671_v4 }
 0x779   :  { %6829 = vmatprep.subr.bf16.mxu0 %v8674_v12 }
 0x77c   :  { %6831 = vmatpush1.bf16.msra.mxu0 %v8679_v30 }
 0x77d   :  { %6833 = vmatprep.subr.bf16.mxu0 %v10889_v20 }
 0x780   :  { %6835 = vmatpush1.bf16.msra.mxu0 %v11092_v3 }
 0x781   :  { %6837 = vmatprep.subr.bf16.mxu0 %v11093_v2 }
 0x784   :  { %6839 = vmatpush1.bf16.msra.mxu0 %v10892_v31 }
 0x785   :  { %6841 = vmatprep.subr.bf16.mxu0 %v10893_v32 }
 0x788   :  { %6843 = vmatpush1.bf16.msra.mxu0 %v11094_v43 }
 0x789   :  { %6845 = vmatprep.subr.bf16.mxu0 %v11095_v39 }
 0x78c   :  { %6847 = vmatpush1.bf16.msra.mxu0 %v11096_v55 }
 0x78d   :  { %6849 = vmatprep.subr.bf16.mxu0 %v10897_v45 }
 0x790   :  { %6851 = vmatpush1.bf16.msra.mxu0 %v10898_v50 }
 0x791   :  { %6853 = vmatprep.subr.bf16.mxu0 %v10899_v51 }
 0x794   :  { %6855 = vmatpush1.bf16.msra.mxu0 %v10900_v56 }
 0x795   :  { %6857 = vmatprep.subr.bf16.mxu0 %v10901_v57 }
 0x798   :  { %6859 = vmatpush1.bf16.msra.mxu0 %v10902_v62 }
 0x799   :  { %6861 = vmatprep.subr.bf16.mxu0 %v10903_v63  ;;  %v3454_v63 = vld [vmem:[#allocation5 + $0x4b8] sm:$0xff] }
 0x79c   :  { %6863 = vmatpush1.bf16.msra.mxu0 %v10904_v5  ;;  %v3453_v5 = vld [vmem:[#allocation5 + $0x4b0] sm:$0xff] }
 0x79d   :  { %6865 = vmatprep.subr.bf16.mxu0 %v10905_v15  ;;  %v11225_v15 = vld [vmem:[#allocation72_spill] sm:$0xff] }
 0x7a0   :  { %6867 = vmatpush1.bf16.msra.mxu0 %v10906_v47 }
 0x7a1   :  { %6869 = vmatprep.subr.bf16.mxu0 %v10907_v28  ;;  %v3434_v28 = vld [vmem:[#allocation5 + $0x418] sm:$0xff] }
 0x7a4   :  { %6871 = vmatpush1.bf16.msra.mxu0 %v11187_v16  ;;  %v3433_v16 = vld [vmem:[#allocation5 + $0x410] sm:$0xff] }
 0x7a5   :  { %6873 = vmatprep.subr.bf16.mxu0 %v11188_v37  ;;  %v7070_v47 = vpack.c.bf16 %v3434_v28, %v3433_v16  ;;  %v3455_v28 = vld [vmem:[#allocation5 + $0x4c0] sm:$0xff]  ;;  %v3456_v16 = vld [vmem:[#allocation5 + $0x4c8] sm:$0xff] }
 0x7a7   :  { %3208 = vmatmul.mubr.f32.vlgmr.msra.gmra.mrb[18].mxu0 %v11189_v42  ;;  %v11200_v42 = vld [vmem:[#allocation47_spill] sm:$0xff] }
 0x7a8   :  { %6875 = vmatpush1.bf16.msra.mxu0 %v11190_v59  ;;  %3278 = vmatprep.mubr.f32.mxu0 %v11191_v52  ;;  %v11202_v52 = vld [vmem:[#allocation49_spill] sm:$0xff] }
 0x7a9   :  { %6877 = vmatprep.subr.bf16.mxu0 %v11192_v11  ;;  %v11203_v11 = vld [vmem:[#allocation50_spill] sm:$0xff] }
 0x7ac   :  { %6879 = vmatpush1.bf16.msra.mxu0 %v11193_v25  ;;  %v11204_v25 = vld [vmem:[#allocation51_spill] sm:$0xff] }
 0x7ad   :  { %6881 = vmatprep.subr.bf16.mxu0 %v11194_v44  ;;  %v11205_v44 = vld [vmem:[#allocation52_spill] sm:$0xff] }
 0x7b0   :  { %6883 = vmatpush1.bf16.msra.mxu0 %v11195_v24  ;;  %v11206_v24 = vld [vmem:[#allocation53_spill] sm:$0xff] }
 0x7b1   :  { %6885 = vmatprep.subr.bf16.mxu0 %v11196_v54  ;;  %v11207_v54 = vld [vmem:[#allocation54_spill] sm:$0xff] }
 0x7b4   :  { %6887 = vmatpush1.bf16.msra.mxu0 %v11197_v40  ;;  %v11208_v40 = vld [vmem:[#allocation55_spill] sm:$0xff] }
 0x7b5   :  { %6889 = vmatprep.subr.bf16.mxu0 %v11198_v14  ;;  %v11209_v14 = vld [vmem:[#allocation56_spill] sm:$0xff] }
 0x7b8   :  { %6891 = vmatpush1.bf16.msra.mxu0 %v11199_v17  ;;  %v11210_v17 = vld [vmem:[#allocation57_spill] sm:$0xff] }
 0x7b9   :  { %6893 = vmatprep.subr.bf16.mxu0 %v11200_v42  ;;  %v11211_v42 = vld [vmem:[#allocation58_spill] sm:$0xff] }
 0x7bc   :  { %6895 = vmatpush1.bf16.msra.mxu0 %v11201_v48  ;;  %v11212_v48 = vld [vmem:[#allocation59_spill] sm:$0xff] }
 0x7bd   :  { %6897 = vmatprep.subr.bf16.mxu0 %v11202_v52  ;;  %v11213_v52 = vld [vmem:[#allocation60_spill] sm:$0xff] }
 0x7c0   :  { %6899 = vmatpush1.bf16.msra.mxu0 %v11203_v11  ;;  %v11214_v11 = vld [vmem:[#allocation61_spill] sm:$0xff] }
 0x7c1   :  { %6901 = vmatprep.subr.bf16.mxu0 %v11204_v25  ;;  %v11215_v25 = vld [vmem:[#allocation62_spill] sm:$0xff] }
 0x7c4   :  { %6903 = vmatpush1.bf16.msra.mxu0 %v11205_v44  ;;  %v11216_v44 = vld [vmem:[#allocation63_spill] sm:$0xff] }
 0x7c5   :  { %6905 = vmatprep.subr.bf16.mxu0 %v11206_v24  ;;  %v11217_v24 = vld [vmem:[#allocation64_spill] sm:$0xff] }
 0x7c8   :  { %6907 = vmatpush1.bf16.msra.mxu0 %v11207_v54  ;;  %v11218_v54 = vld [vmem:[#allocation65_spill] sm:$0xff] }
 0x7c9   :  { %6909 = vmatprep.subr.bf16.mxu0 %v11208_v40  ;;  %v11219_v40 = vld [vmem:[#allocation66_spill] sm:$0xff] }
 0x7cc   :  { %6911 = vmatpush1.bf16.msra.mxu0 %v11209_v14  ;;  %v11220_v14 = vld [vmem:[#allocation67_spill] sm:$0xff] }
 0x7cd   :  { %6913 = vmatprep.subr.bf16.mxu0 %v11210_v17  ;;  %v11221_v17 = vld [vmem:[#allocation68_spill] sm:$0xff] }
 0x7d0   :  { %6915 = vmatpush1.bf16.msra.mxu0 %v11211_v42  ;;  %v11222_v42 = vld [vmem:[#allocation69_spill] sm:$0xff] }
 0x7d1   :  { %6917 = vmatprep.subr.bf16.mxu0 %v11212_v48  ;;  %v3450_v48 = vld [vmem:[#allocation5 + $0x498] sm:$0xff] }
 0x7d4   :  { %6919 = vmatpush1.bf16.msra.mxu0 %v11213_v52  ;;  %v3431_v52 = vld [vmem:[#allocation5 + $0x400] sm:$0xff] }
 0x7d5   :  { %6921 = vmatprep.subr.bf16.mxu0 %v11214_v11  ;;  %v9944_v11 = vld [vmem:[%s10406_s9 + $0x98] sm:$0xff] }
 0x7d8   :  { %6923 = vmatpush1.bf16.msra.mxu0 %v11215_v25  ;;  %v10735_v25 = vmax.f32 %v9944_v11, 0.0 }
 0x7d9   :  { %6925 = vmatprep.subr.bf16.mxu0 %v11216_v44  ;;  %v11223_v44 = vmax.f32 %v9857_v27, 0.0  ;;  %v3451_v27 = vld [vmem:[#allocation5 + $0x4a0] sm:$0xff] }
 0x7dc   :  { %6927 = vmatpush1.bf16.msra.mxu0 %v11217_v24  ;;  %v3447_v24 = vld [vmem:[#allocation5 + $0x480] sm:$0xff] }
 0x7dd   :  { %6929 = vmatprep.subr.bf16.mxu0 %v11218_v54  ;;  %v3448_v54 = vld [vmem:[#allocation5 + $0x488] sm:$0xff] }
 0x7e0   :  { %6931 = vmatpush1.bf16.msra.mxu0 %v11219_v40  ;;  %v11224_v40 = vld [vmem:[#allocation70_spill] sm:$0xff] }
 0x7e1   :  { %6933 = vmatprep.subr.bf16.mxu0 %v11220_v14  ;;  %v3449_v14 = vld [vmem:[#allocation5 + $0x490] sm:$0xff] }
 0x7e2   :  { %v7068_v37 = vpack.c.bf16 %v3450_v48, %v3449_v14  ;;  %v11227_v14 = vld [vmem:[#allocation74_spill] sm:$0xff]  ;;  %v7076_v48 = vpack.c.bf16 %v3454_v63, %v3453_v5 }
 0x7e4   :  { %6935 = vmatpush1.bf16.msra.mxu0 %v11221_v17  ;;  %v7064_v17 = vpack.c.bf16 %v3448_v54, %v3447_v24  ;;  %v3436_v24 = vld [vmem:[#allocation5 + $0x428] sm:$0xff]  ;;  %v11226_v54 = vld [vmem:[#allocation73_spill] sm:$0xff] }
 0x7e5   :  { %6937 = vmatprep.subr.bf16.mxu0 %v11222_v42  ;;  %v3432_v42 = vld [vmem:[#allocation5 + $0x408] sm:$0xff] }
 0x7e6   :  { %v7066_v59 = vpack.c.bf16 %v3432_v42, %v3431_v52  ;;  %7065 = vmatprep.subr.bf16.mxu1 %v7064_v17  ;;  %v3437_v17 = vld [vmem:[#allocation5 + $0x430] sm:$0xff]  ;;  %v3438_v52 = vld [vmem:[#allocation5 + $0x438] sm:$0xff] }
 0x7e7   :  { %3279 = vmatmul.mubr.f32.vlgmr.msra.gmra.mrb[18].mxu0 %v11223_v44  ;;  %v3452_v44 = vld [vmem:[#allocation5 + $0x4a8] sm:$0xff] }
 0x7e8   :  { %6939 = vmatpush1.bf16.msra.mxu0 %v11224_v40  ;;  %3349 = vmatprep.mubr.f32.mxu0 %v10735_v25  ;;  %v7072_v40 = vpack.c.bf16 %v3452_v44, %v3451_v27  ;;  %v3435_v25 = vld [vmem:[#allocation5 + $0x420] sm:$0xff]  ;;  %v11229_v27 = vld [vmem:[#allocation76_spill] sm:$0xff]  ;;  %v7080_v44 = vpack.c.bf16 %v3456_v16, %v3455_v28  ;;  %v3444_v16 = vld [vmem:[#allocation5 + $0x468] sm:$0xff] }
 0x7e9   :  { %6941 = vmatprep.subr.bf16.mxu0 %v11132_v49  ;;  %7067 = vmatpush3.bf16.msra.mxu1 %v7066_v59  ;;  %v7074_v42 = vpack.c.bf16 %v3436_v24, %v3435_v25  ;;  %v11228_v59 = vld [vmem:[#allocation75_spill] sm:$0xff]  ;;  %v3457_v25 = vld [vmem:[#allocation5 + $0x4d0] sm:$0xff]  ;;  %v3458_v24 = vld [vmem:[#allocation5 + $0x4d8] sm:$0xff] }
 0x7ea   :  { %7069 = vmatprep.subr.bf16.mxu1 %v7068_v37  ;;  %v7078_v37 = vpack.c.bf16 %v3438_v52, %v3437_v17  ;;  %v7084_v5 = vpack.c.bf16 %v3458_v24, %v3457_v25  ;;  %v3460_v17 = vld [vmem:[#allocation5 + $0x4e8] sm:$0xff]  ;;  %v3443_v28 = vld [vmem:[#allocation5 + $0x460] sm:$0xff]  ;;  %v11235_v25 = vld [vmem:[#allocation88_spill] sm:$0xff] }
 0x7eb   :  { %v11236_v24 = vld [vmem:[#allocation89_spill] sm:$0xff] }
 0x7ec   :  { %6943 = vmatpush1.bf16.msra.mxu0 %v11225_v15  ;;  %v3440_v15 = vld [vmem:[#allocation5 + $0x448] sm:$0xff] }
 0x7ed   :  { %6945 = vmatprep.subr.bf16.mxu0 %v11226_v54  ;;  %7071 = vmatpush3.bf16.msra.mxu1 %v7070_v47  ;;  %v3439_v54 = vld [vmem:[#allocation5 + $0x440] sm:$0xff]  ;;  %v11230_v47 = vld [vmem:[#allocation77_spill] sm:$0xff] }
 0x7ee   :  { %7073 = vmatprep.subr.bf16.mxu1 %v7072_v40  ;;  %v7082_v63 = vpack.c.bf16 %v3440_v15, %v3439_v54  ;;  %v3441_v40 = vld [vmem:[#allocation5 + $0x450] sm:$0xff]  ;;  %v7090_v15 = vpack.c.bf16 %v3444_v16, %v3443_v28  ;;  %v9992_v16 = vld [vmem:[%s10406_s9 + $0xa8] sm:$0xff] }
 0x7ef   :  { %v11231_v54 = vld [vmem:[#allocation84_spill] sm:$0xff] }
 0x7f0   :  { %6947 = vmatpush1.bf16.msra.mxu0 %v11227_v14 }
 0x7f1   :  { %6949 = vmatprep.subr.bf16.mxu0 %v11228_v59  ;;  %7075 = vmatpush3.bf16.msra.mxu1 %v7074_v42  ;;  %v3442_v59 = vld [vmem:[#allocation5 + $0x458] sm:$0xff]  ;;  %v3459_v42 = vld [vmem:[#allocation5 + $0x4e0] sm:$0xff] }
 0x7f2   :  { %7077 = vmatprep.subr.bf16.mxu1 %v7076_v48  ;;  %v7086_v48 = vpack.c.bf16 %v3442_v59, %v3441_v40  ;;  %v7088_v52 = vpack.c.bf16 %v3460_v17, %v3459_v42  ;;  %v11233_v59 = vld [vmem:[#allocation86_spill] sm:$0xff]  ;;  %v11239_v40 = vld [vmem:[#allocation92_spill] sm:$0xff]  ;;  %v11240_v42 = vld [vmem:[#allocation93_spill] sm:$0xff] }
 0x7f3   :  { %v11241_v17 = vld [vmem:[#allocation94_spill] sm:$0xff] }
 0x7f4   :  { %6951 = vmatpush1.bf16.msra.mxu0 %v11229_v27 }
 0x7f5   :  { %6953 = vmatprep.subr.bf16.mxu0 %v11230_v47  ;;  %7079 = vmatpush3.bf16.msra.mxu1 %v7078_v37  ;;  %v11232_v37 = vld [vmem:[#allocation85_spill] sm:$0xff] }
 0x7f6   :  { %7081 = vmatprep.subr.bf16.mxu1 %v7080_v44  ;;  %v11234_v44 = vld [vmem:[#allocation87_spill] sm:$0xff] }
 0x7f8   :  { %6955 = vmatpush1.bf16.msra.mxu0 %v11139_v6 }
 0x7f9   :  { %6957 = vmatprep.subr.bf16.mxu0 %v11140_v10  ;;  %7083 = vmatpush3.bf16.msra.mxu1 %v7082_v63  ;;  %v11237_v63 = vld [vmem:[#allocation90_spill] sm:$0xff] }
 0x7fa   :  { %7085 = vmatprep.subr.bf16.mxu1 %v7084_v5  ;;  %v11238_v5 = vld [vmem:[#allocation91_spill] sm:$0xff] }
 0x7fc   :  { %6959 = vmatpush1.bf16.msra.mxu0 %v11141_v26 }
 0x7fd   :  { %6961 = vmatprep.subr.bf16.mxu0 %v11142_v41  ;;  %7087 = vmatpush3.bf16.msra.mxu1 %v7086_v48  ;;  %v11242_v48 = vld [vmem:[#allocation95_spill] sm:$0xff] }
 0x7fe   :  { %7089 = vmatprep.subr.bf16.mxu1 %v7088_v52  ;;  %v9985_v52 = vld [vmem:[%s10406_s9 + $0x90] sm:$0xff] }
 0x7ff   :  { %v10744_v28 = vmax.f32 %v9985_v52, 0.0 }
 0x800   :  { %6963 = vmatpush1.bf16.msra.mxu0 %v11143_v22 }
 0x801   :  { %6965 = vmatprep.subr.bf16.mxu0 %v11144_v0  ;;  %7091 = vmatpush3.bf16.msra.mxu1 %v7090_v15  ;;  %v10746_v15 = vmax.f32 %v9992_v16, 0.0 }
 0x804   :  { %6967 = vmatpush1.bf16.msra.mxu0 %v11231_v54 }
 0x805   :  { %6969 = vmatprep.subr.bf16.mxu0 %v11232_v37 }
 0x808   :  { %6971 = vmatpush1.bf16.msra.mxu0 %v11233_v59 }
 0x809   :  { %6973 = vmatprep.subr.bf16.mxu0 %v11234_v44 }
 0x80c   :  { %6975 = vmatpush1.bf16.msra.mxu0 %v11235_v25 }
 0x80d   :  { %6977 = vmatprep.subr.bf16.mxu0 %v11236_v24 }
 0x810   :  { %6979 = vmatpush1.bf16.msra.mxu0 %v11237_v63 }
 0x811   :  { %6981 = vmatprep.subr.bf16.mxu0 %v11238_v5 }
 0x814   :  { %6983 = vmatpush1.bf16.msra.mxu0 %v11239_v40 }
 0x815   :  { %6985 = vmatprep.subr.bf16.mxu0 %v11240_v42 }
 0x818   :  { %6987 = vmatpush1.bf16.msra.mxu0 %v11241_v17 }
 0x819   :  { %6989 = vmatprep.subr.bf16.mxu0 %v11242_v48  ;;  %v11249_v48 = vld [vmem:[#allocation112_spill] sm:$0xff] }
 0x81c   :  { %6991 = vmatpush1.bf16.msra.mxu0 %v11157_v21  ;;  %v11248_v21 = vld [vmem:[#allocation111_spill] sm:$0xff] }
 0x81d   :  { %6993 = vmatprep.subr.bf16.mxu0 %v11158_v58  ;;  %v11247_v58 = vld [vmem:[#allocation110_spill] sm:$0xff] }
 0x820   :  { %6995 = vmatpush1.bf16.msra.mxu0 %v11159_v23  ;;  %v11246_v23 = vld [vmem:[#allocation109_spill] sm:$0xff] }
 0x821   :  { %6997 = vmatprep.subr.bf16.mxu0 %v11160_v33  ;;  %v11244_v33 = vld [vmem:[#allocation107_spill] sm:$0xff] }
 0x824   :  { %6999 = vmatpush1.bf16.msra.mxu0 %v11161_v7  ;;  %v11243_v7 = vld [vmem:[#allocation105_spill] sm:$0xff] }
 0x825   :  { %7001 = vmatprep.subr.bf16.mxu0 %v11162_v34  ;;  %v11245_v34 = vld [vmem:[#allocation108_spill] sm:$0xff] }
 0x827   :  { %3350 = vmatmul.mubr.f32.vlgmr.msra.gmra.mrb[18].mxu0 %v10744_v28  ;;  %v11250_v28 = vld [vmem:[#allocation113_spill] sm:$0xff] }
 0x828   :  { %7003 = vmatpush1.bf16.msra.mxu0 %v11072_v8  ;;  %3420 = vmatprep.mubr.f32.mxu0 %v10746_v15  ;;  %v11251_v8 = vld [vmem:[#allocation114_spill] sm:$0xff] }
 0x829   :  { %7005 = vmatprep.subr.bf16.mxu0 %v11243_v7 }
 0x82c   :  { %7007 = vmatpush1.bf16.msra.mxu0 %v11244_v33 }
 0x82d   :  { %7009 = vmatprep.subr.bf16.mxu0 %v11245_v34  ;;  %v11252_v34 = vld [vmem:[#allocation36_spill] sm:$0xff] }
 0x830   :  { %7011 = vmatpush1.bf16.msra.mxu0 %v11246_v23  ;;  %v11254_v23 = vld [vmem:[#allocation117_spill] sm:$0xff] }
 0x831   :  { %7013 = vmatprep.subr.bf16.mxu0 %v11247_v58  ;;  %v11255_v58 = vld [vmem:[#allocation118_spill] sm:$0xff] }
 0x834   :  { %7015 = vmatpush1.bf16.msra.mxu0 %v11248_v21  ;;  %v11256_v21 = vld [vmem:[#allocation119_spill] sm:$0xff] }
 0x835   :  { %7017 = vmatprep.subr.bf16.mxu0 %v11249_v48  ;;  %v11257_v48 = vld [vmem:[#allocation120_spill] sm:$0xff] }
 0x838   :  { %7019 = vmatpush1.bf16.msra.mxu0 %v11250_v28  ;;  %v11258_v28 = vld [vmem:[#allocation121_spill] sm:$0xff] }
 0x839   :  { %7021 = vmatprep.subr.bf16.mxu0 %v11251_v8  ;;  %v11259_v8 = vld [vmem:[#allocation122_spill] sm:$0xff] }
 0x83a   :  { %v4600_v17 = vpop.f32.mrb[16].mxu0 }
 0x83b   :  { %v4601_v15 = vpop.f32.mrb[17].mxu0 }
 0x83c   :  { %v4602_v42 = vadd.f32 %v4601_v15, %v4600_v17  ;;  %7023 = vmatpush1.bf16.msra.mxu0 %v11164_v46  ;;  %v11260_v17 = vld [vmem:[#allocation123_spill] sm:$0xff]  ;;  %v11261_v15 = vld [vmem:[#allocation124_spill] sm:$0xff] }
 0x83d   :  { %7025 = vmatprep.subr.bf16.mxu0 %v11165_v38  ;;  %v11262_v38 = vld [vmem:[#allocation125_spill] sm:$0xff] }
 0x83e   :  { %v10012_v33 = vadd.f32 %v4602_v42, %v11252_v34  ;;  %v11263_v34 = vld [vmem:[#allocation126_spill] sm:$0xff]  ;;  %v11264_v42 = vld [vmem:[#allocation127_spill] sm:$0xff] }
 0x840   :  { %11253 = vst [vmem:[#allocation106_spill] sm:$0xff] %v10012_v33  ;;  %7027 = vmatpush1.bf16.msra.mxu0 %v11254_v23  ;;  %v11265_v23 = vld [vmem:[#allocation128_spill] sm:$0xff] }
 0x841   :  { %7029 = vmatprep.subr.bf16.mxu0 %v11255_v58  ;;  %v11266_v58 = vld [vmem:[#allocation129_spill] sm:$0xff] }
 0x844   :  { %7031 = vmatpush1.bf16.msra.mxu0 %v11256_v21  ;;  %v11267_v21 = vld [vmem:[#allocation130_spill] sm:$0xff] }
 0x845   :  { %7033 = vmatprep.subr.bf16.mxu0 %v11257_v48  ;;  %v11268_v48 = vld [vmem:[#allocation131_spill] sm:$0xff] }
 0x848   :  { %7035 = vmatpush1.bf16.msra.mxu0 %v11258_v28  ;;  %v11269_v28 = vld [vmem:[#allocation132_spill] sm:$0xff] }
 0x849   :  { %7037 = vmatprep.subr.bf16.mxu0 %v11259_v8  ;;  %v11270_v8 = vld [vmem:[#allocation133_spill] sm:$0xff] }
 0x84c   :  { %7039 = vmatpush1.bf16.msra.mxu0 %v11260_v17  ;;  %v11271_v17 = vld [vmem:[#allocation134_spill] sm:$0xff] }
 0x84d   :  { %7041 = vmatprep.subr.bf16.mxu0 %v11261_v15  ;;  %v11272_v15 = vld [vmem:[#allocation135_spill] sm:$0xff] }
 0x850   :  { %7043 = vmatpush1.bf16.msra.mxu0 %v11262_v38 }
 0x851   :  { %7045 = vmatprep.subr.bf16.mxu0 %v11263_v34  ;;  %v3446_v34 = vld [vmem:[#allocation5 + $0x478] sm:$0xff] }
 0x854   :  { %7047 = vmatpush1.bf16.msra.mxu0 %v11264_v42  ;;  %v10036_v42 = vld [vmem:[%s10406_s9 + $0xa0] sm:$0xff] }
 0x855   :  { %7049 = vmatprep.subr.bf16.mxu0 %v11265_v23  ;;  %v10748_v23 = vmax.f32 %v10036_v42, 0.0 }
 0x858   :  { %7051 = vmatpush1.bf16.msra.mxu0 %v11266_v58 }
 0x859   :  { %7053 = vmatprep.subr.bf16.mxu0 %v11267_v21  ;;  %v3461_v21 = vld [vmem:[#allocation5 + $0x4f0] sm:$0xff] }
 0x85c   :  { %7055 = vmatpush1.bf16.msra.mxu0 %v11268_v48  ;;  %v3462_v48 = vld [vmem:[#allocation5 + $0x4f8] sm:$0xff] }
 0x85d   :  { %7057 = vmatprep.subr.bf16.mxu0 %v11269_v28  ;;  %v7092_v58 = vpack.c.bf16 %v3462_v48, %v3461_v21  ;;  %v3445_v28 = vld [vmem:[#allocation5 + $0x470] sm:$0xff] }
 0x85f   :  { %7093 = vmatprep.subr.bf16.mxu1 %v7092_v58  ;;  %v11275_v58 = vld [vmem:[#allocation30_spill] sm:$0xff] }
 0x860   :  { %7059 = vmatpush1.bf16.msra.mxu0 %v11270_v8  ;;  %v7094_v8 = vpack.c.bf16 %v3446_v34, %v3445_v28  ;;  %v11278_v28 = vld [vmem:[#allocation33_spill] sm:$0xff]  ;;  %v11281_v34 = vmax.f32 %v9985_v52, 0.0  ;;  %v11291_v52 = vld [vmem:[#allocation46_spill] sm:$0xff] }
 0x861   :  { %7061 = vmatprep.subr.bf16.mxu0 %v11271_v17 }
 0x862   :  { %7095 = vmatpush3.bf16.msra.mxu1 %v7094_v8  ;;  %v11273_v8 = vmax.f32 %v9944_v11, 0.0  ;;  %v11277_v11 = vld [vmem:[#allocation32_spill] sm:$0xff] }
 0x863   :  { %7097 = vmatprep.subr.bf16.mxu1 %v11086_v9 }
 0x864   :  { %7063 = vmatpush1.bf16.msra.mxu0 %v11272_v15 }
 0x867   :  { %3421 = vmatmul.mubr.f32.vlgmr.msra.gmra.mrb[18].mxu0 %v10748_v23  ;;  %v11285_v23 = vld [vmem:[#allocation40_spill] sm:$0xff] }
 0x93a   :  { %v3422_v15 = vpop.f32.mrb[18].mxu0 }
 0x93b   :  { %v7704_v17 = vadd.f32 %v3422_v15, %v11082_v13  ;;  %v3424_v38 = vpop.f32.mrb[19].mxu0  ;;  %v11280_v15 = vld [vmem:[#allocation35_spill] sm:$0xff] }
 0x93c   :  { %v7705_v33 = vadd.f32 %v3424_v38, %v11083_v19  ;;  %v11274_v38 = vld [vmem:[#allocation29_spill] sm:$0xff] }
 0x93d   :  { %3427 = vst [vmem:[%s10407_s10 + $0x40] sm:$0xff] %v7704_v17  ;;  %v3429_v48 = vmax.f32 %v7704_v17, 0.0  ;;  %v11279_v17 = vld [vmem:[#allocation34_spill] sm:$0xff] }
 0x93e   :  { %3428 = vst [vmem:[%s10407_s10 + $0x48] sm:$0xff] %v7705_v33  ;;  %v3430_v21 = vmax.f32 %v7705_v33, 0.0  ;;  %v11276_v33 = vld [vmem:[#allocation31_spill] sm:$0xff] }
 0x940   :  { %3527 = vmatprep.mubr.f32.mxu1 %v3430_v21  ;;  %v11282_v21 = vld [vmem:[#allocation38_spill] sm:$0xff] }
 0x941   :  { %3528 = vmatmul.mubr.f32.vlgmr.msra.gmra.mrb[26].mxu1 %v3429_v48  ;;  %v11283_v48 = vmax.f32 %v9992_v16, 0.0  ;;  %v11293_v16 = vld [vmem:[#allocation48_spill] sm:$0xff] }
 0x942   :  { %7099 = vmatpush1.bf16.msra.mxu1 %v8634_v60  ;;  %3606 = vmatprep.mubr.f32.mxu1 %v11273_v8  ;;  %v11284_v8 = vld [vmem:[#allocation39_spill] sm:$0xff] }
 0x943   :  { %7101 = vmatprep.subr.bf16.mxu1 %v8641_v61 }
 0x946   :  { %7103 = vmatpush1.bf16.msra.mxu1 %v8646_v18 }
 0x947   :  { %7105 = vmatprep.subr.bf16.mxu1 %v11089_v35 }
 0x94a   :  { %7107 = vmatpush1.bf16.msra.mxu1 %v11090_v1 }
 0x94b   :  { %7109 = vmatprep.subr.bf16.mxu1 %v8658_v36 }
 0x94e   :  { %7111 = vmatpush1.bf16.msra.mxu1 %v11091_v29 }
 0x94f   :  { %7113 = vmatprep.subr.bf16.mxu1 %v8666_v53 }
 0x952   :  { %7115 = vmatpush1.bf16.msra.mxu1 %v8671_v4 }
 0x953   :  { %7117 = vmatprep.subr.bf16.mxu1 %v8674_v12 }
 0x956   :  { %7119 = vmatpush1.bf16.msra.mxu1 %v8679_v30 }
 0x957   :  { %7121 = vmatprep.subr.bf16.mxu1 %v10889_v20 }
 0x95a   :  { %7123 = vmatpush1.bf16.msra.mxu1 %v11092_v3 }
 0x95b   :  { %7125 = vmatprep.subr.bf16.mxu1 %v11093_v2 }
 0x95e   :  { %7127 = vmatpush1.bf16.msra.mxu1 %v10892_v31 }
 0x95f   :  { %7129 = vmatprep.subr.bf16.mxu1 %v10893_v32 }
 0x962   :  { %7131 = vmatpush1.bf16.msra.mxu1 %v11094_v43 }
 0x963   :  { %7133 = vmatprep.subr.bf16.mxu1 %v11095_v39 }
 0x966   :  { %7135 = vmatpush1.bf16.msra.mxu1 %v11096_v55 }
 0x967   :  { %7137 = vmatprep.subr.bf16.mxu1 %v10897_v45 }
 0x96a   :  { %7139 = vmatpush1.bf16.msra.mxu1 %v10898_v50  ;;  %v3853_v50 = vld [vmem:[#allocation5 + $0x5b8] sm:$0xff] }
 0x96b   :  { %7141 = vmatprep.subr.bf16.mxu1 %v10899_v51  ;;  %v3852_v51 = vld [vmem:[#allocation5 + $0x5b0] sm:$0xff] }
 0x96e   :  { %7143 = vmatpush1.bf16.msra.mxu1 %v10900_v56  ;;  %v11317_v56 = vld [vmem:[#allocation72_spill] sm:$0xff] }
 0x96f   :  { %7145 = vmatprep.subr.bf16.mxu1 %v10901_v57 }
 0x972   :  { %7147 = vmatpush1.bf16.msra.mxu1 %v10902_v62  ;;  %v3833_v62 = vld [vmem:[#allocation5 + $0x518] sm:$0xff] }
 0x973   :  { %7149 = vmatprep.subr.bf16.mxu1 %v11274_v38  ;;  %v3832_v38 = vld [vmem:[#allocation5 + $0x510] sm:$0xff] }
 0x974   :  { %v7358_v57 = vpack.c.bf16 %v3833_v62, %v3832_v38  ;;  %v3854_v62 = vld [vmem:[#allocation5 + $0x5c0] sm:$0xff]  ;;  %v3855_v38 = vld [vmem:[#allocation5 + $0x5c8] sm:$0xff] }
 0x976   :  { %7151 = vmatpush1.bf16.msra.mxu1 %v11275_v58 }
 0x977   :  { %7153 = vmatprep.subr.bf16.mxu1 %v11276_v33  ;;  %v11286_v33 = vld [vmem:[#allocation41_spill] sm:$0xff] }
 0x97a   :  { %7155 = vmatpush1.bf16.msra.mxu1 %v11277_v11  ;;  %v11287_v11 = vld [vmem:[#allocation42_spill] sm:$0xff] }
 0x97b   :  { %7157 = vmatprep.subr.bf16.mxu1 %v11278_v28  ;;  %v11288_v28 = vld [vmem:[#allocation43_spill] sm:$0xff] }
 0x97e   :  { %7159 = vmatpush1.bf16.msra.mxu1 %v11279_v17  ;;  %v11289_v17 = vld [vmem:[#allocation44_spill] sm:$0xff] }
 0x97f   :  { %7161 = vmatprep.subr.bf16.mxu1 %v11280_v15  ;;  %v11290_v15 = vld [vmem:[#allocation45_spill] sm:$0xff] }
 0x981   :  { %3607 = vmatmul.mubr.f32.vlgmr.msra.gmra.mrb[28].mxu1 %v11281_v34  ;;  %v11292_v34 = vld [vmem:[#allocation47_spill] sm:$0xff] }
 0x982   :  { %7163 = vmatpush1.bf16.msra.mxu1 %v11282_v21  ;;  %3677 = vmatprep.mubr.f32.mxu1 %v11283_v48  ;;  %v11294_v48 = vld [vmem:[#allocation49_spill] sm:$0xff] }
 0x983   :  { %7165 = vmatprep.subr.bf16.mxu1 %v11284_v8  ;;  %v11295_v8 = vld [vmem:[#allocation50_spill] sm:$0xff] }
 0x986   :  { %7167 = vmatpush1.bf16.msra.mxu1 %v11285_v23  ;;  %v11296_v23 = vld [vmem:[#allocation51_spill] sm:$0xff] }
 0x987   :  { %7169 = vmatprep.subr.bf16.mxu1 %v11286_v33  ;;  %v11297_v33 = vld [vmem:[#allocation52_spill] sm:$0xff] }
 0x98a   :  { %7171 = vmatpush1.bf16.msra.mxu1 %v11287_v11  ;;  %v11298_v11 = vld [vmem:[#allocation53_spill] sm:$0xff] }
 0x98b   :  { %7173 = vmatprep.subr.bf16.mxu1 %v11288_v28  ;;  %v11299_v28 = vld [vmem:[#allocation54_spill] sm:$0xff] }
 0x98e   :  { %7175 = vmatpush1.bf16.msra.mxu1 %v11289_v17  ;;  %v11300_v17 = vld [vmem:[#allocation55_spill] sm:$0xff] }
 0x98f   :  { %7177 = vmatprep.subr.bf16.mxu1 %v11290_v15  ;;  %v11301_v15 = vld [vmem:[#allocation56_spill] sm:$0xff] }
 0x992   :  { %7179 = vmatpush1.bf16.msra.mxu1 %v11291_v52  ;;  %v11302_v52 = vld [vmem:[#allocation57_spill] sm:$0xff] }
 0x993   :  { %7181 = vmatprep.subr.bf16.mxu1 %v11292_v34  ;;  %v11303_v34 = vld [vmem:[#allocation58_spill] sm:$0xff] }
 0x996   :  { %7183 = vmatpush1.bf16.msra.mxu1 %v11293_v16  ;;  %v11304_v16 = vld [vmem:[#allocation59_spill] sm:$0xff] }
 0x997   :  { %7185 = vmatprep.subr.bf16.mxu1 %v11294_v48  ;;  %v11305_v48 = vld [vmem:[#allocation60_spill] sm:$0xff] }
 0x99a   :  { %7187 = vmatpush1.bf16.msra.mxu1 %v11295_v8  ;;  %v11306_v8 = vld [vmem:[#allocation61_spill] sm:$0xff] }
 0x99b   :  { %7189 = vmatprep.subr.bf16.mxu1 %v11296_v23  ;;  %v11307_v23 = vld [vmem:[#allocation62_spill] sm:$0xff] }
 0x99e   :  { %7191 = vmatpush1.bf16.msra.mxu1 %v11297_v33  ;;  %v11308_v33 = vld [vmem:[#allocation63_spill] sm:$0xff] }
 0x99f   :  { %7193 = vmatprep.subr.bf16.mxu1 %v11298_v11  ;;  %v11309_v11 = vld [vmem:[#allocation64_spill] sm:$0xff] }
 0x9a2   :  { %7195 = vmatpush1.bf16.msra.mxu1 %v11299_v28  ;;  %v11310_v28 = vld [vmem:[#allocation65_spill] sm:$0xff] }
 0x9a3   :  { %7197 = vmatprep.subr.bf16.mxu1 %v11300_v17  ;;  %v11311_v17 = vld [vmem:[#allocation66_spill] sm:$0xff] }
 0x9a6   :  { %7199 = vmatpush1.bf16.msra.mxu1 %v11301_v15  ;;  %v11312_v15 = vld [vmem:[#allocation67_spill] sm:$0xff] }
 0x9a7   :  { %7201 = vmatprep.subr.bf16.mxu1 %v11302_v52  ;;  %v11313_v52 = vld [vmem:[#allocation68_spill] sm:$0xff] }
 0x9aa   :  { %7203 = vmatpush1.bf16.msra.mxu1 %v11303_v34  ;;  %v11314_v34 = vld [vmem:[#allocation69_spill] sm:$0xff] }
 0x9ab   :  { %7205 = vmatprep.subr.bf16.mxu1 %v11304_v16  ;;  %v3849_v16 = vld [vmem:[#allocation5 + $0x598] sm:$0xff] }
 0x9ae   :  { %7207 = vmatpush1.bf16.msra.mxu1 %v11305_v48  ;;  %v3830_v48 = vld [vmem:[#allocation5 + $0x500] sm:$0xff] }
 0x9af   :  { %7209 = vmatprep.subr.bf16.mxu1 %v11306_v8  ;;  %v10123_v8 = vld [vmem:[%s10406_s9 + $0xb8] sm:$0xff] }
 0x9b2   :  { %7211 = vmatpush1.bf16.msra.mxu1 %v11307_v23  ;;  %v10752_v23 = vmax.f32 %v10123_v8, 0.0 }
 0x9b3   :  { %7213 = vmatprep.subr.bf16.mxu1 %v11308_v33  ;;  %v11315_v33 = vmax.f32 %v10036_v42, 0.0  ;;  %v3850_v42 = vld [vmem:[#allocation5 + $0x5a0] sm:$0xff] }
 0x9b6   :  { %7215 = vmatpush1.bf16.msra.mxu1 %v11309_v11  ;;  %v3846_v11 = vld [vmem:[#allocation5 + $0x580] sm:$0xff] }
 0x9b7   :  { %7217 = vmatprep.subr.bf16.mxu1 %v11310_v28  ;;  %v3847_v28 = vld [vmem:[#allocation5 + $0x588] sm:$0xff] }
 0x9ba   :  { %7219 = vmatpush1.bf16.msra.mxu1 %v11311_v17  ;;  %v11316_v17 = vld [vmem:[#allocation70_spill] sm:$0xff] }
 0x9bb   :  { %7221 = vmatprep.subr.bf16.mxu1 %v11312_v15  ;;  %v3848_v15 = vld [vmem:[#allocation5 + $0x590] sm:$0xff] }
 0x9bc   :  { %v7356_v58 = vpack.c.bf16 %v3849_v16, %v3848_v15  ;;  %v7364_v15 = vpack.c.bf16 %v3853_v50, %v3852_v51  ;;  %v3837_v16 = vld [vmem:[#allocation5 + $0x538] sm:$0xff] }
 0x9be   :  { %7223 = vmatpush1.bf16.msra.mxu1 %v11313_v52  ;;  %v7352_v52 = vpack.c.bf16 %v3847_v28, %v3846_v11  ;;  %v3835_v11 = vld [vmem:[#allocation5 + $0x528] sm:$0xff]  ;;  %v11318_v28 = vld [vmem:[#allocation73_spill] sm:$0xff] }
 0x9bf   :  { %7225 = vmatprep.subr.bf16.mxu1 %v11314_v34  ;;  %v3831_v34 = vld [vmem:[#allocation5 + $0x508] sm:$0xff] }
 0x9c0   :  { %v7354_v21 = vpack.c.bf16 %v3831_v34, %v3830_v48  ;;  %7353 = vmatprep.subr.bf16.mxu0 %v7352_v52  ;;  %v3836_v52 = vld [vmem:[#allocation5 + $0x530] sm:$0xff]  ;;  %v7368_v48 = vpack.c.bf16 %v3855_v38, %v3854_v62  ;;  %v3842_v62 = vld [vmem:[#allocation5 + $0x560] sm:$0xff]  ;;  %v3843_v38 = vld [vmem:[#allocation5 + $0x568] sm:$0xff] }
 0x9c1   :  { %3678 = vmatmul.mubr.f32.vlgmr.msra.gmra.mrb[28].mxu1 %v11315_v33  ;;  %v3851_v33 = vld [vmem:[#allocation5 + $0x5a8] sm:$0xff] }
 0x9c2   :  { %7227 = vmatpush1.bf16.msra.mxu1 %v11316_v17  ;;  %3748 = vmatprep.mubr.f32.mxu1 %v10752_v23  ;;  %v7360_v17 = vpack.c.bf16 %v3851_v33, %v3850_v42  ;;  %v3834_v23 = vld [vmem:[#allocation5 + $0x520] sm:$0xff]  ;;  %v3839_v33 = vld [vmem:[#allocation5 + $0x548] sm:$0xff] }
 0x9c3   :  { %7229 = vmatprep.subr.bf16.mxu1 %v11132_v49  ;;  %7355 = vmatpush3.bf16.msra.mxu0 %v7354_v21  ;;  %v7362_v34 = vpack.c.bf16 %v3835_v11, %v3834_v23  ;;  %v11319_v21 = vld [vmem:[#allocation75_spill] sm:$0xff]  ;;  %v3838_v42 = vld [vmem:[#allocation5 + $0x540] sm:$0xff]  ;;  %v3857_v23 = vld [vmem:[#allocation5 + $0x5d8] sm:$0xff] }
 0x9c4   :  { %7357 = vmatprep.subr.bf16.mxu0 %v7356_v58  ;;  %v7366_v58 = vpack.c.bf16 %v3837_v16, %v3836_v52  ;;  %v7370_v50 = vpack.c.bf16 %v3839_v33, %v3838_v42  ;;  %v3841_v11 = vld [vmem:[#allocation5 + $0x558] sm:$0xff]  ;;  %v3859_v52 = vld [vmem:[#allocation5 + $0x5e8] sm:$0xff]  ;;  %v11321_v42 = vld [vmem:[#allocation94_spill] sm:$0xff] }
 0x9c5   :  { %v11322_v33 = vld [vmem:[#allocation95_spill] sm:$0xff] }
 0x9c6   :  { %7231 = vmatpush1.bf16.msra.mxu1 %v11317_v56 }
 0x9c7   :  { %7233 = vmatprep.subr.bf16.mxu1 %v11318_v28  ;;  %7359 = vmatpush3.bf16.msra.mxu0 %v7358_v57  ;;  %v3856_v57 = vld [vmem:[#allocation5 + $0x5d0] sm:$0xff] }
 0x9c8   :  { %7361 = vmatprep.subr.bf16.mxu0 %v7360_v17  ;;  %v7372_v51 = vpack.c.bf16 %v3857_v23, %v3856_v57  ;;  %v3840_v17 = vld [vmem:[#allocation5 + $0x550] sm:$0xff]  ;;  %v11324_v23 = vld [vmem:[#allocation97_spill] sm:$0xff] }
 0x9c9   :  { %v11323_v57 = vld [vmem:[#allocation96_spill] sm:$0xff] }
 0x9ca   :  { %7235 = vmatpush1.bf16.msra.mxu1 %v11227_v14 }
 0x9cb   :  { %7237 = vmatprep.subr.bf16.mxu1 %v11319_v21  ;;  %7363 = vmatpush3.bf16.msra.mxu0 %v7362_v34  ;;  %v3858_v34 = vld [vmem:[#allocation5 + $0x5e0] sm:$0xff] }
 0x9cc   :  { %7365 = vmatprep.subr.bf16.mxu0 %v7364_v15  ;;  %v7374_v15 = vpack.c.bf16 %v3841_v11, %v3840_v17  ;;  %v7376_v16 = vpack.c.bf16 %v3859_v52, %v3858_v34  ;;  %v11327_v17 = vld [vmem:[#allocation100_spill] sm:$0xff]  ;;  %v11328_v52 = vld [vmem:[#allocation101_spill] sm:$0xff] }
 0x9cd   :  { %v10164_v11 = vld [vmem:[%s10406_s9 + $0xb0] sm:$0xff] }
 0x9ce   :  { %7239 = vmatpush1.bf16.msra.mxu1 %v11229_v27  ;;  %v10755_v34 = vmax.f32 %v10164_v11, 0.0 }
 0x9cf   :  { %7241 = vmatprep.subr.bf16.mxu1 %v11230_v47  ;;  %7367 = vmatpush3.bf16.msra.mxu0 %v7366_v58  ;;  %v7378_v58 = vpack.c.bf16 %v3843_v38, %v3842_v62  ;;  %v11329_v62 = vld [vmem:[#allocation104_spill] sm:$0xff]  ;;  %v11330_v38 = vld [vmem:[#allocation107_spill] sm:$0xff] }
 0x9d0   :  { %7369 = vmatprep.subr.bf16.mxu0 %v7368_v48  ;;  %v11320_v48 = vld [vmem:[#allocation93_spill] sm:$0xff] }
 0x9d2   :  { %7243 = vmatpush1.bf16.msra.mxu1 %v11139_v6 }
 0x9d3   :  { %7245 = vmatprep.subr.bf16.mxu1 %v11140_v10  ;;  %7371 = vmatpush3.bf16.msra.mxu0 %v7370_v50  ;;  %v11325_v50 = vld [vmem:[#allocation98_spill] sm:$0xff] }
 0x9d4   :  { %7373 = vmatprep.subr.bf16.mxu0 %v7372_v51  ;;  %v11326_v51 = vld [vmem:[#allocation99_spill] sm:$0xff] }
 0x9d6   :  { %7247 = vmatpush1.bf16.msra.mxu1 %v11141_v26 }
 0x9d7   :  { %7249 = vmatprep.subr.bf16.mxu1 %v11142_v41  ;;  %7375 = vmatpush3.bf16.msra.mxu0 %v7374_v15  ;;  %v10171_v15 = vld [vmem:[%s10406_s9 + $0xc8] sm:$0xff] }
 0x9d8   :  { %7377 = vmatprep.subr.bf16.mxu0 %v7376_v16  ;;  %v10756_v16 = vmax.f32 %v10171_v15, 0.0 }
 0x9da   :  { %7251 = vmatpush1.bf16.msra.mxu1 %v11143_v22 }
 0x9db   :  { %7253 = vmatprep.subr.bf16.mxu1 %v11144_v0  ;;  %7379 = vmatpush3.bf16.msra.mxu0 %v7378_v58  ;;  %v11331_v58 = vld [vmem:[#allocation108_spill] sm:$0xff] }
 0x9de   :  { %7255 = vmatpush1.bf16.msra.mxu1 %v11231_v54 }
 0x9df   :  { %7257 = vmatprep.subr.bf16.mxu1 %v11232_v37 }
 0x9e2   :  { %7259 = vmatpush1.bf16.msra.mxu1 %v11233_v59 }
 0x9e3   :  { %7261 = vmatprep.subr.bf16.mxu1 %v11234_v44 }
 0x9e6   :  { %7263 = vmatpush1.bf16.msra.mxu1 %v11235_v25 }
 0x9e7   :  { %7265 = vmatprep.subr.bf16.mxu1 %v11236_v24 }
 0x9ea   :  { %7267 = vmatpush1.bf16.msra.mxu1 %v11237_v63 }
 0x9eb   :  { %7269 = vmatprep.subr.bf16.mxu1 %v11238_v5 }
 0x9ee   :  { %7271 = vmatpush1.bf16.msra.mxu1 %v11239_v40 }
 0x9ef   :  { %7273 = vmatprep.subr.bf16.mxu1 %v11320_v48 }
 0x9f2   :  { %7275 = vmatpush1.bf16.msra.mxu1 %v11321_v42 }
 0x9f3   :  { %7277 = vmatprep.subr.bf16.mxu1 %v11322_v33 }
 0x9f6   :  { %7279 = vmatpush1.bf16.msra.mxu1 %v11323_v57 }
 0x9f7   :  { %7281 = vmatprep.subr.bf16.mxu1 %v11324_v23 }
 0x9fa   :  { %7283 = vmatpush1.bf16.msra.mxu1 %v11325_v50  ;;  %v11335_v50 = vld [vmem:[#allocation112_spill] sm:$0xff] }
 0x9fb   :  { %7285 = vmatprep.subr.bf16.mxu1 %v11326_v51  ;;  %v11334_v51 = vld [vmem:[#allocation111_spill] sm:$0xff] }
 0x9fe   :  { %7287 = vmatpush1.bf16.msra.mxu1 %v11327_v17  ;;  %v11333_v17 = vld [vmem:[#allocation110_spill] sm:$0xff] }
 0x9ff   :  { %7289 = vmatprep.subr.bf16.mxu1 %v11328_v52  ;;  %v11332_v52 = vld [vmem:[#allocation109_spill] sm:$0xff] }
 0xa01   :  { %3749 = vmatmul.mubr.f32.vlgmr.msra.gmra.mrb[28].mxu1 %v10755_v34  ;;  %v11336_v34 = vld [vmem:[#allocation113_spill] sm:$0xff] }
 0xa02   :  { %7291 = vmatpush1.bf16.msra.mxu1 %v11329_v62  ;;  %3819 = vmatprep.mubr.f32.mxu1 %v10756_v16  ;;  %v11337_v62 = vld [vmem:[#allocation114_spill] sm:$0xff] }
 0xa03   :  { %7293 = vmatprep.subr.bf16.mxu1 %v11243_v7 }
 0xa06   :  { %7295 = vmatpush1.bf16.msra.mxu1 %v11330_v38  ;;  %v11338_v38 = vld [vmem:[#allocation116_spill] sm:$0xff] }
 0xa07   :  { %7297 = vmatprep.subr.bf16.mxu1 %v11331_v58  ;;  %v11339_v58 = vld [vmem:[#allocation106_spill] sm:$0xff] }
 0xa0a   :  { %7299 = vmatpush1.bf16.msra.mxu1 %v11332_v52  ;;  %v11341_v52 = vld [vmem:[#allocation117_spill] sm:$0xff] }
 0xa0b   :  { %7301 = vmatprep.subr.bf16.mxu1 %v11333_v17  ;;  %v11342_v17 = vld [vmem:[#allocation118_spill] sm:$0xff] }
 0xa0e   :  { %7303 = vmatpush1.bf16.msra.mxu1 %v11334_v51  ;;  %v11343_v51 = vld [vmem:[#allocation119_spill] sm:$0xff] }
 0xa0f   :  { %7305 = vmatprep.subr.bf16.mxu1 %v11335_v50  ;;  %v11344_v50 = vld [vmem:[#allocation120_spill] sm:$0xff] }
 0xa12   :  { %7307 = vmatpush1.bf16.msra.mxu1 %v11336_v34  ;;  %v11345_v34 = vld [vmem:[#allocation121_spill] sm:$0xff] }
 0xa13   :  { %7309 = vmatprep.subr.bf16.mxu1 %v11337_v62  ;;  %v11346_v62 = vld [vmem:[#allocation122_spill] sm:$0xff] }
 0xa14   :  { %v4635_v23 = vpop.f32.mrb[26].mxu1 }
 0xa15   :  { %v4636_v16 = vpop.f32.mrb[27].mxu1 }
 0xa16   :  { %v4637_v57 = vadd.f32 %v4636_v16, %v4635_v23  ;;  %7311 = vmatpush1.bf16.msra.mxu1 %v11164_v46  ;;  %v11347_v23 = vld [vmem:[#allocation123_spill] sm:$0xff]  ;;  %v11348_v16 = vld [vmem:[#allocation124_spill] sm:$0xff] }
 0xa17   :  { %7313 = vmatprep.subr.bf16.mxu1 %v11338_v38  ;;  %v11349_v38 = vld [vmem:[#allocation125_spill] sm:$0xff] }
 0xa18   :  { %v10191_v7 = vadd.f32 %v4637_v57, %v11339_v58  ;;  %v11350_v57 = vld [vmem:[#allocation126_spill] sm:$0xff]  ;;  %v11351_v58 = vld [vmem:[#allocation127_spill] sm:$0xff] }
 0xa1a   :  { %11340 = vst [vmem:[#allocation136_spill] sm:$0xff] %v10191_v7  ;;  %7315 = vmatpush1.bf16.msra.mxu1 %v11341_v52  ;;  %v11352_v52 = vld [vmem:[#allocation128_spill] sm:$0xff] }
 0xa1b   :  { %7317 = vmatprep.subr.bf16.mxu1 %v11342_v17  ;;  %v11353_v17 = vld [vmem:[#allocation129_spill] sm:$0xff] }
 0xa1e   :  { %7319 = vmatpush1.bf16.msra.mxu1 %v11343_v51  ;;  %v11354_v51 = vld [vmem:[#allocation130_spill] sm:$0xff] }
 0xa1f   :  { %7321 = vmatprep.subr.bf16.mxu1 %v11344_v50  ;;  %v11355_v50 = vld [vmem:[#allocation131_spill] sm:$0xff] }
 0xa22   :  { %7323 = vmatpush1.bf16.msra.mxu1 %v11345_v34  ;;  %v11356_v34 = vld [vmem:[#allocation132_spill] sm:$0xff] }
 0xa23   :  { %7325 = vmatprep.subr.bf16.mxu1 %v11346_v62  ;;  %v11357_v62 = vld [vmem:[#allocation133_spill] sm:$0xff] }
 0xa26   :  { %7327 = vmatpush1.bf16.msra.mxu1 %v11347_v23  ;;  %v11358_v23 = vld [vmem:[#allocation134_spill] sm:$0xff] }
 0xa27   :  { %7329 = vmatprep.subr.bf16.mxu1 %v11348_v16  ;;  %v11359_v16 = vld [vmem:[#allocation135_spill] sm:$0xff] }
 0xa2a   :  { %7331 = vmatpush1.bf16.msra.mxu1 %v11349_v38 }
 0xa2b   :  { %7333 = vmatprep.subr.bf16.mxu1 %v11350_v57  ;;  %v3845_v57 = vld [vmem:[#allocation5 + $0x578] sm:$0xff] }
 0xa2e   :  { %7335 = vmatpush1.bf16.msra.mxu1 %v11351_v58  ;;  %v10215_v58 = vld [vmem:[%s10406_s9 + $0xc0] sm:$0xff] }
 0xa2f   :  { %7337 = vmatprep.subr.bf16.mxu1 %v11352_v52  ;;  %v1181_v52 = vmax.f32 %v10215_v58, 0.0  ;;  %v4250_v58 = vld [vmem:[#allocation5 + $0x6a8] sm:$0xff] }
 0xa32   :  { %7339 = vmatpush1.bf16.msra.mxu1 %v11353_v17 }
 0xa33   :  { %7341 = vmatprep.subr.bf16.mxu1 %v11354_v51  ;;  %v3860_v51 = vld [vmem:[#allocation5 + $0x5f0] sm:$0xff] }
 0xa36   :  { %7343 = vmatpush1.bf16.msra.mxu1 %v11355_v50  ;;  %v3861_v50 = vld [vmem:[#allocation5 + $0x5f8] sm:$0xff] }
 0xa37   :  { %7345 = vmatprep.subr.bf16.mxu1 %v11356_v34  ;;  %v7380_v17 = vpack.c.bf16 %v3861_v50, %v3860_v51  ;;  %v3844_v34 = vld [vmem:[#allocation5 + $0x570] sm:$0xff] }
 0xa39   :  { %7381 = vmatprep.subr.bf16.mxu0 %v7380_v17  ;;  %v11383_v17 = vld [vmem:[#allocation46_spill] sm:$0xff] }
 0xa3a   :  { %7347 = vmatpush1.bf16.msra.mxu1 %v11357_v62  ;;  %v7382_v62 = vpack.c.bf16 %v3845_v57, %v3844_v34  ;;  %v11385_v34 = vld [vmem:[#allocation48_spill] sm:$0xff]  ;;  %v11391_v57 = vld [vmem:[#allocation54_spill] sm:$0xff] }
 0xa3b   :  { %7349 = vmatprep.subr.bf16.mxu1 %v11358_v23 }
 0xa3c   :  { %7383 = vmatpush3.bf16.msra.mxu0 %v7382_v62  ;;  %v11387_v62 = vld [vmem:[#allocation50_spill] sm:$0xff] }
 0xa3d   :  { %7385 = vmatprep.subr.bf16.mxu0 %v11086_v9  ;;  %v11360_v9 = vmax.f32 %v10123_v8, 0.0  ;;  %v11382_v8 = vld [vmem:[#allocation45_spill] sm:$0xff] }
 0xa3e   :  { %7351 = vmatpush1.bf16.msra.mxu1 %v11359_v16 }
 0xa41   :  { %3820 = vmatmul.mubr.f32.vlgmr.msra.gmra.mrb[28].mxu1 %v1181_v52 }
 0xb14   :  { %v3821_v16 = vpop.f32.mrb[28].mxu1 }
 0xb15   :  { %v7706_v23 = vadd.f32 %v3821_v16, %v11082_v13  ;;  %v3823_v38 = vpop.f32.mrb[29].mxu1  ;;  %v11390_v16 = vld [vmem:[#allocation53_spill] sm:$0xff] }
 0xb16   :  { %v7707_v7 = vadd.f32 %v3823_v38, %v11083_v19  ;;  %v11388_v38 = vld [vmem:[#allocation51_spill] sm:$0xff] }
 0xb17   :  { %3826 = vst [vmem:[%s10407_s10 + $0x50] sm:$0xff] %v7706_v23  ;;  %v3828_v51 = vmax.f32 %v7706_v23, 0.0  ;;  %v11389_v23 = vld [vmem:[#allocation52_spill] sm:$0xff] }
 0xb18   :  { %3827 = vst [vmem:[%s10407_s10 + $0x58] sm:$0xff] %v7707_v7  ;;  %v3829_v50 = vmax.f32 %v7707_v7, 0.0  ;;  %v11381_v7 = vld [vmem:[#allocation44_spill] sm:$0xff] }
 0xb1a   :  { %3926 = vmatprep.mubr.f32.mxu0 %v3829_v50  ;;  %v11392_v50 = vld [vmem:[#allocation55_spill] sm:$0xff] }
 0xb1b   :  { %3927 = vmatmul.mubr.f32.vlgmr.msra.gmra.mrb[20].mxu0 %v3828_v51  ;;  %v11393_v51 = vld [vmem:[#allocation56_spill] sm:$0xff] }
 0xb1c   :  { %7387 = vmatpush1.bf16.msra.mxu0 %v8634_v60  ;;  %4005 = vmatprep.mubr.f32.mxu0 %v11360_v9  ;;  %v11361_v60 = vld [vmem:[#allocation24_spill] sm:$0xff]  ;;  %v11394_v9 = vld [vmem:[#allocation57_spill] sm:$0xff] }
 0xb1d   :  { %7389 = vmatprep.subr.bf16.mxu0 %v8641_v61  ;;  %v11362_v61 = vld [vmem:[#allocation25_spill] sm:$0xff] }
 0xb20   :  { %7391 = vmatpush1.bf16.msra.mxu0 %v8646_v18  ;;  %v11363_v18 = vld [vmem:[#allocation26_spill] sm:$0xff] }
 0xb21   :  { %7393 = vmatprep.subr.bf16.mxu0 %v11089_v35  ;;  %v11373_v35 = vmax.f32 %v10164_v11, 0.0  ;;  %v11384_v11 = vld [vmem:[#allocation47_spill] sm:$0xff] }
 0xb24   :  { %7395 = vmatpush1.bf16.msra.mxu0 %v11090_v1  ;;  %v11374_v1 = vld [vmem:[#allocation38_spill] sm:$0xff] }
 0xb25   :  { %7397 = vmatprep.subr.bf16.mxu0 %v8658_v36  ;;  %v11364_v36 = vld [vmem:[#allocation27_spill] sm:$0xff] }
 0xb28   :  { %7399 = vmatpush1.bf16.msra.mxu0 %v11091_v29  ;;  %v11375_v29 = vmax.f32 %v10171_v15, 0.0  ;;  %v11386_v15 = vld [vmem:[#allocation49_spill] sm:$0xff] }
 0xb29   :  { %7401 = vmatprep.subr.bf16.mxu0 %v8666_v53  ;;  %v11365_v53 = vld [vmem:[#allocation28_spill] sm:$0xff] }
 0xb2c   :  { %7403 = vmatpush1.bf16.msra.mxu0 %v8671_v4  ;;  %v11366_v4 = vld [vmem:[#allocation29_spill] sm:$0xff] }
 0xb2d   :  { %7405 = vmatprep.subr.bf16.mxu0 %v8674_v12  ;;  %v11367_v12 = vld [vmem:[#allocation30_spill] sm:$0xff] }
 0xb30   :  { %7407 = vmatpush1.bf16.msra.mxu0 %v8679_v30  ;;  %v11368_v30 = vld [vmem:[#allocation31_spill] sm:$0xff] }
 0xb31   :  { %7409 = vmatprep.subr.bf16.mxu0 %v10889_v20  ;;  %v11369_v20 = vld [vmem:[#allocation32_spill] sm:$0xff] }
 0xb34   :  { %7411 = vmatpush1.bf16.msra.mxu0 %v11092_v3  ;;  %v11376_v3 = vld [vmem:[#allocation39_spill] sm:$0xff] }
 0xb35   :  { %7413 = vmatprep.subr.bf16.mxu0 %v11093_v2  ;;  %v11377_v2 = vld [vmem:[#allocation40_spill] sm:$0xff] }
 0xb38   :  { %7415 = vmatpush1.bf16.msra.mxu0 %v10892_v31  ;;  %v11370_v31 = vld [vmem:[#allocation33_spill] sm:$0xff] }
 0xb39   :  { %7417 = vmatprep.subr.bf16.mxu0 %v10893_v32  ;;  %v11371_v32 = vld [vmem:[#allocation34_spill] sm:$0xff] }
 0xb3c   :  { %7419 = vmatpush1.bf16.msra.mxu0 %v11094_v43  ;;  %v11378_v43 = vld [vmem:[#allocation41_spill] sm:$0xff] }
 0xb3d   :  { %7421 = vmatprep.subr.bf16.mxu0 %v11095_v39  ;;  %v11379_v39 = vld [vmem:[#allocation42_spill] sm:$0xff] }
 0xb40   :  { %7423 = vmatpush1.bf16.msra.mxu0 %v11096_v55  ;;  %v11380_v55 = vld [vmem:[#allocation43_spill] sm:$0xff] }
 0xb41   :  { %7425 = vmatprep.subr.bf16.mxu0 %v10897_v45  ;;  %v11372_v45 = vld [vmem:[#allocation35_spill] sm:$0xff] }
 0xb44   :  { %7427 = vmatpush1.bf16.msra.mxu0 %v11361_v60  ;;  %v11395_v60 = vld [vmem:[#allocation58_spill] sm:$0xff] }
 0xb45   :  { %7429 = vmatprep.subr.bf16.mxu0 %v11362_v61  ;;  %v11396_v61 = vld [vmem:[#allocation59_spill] sm:$0xff] }
 0xb48   :  { %7431 = vmatpush1.bf16.msra.mxu0 %v11363_v18  ;;  %v11397_v18 = vld [vmem:[#allocation60_spill] sm:$0xff] }
 0xb49   :  { %7433 = vmatprep.subr.bf16.mxu0 %v11364_v36  ;;  %v11398_v36 = vld [vmem:[#allocation61_spill] sm:$0xff] }
 0xb4c   :  { %7435 = vmatpush1.bf16.msra.mxu0 %v11365_v53  ;;  %v11399_v53 = vld [vmem:[#allocation62_spill] sm:$0xff] }
 0xb4d   :  { %7437 = vmatprep.subr.bf16.mxu0 %v11366_v4  ;;  %v11400_v4 = vld [vmem:[#allocation63_spill] sm:$0xff] }
 0xb50   :  { %7439 = vmatpush1.bf16.msra.mxu0 %v11367_v12  ;;  %v11401_v12 = vld [vmem:[#allocation64_spill] sm:$0xff] }
 0xb51   :  { %7441 = vmatprep.subr.bf16.mxu0 %v11368_v30  ;;  %v11402_v30 = vld [vmem:[#allocation65_spill] sm:$0xff] }
 0xb54   :  { %7443 = vmatpush1.bf16.msra.mxu0 %v11369_v20  ;;  %v11403_v20 = vld [vmem:[#allocation66_spill] sm:$0xff] }
 0xb55   :  { %7445 = vmatprep.subr.bf16.mxu0 %v11370_v31  ;;  %v11404_v31 = vld [vmem:[#allocation67_spill] sm:$0xff] }
 0xb58   :  { %7447 = vmatpush1.bf16.msra.mxu0 %v11371_v32  ;;  %v11405_v32 = vld [vmem:[#allocation68_spill] sm:$0xff] }
 0xb59   :  { %7449 = vmatprep.subr.bf16.mxu0 %v11372_v45  ;;  %v11406_v45 = vld [vmem:[#allocation69_spill] sm:$0xff] }
 0xb5b   :  { %4006 = vmatmul.mubr.f32.vlgmr.msra.gmra.mrb[22].mxu0 %v11373_v35  ;;  %v7783_v35 = vld [vmem:[%s10406_s9 + $0xd8] sm:$0xff] }
 0xb5c   :  { %7451 = vmatpush1.bf16.msra.mxu0 %v11374_v1  ;;  %4076 = vmatprep.mubr.f32.mxu0 %v11375_v29  ;;  %v1261_v1 = vmax.f32 %v7783_v35, 0.0  ;;  %v4245_v29 = vld [vmem:[#allocation5 + $0x680] sm:$0xff] }
 0xb5d   :  { %7453 = vmatprep.subr.bf16.mxu0 %v11376_v3  ;;  %v4246_v3 = vld [vmem:[#allocation5 + $0x688] sm:$0xff] }
 0xb60   :  { %7455 = vmatpush1.bf16.msra.mxu0 %v11377_v2  ;;  %v4229_v2 = vld [vmem:[#allocation5 + $0x600] sm:$0xff] }
 0xb61   :  { %7457 = vmatprep.subr.bf16.mxu0 %v11378_v43  ;;  %v11407_v43 = vld [vmem:[#allocation70_spill] sm:$0xff] }
 0xb64   :  { %7459 = vmatpush1.bf16.msra.mxu0 %v11379_v39  ;;  %v7640_v39 = vpack.c.bf16 %v4246_v3, %v4245_v29  ;;  %v11425_v3 = vld [vmem:[#allocation116_spill] sm:$0xff] }
 0xb65   :  { %7461 = vmatprep.subr.bf16.mxu0 %v11380_v55  ;;  %v4230_v55 = vld [vmem:[#allocation5 + $0x608] sm:$0xff] }
 0xb66   :  { %7641 = vmatprep.subr.bf16.mxu1 %v7640_v39  ;;  %v11427_v39 = vld [vmem:[#allocation117_spill] sm:$0xff] }
 0xb68   :  { %7463 = vmatpush1.bf16.msra.mxu0 %v11381_v7  ;;  %v4247_v7 = vld [vmem:[#allocation5 + $0x690] sm:$0xff] }
 0xb69   :  { %7465 = vmatprep.subr.bf16.mxu0 %v11382_v8  ;;  %v4248_v8 = vld [vmem:[#allocation5 + $0x698] sm:$0xff] }
 0xb6c   :  { %7467 = vmatpush1.bf16.msra.mxu0 %v11383_v17  ;;  %v7642_v17 = vpack.c.bf16 %v4230_v55, %v4229_v2  ;;  %v11426_v2 = vld [vmem:[#allocation136_spill] sm:$0xff]  ;;  %v11428_v55 = vld [vmem:[#allocation118_spill] sm:$0xff] }
 0xb6d   :  { %7469 = vmatprep.subr.bf16.mxu0 %v11384_v11  ;;  %v7644_v11 = vpack.c.bf16 %v4248_v8, %v4247_v7  ;;  %v11429_v7 = vld [vmem:[#allocation119_spill] sm:$0xff]  ;;  %v11430_v8 = vld [vmem:[#allocation120_spill] sm:$0xff] }
 0xb6e   :  { %7643 = vmatpush3.bf16.msra.mxu1 %v7642_v17  ;;  %v11431_v17 = vld [vmem:[#allocation121_spill] sm:$0xff] }
 0xb6f   :  { %7645 = vmatprep.subr.bf16.mxu1 %v7644_v11  ;;  %v11432_v11 = vld [vmem:[#allocation122_spill] sm:$0xff] }
 0xb70   :  { %7471 = vmatpush1.bf16.msra.mxu0 %v11385_v34  ;;  %v4231_v34 = vld [vmem:[#allocation5 + $0x610] sm:$0xff] }
 0xb71   :  { %7473 = vmatprep.subr.bf16.mxu0 %v11386_v15  ;;  %v4232_v15 = vld [vmem:[#allocation5 + $0x618] sm:$0xff] }
 0xb74   :  { %7475 = vmatpush1.bf16.msra.mxu0 %v11387_v62  ;;  %v4249_v62 = vld [vmem:[#allocation5 + $0x6a0] sm:$0xff] }
 0xb75   :  { %7477 = vmatprep.subr.bf16.mxu0 %v11388_v38  ;;  %v7648_v38 = vpack.c.bf16 %v4250_v58, %v4249_v62  ;;  %v11436_v62 = vld [vmem:[#allocation126_spill] sm:$0xff]  ;;  %v11437_v58 = vld [vmem:[#allocation127_spill] sm:$0xff] }
 0xb78   :  { %7479 = vmatpush1.bf16.msra.mxu0 %v11389_v23  ;;  %v4233_v23 = vld [vmem:[#allocation5 + $0x620] sm:$0xff] }
 0xb79   :  { %7481 = vmatprep.subr.bf16.mxu0 %v11390_v16  ;;  %v4234_v16 = vld [vmem:[#allocation5 + $0x628] sm:$0xff] }
 0xb7c   :  { %7483 = vmatpush1.bf16.msra.mxu0 %v11391_v57  ;;  %v4251_v57 = vld [vmem:[#allocation5 + $0x6b0] sm:$0xff] }
 0xb7d   :  { %7485 = vmatprep.subr.bf16.mxu0 %v11392_v50  ;;  %v4252_v50 = vld [vmem:[#allocation5 + $0x6b8] sm:$0xff] }
 0xb80   :  { %7487 = vmatpush1.bf16.msra.mxu0 %v11393_v51  ;;  %v7652_v51 = vpack.c.bf16 %v4252_v50, %v4251_v57  ;;  %v11442_v57 = vld [vmem:[#allocation132_spill] sm:$0xff]  ;;  %v11443_v50 = vld [vmem:[#allocation133_spill] sm:$0xff] }
 0xb81   :  { %7489 = vmatprep.subr.bf16.mxu0 %v11394_v9  ;;  %v4235_v9 = vld [vmem:[#allocation5 + $0x630] sm:$0xff] }
 0xb84   :  { %7491 = vmatpush1.bf16.msra.mxu0 %v11395_v60  ;;  %v4236_v60 = vld [vmem:[#allocation5 + $0x638] sm:$0xff] }
 0xb85   :  { %7493 = vmatprep.subr.bf16.mxu0 %v11396_v61  ;;  %v4253_v61 = vld [vmem:[#allocation5 + $0x6c0] sm:$0xff] }
 0xb88   :  { %7495 = vmatpush1.bf16.msra.mxu0 %v11397_v18  ;;  %v7654_v18 = vpack.c.bf16 %v4236_v60, %v4235_v9  ;;  %v4241_v9 = vld [vmem:[#allocation5 + $0x660] sm:$0xff]  ;;  %v4242_v60 = vld [vmem:[#allocation5 + $0x668] sm:$0xff] }
 0xb89   :  { %7497 = vmatprep.subr.bf16.mxu0 %v11398_v36  ;;  %v4237_v36 = vld [vmem:[#allocation5 + $0x640] sm:$0xff] }
 0xb8c   :  { %7499 = vmatpush1.bf16.msra.mxu0 %v11399_v53  ;;  %v4238_v53 = vld [vmem:[#allocation5 + $0x648] sm:$0xff] }
 0xb8d   :  { %7501 = vmatprep.subr.bf16.mxu0 %v11400_v4  ;;  %v4255_v4 = vld [vmem:[#allocation5 + $0x6d0] sm:$0xff] }
 0xb90   :  { %7503 = vmatpush1.bf16.msra.mxu0 %v11401_v12  ;;  %v7658_v12 = vpack.c.bf16 %v4238_v53, %v4237_v36  ;;  %v4243_v36 = vld [vmem:[#allocation5 + $0x670] sm:$0xff]  ;;  %v4244_v53 = vld [vmem:[#allocation5 + $0x678] sm:$0xff] }
 0xb91   :  { %7505 = vmatprep.subr.bf16.mxu0 %v11402_v30  ;;  %v4239_v30 = vld [vmem:[#allocation5 + $0x650] sm:$0xff] }
 0xb94   :  { %7507 = vmatpush1.bf16.msra.mxu0 %v11403_v20  ;;  %v4240_v20 = vld [vmem:[#allocation5 + $0x658] sm:$0xff] }
 0xb95   :  { %7509 = vmatprep.subr.bf16.mxu0 %v11404_v31  ;;  %v4257_v31 = vld [vmem:[#allocation5 + $0x6e0] sm:$0xff] }
 0xb98   :  { %7511 = vmatpush1.bf16.msra.mxu0 %v11405_v32  ;;  %v7662_v32 = vpack.c.bf16 %v4240_v20, %v4239_v30  ;;  %v4334_v20 = vld [vmem:[#allocation7] sm:$0xff] }
 0xb99   :  { %7513 = vmatprep.subr.bf16.mxu0 %v11406_v45  ;;  %v11424_v45 = vld [vmem:[#allocation114_spill] sm:$0xff] }
 0xb9b   :  { %4077 = vmatmul.mubr.f32.vlgmr.msra.gmra.mrb[22].mxu0 %v1181_v52  ;;  %v7646_v52 = vpack.c.bf16 %v4232_v15, %v4231_v34  ;;  %v11433_v34 = vld [vmem:[#allocation123_spill] sm:$0xff]  ;;  %v11435_v15 = vld [vmem:[#allocation125_spill] sm:$0xff] }
 0xb9c   :  { %7515 = vmatpush1.bf16.msra.mxu0 %v11407_v43  ;;  %4147 = vmatprep.mubr.f32.mxu0 %v1261_v1 }
 0xb9d   :  { %7517 = vmatprep.subr.bf16.mxu0 %v11132_v49  ;;  %7647 = vmatpush3.bf16.msra.mxu1 %v7646_v52  ;;  %v7650_v49 = vpack.c.bf16 %v4234_v16, %v4233_v23  ;;  %v11438_v52 = vld [vmem:[#allocation128_spill] sm:$0xff]  ;;  %v11440_v23 = vld [vmem:[#allocation130_spill] sm:$0xff]  ;;  %v11441_v16 = vld [vmem:[#allocation131_spill] sm:$0xff] }
 0xb9e   :  { %7649 = vmatprep.subr.bf16.mxu1 %v7648_v38  ;;  %v11439_v38 = vld [vmem:[#allocation129_spill] sm:$0xff] }
 0xba0   :  { %7519 = vmatpush1.bf16.msra.mxu0 %v11317_v56  ;;  %v4254_v56 = vld [vmem:[#allocation5 + $0x6c8] sm:$0xff] }
 0xba1   :  { %7521 = vmatprep.subr.bf16.mxu0 %v11318_v28  ;;  %7651 = vmatpush3.bf16.msra.mxu1 %v7650_v49  ;;  %v7656_v28 = vpack.c.bf16 %v4254_v56, %v4253_v61  ;;  %v11444_v49 = vld [vmem:[#allocation134_spill] sm:$0xff]  ;;  %v7666_v61 = vpack.c.bf16 %v4242_v60, %v4241_v9  ;;  %v4259_v56 = vld [vmem:[#allocation5 + $0x6f0] sm:$0xff] }
 0xba2   :  { %7653 = vmatprep.subr.bf16.mxu1 %v7652_v51  ;;  %v11445_v51 = vld [vmem:[#allocation135_spill] sm:$0xff] }
 0xba4   :  { %7523 = vmatpush1.bf16.msra.mxu0 %v11227_v14  ;;  %v4256_v14 = vld [vmem:[#allocation5 + $0x6d8] sm:$0xff] }
 0xba5   :  { %7525 = vmatprep.subr.bf16.mxu0 %v11319_v21  ;;  %7655 = vmatpush3.bf16.msra.mxu1 %v7654_v18  ;;  %v7660_v21 = vpack.c.bf16 %v4256_v14, %v4255_v4  ;;  %v4260_v18 = vld [vmem:[#allocation5 + $0x6f8] sm:$0xff]  ;;  %v7670_v4 = vpack.c.bf16 %v4244_v53, %v4243_v36  ;;  %v7863_v14 = vmov 0.0|0.0  }
 0xba6   :  { %7657 = vmatprep.subr.bf16.mxu1 %v7656_v28  ;;  %v7668_v28 = vpack.c.bf16 %v4260_v18, %v4259_v56 }
 0xba8   :  { %7527 = vmatpush1.bf16.msra.mxu0 %v11229_v27  ;;  %v4258_v27 = vld [vmem:[#allocation5 + $0x6e8] sm:$0xff] }
 0xba9   :  { %7529 = vmatprep.subr.bf16.mxu0 %v11230_v47  ;;  %7659 = vmatpush3.bf16.msra.mxu1 %v7658_v12  ;;  %v7664_v47 = vpack.c.bf16 %v4258_v27, %v4257_v31  ;;  %v4335_v31 = vld [vmem:[#allocation7 + $0x8] sm:$0xff] }
 0xbaa   :  { %7661 = vmatprep.subr.bf16.mxu1 %v7660_v21 }
 0xbac   :  { %7531 = vmatpush1.bf16.msra.mxu0 %v11139_v6  ;;  %v11408_v6 = vld [vmem:[#allocation96_spill] sm:$0xff] }
 0xbad   :  { %7533 = vmatprep.subr.bf16.mxu0 %v11140_v10  ;;  %7663 = vmatpush3.bf16.msra.mxu1 %v7662_v32  ;;  %v11409_v10 = vld [vmem:[#allocation97_spill] sm:$0xff] }
 0xbae   :  { %7665 = vmatprep.subr.bf16.mxu1 %v7664_v47  ;;  %v7673_v47 = vpack.c.bf16 %v4335_v31, %v4334_v20 }
 0xbb0   :  { %7535 = vmatpush1.bf16.msra.mxu0 %v11141_v26  ;;  %v11410_v26 = vld [vmem:[#allocation98_spill] sm:$0xff] }
 0xbb1   :  { %7537 = vmatprep.subr.bf16.mxu0 %v11142_v41  ;;  %v11411_v41 = vld [vmem:[#allocation99_spill] sm:$0xff]  ;;  %7667 = vmatpush3.bf16.msra.mxu1 %v7666_v61 }
 0xbb2   :  { %7669 = vmatprep.subr.bf16.mxu1 %v7668_v28 }
 0xbb4   :  { %7539 = vmatpush1.bf16.msra.mxu0 %v11143_v22  ;;  %v11412_v22 = vld [vmem:[#allocation100_spill] sm:$0xff] }
 0xbb5   :  { %7541 = vmatprep.subr.bf16.mxu0 %v11144_v0  ;;  %v7784_v0 = vld [vmem:[%s10406_s9 + $0xd0] sm:$0xff]  ;;  %7671 = vmatpush3.bf16.msra.mxu1 %v7670_v4 }
 0xbb6   :  { %7672 = vmatprep.subr.bf16.mxu1 %v7863_v14 }
 0xbb8   :  { %7543 = vmatpush1.bf16.msra.mxu0 %v11231_v54  ;;  %v1260_v54 = vmax.f32 %v7784_v0, 0.0  ;;  %v4340_v0 = vld [vmem:[#allocation7 + $0x30] sm:$0xff] }
 0xbb9   :  { %7545 = vmatprep.subr.bf16.mxu0 %v11232_v37  ;;  %v11413_v37 = vld [vmem:[#allocation101_spill] sm:$0xff] }
 0xbbc   :  { %7547 = vmatpush1.bf16.msra.mxu0 %v11233_v59  ;;  %v11414_v59 = vld [vmem:[#allocation104_spill] sm:$0xff] }
 0xbbd   :  { %7549 = vmatprep.subr.bf16.mxu0 %v11234_v44  ;;  %v11415_v44 = vmov 0.0  }
 0xbc0   :  { %7551 = vmatpush1.bf16.msra.mxu0 %v11235_v25  ;;  %v11416_v25 = vld [vmem:[#allocation105_spill] sm:$0xff] }
 0xbc1   :  { %7553 = vmatprep.subr.bf16.mxu0 %v11236_v24  ;;  %v11417_v24 = vld [vmem:[#allocation107_spill] sm:$0xff] }
 0xbc4   :  { %7555 = vmatpush1.bf16.msra.mxu0 %v11237_v63  ;;  %v11418_v63 = vld [vmem:[#allocation108_spill] sm:$0xff] }
 0xbc5   :  { %7557 = vmatprep.subr.bf16.mxu0 %v11238_v5  ;;  %v11419_v5 = vld [vmem:[#allocation109_spill] sm:$0xff] }
 0xbc8   :  { %7559 = vmatpush1.bf16.msra.mxu0 %v11239_v40  ;;  %v11420_v40 = vld [vmem:[#allocation110_spill] sm:$0xff] }
 0xbc9   :  { %7561 = vmatprep.subr.bf16.mxu0 %v11320_v48  ;;  %v11421_v48 = vld [vmem:[#allocation111_spill] sm:$0xff] }
 0xbcc   :  { %7563 = vmatpush1.bf16.msra.mxu0 %v11321_v42  ;;  %v11422_v42 = vld [vmem:[#allocation112_spill] sm:$0xff] }
 0xbcd   :  { %7565 = vmatprep.subr.bf16.mxu0 %v11322_v33  ;;  %v11423_v33 = vld [vmem:[#allocation113_spill] sm:$0xff] }
 0xbd0   :  { %7567 = vmatpush1.bf16.msra.mxu0 %v11408_v6 }
 0xbd1   :  { %7569 = vmatprep.subr.bf16.mxu0 %v11409_v10  ;;  %v4336_v10 = vld [vmem:[#allocation7 + $0x10] sm:$0xff] }
 0xbd4   :  { %7571 = vmatpush1.bf16.msra.mxu0 %v11410_v26  ;;  %v4337_v26 = vld [vmem:[#allocation7 + $0x18] sm:$0xff] }
 0xbd5   :  { %7573 = vmatprep.subr.bf16.mxu0 %v11411_v41  ;;  %v4338_v41 = vld [vmem:[#allocation7 + $0x20] sm:$0xff] }
 0xbd8   :  { %7575 = vmatpush1.bf16.msra.mxu0 %v11412_v22 }
 0xbd9   :  { %7577 = vmatprep.subr.bf16.mxu0 %v11413_v37 }
 0xbdb   :  { %4148 = vmatmul.mubr.f32.vlgmr.msra.gmra.mrb[22].mxu0 %v1260_v54  ;;  %v4341_v54 = vld [vmem:[#allocation7 + $0x38] sm:$0xff] }
 0xbdc   :  { %7579 = vmatpush1.bf16.msra.mxu0 %v11414_v59  ;;  %4218 = vmatprep.mubr.f32.mxu0 %v11415_v44  ;;  %v7682_v37 = vpack.c.bf16 %v4341_v54, %v4340_v0  ;;  %v4342_v59 = vld [vmem:[#allocation7 + $0x40] sm:$0xff] }
 0xbdd   :  { %7581 = vmatprep.subr.bf16.mxu0 %v11416_v25  ;;  %v4343_v25 = vld [vmem:[#allocation7 + $0x48] sm:$0xff] }
 0xbe0   :  { %7583 = vmatpush1.bf16.msra.mxu0 %v11417_v24  ;;  %v7685_v24 = vpack.c.bf16 %v4343_v25, %v4342_v59 }
 0xbe1   :  { %7585 = vmatprep.subr.bf16.mxu0 %v11418_v63  ;;  %v4344_v63 = vld [vmem:[#allocation7 + $0x50] sm:$0xff] }
 0xbe4   :  { %7587 = vmatpush1.bf16.msra.mxu0 %v11419_v5  ;;  %v4345_v5 = vld [vmem:[#allocation7 + $0x58] sm:$0xff] }
 0xbe5   :  { %7589 = vmatprep.subr.bf16.mxu0 %v11420_v40  ;;  %v7688_v40 = vpack.c.bf16 %v4345_v5, %v4344_v63 }
 0xbe8   :  { %7591 = vmatpush1.bf16.msra.mxu0 %v11421_v48  ;;  %v4346_v48 = vld [vmem:[#allocation7 + $0x60] sm:$0xff] }
 0xbe9   :  { %7593 = vmatprep.subr.bf16.mxu0 %v11422_v42  ;;  %v4347_v42 = vld [vmem:[#allocation7 + $0x68] sm:$0xff] }
 0xbec   :  { %7595 = vmatpush1.bf16.msra.mxu0 %v11423_v33  ;;  %v7691_v33 = vpack.c.bf16 %v4347_v42, %v4346_v48 }
 0xbed   :  { %7597 = vmatprep.subr.bf16.mxu0 %v11424_v45  ;;  %v4348_v45 = vld [vmem:[#allocation7 + $0x70] sm:$0xff] }
 0xbee   :  { %v4670_v35 = vpop.f32.mrb[20].mxu0 }
 0xbef   :  { %v4671_v1 = vpop.f32.mrb[21].mxu0 }
 0xbf0   :  { %v4672_v29 = vadd.f32 %v4671_v1, %v4670_v35  ;;  %7599 = vmatpush1.bf16.msra.mxu0 %v11164_v46  ;;  %v11434_v46 = vld [vmem:[#allocation124_spill] sm:$0xff]  ;;  %v4349_v35 = vld [vmem:[#allocation7 + $0x78] sm:$0xff] }
 0xbf1   :  { %7601 = vmatprep.subr.bf16.mxu0 %v11425_v3  ;;  %v7694_v1 = vpack.c.bf16 %v4349_v35, %v4348_v45 }
 0xbf2   :  { %v10353_v43 = vadd.f32 %v4672_v29, %v11426_v2 }
 0xbf4   :  { %7603 = vmatpush1.bf16.msra.mxu0 %v11427_v39 }
 0xbf5   :  { %7605 = vmatprep.subr.bf16.mxu0 %v11428_v55 }
 0xbf8   :  { %7607 = vmatpush1.bf16.msra.mxu0 %v11429_v7  ;;  %v4462_v7 = vld [vmem:[%s10405_s8] ss:$0 sm:$0xff] }
 0xbf9   :  { %7609 = vmatprep.subr.bf16.mxu0 %v11430_v8 }
 0xbfc   :  { %7611 = vmatpush1.bf16.msra.mxu0 %v11431_v17 }
 0xbfd   :  { %7613 = vmatprep.subr.bf16.mxu0 %v11432_v11 }
 0xc00   :  { %7615 = vmatpush1.bf16.msra.mxu0 %v11433_v34 }
 0xc01   :  { %7617 = vmatprep.subr.bf16.mxu0 %v11434_v46 }
 0xc04   :  { %7619 = vmatpush1.bf16.msra.mxu0 %v11435_v15 }
 0xc05   :  { %7621 = vmatprep.subr.bf16.mxu0 %v11436_v62 }
 0xc08   :  { %7623 = vmatpush1.bf16.msra.mxu0 %v11437_v58 }
 0xc09   :  { %7625 = vmatprep.subr.bf16.mxu0 %v11438_v52 }
 0xc0c   :  { %7627 = vmatpush1.bf16.msra.mxu0 %v11439_v38 }
 0xc0d   :  { %7629 = vmatprep.subr.bf16.mxu0 %v11440_v23 }
 0xc10   :  { %7631 = vmatpush1.bf16.msra.mxu0 %v11441_v16 }
 0xc11   :  { %7633 = vmatprep.subr.bf16.mxu0 %v11442_v57 }
 0xc14   :  { %7635 = vmatpush1.bf16.msra.mxu0 %v11443_v50 }
 0xc15   :  { %7637 = vmatprep.subr.bf16.mxu0 %v11444_v49 }
 0xc18   :  { %7639 = vmatpush1.bf16.msra.mxu0 %v11445_v51 }
 0xc1b   :  { %4219 = vmatmul.mubr.f32.vlgmr.msra.gmra.mrb[22].mxu0 %v11415_v44 }
 0xcee   :  { %v4220_v12 = vpop.f32.mrb[22].mxu0 }
 0xcef   :  { %v7708_v21 = vadd.f32 %v4220_v12, %v11082_v13  ;;  %v4222_v30 = vpop.f32.mrb[23].mxu0  ;;  %v7676_v13 = vpack.c.bf16 %v4337_v26, %v4336_v10 }
 0xcf0   :  { %v7709_v27 = vadd.f32 %v4222_v30, %v11083_v19  ;;  %v4339_v19 = vld [vmem:[#allocation7 + $0x28] sm:$0xff] }
 0xcf1   :  { %4225 = vst [vmem:[%s10407_s10 + $0x60] sm:$0xff] %v7708_v21  ;;  %v4227_v6 = vmax.f32 %v7708_v21, 0.0  ;;  %v7679_v22 = vpack.c.bf16 %v4339_v19, %v4338_v41 }
 0xcf2   :  { %4226 = vst [vmem:[%s10407_s10 + $0x68] sm:$0xff] %v7709_v27  ;;  %v4228_v32 = vmax.f32 %v7709_v27, 0.0 }
 0xcf4   :  { %4325 = vmatprep.mubr.f32.mxu1 %v4228_v32 }
 0xcf5   :  { %4326 = vmatmul.mubr.f32.vlgmr.msra.gmra.mrb[30].mxu1 %v4227_v6 }
 0xcf6   :  { %7674 = vmatpush3.bf16.msra.mxu1 %v7673_v47  ;;  %4757 = vmatprep.mubr.msk.f32.mxu1 %vm7864_vm0, %v11415_v44 }
 0xcf7   :  { %7675 = vmatprep.subr.bf16.mxu1 %v7863_v14 }
 0xcfa   :  { %7677 = vmatpush3.bf16.msra.mxu1 %v7676_v13 }
 0xcfb   :  { %7678 = vmatprep.subr.bf16.mxu1 %v7863_v14 }
 0xcfe   :  { %7680 = vmatpush3.bf16.msra.mxu1 %v7679_v22 }
 0xcff   :  { %7681 = vmatprep.subr.bf16.mxu1 %v7863_v14 }
 0xd02   :  { %7683 = vmatpush3.bf16.msra.mxu1 %v7682_v37 }
 0xd03   :  { %7684 = vmatprep.subr.bf16.mxu1 %v7863_v14 }
 0xd06   :  { %7686 = vmatpush3.bf16.msra.mxu1 %v7685_v24 }
 0xd07   :  { %7687 = vmatprep.subr.bf16.mxu1 %v7863_v14 }
 0xd0a   :  { %7689 = vmatpush3.bf16.msra.mxu1 %v7688_v40 }
 0xd0b   :  { %7690 = vmatprep.subr.bf16.mxu1 %v7863_v14 }
 0xd0e   :  { %7692 = vmatpush3.bf16.msra.mxu1 %v7691_v33 }
 0xd0f   :  { %7693 = vmatprep.subr.bf16.mxu1 %v7863_v14 }
 0xd12   :  { %7695 = vmatpush3.bf16.msra.mxu1 %v7694_v1 }
 0xdc8   :  { %v4705_v29 = vpop.f32.mrb[30].mxu1 }
 0xdc9   :  { %v4706_v3 = vpop.f32.mrb[31].mxu1 }
 0xdca   :  { %v4707_v2 = vadd.f32 %v4706_v3, %v4705_v29 }
 0xdcc   :  { %v4331_v39 = vadd.f32 %v4707_v2, %v10353_v43 }
 0xdce   :  { %4332 = vst [vmem:[%s10408_s11] sm:$0xff] %v4331_v39  ;;  %v4333_v55 = vmax.f32 %v4331_v39, 0.0 }
 0xdd0   :  { %4758 = vmatmul.mubr.f32.vlgmr.msra.gmra.mrb[32].mxu1 %v4333_v55 }
 0xea3   :  { %v4423_v8 = vpop.f32.mrb[32].mxu1 }
 0xea4   :  { %v4424_v17 = vadd.f32 %v4462_v7, %v4423_v8  ;;  %v4759_v11 = vpop.f32.mrb[33].mxu1 }
 0xea6   :  { %4427 = vst [vmem:[%s10409_s12] sm:$0xff] %v4424_v17  ;;  %4428 = vmax.xlane.f32.xlu0 %v4424_v17 }
 0xf33   :  { %v4429_v44 = vpop.xlane.xlu0 %4428 }
 0xf34   :  { %v4430_v43 = vsub.f32 %v4424_v17, %v4429_v44 }
 0xf36   :  { %v4431_v34 = vmul.f32 1.442695, %v4430_v43 }
 0xf38   :  { %7762 = vpow2.f32 %v4431_v34 }
 0xf42   :  { %v7763_v46 = vpop.eup %7762 }
 0xf43   :  { %4433 = vadd.xlane.f32.xlu0 %v7763_v46 }
 0xfd0   :  { %v4434_v15 = vpop.xlane.xlu0 %4433 }
 0xfd1   :  { %7764 = vrcp.f32 %v4434_v15 }
 0xfdb   :  { %v7765_v62 = vpop.eup %7764 }
 0xfdc   :  { %v4437_v58 = vmul.f32 %v7765_v62, %v7763_v46 }
 0xfde   :  { %4438 = vst [vmem:[%s10410_s13] sm:$0xff] %v4437_v58 }
 0xfdf   :  { %4459 = vsyncpa [#allocation4], 1 }
 0xfe0   :  { %4460 = vsyncpa [#allocation6], 1 }

</bundles_post_ra>
